<compile_context>
chip_gen: v7x
topology: tpu7x:2x2x1
jax: 0.10.0
libtpu: 0.0.40
codegen_flags: <defaults>
</compile_context>

<pallas_src>
import functools

import jax
import jax.numpy as jnp
import numpy as np
from jax.experimental import pallas as pl
from jax.experimental.pallas import tpu as pltpu

_VMEM_LIMIT = 32 * 1024 * 1024  # safe on v5e / v6e / v7x; actual use << 4 MiB
_EPS = 1e-5


# ----------------------------------------------------------------------------
# Pallas kernels
# ----------------------------------------------------------------------------
def _proj_bn_relu_kernel(x_ref, w_ref, g_ref, b_ref, o_ref, *, eps, c1):
    """Block 1: ConvTranspose(Z->C1, k=4, s=1, p=0) on 1x1 input + BN + ReLU.

    x: (N, Z) bf16, w: (Z, 16*C1) bf16 with columns (ky, kx, c),
    gamma/beta: (1, C1) f32.  Output: (N, 16*C1) bf16, one lane-dense store.
    """
    y = jnp.dot(x_ref[...], w_ref[...], preferred_element_type=jnp.float32)
    cnt = 16.0 * x_ref.shape[0]
    colsum = jnp.sum(y, axis=0, keepdims=True)                 # (1, 16*C1)
    colsq = jnp.sum(y * y, axis=0, keepdims=True)
    # per-channel batch stats: reduce the 16 (ky,kx) column groups (C1-aligned)
    ssum = sum(colsum[:, g * c1:(g + 1) * c1] for g in range(16))
    ssq = sum(colsq[:, g * c1:(g + 1) * c1] for g in range(16))
    mean = ssum / cnt
    var = jnp.maximum(ssq / cnt - mean * mean, 0.0)            # biased, clamped
    scale = g_ref[...] * jax.lax.rsqrt(var + eps)              # (1, C1)
    shift = b_ref[...] - mean * scale
    scale_w = jnp.concatenate([scale] * 16, axis=1)            # built once
    shift_w = jnp.concatenate([shift] * 16, axis=1)
    o_ref[...] = jnp.maximum(y * scale_w + shift_w, 0.0).astype(o_ref.dtype)


def _deconv_bn_relu_kernel(p_ref, w_ref, r_ref, g_ref, b_ref, o_ref, *, eps):
    """ConvTranspose(k=4, s=2, p=1, bias=False) + BN(batch stats) + ReLU.

    p: (M, 9*Cin) bf16 super-patch (9 spatial shifts), w: (9*Cin, 4*Cout) bf16
    phase-merged weights, r: (4*Cout, 4*Cout) f32 group-sum matrix
    (r[i, j] = 1 iff columns i and j are the same channel), gamma/beta:
    (1, 4*Cout) f32 pre-tiled.  Output: (M, 4*Cout) bf16, columns (phase, c).
    """
    y = jnp.dot(p_ref[...], w_ref[...], preferred_element_type=jnp.float32)
    cnt = 4.0 * p_ref.shape[0]                                 # = N * 2H * 2W
    colsum = jnp.sum(y, axis=0, keepdims=True)                 # (1, 4*Cout)
    colsq = jnp.sum(y * y, axis=0, keepdims=True)
    # cross-phase per-channel reduction, replicated back to full width
    ssum = jnp.dot(colsum, r_ref[...], preferred_element_type=jnp.float32)
    ssq = jnp.dot(colsq, r_ref[...], preferred_element_type=jnp.float32)
    mean = ssum / cnt
    var = jnp.maximum(ssq / cnt - mean * mean, 0.0)
    scale = g_ref[...] * jax.lax.rsqrt(var + eps)              # (1, 4*Cout)
    shift = b_ref[...] - mean * scale
    o_ref[...] = jnp.maximum(y * scale + shift, 0.0).astype(o_ref.dtype)


def _deconv_bias_tanh_kernel(p_ref, w_ref, b_ref, o_ref):
    """Final ConvTranspose(k=4,s=2,p=1,bias=True) + Tanh, channel-planar.

    p: (9*Cin, Mb) bf16 transposed super-patch, w: (4*Cimg, 9*Cin) bf16,
    b: (4*Cimg, 1) f32.  Output: (4*Cimg, Mb) f32, lane-dense along M.
    """
    y = jnp.dot(w_ref[...], p_ref[...], preferred_element_type=jnp.float32)
    o_ref[...] = jnp.tanh(y + b_ref[...]).astype(o_ref.dtype)


# ----------------------------------------------------------------------------
# One-time parameter packing (hoisted out of the jitted forward)
# ----------------------------------------------------------------------------
def _merged_deconv_weight(w_ct):
    """PyTorch ConvTranspose2d weight (Cin, Cout, 4, 4) -> (9*Cin, 4*Cout) bf16.

    Rows: (shift_y+1, shift_x+1, cin) for shifts in {-1,0,1}^2 (super-patch
    column order); columns: (phase = py*2+px, cout).  For phase (py, px) and
    shift (s, t) the contributing kernel tap is w[:, :, 1+py-2s, 1+px-2t]
    when in range, else 0.
    """
    w = np.asarray(w_ct, dtype=np.float32)
    cin, cout = w.shape[0], w.shape[1]
    wm = np.zeros((3, 3, cin, 4, cout), np.float32)
    for si in range(3):                         # s = si - 1
        for py in range(2):
            ky = 3 + py - 2 * si
            if not 0 <= ky <= 3:
                continue
            for ti in range(3):                 # t = ti - 1
                for px in range(2):
                    kx = 3 + px - 2 * ti
                    if not 0 <= kx <= 3:
                        continue
                    wm[si, ti, :, py * 2 + px, :] = w[:, :, ky, kx]
    return jnp.asarray(wm.reshape(9 * cin, 4 * cout), dtype=jnp.bfloat16)


def _group_sum_matrix(cout):
    """(4*Cout, 4*Cout) f32: ones where row/col index the same channel."""
    ch = np.arange(4 * cout) % cout
    return jnp.asarray((ch[:, None] == ch[None, :]).astype(np.float32))


def pack_generator_params(params):
    """One-time packing of PyTorch-layout parameters into kernel layouts."""
    w1 = np.asarray(params["w1"], dtype=np.float32)            # (Z, C1, 4, 4)
    z, c1 = w1.shape[0], w1.shape[1]
    packed = {
        "w1": jnp.asarray(w1.transpose(0, 2, 3, 1).reshape(z, 16 * c1),
                          dtype=jnp.bfloat16),                 # cols (ky,kx,c)
        "g1": jnp.asarray(params["g1"], jnp.float32)[None, :],
        "b1": jnp.asarray(params["b1"], jnp.float32)[None, :],
    }
    for i in (2, 3, 4):
        wi = params[f"w{i}"]
        cout = wi.shape[1]
        packed[f"w{i}"] = _merged_deconv_weight(wi)
        packed[f"r{i}"] = _group_sum_matrix(cout)
        packed[f"g{i}"] = jnp.tile(jnp.asarray(params[f"g{i}"], jnp.float32), 4)[None, :]
        packed[f"b{i}"] = jnp.tile(jnp.asarray(params[f"b{i}"], jnp.float32), 4)[None, :]
    cimg = params["w5"].shape[1]
    packed["w5T"] = _merged_deconv_weight(params["w5"]).T       # (4*Cimg, 9*Cin)
    packed["bias5"] = jnp.tile(jnp.asarray(params["bias5"], jnp.float32),
                               4).reshape(4 * cimg, 1)
    return packed


# ----------------------------------------------------------------------------
# Thin XLA glue between the fused block kernels (tiny tensors)
# ----------------------------------------------------------------------------
def _superpatch(x_nhwc):
    """(N, H, W, C) -> (N*H*W, 9*C) bf16 super-patch; columns (sy, sx, c)."""
    n, h, w, c = x_nhwc.shape
    xp = jnp.pad(x_nhwc, ((0, 0), (1, 1), (1, 1), (0, 0)))
    taps = [xp[:, si:si + h, ti:ti + w, :] for si in range(3) for ti in range(3)]
    return jnp.concatenate(taps, axis=-1).reshape(n * h * w, 9 * c).astype(jnp.bfloat16)


def _interleave_phases(y, n, h, w, cout):
    """(N*H*W, 4*Cout) with columns (py, px, c) -> NHWC (N, 2H, 2W, Cout)."""
    z = y.reshape(n, h, w, 2, 2, cout).transpose(0, 1, 3, 2, 4, 5)
    return z.reshape(n, 2 * h, 2 * w, cout)


def _full_block_call(kernel, in_shapes, out_shape, out_dtype):
    """pallas_call with grid=(1,) and whole-array VMEM blocks."""
    def spec(shape):
        nd = len(shape)
        return pl.BlockSpec(shape, lambda i, _nd=nd: (0,) * _nd)
    return pl.pallas_call(
        kernel,
        out_shape=jax.ShapeDtypeStruct(out_shape, out_dtype),
        grid_spec=pltpu.PrefetchScalarGridSpec(
            num_scalar_prefetch=0,
            grid=(1,),
            in_specs=[spec(s) for s in in_shapes],
            out_specs=spec(out_shape),
        ),
        compiler_params=pltpu.CompilerParams(
            dimension_semantics=("arbitrary",),
            vmem_limit_bytes=_VMEM_LIMIT),
    )


# ----------------------------------------------------------------------------
# Fused block wrappers
# ----------------------------------------------------------------------------
def fused_proj_bn_relu(x_nz, w1p, gamma, beta, eps=_EPS):
    n, z = x_nz.shape
    c16 = w1p.shape[1]
    c1 = c16 // 16
    out = _full_block_call(
        functools.partial(_proj_bn_relu_kernel, eps=eps, c1=c1),
        in_shapes=[(n, z), (z, c16), (1, c1), (1, c1)],
        out_shape=(n, c16), out_dtype=jnp.bfloat16,
    )(x_nz.astype(jnp.bfloat16), w1p, gamma, beta)
    return out.reshape(n, 4, 4, c1)                             # (ky,kx,c) -> NHWC


def fused_deconv_bn_relu(x_nhwc, w_merged, r_mat, gamma4, beta4, eps=_EPS):
    n, h, w, cin = x_nhwc.shape
    cout4 = w_merged.shape[1]
    m = n * h * w
    patches = _superpatch(x_nhwc)                               # (M, 9*Cin)
    out = _full_block_call(
        functools.partial(_deconv_bn_relu_kernel, eps=eps),
        in_shapes=[(m, 9 * cin), (9 * cin, cout4), (cout4, cout4),
                   (1, cout4), (1, cout4)],
        out_shape=(m, cout4), out_dtype=jnp.bfloat16,
    )(patches, w_merged, r_mat, gamma4, beta4)
    return _interleave_phases(out, n, h, w, cout4 // 4)


def fused_deconv_bias_tanh(x_nhwc, w5t, bias_rows):
    n, h, w, cin = x_nhwc.shape
    c4 = w5t.shape[0]                                           # 4 * img_channels
    cimg = c4 // 4
    m = n * h * w
    patches_t = _superpatch(x_nhwc).T                           # (9*Cin, M)
    nblk = 2 if m % 256 == 0 else 1                             # both TCs on v7x
    mb = m // nblk
    out = pl.pallas_call(
        _deconv_bias_tanh_kernel,
        out_shape=jax.ShapeDtypeStruct((c4, m), jnp.float32),
        grid_spec=pltpu.PrefetchScalarGridSpec(
            num_scalar_prefetch=0,
            grid=(nblk,),
            in_specs=[pl.BlockSpec((9 * cin, mb), lambda i: (0, i)),
                      pl.BlockSpec((c4, 9 * cin), lambda i: (0, 0)),
                      pl.BlockSpec((c4, 1), lambda i: (0, 0))],
            out_specs=pl.BlockSpec((c4, mb), lambda i: (0, i)),
        ),
        compiler_params=pltpu.CompilerParams(
            dimension_semantics=("parallel",),
            vmem_limit_bytes=_VMEM_LIMIT),
    )(patches_t, w5t, bias_rows)
    # rows (py, px, c), cols (n, h, w) -> NCHW (N, Cimg, 2H, 2W)
    o = out.reshape(2, 2, cimg, n, h, w).transpose(3, 2, 4, 0, 5, 1)
    return o.reshape(n, cimg, 2 * h, 2 * w)


# ----------------------------------------------------------------------------
# Generator forward
# ----------------------------------------------------------------------------
def generator_forward(x, packed, eps=_EPS):
    """x: (N, z_dim, 1, 1) NCHW -> (N, img_channels, 64, 64) NCHW."""
    n, z = x.shape[0], x.shape[1]
    h = fused_proj_bn_relu(x.reshape(n, z), packed["w1"],
                           packed["g1"], packed["b1"], eps)     # (N, 4, 4, 16*fg)
    for i in (2, 3, 4):
        h = fused_deconv_bn_relu(h, packed[f"w{i}"], packed[f"r{i}"],
                                 packed[f"g{i}"], packed[f"b{i}"], eps)
    return fused_deconv_bias_tanh(h, packed["w5T"], packed["bias5"])


# ----------------------------------------------------------------------------
# Main
# ----------------------------------------------------------------------------
if __name__ == "__main__":
    Z_DIM, IMG_CH, FG, BATCH = 64, 3, 8, 2      # features_g*16 = 128

    key = jax.random.PRNGKey(0)
    ks = jax.random.split(key, 8)

    def winit(k_, shape):
        return (0.02 * jax.random.normal(k_, shape)).astype(jnp.float32)

    params = {
        # ConvTranspose2d weights, PyTorch layout (Cin, Cout, kH, kW)
        "w1": winit(ks[0], (Z_DIM, FG * 16, 4, 4)),
        "w2": winit(ks[1], (FG * 16, FG * 8, 4, 4)),
        "w3": winit(ks[2], (FG * 8, FG * 4, 4, 4)),
        "w4": winit(ks[3], (FG * 4, FG * 2, 4, 4)),
        "w5": winit(ks[4], (FG * 2, IMG_CH, 4, 4)),
        "bias5": winit(ks[5], (IMG_CH,)),
        # BatchNorm2d params (PyTorch defaults: gamma=1, beta=0)
        "g1": jnp.ones((FG * 16,), jnp.float32), "b1": jnp.zeros((FG * 16,), jnp.float32),
        "g2": jnp.ones((FG * 8,), jnp.float32), "b2": jnp.zeros((FG * 8,), jnp.float32),
        "g3": jnp.ones((FG * 4,), jnp.float32), "b3": jnp.zeros((FG * 4,), jnp.float32),
        "g4": jnp.ones((FG * 2,), jnp.float32), "b4": jnp.zeros((FG * 2,), jnp.float32),
    }

    packed = pack_generator_params(params)      # one-time, outside jit
    x = jax.random.normal(ks[6], (BATCH, Z_DIM, 1, 1), jnp.float32)

    fwd = jax.jit(generator_forward)
    y = fwd(x, packed)
    jax.block_until_ready(y)

    assert y.shape == (BATCH, IMG_CH, 64, 64), y.shape
    assert bool(jnp.all(jnp.isfinite(y)))
    assert float(jnp.max(jnp.abs(y))) <= 1.0 + 1e-5   # Tanh range
    print("KERNEL_OK")
</pallas_src>

<mosaic_0001>
module attributes {stable_mosaic.version = 11 : i64} {
  func.func @_proj_bn_relu_kernel(%arg0: i32, %arg1: memref<2x64xbf16, #tpu.memory_space<vmem>>, %arg2: memref<64x2048xbf16, #tpu.memory_space<vmem>>, %arg3: memref<1x128xf32, #tpu.memory_space<vmem>>, %arg4: memref<1x128xf32, #tpu.memory_space<vmem>>, %arg5: memref<2x2048xbf16, #tpu.memory_space<vmem>>) attributes {dimension_semantics = [#tpu.dimension_semantics<arbitrary>], iteration_bounds = array<i64: 1>, scalar_prefetch = 0 : i64, scratch_operands = 0 : i64, tpu.core_type = #tpu.core_type<tc>, window_params = [{pipeline_mode = #tpu.pipeline_mode<synchronous>, transform_indices = @transform_0, window_bounds = array<i64: 2, 64>}, {pipeline_mode = #tpu.pipeline_mode<synchronous>, transform_indices = @transform_1, window_bounds = array<i64: 64, 2048>}, {pipeline_mode = #tpu.pipeline_mode<synchronous>, transform_indices = @transform_2, window_bounds = array<i64: 1, 128>}, {pipeline_mode = #tpu.pipeline_mode<synchronous>, transform_indices = @transform_3, window_bounds = array<i64: 1, 128>}, {pipeline_mode = #tpu.pipeline_mode<synchronous>, transform_indices = @transform_4, window_bounds = array<i64: 2, 2048>}]} {
    %c0 = arith.constant 0 : index
    %c0_0 = arith.constant 0 : index
    %0 = vector.load %arg1[%c0, %c0_0] : memref<2x64xbf16, #tpu.memory_space<vmem>>, vector<2x64xbf16>
    %c0_1 = arith.constant 0 : index
    %c0_2 = arith.constant 0 : index
    %1 = vector.load %arg2[%c0_1, %c0_2] : memref<64x2048xbf16, #tpu.memory_space<vmem>>, vector<64x2048xbf16>
    %cst = arith.constant dense<0.000000e+00> : vector<2x2048xf32>
    %2 = tpu.matmul %0, %1, %cst {dimension_numbers = #tpu.dot_dimension_numbers<[1], [0], [0], [1], [0, 0, 1, 1], [], []>} : vector<2x64xbf16>, vector<64x2048xbf16>, vector<2x2048xf32> -> vector<2x2048xf32>
    %cst_3 = arith.constant dense<0.000000e+00> : vector<2048xf32>
    %3 = vector.multi_reduction <add>, %2, %cst_3 [0] : vector<2x2048xf32> to vector<2048xf32>
    %4 = vector.shape_cast %3 : vector<2048xf32> to vector<1x2048xf32>
    %5 = arith.mulf %2, %2 : vector<2x2048xf32>
    %cst_4 = arith.constant dense<0.000000e+00> : vector<2048xf32>
    %6 = vector.multi_reduction <add>, %5, %cst_4 [0] : vector<2x2048xf32> to vector<2048xf32>
    %7 = vector.shape_cast %6 : vector<2048xf32> to vector<1x2048xf32>
    %8 = vector.extract_strided_slice %4 {offsets = [0, 0], sizes = [1, 128], strides = [1, 1]} : vector<1x2048xf32> to vector<1x128xf32>
    %cst_5 = arith.constant 0.000000e+00 : f32
    %9 = vector.broadcast %cst_5 : f32 to vector<1x128xf32>
    %10 = arith.addf %9, %8 : vector<1x128xf32>
    %11 = vector.extract_strided_slice %4 {offsets = [0, 128], sizes = [1, 128], strides = [1, 1]} : vector<1x2048xf32> to vector<1x128xf32>
    %12 = arith.addf %10, %11 : vector<1x128xf32>
    %13 = vector.extract_strided_slice %4 {offsets = [0, 256], sizes = [1, 128], strides = [1, 1]} : vector<1x2048xf32> to vector<1x128xf32>
    %14 = arith.addf %12, %13 : vector<1x128xf32>
    %15 = vector.extract_strided_slice %4 {offsets = [0, 384], sizes = [1, 128], strides = [1, 1]} : vector<1x2048xf32> to vector<1x128xf32>
    %16 = arith.addf %14, %15 : vector<1x128xf32>
    %17 = vector.extract_strided_slice %4 {offsets = [0, 512], sizes = [1, 128], strides = [1, 1]} : vector<1x2048xf32> to vector<1x128xf32>
    %18 = arith.addf %16, %17 : vector<1x128xf32>
    %19 = vector.extract_strided_slice %4 {offsets = [0, 640], sizes = [1, 128], strides = [1, 1]} : vector<1x2048xf32> to vector<1x128xf32>
    %20 = arith.addf %18, %19 : vector<1x128xf32>
    %21 = vector.extract_strided_slice %4 {offsets = [0, 768], sizes = [1, 128], strides = [1, 1]} : vector<1x2048xf32> to vector<1x128xf32>
    %22 = arith.addf %20, %21 : vector<1x128xf32>
    %23 = vector.extract_strided_slice %4 {offsets = [0, 896], sizes = [1, 128], strides = [1, 1]} : vector<1x2048xf32> to vector<1x128xf32>
    %24 = arith.addf %22, %23 : vector<1x128xf32>
    %25 = vector.extract_strided_slice %4 {offsets = [0, 1024], sizes = [1, 128], strides = [1, 1]} : vector<1x2048xf32> to vector<1x128xf32>
    %26 = arith.addf %24, %25 : vector<1x128xf32>
    %27 = vector.extract_strided_slice %4 {offsets = [0, 1152], sizes = [1, 128], strides = [1, 1]} : vector<1x2048xf32> to vector<1x128xf32>
    %28 = arith.addf %26, %27 : vector<1x128xf32>
    %29 = vector.extract_strided_slice %4 {offsets = [0, 1280], sizes = [1, 128], strides = [1, 1]} : vector<1x2048xf32> to vector<1x128xf32>
    %30 = arith.addf %28, %29 : vector<1x128xf32>
    %31 = vector.extract_strided_slice %4 {offsets = [0, 1408], sizes = [1, 128], strides = [1, 1]} : vector<1x2048xf32> to vector<1x128xf32>
    %32 = arith.addf %30, %31 : vector<1x128xf32>
    %33 = vector.extract_strided_slice %4 {offsets = [0, 1536], sizes = [1, 128], strides = [1, 1]} : vector<1x2048xf32> to vector<1x128xf32>
    %34 = arith.addf %32, %33 : vector<1x128xf32>
    %35 = vector.extract_strided_slice %4 {offsets = [0, 1664], sizes = [1, 128], strides = [1, 1]} : vector<1x2048xf32> to vector<1x128xf32>
    %36 = arith.addf %34, %35 : vector<1x128xf32>
    %37 = vector.extract_strided_slice %4 {offsets = [0, 1792], sizes = [1, 128], strides = [1, 1]} : vector<1x2048xf32> to vector<1x128xf32>
    %38 = arith.addf %36, %37 : vector<1x128xf32>
    %39 = vector.extract_strided_slice %4 {offsets = [0, 1920], sizes = [1, 128], strides = [1, 1]} : vector<1x2048xf32> to vector<1x128xf32>
    %40 = arith.addf %38, %39 : vector<1x128xf32>
    %41 = vector.extract_strided_slice %7 {offsets = [0, 0], sizes = [1, 128], strides = [1, 1]} : vector<1x2048xf32> to vector<1x128xf32>
    %cst_6 = arith.constant 0.000000e+00 : f32
    %42 = vector.broadcast %cst_6 : f32 to vector<1x128xf32>
    %43 = arith.addf %42, %41 : vector<1x128xf32>
    %44 = vector.extract_strided_slice %7 {offsets = [0, 128], sizes = [1, 128], strides = [1, 1]} : vector<1x2048xf32> to vector<1x128xf32>
    %45 = arith.addf %43, %44 : vector<1x128xf32>
    %46 = vector.extract_strided_slice %7 {offsets = [0, 256], sizes = [1, 128], strides = [1, 1]} : vector<1x2048xf32> to vector<1x128xf32>
    %47 = arith.addf %45, %46 : vector<1x128xf32>
    %48 = vector.extract_strided_slice %7 {offsets = [0, 384], sizes = [1, 128], strides = [1, 1]} : vector<1x2048xf32> to vector<1x128xf32>
    %49 = arith.addf %47, %48 : vector<1x128xf32>
    %50 = vector.extract_strided_slice %7 {offsets = [0, 512], sizes = [1, 128], strides = [1, 1]} : vector<1x2048xf32> to vector<1x128xf32>
    %51 = arith.addf %49, %50 : vector<1x128xf32>
    %52 = vector.extract_strided_slice %7 {offsets = [0, 640], sizes = [1, 128], strides = [1, 1]} : vector<1x2048xf32> to vector<1x128xf32>
    %53 = arith.addf %51, %52 : vector<1x128xf32>
    %54 = vector.extract_strided_slice %7 {offsets = [0, 768], sizes = [1, 128], strides = [1, 1]} : vector<1x2048xf32> to vector<1x128xf32>
    %55 = arith.addf %53, %54 : vector<1x128xf32>
    %56 = vector.extract_strided_slice %7 {offsets = [0, 896], sizes = [1, 128], strides = [1, 1]} : vector<1x2048xf32> to vector<1x128xf32>
    %57 = arith.addf %55, %56 : vector<1x128xf32>
    %58 = vector.extract_strided_slice %7 {offsets = [0, 1024], sizes = [1, 128], strides = [1, 1]} : vector<1x2048xf32> to vector<1x128xf32>
    %59 = arith.addf %57, %58 : vector<1x128xf32>
    %60 = vector.extract_strided_slice %7 {offsets = [0, 1152], sizes = [1, 128], strides = [1, 1]} : vector<1x2048xf32> to vector<1x128xf32>
    %61 = arith.addf %59, %60 : vector<1x128xf32>
    %62 = vector.extract_strided_slice %7 {offsets = [0, 1280], sizes = [1, 128], strides = [1, 1]} : vector<1x2048xf32> to vector<1x128xf32>
    %63 = arith.addf %61, %62 : vector<1x128xf32>
    %64 = vector.extract_strided_slice %7 {offsets = [0, 1408], sizes = [1, 128], strides = [1, 1]} : vector<1x2048xf32> to vector<1x128xf32>
    %65 = arith.addf %63, %64 : vector<1x128xf32>
    %66 = vector.extract_strided_slice %7 {offsets = [0, 1536], sizes = [1, 128], strides = [1, 1]} : vector<1x2048xf32> to vector<1x128xf32>
    %67 = arith.addf %65, %66 : vector<1x128xf32>
    %68 = vector.extract_strided_slice %7 {offsets = [0, 1664], sizes = [1, 128], strides = [1, 1]} : vector<1x2048xf32> to vector<1x128xf32>
    %69 = arith.addf %67, %68 : vector<1x128xf32>
    %70 = vector.extract_strided_slice %7 {offsets = [0, 1792], sizes = [1, 128], strides = [1, 1]} : vector<1x2048xf32> to vector<1x128xf32>
    %71 = arith.addf %69, %70 : vector<1x128xf32>
    %72 = vector.extract_strided_slice %7 {offsets = [0, 1920], sizes = [1, 128], strides = [1, 1]} : vector<1x2048xf32> to vector<1x128xf32>
    %73 = arith.addf %71, %72 : vector<1x128xf32>
    %cst_7 = arith.constant 3.200000e+01 : f32
    %74 = vector.broadcast %cst_7 : f32 to vector<1x128xf32>
    %75 = arith.divf %40, %74 : vector<1x128xf32>
    %cst_8 = arith.constant 3.200000e+01 : f32
    %76 = vector.broadcast %cst_8 : f32 to vector<1x128xf32>
    %77 = arith.divf %73, %76 : vector<1x128xf32>
    %78 = arith.mulf %75, %75 : vector<1x128xf32>
    %79 = arith.subf %77, %78 : vector<1x128xf32>
    %cst_9 = arith.constant 0.000000e+00 : f32
    %80 = vector.broadcast %cst_9 : f32 to vector<1x128xf32>
    %81 = arith.maximumf %79, %80 : vector<1x128xf32>
    %c0_10 = arith.constant 0 : index
    %c0_11 = arith.constant 0 : index
    %82 = vector.load %arg3[%c0_10, %c0_11] : memref<1x128xf32, #tpu.memory_space<vmem>>, vector<1x128xf32>
    %cst_12 = arith.constant 9.99999974E-6 : f32
    %83 = vector.broadcast %cst_12 : f32 to vector<1x128xf32>
    %84 = arith.addf %81, %83 : vector<1x128xf32>
    %85 = math.rsqrt %84 : vector<1x128xf32>
    %86 = arith.mulf %82, %85 : vector<1x128xf32>
    %c0_13 = arith.constant 0 : index
    %c0_14 = arith.constant 0 : index
    %87 = vector.load %arg4[%c0_13, %c0_14] : memref<1x128xf32, #tpu.memory_space<vmem>>, vector<1x128xf32>
    %88 = arith.mulf %75, %86 : vector<1x128xf32>
    %89 = arith.subf %87, %88 : vector<1x128xf32>
    %90 = tpu.concatenate %86, %86, %86, %86, %86, %86, %86, %86, %86, %86, %86, %86, %86, %86, %86, %86 in 1 : vector<1x128xf32>, vector<1x128xf32>, vector<1x128xf32>, vector<1x128xf32>, vector<1x128xf32>, vector<1x128xf32>, vector<1x128xf32>, vector<1x128xf32>, vector<1x128xf32>, vector<1x128xf32>, vector<1x128xf32>, vector<1x128xf32>, vector<1x128xf32>, vector<1x128xf32>, vector<1x128xf32>, vector<1x128xf32> -> vector<1x2048xf32>
    %91 = tpu.concatenate %89, %89, %89, %89, %89, %89, %89, %89, %89, %89, %89, %89, %89, %89, %89, %89 in 1 : vector<1x128xf32>, vector<1x128xf32>, vector<1x128xf32>, vector<1x128xf32>, vector<1x128xf32>, vector<1x128xf32>, vector<1x128xf32>, vector<1x128xf32>, vector<1x128xf32>, vector<1x128xf32>, vector<1x128xf32>, vector<1x128xf32>, vector<1x128xf32>, vector<1x128xf32>, vector<1x128xf32>, vector<1x128xf32> -> vector<1x2048xf32>
    %92 = vector.broadcast %90 : vector<1x2048xf32> to vector<2x2048xf32>
    %93 = arith.mulf %2, %92 : vector<2x2048xf32>
    %94 = vector.broadcast %91 : vector<1x2048xf32> to vector<2x2048xf32>
    %95 = arith.addf %93, %94 : vector<2x2048xf32>
    %cst_15 = arith.constant 0.000000e+00 : f32
    %96 = vector.broadcast %cst_15 : f32 to vector<2x2048xf32>
    %97 = arith.maximumf %95, %96 : vector<2x2048xf32>
    %98 = arith.truncf %97 : vector<2x2048xf32> to vector<2x2048xbf16>
    %c0_16 = arith.constant 0 : index
    %c0_17 = arith.constant 0 : index
    %99 = vector.load %arg5[%c0_16, %c0_17] : memref<2x2048xbf16, #tpu.memory_space<vmem>>, vector<2x2048xbf16>
    tpu.vector_store %arg5[%c0_16, %c0_17], %98 {strides = array<i32>} : memref<2x2048xbf16, #tpu.memory_space<vmem>>, vector<2x2048xbf16>,
    return
  }
  func.func @transform_0(%arg0: i32) -> (i32, i32) {
    %c0_i32 = arith.constant 0 : i32
    %c0_i32_0 = arith.constant 0 : i32
    %c0_i32_1 = arith.constant 0 : i32
    return %c0_i32, %c0_i32_0 : i32, i32
  }
  func.func @transform_1(%arg0: i32) -> (i32, i32) {
    %c0_i32 = arith.constant 0 : i32
    %c0_i32_0 = arith.constant 0 : i32
    %c0_i32_1 = arith.constant 0 : i32
    return %c0_i32, %c0_i32_0 : i32, i32
  }
  func.func @transform_2(%arg0: i32) -> (i32, i32) {
    %c0_i32 = arith.constant 0 : i32
    %c0_i32_0 = arith.constant 0 : i32
    %c0_i32_1 = arith.constant 0 : i32
    return %c0_i32, %c0_i32_0 : i32, i32
  }
  func.func @transform_3(%arg0: i32) -> (i32, i32) {
    %c0_i32 = arith.constant 0 : i32
    %c0_i32_0 = arith.constant 0 : i32
    %c0_i32_1 = arith.constant 0 : i32
    return %c0_i32, %c0_i32_0 : i32, i32
  }
  func.func @transform_4(%arg0: i32) -> (i32, i32) {
    %c0_i32 = arith.constant 0 : i32
    %c0_i32_0 = arith.constant 0 : i32
    %c0_i32_1 = arith.constant 0 : i32
    return %c0_i32, %c0_i32_0 : i32, i32
  }
}

module attributes {stable_mosaic.version = 11 : i64} {
  func.func @_deconv_bn_relu_kernel(%arg0: i32, %arg1: memref<32x1152xbf16, #tpu.memory_space<vmem>>, %arg2: memref<1152x256xbf16, #tpu.memory_space<vmem>>, %arg3: memref<256x256xf32, #tpu.memory_space<vmem>>, %arg4: memref<1x256xf32, #tpu.memory_space<vmem>>, %arg5: memref<1x256xf32, #tpu.memory_space<vmem>>, %arg6: memref<32x256xbf16, #tpu.memory_space<vmem>>) attributes {dimension_semantics = [#tpu.dimension_semantics<arbitrary>], iteration_bounds = array<i64: 1>, scalar_prefetch = 0 : i64, scratch_operands = 0 : i64, tpu.core_type = #tpu.core_type<tc>, window_params = [{pipeline_mode = #tpu.pipeline_mode<synchronous>, transform_indices = @transform_0, window_bounds = array<i64: 32, 1152>}, {pipeline_mode = #tpu.pipeline_mode<synchronous>, transform_indices = @transform_1, window_bounds = array<i64: 1152, 256>}, {pipeline_mode = #tpu.pipeline_mode<synchronous>, transform_indices = @transform_2, window_bounds = array<i64: 256, 256>}, {pipeline_mode = #tpu.pipeline_mode<synchronous>, transform_indices = @transform_3, window_bounds = array<i64: 1, 256>}, {pipeline_mode = #tpu.pipeline_mode<synchronous>, transform_indices = @transform_4, window_bounds = array<i64: 1, 256>}, {pipeline_mode = #tpu.pipeline_mode<synchronous>, transform_indices = @transform_5, window_bounds = array<i64: 32, 256>}]} {
    %c0 = arith.constant 0 : index
    %c0_0 = arith.constant 0 : index
    %0 = vector.load %arg1[%c0, %c0_0] : memref<32x1152xbf16, #tpu.memory_space<vmem>>, vector<32x1152xbf16>
    %c0_1 = arith.constant 0 : index
    %c0_2 = arith.constant 0 : index
    %1 = vector.load %arg2[%c0_1, %c0_2] : memref<1152x256xbf16, #tpu.memory_space<vmem>>, vector<1152x256xbf16>
    %cst = arith.constant dense<0.000000e+00> : vector<32x256xf32>
    %2 = tpu.matmul %0, %1, %cst {dimension_numbers = #tpu.dot_dimension_numbers<[1], [0], [0], [1], [0, 0, 1, 1], [], []>} : vector<32x1152xbf16>, vector<1152x256xbf16>, vector<32x256xf32> -> vector<32x256xf32>
    %cst_3 = arith.constant dense<0.000000e+00> : vector<256xf32>
    %3 = vector.multi_reduction <add>, %2, %cst_3 [0] : vector<32x256xf32> to vector<256xf32>
    %4 = vector.shape_cast %3 : vector<256xf32> to vector<1x256xf32>
    %5 = arith.mulf %2, %2 : vector<32x256xf32>
    %cst_4 = arith.constant dense<0.000000e+00> : vector<256xf32>
    %6 = vector.multi_reduction <add>, %5, %cst_4 [0] : vector<32x256xf32> to vector<256xf32>
    %7 = vector.shape_cast %6 : vector<256xf32> to vector<1x256xf32>
    %c0_5 = arith.constant 0 : index
    %c0_6 = arith.constant 0 : index
    %8 = vector.load %arg3[%c0_5, %c0_6] : memref<256x256xf32, #tpu.memory_space<vmem>>, vector<256x256xf32>
    %cst_7 = arith.constant dense<0.000000e+00> : vector<1x256xf32>
    %9 = tpu.matmul %4, %8, %cst_7 {dimension_numbers = #tpu.dot_dimension_numbers<[1], [0], [0], [1], [0, 0, 1, 1], [], []>} : vector<1x256xf32>, vector<256x256xf32>, vector<1x256xf32> -> vector<1x256xf32>
    %c0_8 = arith.constant 0 : index
    %c0_9 = arith.constant 0 : index
    %10 = vector.load %arg3[%c0_8, %c0_9] : memref<256x256xf32, #tpu.memory_space<vmem>>, vector<256x256xf32>
    %cst_10 = arith.constant dense<0.000000e+00> : vector<1x256xf32>
    %11 = tpu.matmul %7, %10, %cst_10 {dimension_numbers = #tpu.dot_dimension_numbers<[1], [0], [0], [1], [0, 0, 1, 1], [], []>} : vector<1x256xf32>, vector<256x256xf32>, vector<1x256xf32> -> vector<1x256xf32>
    %cst_11 = arith.constant 1.280000e+02 : f32
    %12 = vector.broadcast %cst_11 : f32 to vector<1x256xf32>
    %13 = arith.divf %9, %12 : vector<1x256xf32>
    %cst_12 = arith.constant 1.280000e+02 : f32
    %14 = vector.broadcast %cst_12 : f32 to vector<1x256xf32>
    %15 = arith.divf %11, %14 : vector<1x256xf32>
    %16 = arith.mulf %13, %13 : vector<1x256xf32>
    %17 = arith.subf %15, %16 : vector<1x256xf32>
    %cst_13 = arith.constant 0.000000e+00 : f32
    %18 = vector.broadcast %cst_13 : f32 to vector<1x256xf32>
    %19 = arith.maximumf %17, %18 : vector<1x256xf32>
    %c0_14 = arith.constant 0 : index
    %c0_15 = arith.constant 0 : index
    %20 = vector.load %arg4[%c0_14, %c0_15] : memref<1x256xf32, #tpu.memory_space<vmem>>, vector<1x256xf32>
    %cst_16 = arith.constant 9.99999974E-6 : f32
    %21 = vector.broadcast %cst_16 : f32 to vector<1x256xf32>
    %22 = arith.addf %19, %21 : vector<1x256xf32>
    %23 = math.rsqrt %22 : vector<1x256xf32>
    %24 = arith.mulf %20, %23 : vector<1x256xf32>
    %c0_17 = arith.constant 0 : index
    %c0_18 = arith.constant 0 : index
    %25 = vector.load %arg5[%c0_17, %c0_18] : memref<1x256xf32, #tpu.memory_space<vmem>>, vector<1x256xf32>
    %26 = arith.mulf %13, %24 : vector<1x256xf32>
    %27 = arith.subf %25, %26 : vector<1x256xf32>
    %28 = vector.broadcast %24 : vector<1x256xf32> to vector<32x256xf32>
    %29 = arith.mulf %2, %28 : vector<32x256xf32>
    %30 = vector.broadcast %27 : vector<1x256xf32> to vector<32x256xf32>
    %31 = arith.addf %29, %30 : vector<32x256xf32>
    %cst_19 = arith.constant 0.000000e+00 : f32
    %32 = vector.broadcast %cst_19 : f32 to vector<32x256xf32>
    %33 = arith.maximumf %31, %32 : vector<32x256xf32>
    %34 = arith.truncf %33 : vector<32x256xf32> to vector<32x256xbf16>
    %c0_20 = arith.constant 0 : index
    %c0_21 = arith.constant 0 : index
    %35 = vector.load %arg6[%c0_20, %c0_21] : memref<32x256xbf16, #tpu.memory_space<vmem>>, vector<32x256xbf16>
    tpu.vector_store %arg6[%c0_20, %c0_21], %34 {strides = array<i32>} : memref<32x256xbf16, #tpu.memory_space<vmem>>, vector<32x256xbf16>,
    return
  }
  func.func @transform_0(%arg0: i32) -> (i32, i32) {
    %c0_i32 = arith.constant 0 : i32
    %c0_i32_0 = arith.constant 0 : i32
    %c0_i32_1 = arith.constant 0 : i32
    return %c0_i32, %c0_i32_0 : i32, i32
  }
  func.func @transform_1(%arg0: i32) -> (i32, i32) {
    %c0_i32 = arith.constant 0 : i32
    %c0_i32_0 = arith.constant 0 : i32
    %c0_i32_1 = arith.constant 0 : i32
    return %c0_i32, %c0_i32_0 : i32, i32
  }
  func.func @transform_2(%arg0: i32) -> (i32, i32) {
    %c0_i32 = arith.constant 0 : i32
    %c0_i32_0 = arith.constant 0 : i32
    %c0_i32_1 = arith.constant 0 : i32
    return %c0_i32, %c0_i32_0 : i32, i32
  }
  func.func @transform_3(%arg0: i32) -> (i32, i32) {
    %c0_i32 = arith.constant 0 : i32
    %c0_i32_0 = arith.constant 0 : i32
    %c0_i32_1 = arith.constant 0 : i32
    return %c0_i32, %c0_i32_0 : i32, i32
  }
  func.func @transform_4(%arg0: i32) -> (i32, i32) {
    %c0_i32 = arith.constant 0 : i32
    %c0_i32_0 = arith.constant 0 : i32
    %c0_i32_1 = arith.constant 0 : i32
    return %c0_i32, %c0_i32_0 : i32, i32
  }
  func.func @transform_5(%arg0: i32) -> (i32, i32) {
    %c0_i32 = arith.constant 0 : i32
    %c0_i32_0 = arith.constant 0 : i32
    %c0_i32_1 = arith.constant 0 : i32
    return %c0_i32, %c0_i32_0 : i32, i32
  }
}

module attributes {stable_mosaic.version = 11 : i64} {
  func.func @_deconv_bn_relu_kernel(%arg0: i32, %arg1: memref<128x576xbf16, #tpu.memory_space<vmem>>, %arg2: memref<576x128xbf16, #tpu.memory_space<vmem>>, %arg3: memref<128x128xf32, #tpu.memory_space<vmem>>, %arg4: memref<1x128xf32, #tpu.memory_space<vmem>>, %arg5: memref<1x128xf32, #tpu.memory_space<vmem>>, %arg6: memref<128x128xbf16, #tpu.memory_space<vmem>>) attributes {dimension_semantics = [#tpu.dimension_semantics<arbitrary>], iteration_bounds = array<i64: 1>, scalar_prefetch = 0 : i64, scratch_operands = 0 : i64, tpu.core_type = #tpu.core_type<tc>, window_params = [{pipeline_mode = #tpu.pipeline_mode<synchronous>, transform_indices = @transform_0, window_bounds = array<i64: 128, 576>}, {pipeline_mode = #tpu.pipeline_mode<synchronous>, transform_indices = @transform_1, window_bounds = array<i64: 576, 128>}, {pipeline_mode = #tpu.pipeline_mode<synchronous>, transform_indices = @transform_2, window_bounds = array<i64: 128, 128>}, {pipeline_mode = #tpu.pipeline_mode<synchronous>, transform_indices = @transform_3, window_bounds = array<i64: 1, 128>}, {pipeline_mode = #tpu.pipeline_mode<synchronous>, transform_indices = @transform_4, window_bounds = array<i64: 1, 128>}, {pipeline_mode = #tpu.pipeline_mode<synchronous>, transform_indices = @transform_5, window_bounds = array<i64: 128, 128>}]} {
    %c0 = arith.constant 0 : index
    %c0_0 = arith.constant 0 : index
    %0 = vector.load %arg1[%c0, %c0_0] : memref<128x576xbf16, #tpu.memory_space<vmem>>, vector<128x576xbf16>
    %c0_1 = arith.constant 0 : index
    %c0_2 = arith.constant 0 : index
    %1 = vector.load %arg2[%c0_1, %c0_2] : memref<576x128xbf16, #tpu.memory_space<vmem>>, vector<576x128xbf16>
    %cst = arith.constant dense<0.000000e+00> : vector<128x128xf32>
    %2 = tpu.matmul %0, %1, %cst {dimension_numbers = #tpu.dot_dimension_numbers<[1], [0], [0], [1], [0, 0, 1, 1], [], []>} : vector<128x576xbf16>, vector<576x128xbf16>, vector<128x128xf32> -> vector<128x128xf32>
    %cst_3 = arith.constant dense<0.000000e+00> : vector<128xf32>
    %3 = vector.multi_reduction <add>, %2, %cst_3 [0] : vector<128x128xf32> to vector<128xf32>
    %4 = vector.shape_cast %3 : vector<128xf32> to vector<1x128xf32>
    %5 = arith.mulf %2, %2 : vector<128x128xf32>
    %cst_4 = arith.constant dense<0.000000e+00> : vector<128xf32>
    %6 = vector.multi_reduction <add>, %5, %cst_4 [0] : vector<128x128xf32> to vector<128xf32>
    %7 = vector.shape_cast %6 : vector<128xf32> to vector<1x128xf32>
    %c0_5 = arith.constant 0 : index
    %c0_6 = arith.constant 0 : index
    %8 = vector.load %arg3[%c0_5, %c0_6] : memref<128x128xf32, #tpu.memory_space<vmem>>, vector<128x128xf32>
    %cst_7 = arith.constant dense<0.000000e+00> : vector<1x128xf32>
    %9 = tpu.matmul %4, %8, %cst_7 {dimension_numbers = #tpu.dot_dimension_numbers<[1], [0], [0], [1], [0, 0, 1, 1], [], []>} : vector<1x128xf32>, vector<128x128xf32>, vector<1x128xf32> -> vector<1x128xf32>
    %c0_8 = arith.constant 0 : index
    %c0_9 = arith.constant 0 : index
    %10 = vector.load %arg3[%c0_8, %c0_9] : memref<128x128xf32, #tpu.memory_space<vmem>>, vector<128x128xf32>
    %cst_10 = arith.constant dense<0.000000e+00> : vector<1x128xf32>
    %11 = tpu.matmul %7, %10, %cst_10 {dimension_numbers = #tpu.dot_dimension_numbers<[1], [0], [0], [1], [0, 0, 1, 1], [], []>} : vector<1x128xf32>, vector<128x128xf32>, vector<1x128xf32> -> vector<1x128xf32>
    %cst_11 = arith.constant 5.120000e+02 : f32
    %12 = vector.broadcast %cst_11 : f32 to vector<1x128xf32>
    %13 = arith.divf %9, %12 : vector<1x128xf32>
    %cst_12 = arith.constant 5.120000e+02 : f32
    %14 = vector.broadcast %cst_12 : f32 to vector<1x128xf32>
    %15 = arith.divf %11, %14 : vector<1x128xf32>
    %16 = arith.mulf %13, %13 : vector<1x128xf32>
    %17 = arith.subf %15, %16 : vector<1x128xf32>
    %cst_13 = arith.constant 0.000000e+00 : f32
    %18 = vector.broadcast %cst_13 : f32 to vector<1x128xf32>
    %19 = arith.maximumf %17, %18 : vector<1x128xf32>
    %c0_14 = arith.constant 0 : index
    %c0_15 = arith.constant 0 : index
    %20 = vector.load %arg4[%c0_14, %c0_15] : memref<1x128xf32, #tpu.memory_space<vmem>>, vector<1x128xf32>
    %cst_16 = arith.constant 9.99999974E-6 : f32
    %21 = vector.broadcast %cst_16 : f32 to vector<1x128xf32>
    %22 = arith.addf %19, %21 : vector<1x128xf32>
    %23 = math.rsqrt %22 : vector<1x128xf32>
    %24 = arith.mulf %20, %23 : vector<1x128xf32>
    %c0_17 = arith.constant 0 : index
    %c0_18 = arith.constant 0 : index
    %25 = vector.load %arg5[%c0_17, %c0_18] : memref<1x128xf32, #tpu.memory_space<vmem>>, vector<1x128xf32>
    %26 = arith.mulf %13, %24 : vector<1x128xf32>
    %27 = arith.subf %25, %26 : vector<1x128xf32>
    %28 = vector.broadcast %24 : vector<1x128xf32> to vector<128x128xf32>
    %29 = arith.mulf %2, %28 : vector<128x128xf32>
    %30 = vector.broadcast %27 : vector<1x128xf32> to vector<128x128xf32>
    %31 = arith.addf %29, %30 : vector<128x128xf32>
    %cst_19 = arith.constant 0.000000e+00 : f32
    %32 = vector.broadcast %cst_19 : f32 to vector<128x128xf32>
    %33 = arith.maximumf %31, %32 : vector<128x128xf32>
    %34 = arith.truncf %33 : vector<128x128xf32> to vector<128x128xbf16>
    %c0_20 = arith.constant 0 : index
    %c0_21 = arith.constant 0 : index
    %35 = vector.load %arg6[%c0_20, %c0_21] : memref<128x128xbf16, #tpu.memory_space<vmem>>, vector<128x128xbf16>
    tpu.vector_store %arg6[%c0_20, %c0_21], %34 {strides = array<i32>} : memref<128x128xbf16, #tpu.memory_space<vmem>>, vector<128x128xbf16>,
    return
  }
  func.func @transform_0(%arg0: i32) -> (i32, i32) {
    %c0_i32 = arith.constant 0 : i32
    %c0_i32_0 = arith.constant 0 : i32
    %c0_i32_1 = arith.constant 0 : i32
    return %c0_i32, %c0_i32_0 : i32, i32
  }
  func.func @transform_1(%arg0: i32) -> (i32, i32) {
    %c0_i32 = arith.constant 0 : i32
    %c0_i32_0 = arith.constant 0 : i32
    %c0_i32_1 = arith.constant 0 : i32
    return %c0_i32, %c0_i32_0 : i32, i32
  }
  func.func @transform_2(%arg0: i32) -> (i32, i32) {
    %c0_i32 = arith.constant 0 : i32
    %c0_i32_0 = arith.constant 0 : i32
    %c0_i32_1 = arith.constant 0 : i32
    return %c0_i32, %c0_i32_0 : i32, i32
  }
  func.func @transform_3(%arg0: i32) -> (i32, i32) {
    %c0_i32 = arith.constant 0 : i32
    %c0_i32_0 = arith.constant 0 : i32
    %c0_i32_1 = arith.constant 0 : i32
    return %c0_i32, %c0_i32_0 : i32, i32
  }
  func.func @transform_4(%arg0: i32) -> (i32, i32) {
    %c0_i32 = arith.constant 0 : i32
    %c0_i32_0 = arith.constant 0 : i32
    %c0_i32_1 = arith.constant 0 : i32
    return %c0_i32, %c0_i32_0 : i32, i32
  }
  func.func @transform_5(%arg0: i32) -> (i32, i32) {
    %c0_i32 = arith.constant 0 : i32
    %c0_i32_0 = arith.constant 0 : i32
    %c0_i32_1 = arith.constant 0 : i32
    return %c0_i32, %c0_i32_0 : i32, i32
  }
}

module attributes {stable_mosaic.version = 11 : i64} {
  func.func @_deconv_bn_relu_kernel(%arg0: i32, %arg1: memref<512x288xbf16, #tpu.memory_space<vmem>>, %arg2: memref<288x64xbf16, #tpu.memory_space<vmem>>, %arg3: memref<64x64xf32, #tpu.memory_space<vmem>>, %arg4: memref<1x64xf32, #tpu.memory_space<vmem>>, %arg5: memref<1x64xf32, #tpu.memory_space<vmem>>, %arg6: memref<512x64xbf16, #tpu.memory_space<vmem>>) attributes {dimension_semantics = [#tpu.dimension_semantics<arbitrary>], iteration_bounds = array<i64: 1>, scalar_prefetch = 0 : i64, scratch_operands = 0 : i64, tpu.core_type = #tpu.core_type<tc>, window_params = [{pipeline_mode = #tpu.pipeline_mode<synchronous>, transform_indices = @transform_0, window_bounds = array<i64: 512, 288>}, {pipeline_mode = #tpu.pipeline_mode<synchronous>, transform_indices = @transform_1, window_bounds = array<i64: 288, 64>}, {pipeline_mode = #tpu.pipeline_mode<synchronous>, transform_indices = @transform_2, window_bounds = array<i64: 64, 64>}, {pipeline_mode = #tpu.pipeline_mode<synchronous>, transform_indices = @transform_3, window_bounds = array<i64: 1, 64>}, {pipeline_mode = #tpu.pipeline_mode<synchronous>, transform_indices = @transform_4, window_bounds = array<i64: 1, 64>}, {pipeline_mode = #tpu.pipeline_mode<synchronous>, transform_indices = @transform_5, window_bounds = array<i64: 512, 64>}]} {
    %c0 = arith.constant 0 : index
    %c0_0 = arith.constant 0 : index
    %0 = vector.load %arg1[%c0, %c0_0] : memref<512x288xbf16, #tpu.memory_space<vmem>>, vector<512x288xbf16>
    %c0_1 = arith.constant 0 : index
    %c0_2 = arith.constant 0 : index
    %1 = vector.load %arg2[%c0_1, %c0_2] : memref<288x64xbf16, #tpu.memory_space<vmem>>, vector<288x64xbf16>
    %cst = arith.constant dense<0.000000e+00> : vector<512x64xf32>
    %2 = tpu.matmul %0, %1, %cst {dimension_numbers = #tpu.dot_dimension_numbers<[1], [0], [0], [1], [0, 0, 1, 1], [], []>} : vector<512x288xbf16>, vector<288x64xbf16>, vector<512x64xf32> -> vector<512x64xf32>
    %cst_3 = arith.constant dense<0.000000e+00> : vector<64xf32>
    %3 = vector.multi_reduction <add>, %2, %cst_3 [0] : vector<512x64xf32> to vector<64xf32>
    %4 = vector.shape_cast %3 : vector<64xf32> to vector<1x64xf32>
    %5 = arith.mulf %2, %2 : vector<512x64xf32>
    %cst_4 = arith.constant dense<0.000000e+00> : vector<64xf32>
    %6 = vector.multi_reduction <add>, %5, %cst_4 [0] : vector<512x64xf32> to vector<64xf32>
    %7 = vector.shape_cast %6 : vector<64xf32> to vector<1x64xf32>
    %c0_5 = arith.constant 0 : index
    %c0_6 = arith.constant 0 : index
    %8 = vector.load %arg3[%c0_5, %c0_6] : memref<64x64xf32, #tpu.memory_space<vmem>>, vector<64x64xf32>
    %cst_7 = arith.constant dense<0.000000e+00> : vector<1x64xf32>
    %9 = tpu.matmul %4, %8, %cst_7 {dimension_numbers = #tpu.dot_dimension_numbers<[1], [0], [0], [1], [0, 0, 1, 1], [], []>} : vector<1x64xf32>, vector<64x64xf32>, vector<1x64xf32> -> vector<1x64xf32>
    %c0_8 = arith.constant 0 : index
    %c0_9 = arith.constant 0 : index
    %10 = vector.load %arg3[%c0_8, %c0_9] : memref<64x64xf32, #tpu.memory_space<vmem>>, vector<64x64xf32>
    %cst_10 = arith.constant dense<0.000000e+00> : vector<1x64xf32>
    %11 = tpu.matmul %7, %10, %cst_10 {dimension_numbers = #tpu.dot_dimension_numbers<[1], [0], [0], [1], [0, 0, 1, 1], [], []>} : vector<1x64xf32>, vector<64x64xf32>, vector<1x64xf32> -> vector<1x64xf32>
    %cst_11 = arith.constant 2.048000e+03 : f32
    %12 = vector.broadcast %cst_11 : f32 to vector<1x64xf32>
    %13 = arith.divf %9, %12 : vector<1x64xf32>
    %cst_12 = arith.constant 2.048000e+03 : f32
    %14 = vector.broadcast %cst_12 : f32 to vector<1x64xf32>
    %15 = arith.divf %11, %14 : vector<1x64xf32>
    %16 = arith.mulf %13, %13 : vector<1x64xf32>
    %17 = arith.subf %15, %16 : vector<1x64xf32>
    %cst_13 = arith.constant 0.000000e+00 : f32
    %18 = vector.broadcast %cst_13 : f32 to vector<1x64xf32>
    %19 = arith.maximumf %17, %18 : vector<1x64xf32>
    %c0_14 = arith.constant 0 : index
    %c0_15 = arith.constant 0 : index
    %20 = vector.load %arg4[%c0_14, %c0_15] : memref<1x64xf32, #tpu.memory_space<vmem>>, vector<1x64xf32>
    %cst_16 = arith.constant 9.99999974E-6 : f32
    %21 = vector.broadcast %cst_16 : f32 to vector<1x64xf32>
    %22 = arith.addf %19, %21 : vector<1x64xf32>
    %23 = math.rsqrt %22 : vector<1x64xf32>
    %24 = arith.mulf %20, %23 : vector<1x64xf32>
    %c0_17 = arith.constant 0 : index
    %c0_18 = arith.constant 0 : index
    %25 = vector.load %arg5[%c0_17, %c0_18] : memref<1x64xf32, #tpu.memory_space<vmem>>, vector<1x64xf32>
    %26 = arith.mulf %13, %24 : vector<1x64xf32>
    %27 = arith.subf %25, %26 : vector<1x64xf32>
    %28 = vector.broadcast %24 : vector<1x64xf32> to vector<512x64xf32>
    %29 = arith.mulf %2, %28 : vector<512x64xf32>
    %30 = vector.broadcast %27 : vector<1x64xf32> to vector<512x64xf32>
    %31 = arith.addf %29, %30 : vector<512x64xf32>
    %cst_19 = arith.constant 0.000000e+00 : f32
    %32 = vector.broadcast %cst_19 : f32 to vector<512x64xf32>
    %33 = arith.maximumf %31, %32 : vector<512x64xf32>
    %34 = arith.truncf %33 : vector<512x64xf32> to vector<512x64xbf16>
    %c0_20 = arith.constant 0 : index
    %c0_21 = arith.constant 0 : index
    %35 = vector.load %arg6[%c0_20, %c0_21] : memref<512x64xbf16, #tpu.memory_space<vmem>>, vector<512x64xbf16>
    tpu.vector_store %arg6[%c0_20, %c0_21], %34 {strides = array<i32>} : memref<512x64xbf16, #tpu.memory_space<vmem>>, vector<512x64xbf16>,
    return
  }
  func.func @transform_0(%arg0: i32) -> (i32, i32) {
    %c0_i32 = arith.constant 0 : i32
    %c0_i32_0 = arith.constant 0 : i32
    %c0_i32_1 = arith.constant 0 : i32
    return %c0_i32, %c0_i32_0 : i32, i32
  }
  func.func @transform_1(%arg0: i32) -> (i32, i32) {
    %c0_i32 = arith.constant 0 : i32
    %c0_i32_0 = arith.constant 0 : i32
    %c0_i32_1 = arith.constant 0 : i32
    return %c0_i32, %c0_i32_0 : i32, i32
  }
  func.func @transform_2(%arg0: i32) -> (i32, i32) {
    %c0_i32 = arith.constant 0 : i32
    %c0_i32_0 = arith.constant 0 : i32
    %c0_i32_1 = arith.constant 0 : i32
    return %c0_i32, %c0_i32_0 : i32, i32
  }
  func.func @transform_3(%arg0: i32) -> (i32, i32) {
    %c0_i32 = arith.constant 0 : i32
    %c0_i32_0 = arith.constant 0 : i32
    %c0_i32_1 = arith.constant 0 : i32
    return %c0_i32, %c0_i32_0 : i32, i32
  }
  func.func @transform_4(%arg0: i32) -> (i32, i32) {
    %c0_i32 = arith.constant 0 : i32
    %c0_i32_0 = arith.constant 0 : i32
    %c0_i32_1 = arith.constant 0 : i32
    return %c0_i32, %c0_i32_0 : i32, i32
  }
  func.func @transform_5(%arg0: i32) -> (i32, i32) {
    %c0_i32 = arith.constant 0 : i32
    %c0_i32_0 = arith.constant 0 : i32
    %c0_i32_1 = arith.constant 0 : i32
    return %c0_i32, %c0_i32_0 : i32, i32
  }
}

module attributes {stable_mosaic.version = 11 : i64} {
  func.func @_deconv_bias_tanh_kernel(%arg0: i32, %arg1: memref<144x1024xbf16, #tpu.memory_space<vmem>>, %arg2: memref<12x144xbf16, #tpu.memory_space<vmem>>, %arg3: memref<12x1xf32, #tpu.memory_space<vmem>>, %arg4: memref<12x1024xf32, #tpu.memory_space<vmem>>) attributes {dimension_semantics = [#tpu.dimension_semantics<parallel>], iteration_bounds = array<i64: 2>, scalar_prefetch = 0 : i64, scratch_operands = 0 : i64, tpu.core_type = #tpu.core_type<tc>, window_params = [{transform_indices = @transform_0, window_bounds = array<i64: 144, 1024>}, {pipeline_mode = #tpu.pipeline_mode<synchronous>, transform_indices = @transform_1, window_bounds = array<i64: 12, 144>}, {pipeline_mode = #tpu.pipeline_mode<synchronous>, transform_indices = @transform_2, window_bounds = array<i64: 12, 1>}, {transform_indices = @transform_3, window_bounds = array<i64: 12, 1024>}]} {
    %c0 = arith.constant 0 : index
    %c0_0 = arith.constant 0 : index
    %0 = vector.load %arg2[%c0, %c0_0] : memref<12x144xbf16, #tpu.memory_space<vmem>>, vector<12x144xbf16>
    %c0_1 = arith.constant 0 : index
    %c0_2 = arith.constant 0 : index
    %1 = vector.load %arg1[%c0_1, %c0_2] : memref<144x1024xbf16, #tpu.memory_space<vmem>>, vector<144x1024xbf16>
    %cst = arith.constant dense<0.000000e+00> : vector<12x1024xf32>
    %2 = tpu.matmul %0, %1, %cst {dimension_numbers = #tpu.dot_dimension_numbers<[1], [0], [0], [1], [0, 0, 1, 1], [], []>} : vector<12x144xbf16>, vector<144x1024xbf16>, vector<12x1024xf32> -> vector<12x1024xf32>
    %c0_3 = arith.constant 0 : index
    %c0_4 = arith.constant 0 : index
    %3 = vector.load %arg3[%c0_3, %c0_4] : memref<12x1xf32, #tpu.memory_space<vmem>>, vector<12x1xf32>
    %4 = vector.broadcast %3 : vector<12x1xf32> to vector<12x1024xf32>
    %5 = arith.addf %2, %4 : vector<12x1024xf32>
    %6 = math.tanh %5 : vector<12x1024xf32>
    %c0_5 = arith.constant 0 : index
    %c0_6 = arith.constant 0 : index
    %7 = vector.load %arg4[%c0_5, %c0_6] : memref<12x1024xf32, #tpu.memory_space<vmem>>, vector<12x1024xf32>
    tpu.vector_store %arg4[%c0_5, %c0_6], %6 {strides = array<i32>} : memref<12x1024xf32, #tpu.memory_space<vmem>>, vector<12x1024xf32>,
    return
  }
  func.func @transform_0(%arg0: i32) -> (i32, i32) {
    %c0_i32 = arith.constant 0 : i32
    %c0_i32_0 = arith.constant 0 : i32
    return %c0_i32, %arg0 : i32, i32
  }
  func.func @transform_1(%arg0: i32) -> (i32, i32) {
    %c0_i32 = arith.constant 0 : i32
    %c0_i32_0 = arith.constant 0 : i32
    %c0_i32_1 = arith.constant 0 : i32
    return %c0_i32, %c0_i32_0 : i32, i32
  }
  func.func @transform_2(%arg0: i32) -> (i32, i32) {
    %c0_i32 = arith.constant 0 : i32
    %c0_i32_0 = arith.constant 0 : i32
    %c0_i32_1 = arith.constant 0 : i32
    return %c0_i32, %c0_i32_0 : i32, i32
  }
  func.func @transform_3(%arg0: i32) -> (i32, i32) {
    %c0_i32 = arith.constant 0 : i32
    %c0_i32_0 = arith.constant 0 : i32
    return %c0_i32, %arg0 : i32, i32
  }
}

</mosaic_0001>

<bundles_post_ra>
// kernel: generator_forward.5
= control target key start
LH: loop header
LB: loop body
LE: loop exit
PB: predicated region body
PF: predicated region fallthrough
CT: control target
= control target key end

     0   :  { %9 = vsyncpa [#allocation3], 0  ;;  %s1651_s0 = inlined_call_operand.vmem [shape: bf16[2,64], index: 0, kind: input, shape index: {}]   ;;  %s1652_s1 = inlined_call_operand.hbm [shape: bf16[64,2048], index: 1, kind: input, shape index: {}]   ;;  %s1653_s2 = inlined_call_operand.hbm [shape: f32[1,128], index: 2, kind: input, shape index: {}]   ;;  %s1654_s3 = inlined_call_operand.hbm [shape: f32[1,128], index: 3, kind: input, shape index: {}]   ;;  %s1655_s4 = inlined_call_operand.vmem [shape: bf16[2,2048], index: 4, kind: output, shape index: {}]  }
   0x1   :  { %10 = vsyncpa [#allocation5], 0  ;;  %s1413_s15 = smov [#allocation4]   ;;  %s1414_s17 = smov [#allocation2]  }
   0x2   :  { %s31_s16 = sshll.u32 %s1413_s15, 4  ;;  %s18_s18 = sshll.u32 %s1414_s17, 4  ;;  %s32_s16 = int_to_ptr.vmem [resolvable:$true] %s31_s16  ;;  %s1445_s18 = int_to_ptr.vmem [resolvable:$true] %s18_s18 }
   0x3   :  { %s1343_s21 = scalar_lea.hbm %s1653_s2, 16 }
   0x4   :  { %p1344_p0 = scmp.ne.s32.totalorder %s1653_s2, %s1343_s21  ;;  %p1347_p1 = scmp.lt.u32.totalorder %s1343_s21, %s1653_s2 }
   0x6   :  { %p1349_p2 = pnand %p1347_p1, %p1344_p0 }
   0x8   :  { %1352 = shalt.err (!%p1349_p2)
}
   0x9   :  { %s1353_s26 = scalar_lea.vmem %s32_s16, 16  ;;  %s1357_s27 = scalar_lea.vmem %s32_s16, 32 }
   0xa   :  { %p1354_p3 = scmp.ne.s32.totalorder %s32_s16, %s1353_s26  ;;  %p1358_p4 = scmp.lt.s32.totalorder %s32_s16, %s32_s16 }
   0xb   :  { %p1359_p5 = scmp.lt.s32.totalorder %s1357_s27, %s1353_s26 }
   0xd   :  { %p1360_p6 = por %p1359_p5, %p1358_p4 }
   0xf   :  { %p1361_p7 = pnand %p1360_p6, %p1354_p3 }
  0x11   :  { %1364 = shalt.err (!%p1361_p7)
}
  0x12   :  { %34 = dma.hbm_to_vmem [thread:$0]  %s1653_s2, 16, %s32_s16, [#allocation5]  }
  0x13   :  { %s1365_s6 = scalar_lea.hbm %s1652_s1, 8192 }
  0x14   :  { %p1366_p8 = scmp.ne.s32.totalorder %s1652_s1, %s1365_s6  ;;  %p1369_p9 = scmp.lt.u32.totalorder %s1365_s6, %s1652_s1 }
  0x16   :  { %p1371_p10 = pnand %p1369_p9, %p1366_p8 }
  0x18   :  { %1374 = shalt.err (!%p1371_p10)
}
  0x19   :  { %s1375_s11 = scalar_lea.vmem %s1445_s18, 8192  ;;  %p1380_p12 = scmp.lt.s32.totalorder %s1445_s18, %s1445_s18 }
  0x1a   :  { %p1376_p11 = scmp.ne.s32.totalorder %s1445_s18, %s1375_s11  ;;  %p1381_p13 = scmp.lt.s32.totalorder %s1375_s11, %s1375_s11 }
  0x1c   :  { %p1382_p0 = por %p1381_p13, %p1380_p12 }
  0x1e   :  { %p1383_p1 = pnand %p1382_p0, %p1376_p11 }
  0x20   :  { %1386 = shalt.err (!%p1383_p1)
}
  0x21   :  { %s1415_s2 = smov 1024   ;;  %s1416_s12 = smov 64  }
  0x22   :  { %24 = dma.hbm_to_vmem [thread:$0]  %s1652_s1, 8192, %s1445_s18, [#allocation3], %s1415_s2, %s1415_s2, %s1416_s12  }
  0x23   :  { %s1417_s15 = smov [#allocation6]   ;;  %s1387_s20 = scalar_lea.hbm %s1654_s3, 16 }
  0x24   :  { %s41_s16 = sshll.u32 %s1417_s15, 4  ;;  %p1388_p2 = scmp.ne.s32.totalorder %s1654_s3, %s1387_s20  ;;  %s42_s16 = int_to_ptr.vmem [resolvable:$true] %s41_s16 }
  0x25   :  { %p1391_p3 = scmp.lt.u32.totalorder %s1387_s20, %s1654_s3 }
  0x27   :  { %p1393_p4 = pnand %p1391_p3, %p1388_p2 }
  0x29   :  { %1396 = shalt.err (!%p1393_p4)
}
  0x2a   :  { %s1397_s25 = scalar_lea.vmem %s42_s16, 16  ;;  %s1401_s1 = scalar_lea.vmem %s42_s16, 32 }
  0x2b   :  { %p1398_p5 = scmp.ne.s32.totalorder %s42_s16, %s1397_s25  ;;  %p1402_p6 = scmp.lt.s32.totalorder %s42_s16, %s42_s16 }
  0x2c   :  { %p1403_p7 = scmp.lt.s32.totalorder %s1401_s1, %s1397_s25 }
  0x2e   :  { %p1404_p8 = por %p1403_p7, %p1402_p6 }
  0x30   :  { %p1405_p9 = pnand %p1404_p8, %p1398_p5 }
  0x32   :  { %1408 = shalt.err (!%p1405_p9)
}
  0x33   :  { %44 = dma.hbm_to_vmem [thread:$0]  %s1654_s3, 16, %s42_s16, [#allocation5]  }
  0x34   :  { %1409 = dma.done.wait [#allocation3], 8192  }
  0x35   :  { %1410 = vsyncadd [#allocation3], 4294959104 }
  0x36   :  { %1411 = dma.done.wait [#allocation5], 32  }
  0x37   :  { %1412 = vsyncadd [#allocation5], 4294967264  ;;  %v1418_v0 = vmov 0   ;;  %v56_v1 = vld [vmem:[#allocation2] sm:$0xff]  ;;  %v57_v3 = vld [vmem:[#allocation2 + $0x8] sm:$0xff]  ;;  %vm440_vm0 = vcmask 523264  }
  0x38   :  { %476 = vmatprep.mubr.bf16.mxu0 %v1418_v0  ;;  %517 = vmatprep.mubr.bf16.mxu1 %v1418_v0  ;;  %v64_v2 = vld [vmem:[#allocation2 + $0x40] sm:$0xff]  ;;  %v65_v5 = vld [vmem:[#allocation2 + $0x48] sm:$0xff]  ;;  %v58_v31 = vld [vmem:[#allocation2 + $0x10] sm:$0xff]  ;;  %vm772_vm1 = vcmask 1041408  }
  0x39   :  { %v1255_v4 = vcombine.high %v56_v1, %v64_v2  ;;  %v1254_v6 = vcombine.low %v56_v1, %v64_v2  ;;  %v72_v7 = vld [vmem:[#allocation2 + $0x80] sm:$0xff]  ;;  %v1257_v9 = vcombine.high %v57_v3, %v65_v5  ;;  %v1256_v10 = vcombine.low %v57_v3, %v65_v5  ;;  %v73_v12 = vld [vmem:[#allocation2 + $0x88] sm:$0xff]  ;;  %v66_v32 = vld [vmem:[#allocation2 + $0x50] sm:$0xff] }
  0x3a   :  { %v80_v8 = vld [vmem:[#allocation2 + $0xc0] sm:$0xff]  ;;  %v81_v13 = vld [vmem:[#allocation2 + $0xc8] sm:$0xff]  ;;  %v59_v33 = vld [vmem:[#allocation2 + $0x18] sm:$0xff]  ;;  %v1259_v37 = vcombine.high %v58_v31, %v66_v32  ;;  %v1258_v44 = vcombine.low %v58_v31, %v66_v32 }
  0x3b   :  { %v1271_v11 = vcombine.high %v72_v7, %v80_v8  ;;  %v88_v14 = vld [vmem:[#allocation2 + $0x100] sm:$0xff]  ;;  %444 = vmatprep.subr.bf16.mxu0 %v1255_v4  ;;  %v1273_v15 = vcombine.high %v73_v12, %v81_v13  ;;  %v89_v17 = vld [vmem:[#allocation2 + $0x108] sm:$0xff]  ;;  %485 = vmatprep.subr.bf16.mxu1 %v1257_v9  ;;  %v1270_v19 = vcombine.low %v72_v7, %v80_v8  ;;  %v67_v34 = vld [vmem:[#allocation2 + $0x58] sm:$0xff] }
  0x3c   :  { %v96_v16 = vld [vmem:[#allocation2 + $0x140] sm:$0xff]  ;;  %v97_v18 = vld [vmem:[#allocation2 + $0x148] sm:$0xff]  ;;  %445 = vmatpush1.bf16.msra.mxu0 %v1254_v6  ;;  %486 = vmatpush1.bf16.msra.mxu1 %v1256_v10  ;;  %v1272_v20 = vcombine.low %v73_v12, %v81_v13  ;;  %v1261_v38 = vcombine.high %v59_v33, %v67_v34  ;;  %v74_v39 = vld [vmem:[#allocation2 + $0x90] sm:$0xff]  ;;  %v1260_v45 = vcombine.low %v59_v33, %v67_v34 }
  0x3d   :  { %446 = vmatprep.subr.bf16.mxu0 %v1271_v11  ;;  %v1287_v21 = vcombine.high %v88_v14, %v96_v16  ;;  %487 = vmatprep.subr.bf16.mxu1 %v1273_v15  ;;  %v1289_v22 = vcombine.high %v89_v17, %v97_v18  ;;  %v104_v23 = vld [vmem:[#allocation2 + $0x180] sm:$0xff]  ;;  %v105_v25 = vld [vmem:[#allocation2 + $0x188] sm:$0xff]  ;;  %v1286_v27 = vcombine.low %v88_v14, %v96_v16  ;;  %v82_v40 = vld [vmem:[#allocation2 + $0xd0] sm:$0xff] }
  0x3e   :  { %v112_v24 = vld [vmem:[#allocation2 + $0x1c0] sm:$0xff]  ;;  %v113_v26 = vld [vmem:[#allocation2 + $0x1c8] sm:$0xff]  ;;  %v1288_v28 = vcombine.low %v89_v17, %v97_v18  ;;  %v75_v41 = vld [vmem:[#allocation2 + $0x98] sm:$0xff]  ;;  %v1275_v46 = vcombine.high %v74_v39, %v82_v40  ;;  %v1274_v52 = vcombine.low %v74_v39, %v82_v40 }
  0x3f   :  { %v1303_v29 = vcombine.high %v104_v23, %v112_v24  ;;  %v1305_v30 = vcombine.high %v105_v25, %v113_v26  ;;  %v1302_v35 = vcombine.low %v104_v23, %v112_v24  ;;  %v1304_v36 = vcombine.low %v105_v25, %v113_v26  ;;  %v83_v42 = vld [vmem:[#allocation2 + $0xd8] sm:$0xff]  ;;  %v1493_v43 = vld [vmem:[%s1651_s0] sm:$0x1]  ;;  %v90_v48 = vld [vmem:[#allocation2 + $0x110] sm:$0xff] }
  0x40   :  { %447 = vmatpush1.bf16.msra.mxu0 %v1270_v19  ;;  %488 = vmatpush1.bf16.msra.mxu1 %v1272_v20  ;;  %v1277_v47 = vcombine.high %v75_v41, %v83_v42  ;;  %v98_v49 = vld [vmem:[#allocation2 + $0x150] sm:$0xff]  ;;  %v91_v50 = vld [vmem:[#allocation2 + $0x118] sm:$0xff]  ;;  %v1276_v53 = vcombine.low %v75_v41, %v83_v42  ;;  %v60_v1 = vld [vmem:[#allocation2 + $0x20] sm:$0xff] }
  0x41   :  { %448 = vmatprep.subr.bf16.mxu0 %v1287_v21  ;;  %489 = vmatprep.subr.bf16.mxu1 %v1289_v22  ;;  %v99_v51 = vld [vmem:[#allocation2 + $0x158] sm:$0xff]  ;;  %v1291_v54 = vcombine.high %v90_v48, %v98_v49  ;;  %v106_v56 = vld [vmem:[#allocation2 + $0x190] sm:$0xff]  ;;  %v1290_v60 = vcombine.low %v90_v48, %v98_v49  ;;  %v68_v2 = vld [vmem:[#allocation2 + $0x60] sm:$0xff] }
  0x42   :  { %v1293_v55 = vcombine.high %v91_v50, %v99_v51  ;;  %v114_v57 = vld [vmem:[#allocation2 + $0x1d0] sm:$0xff]  ;;  %v107_v58 = vld [vmem:[#allocation2 + $0x198] sm:$0xff]  ;;  %v1292_v61 = vcombine.low %v91_v50, %v99_v51  ;;  %v61_v3 = vld [vmem:[#allocation2 + $0x28] sm:$0xff]  ;;  %v1263_v7 = vcombine.high %v60_v1, %v68_v2  ;;  %v1262_v13 = vcombine.low %v60_v1, %v68_v2 }
  0x43   :  { %v115_v59 = vld [vmem:[#allocation2 + $0x1d8] sm:$0xff]  ;;  %v1307_v62 = vcombine.high %v106_v56, %v114_v57  ;;  %v69_v4 = vld [vmem:[#allocation2 + $0x68] sm:$0xff]  ;;  %v1306_v5 = vcombine.low %v106_v56, %v114_v57  ;;  %v76_v9 = vld [vmem:[#allocation2 + $0xa0] sm:$0xff] }
  0x44   :  { %449 = vmatpush1.bf16.msra.mxu0 %v1286_v27  ;;  %490 = vmatpush1.bf16.msra.mxu1 %v1288_v28  ;;  %v1309_v63 = vcombine.high %v107_v58, %v115_v59  ;;  %v1308_v6 = vcombine.low %v107_v58, %v115_v59  ;;  %v1265_v8 = vcombine.high %v61_v3, %v69_v4  ;;  %v84_v10 = vld [vmem:[#allocation2 + $0xe0] sm:$0xff]  ;;  %v77_v11 = vld [vmem:[#allocation2 + $0xa8] sm:$0xff]  ;;  %v62_v33 = vld [vmem:[#allocation2 + $0x30] sm:$0xff] }
  0x45   :  { %450 = vmatprep.subr.bf16.mxu0 %v1303_v29  ;;  %491 = vmatprep.subr.bf16.mxu1 %v1305_v30  ;;  %v85_v12 = vld [vmem:[#allocation2 + $0xe8] sm:$0xff]  ;;  %v1264_v14 = vcombine.low %v61_v3, %v69_v4  ;;  %v1279_v15 = vcombine.high %v76_v9, %v84_v10  ;;  %v92_v17 = vld [vmem:[#allocation2 + $0x120] sm:$0xff]  ;;  %v1278_v21 = vcombine.low %v76_v9, %v84_v10  ;;  %v70_v34 = vld [vmem:[#allocation2 + $0x70] sm:$0xff] }
  0x46   :  { %v1281_v16 = vcombine.high %v77_v11, %v85_v12  ;;  %v100_v18 = vld [vmem:[#allocation2 + $0x160] sm:$0xff]  ;;  %v93_v19 = vld [vmem:[#allocation2 + $0x128] sm:$0xff]  ;;  %v1280_v22 = vcombine.low %v77_v11, %v85_v12  ;;  %v1267_v39 = vcombine.high %v62_v33, %v70_v34  ;;  %v78_v41 = vld [vmem:[#allocation2 + $0xb0] sm:$0xff] }
  0x47   :  { %v101_v20 = vld [vmem:[#allocation2 + $0x168] sm:$0xff]  ;;  %v1295_v23 = vcombine.high %v92_v17, %v100_v18  ;;  %v108_v25 = vld [vmem:[#allocation2 + $0x1a0] sm:$0xff]  ;;  %v1294_v29 = vcombine.low %v92_v17, %v100_v18  ;;  %v86_v42 = vld [vmem:[#allocation2 + $0xf0] sm:$0xff] }
  0x48   :  { %451 = vmatpush1.bf16.msra.mxu0 %v1302_v35  ;;  %492 = vmatpush1.bf16.msra.mxu1 %v1304_v36  ;;  %v1297_v24 = vcombine.high %v93_v19, %v101_v20  ;;  %v116_v26 = vld [vmem:[#allocation2 + $0x1e0] sm:$0xff]  ;;  %v109_v27 = vld [vmem:[#allocation2 + $0x1a8] sm:$0xff]  ;;  %v1296_v30 = vcombine.low %v93_v19, %v101_v20  ;;  %v63_v35 = vld [vmem:[#allocation2 + $0x38] sm:$0xff]  ;;  %v1283_v48 = vcombine.high %v78_v41, %v86_v42 }
  0x49   :  { %526 = vmatprep.subr.bf16.mxu0 %v1259_v37  ;;  %567 = vmatprep.subr.bf16.mxu1 %v1261_v38  ;;  %v117_v28 = vld [vmem:[#allocation2 + $0x1e8] sm:$0xff]  ;;  %v1311_v31 = vcombine.high %v108_v25, %v116_v26  ;;  %v71_v36 = vld [vmem:[#allocation2 + $0x78] sm:$0xff]  ;;  %v1310_v37 = vcombine.low %v108_v25, %v116_v26  ;;  %v94_v50 = vld [vmem:[#allocation2 + $0x130] sm:$0xff] }
  0x4a   :  { %v1313_v32 = vcombine.high %v109_v27, %v117_v28  ;;  %v1312_v38 = vcombine.low %v109_v27, %v117_v28  ;;  %v1269_v40 = vcombine.high %v63_v35, %v71_v36  ;;  %v102_v51 = vld [vmem:[#allocation2 + $0x170] sm:$0xff] }
  0x4b   :  { %1318 = vmatmul.mubr.msk.bf16.vlgmr.msra.gmra.mrb[0].mxu0 %vm440_vm0, %v1493_v43  ;;  %1319 = vmatmul.mubr.msk.bf16.vlgmr.msra.gmra.mrb[0].mxu1 %vm440_vm0, %v1493_v43  ;;  %v1299_v56 = vcombine.high %v94_v50, %v102_v51  ;;  %v110_v58 = vld [vmem:[#allocation2 + $0x1b0] sm:$0xff] }
  0x4c   :  { %527 = vmatpush1.bf16.msra.mxu0 %v1258_v44  ;;  %568 = vmatpush1.bf16.msra.mxu1 %v1260_v45  ;;  %v79_v44 = vld [vmem:[#allocation2 + $0xb8] sm:$0xff]  ;;  %v118_v59 = vld [vmem:[#allocation2 + $0x1f0] sm:$0xff] }
  0x4d   :  { %528 = vmatprep.subr.bf16.mxu0 %v1275_v46  ;;  %569 = vmatprep.subr.bf16.mxu1 %v1277_v47  ;;  %v87_v45 = vld [vmem:[#allocation2 + $0xf8] sm:$0xff]  ;;  %v1266_v46 = vcombine.low %v62_v33, %v70_v34  ;;  %v1268_v47 = vcombine.low %v63_v35, %v71_v36  ;;  %v1315_v1 = vcombine.high %v110_v58, %v118_v59 }
  0x4e   :  { %558 = vmatprep.mubr.bf16.mxu0 %v1418_v0  ;;  %599 = vmatprep.mubr.bf16.mxu1 %v1418_v0  ;;  %v1285_v49 = vcombine.high %v79_v44, %v87_v45  ;;  %v1314_v3 = vcombine.low %v110_v58, %v118_v59 }
  0x50   :  { %529 = vmatpush1.bf16.msra.mxu0 %v1274_v52  ;;  %570 = vmatpush1.bf16.msra.mxu1 %v1276_v53  ;;  %v95_v52 = vld [vmem:[#allocation2 + $0x138] sm:$0xff] }
  0x51   :  { %530 = vmatprep.subr.bf16.mxu0 %v1291_v54  ;;  %571 = vmatprep.subr.bf16.mxu1 %v1293_v55  ;;  %v103_v53 = vld [vmem:[#allocation2 + $0x178] sm:$0xff]  ;;  %v1282_v54 = vcombine.low %v78_v41, %v86_v42  ;;  %v1284_v55 = vcombine.low %v79_v44, %v87_v45 }
  0x52   :  { %v1301_v57 = vcombine.high %v95_v52, %v103_v53 }
  0x54   :  { %531 = vmatpush1.bf16.msra.mxu0 %v1290_v60  ;;  %572 = vmatpush1.bf16.msra.mxu1 %v1292_v61  ;;  %v111_v60 = vld [vmem:[#allocation2 + $0x1b8] sm:$0xff] }
  0x55   :  { %532 = vmatprep.subr.bf16.mxu0 %v1307_v62  ;;  %573 = vmatprep.subr.bf16.mxu1 %v1309_v63  ;;  %v119_v61 = vld [vmem:[#allocation2 + $0x1f8] sm:$0xff]  ;;  %v1298_v62 = vcombine.low %v94_v50, %v102_v51  ;;  %v1300_v63 = vcombine.low %v95_v52, %v103_v53 }
  0x56   :  { %v1317_v2 = vcombine.high %v111_v60, %v119_v61  ;;  %v1316_v4 = vcombine.low %v111_v60, %v119_v61 }
  0x58   :  { %533 = vmatpush1.bf16.msra.mxu0 %v1306_v5  ;;  %574 = vmatpush1.bf16.msra.mxu1 %v1308_v6 }
  0x59   :  { %608 = vmatprep.subr.bf16.mxu0 %v1263_v7  ;;  %649 = vmatprep.subr.bf16.mxu1 %v1265_v8 }
  0x5b   :  { %1320 = vmatmul.mubr.msk.bf16.vlgmr.msra.gmra.mrb[4].mxu0 %vm440_vm0, %v1493_v43  ;;  %1321 = vmatmul.mubr.msk.bf16.vlgmr.msra.gmra.mrb[4].mxu1 %vm440_vm0, %v1493_v43 }
  0x5c   :  { %609 = vmatpush1.bf16.msra.mxu0 %v1262_v13  ;;  %650 = vmatpush1.bf16.msra.mxu1 %v1264_v14 }
  0x5d   :  { %610 = vmatprep.subr.bf16.mxu0 %v1279_v15  ;;  %651 = vmatprep.subr.bf16.mxu1 %v1281_v16 }
  0x5e   :  { %640 = vmatprep.mubr.bf16.mxu0 %v1418_v0  ;;  %681 = vmatprep.mubr.bf16.mxu1 %v1418_v0 }
  0x60   :  { %611 = vmatpush1.bf16.msra.mxu0 %v1278_v21  ;;  %652 = vmatpush1.bf16.msra.mxu1 %v1280_v22 }
  0x61   :  { %612 = vmatprep.subr.bf16.mxu0 %v1295_v23  ;;  %653 = vmatprep.subr.bf16.mxu1 %v1297_v24 }
  0x64   :  { %613 = vmatpush1.bf16.msra.mxu0 %v1294_v29  ;;  %654 = vmatpush1.bf16.msra.mxu1 %v1296_v30 }
  0x65   :  { %614 = vmatprep.subr.bf16.mxu0 %v1311_v31  ;;  %655 = vmatprep.subr.bf16.mxu1 %v1313_v32 }
  0x68   :  { %615 = vmatpush1.bf16.msra.mxu0 %v1310_v37  ;;  %656 = vmatpush1.bf16.msra.mxu1 %v1312_v38 }
  0x69   :  { %690 = vmatprep.subr.bf16.mxu0 %v1267_v39  ;;  %731 = vmatprep.subr.bf16.mxu1 %v1269_v40 }
  0x6b   :  { %1322 = vmatmul.mubr.msk.bf16.vlgmr.msra.gmra.mrb[8].mxu0 %vm440_vm0, %v1493_v43  ;;  %1323 = vmatmul.mubr.msk.bf16.vlgmr.msra.gmra.mrb[8].mxu1 %vm440_vm0, %v1493_v43 }
  0x6c   :  { %691 = vmatpush1.bf16.msra.mxu0 %v1266_v46  ;;  %732 = vmatpush1.bf16.msra.mxu1 %v1268_v47 }
  0x6d   :  { %692 = vmatprep.subr.bf16.mxu0 %v1283_v48  ;;  %733 = vmatprep.subr.bf16.mxu1 %v1285_v49 }
  0x6e   :  { %722 = vmatprep.mubr.bf16.mxu0 %v1418_v0  ;;  %763 = vmatprep.mubr.bf16.mxu1 %v1418_v0 }
  0x70   :  { %693 = vmatpush1.bf16.msra.mxu0 %v1282_v54  ;;  %734 = vmatpush1.bf16.msra.mxu1 %v1284_v55 }
  0x71   :  { %694 = vmatprep.subr.bf16.mxu0 %v1299_v56  ;;  %735 = vmatprep.subr.bf16.mxu1 %v1301_v57 }
  0x74   :  { %695 = vmatpush1.bf16.msra.mxu0 %v1298_v62  ;;  %736 = vmatpush1.bf16.msra.mxu1 %v1300_v63 }
  0x75   :  { %696 = vmatprep.subr.bf16.mxu0 %v1315_v1  ;;  %737 = vmatprep.subr.bf16.mxu1 %v1317_v2 }
  0x78   :  { %697 = vmatpush1.bf16.msra.mxu0 %v1314_v3  ;;  %738 = vmatpush1.bf16.msra.mxu1 %v1316_v4 }
  0x7b   :  { %1324 = vmatmul.mubr.msk.bf16.vlgmr.msra.gmra.mrb[12].mxu0 %vm440_vm0, %v1493_v43  ;;  %1325 = vmatmul.mubr.msk.bf16.vlgmr.msra.gmra.mrb[12].mxu1 %vm440_vm0, %v1493_v43 }
 0x11e   :  { %v1517_v0 = vpop.f32.mrb[0].mxu0  ;;  %v1523_v7 = vpop.f32.mrb[0].mxu1 }
 0x11f   :  { %v773_v5 = vsel %vm772_vm1, %v1517_v0, 0.0  ;;  %v885_v6 = vmul.f32 %v1517_v0, %v1517_v0  ;;  %v1525_v8 = vpop.f32.mrb[1].mxu0  ;;  %v787_v10 = vsel %vm772_vm1, %v1523_v7, 0.0  ;;  %v887_v43 = vmul.f32 %v1523_v7, %v1523_v7  ;;  %v1533_v12 = vpop.f32.mrb[1].mxu1 }
 0x120   :  { %v774_v9 = vrot.slane %v773_v5, 4  ;;  %v780_v11 = vsel %vm772_vm1, %v1525_v8, 0.0  ;;  %v482_v13 = vpop.f32.mrb[2].mxu0  ;;  %v788_v15 = vrot.slane %v787_v10, 4  ;;  %v886_v17 = vmul.f32 %v1525_v8, %v1525_v8  ;;  %v523_v19 = vpop.f32.mrb[2].mxu1 }
 0x121   :  { %v901_v14 = vsel %vm772_vm1, %v885_v6, 0.0  ;;  %v781_v16 = vrot.slane %v780_v11, 4  ;;  %v483_v18 = vpop.f32.mrb[3].mxu0  ;;  %v915_v22 = vsel %vm772_vm1, %v887_v43, 0.0  ;;  %v794_v23 = vsel %vm772_vm1, %v1533_v12, 0.0  ;;  %v524_v24 = vpop.f32.mrb[3].mxu1 }
 0x122   :  { %v775_v20 = vadd.f32 %v774_v9, %v773_v5  ;;  %v902_v21 = vrot.slane %v901_v14, 4  ;;  %v789_v25 = vadd.f32 %v788_v15, %v787_v10  ;;  %v916_v26 = vrot.slane %v915_v22, 4 }
 0x123   :  { %v782_v27 = vadd.f32 %v781_v16, %v780_v11  ;;  %v908_v28 = vsel %vm772_vm1, %v886_v17, 0.0  ;;  %v795_v32 = vrot.slane %v794_v23, 4  ;;  %v888_v36 = vmul.f32 %v1533_v12, %v1533_v12 }
 0x124   :  { %v776_v29 = vrot.slane %v775_v20, 2  ;;  %v903_v30 = vadd.f32 %v902_v21, %v901_v14  ;;  %v909_v31 = vrot.slane %v908_v28, 4  ;;  %v790_v33 = vrot.slane %v789_v25, 2 }
 0x125   :  { %v917_v34 = vadd.f32 %v916_v26, %v915_v22  ;;  %v783_v35 = vrot.slane %v782_v27, 2  ;;  %v796_v40 = vadd.f32 %v795_v32, %v794_v23  ;;  %v922_v45 = vsel %vm772_vm1, %v888_v36, 0.0 }
 0x126   :  { %v777_v37 = vadd.f32 %v776_v29, %v775_v20  ;;  %v904_v38 = vrot.slane %v903_v30, 2  ;;  %v910_v39 = vadd.f32 %v909_v31, %v908_v28  ;;  %v791_v41 = vadd.f32 %v790_v33, %v789_v25 }
 0x127   :  { %v918_v42 = vrot.slane %v917_v34, 2  ;;  %v784_v44 = vadd.f32 %v783_v35, %v782_v27  ;;  %v797_v49 = vrot.slane %v796_v40, 2  ;;  %v923_v53 = vrot.slane %v922_v45, 4 }
 0x128   :  { %v778_v46 = vrot.slane %v777_v37, 1  ;;  %v905_v47 = vadd.f32 %v904_v38, %v903_v30  ;;  %v911_v48 = vrot.slane %v910_v39, 2  ;;  %v792_v50 = vrot.slane %v791_v41, 1 }
 0x129   :  { %v919_v51 = vadd.f32 %v918_v42, %v917_v34  ;;  %v785_v52 = vrot.slane %v784_v44, 1  ;;  %v798_v57 = vadd.f32 %v797_v49, %v796_v40  ;;  %v924_v60 = vadd.f32 %v923_v53, %v922_v45 }
 0x12a   :  { %v779_v54 = vadd.f32 %v778_v46, %v777_v37  ;;  %v906_v55 = vrot.slane %v905_v47, 1  ;;  %v912_v56 = vadd.f32 %v911_v48, %v910_v39  ;;  %v793_v1 = vadd.f32 %v792_v50, %v791_v41 }
 0x12b   :  { %v920_v58 = vrot.slane %v919_v51, 1  ;;  %v786_v59 = vadd.f32 %v785_v52, %v784_v44  ;;  %v799_v63 = vrot.slane %v798_v57, 1  ;;  %v925_v3 = vrot.slane %v924_v60, 2 }
 0x12c   :  { %v907_v61 = vadd.f32 %v906_v55, %v905_v47  ;;  %v913_v62 = vrot.slane %v912_v56, 1 }
 0x12d   :  { %v1014_v2 = vadd.f32 %v786_v59, %v779_v54  ;;  %v921_v4 = vadd.f32 %v920_v58, %v919_v51  ;;  %v800_v6 = vadd.f32 %v799_v63, %v798_v57  ;;  %v926_v10 = vadd.f32 %v925_v3, %v924_v60 }
 0x12e   :  { %v914_v5 = vadd.f32 %v913_v62, %v912_v56  ;;  %v1545_v9 = vpop.f32.mrb[4].mxu0  ;;  %v1551_v14 = vpop.f32.mrb[4].mxu1 }
 0x12f   :  { %v1015_v43 = vadd.f32 %v1014_v2, %v793_v1  ;;  %v801_v11 = vsel %vm772_vm1, %v1545_v9, 0.0  ;;  %v889_v13 = vmul.f32 %v1545_v9, %v1545_v9  ;;  %v1553_v15 = vpop.f32.mrb[5].mxu0  ;;  %v815_v18 = vsel %vm772_vm1, %v1551_v14, 0.0  ;;  %v1559_v20 = vpop.f32.mrb[5].mxu1 }
 0x130   :  { %v1030_v16 = vadd.f32 %v914_v5, %v907_v61  ;;  %v802_v17 = vrot.slane %v801_v11, 4  ;;  %v891_v19 = vmul.f32 %v1551_v14, %v1551_v14  ;;  %v564_v21 = vpop.f32.mrb[6].mxu0  ;;  %v927_v22 = vrot.slane %v926_v10, 1  ;;  %v605_v27 = vpop.f32.mrb[6].mxu1 }
 0x131   :  { %v1016_v23 = vadd.f32 %v1015_v43, %v800_v6  ;;  %v929_v24 = vsel %vm772_vm1, %v889_v13, 0.0  ;;  %v816_v25 = vrot.slane %v815_v18, 4  ;;  %v565_v26 = vpop.f32.mrb[7].mxu0  ;;  %v606_v32 = vpop.f32.mrb[7].mxu1  ;;  %v808_v36 = vsel %vm772_vm1, %v1553_v15, 0.0 }
 0x132   :  { %v1031_v28 = vadd.f32 %v1030_v16, %v921_v4  ;;  %v803_v29 = vadd.f32 %v802_v17, %v801_v11  ;;  %v930_v30 = vrot.slane %v929_v24, 4  ;;  %v943_v31 = vsel %vm772_vm1, %v891_v19, 0.0 }
 0x133   :  { %v928_v33 = vadd.f32 %v927_v22, %v926_v10  ;;  %v817_v34 = vadd.f32 %v816_v25, %v815_v18  ;;  %v944_v35 = vrot.slane %v943_v31, 4  ;;  %v809_v39 = vrot.slane %v808_v36, 4 }
 0x134   :  { %v804_v37 = vrot.slane %v803_v29, 2  ;;  %v931_v38 = vadd.f32 %v930_v30, %v929_v24  ;;  %v890_v40 = vmul.f32 %v1553_v15, %v1553_v15  ;;  %v822_v45 = vsel %vm772_vm1, %v1559_v20, 0.0 }
 0x135   :  { %v1032_v41 = vadd.f32 %v1031_v28, %v928_v33  ;;  %v818_v42 = vrot.slane %v817_v34, 2  ;;  %v945_v44 = vadd.f32 %v944_v35, %v943_v31  ;;  %v810_v48 = vadd.f32 %v809_v39, %v808_v36 }
 0x136   :  { %v805_v46 = vadd.f32 %v804_v37, %v803_v29  ;;  %v932_v47 = vrot.slane %v931_v38, 2  ;;  %v936_v49 = vsel %vm772_vm1, %v890_v40, 0.0  ;;  %v823_v53 = vrot.slane %v822_v45, 4 }
 0x137   :  { %v819_v50 = vadd.f32 %v818_v42, %v817_v34  ;;  %v946_v51 = vrot.slane %v945_v44, 2  ;;  %v937_v52 = vrot.slane %v936_v49, 4  ;;  %v811_v56 = vrot.slane %v810_v48, 2 }
 0x138   :  { %v806_v54 = vrot.slane %v805_v46, 1  ;;  %v933_v55 = vadd.f32 %v932_v47, %v931_v38  ;;  %v892_v57 = vmul.f32 %v1559_v20, %v1559_v20  ;;  %v824_v61 = vadd.f32 %v823_v53, %v822_v45 }
 0x139   :  { %v820_v58 = vrot.slane %v819_v50, 1  ;;  %v947_v59 = vadd.f32 %v946_v51, %v945_v44  ;;  %v938_v60 = vadd.f32 %v937_v52, %v936_v49  ;;  %v812_v1 = vadd.f32 %v811_v56, %v810_v48 }
 0x13a   :  { %v807_v62 = vadd.f32 %v806_v54, %v805_v46  ;;  %v934_v63 = vrot.slane %v933_v55, 1  ;;  %v950_v2 = vsel %vm772_vm1, %v892_v57, 0.0  ;;  %v825_v5 = vrot.slane %v824_v61, 2 }
 0x13b   :  { %v948_v3 = vrot.slane %v947_v59, 1  ;;  %v939_v4 = vrot.slane %v938_v60, 2  ;;  %v813_v43 = vrot.slane %v812_v1, 1  ;;  %v951_v11 = vrot.slane %v950_v2, 4 }
 0x13c   :  { %v935_v6 = vadd.f32 %v934_v63, %v933_v55  ;;  %v1017_v10 = vadd.f32 %v1016_v23, %v807_v62  ;;  %v821_v13 = vadd.f32 %v820_v58, %v819_v50  ;;  %v826_v17 = vadd.f32 %v825_v5, %v824_v61 }
 0x13d   :  { %v940_v16 = vadd.f32 %v939_v4, %v938_v60  ;;  %v949_v19 = vadd.f32 %v948_v3, %v947_v59  ;;  %v814_v21 = vadd.f32 %v813_v43, %v812_v1  ;;  %v952_v22 = vadd.f32 %v951_v11, %v950_v2 }
 0x13e   :  { %v1033_v18 = vadd.f32 %v1032_v41, %v935_v6  ;;  %v1573_v24 = vpop.f32.mrb[8].mxu0  ;;  %v827_v26 = vrot.slane %v826_v17, 1  ;;  %v1579_v23 = vpop.f32.mrb[8].mxu1 }
 0x13f   :  { %v941_v25 = vrot.slane %v940_v16, 1  ;;  %v829_v27 = vsel %vm772_vm1, %v1573_v24, 0.0  ;;  %v893_v28 = vmul.f32 %v1573_v24, %v1573_v24  ;;  %v1581_v29 = vpop.f32.mrb[9].mxu0  ;;  %v1018_v30 = vadd.f32 %v1017_v10, %v814_v21  ;;  %v1585_v34 = vpop.f32.mrb[9].mxu1 }
 0x140   :  { %v953_v31 = vrot.slane %v952_v22, 2  ;;  %v830_v32 = vrot.slane %v829_v27, 4  ;;  %v843_v33 = vsel %vm772_vm1, %v1579_v23, 0.0  ;;  %v646_v35 = vpop.f32.mrb[10].mxu0  ;;  %v828_v37 = vadd.f32 %v827_v26, %v826_v17  ;;  %v687_v41 = vpop.f32.mrb[10].mxu1 }
 0x141   :  { %v942_v36 = vadd.f32 %v941_v25, %v940_v16  ;;  %v957_v38 = vsel %vm772_vm1, %v893_v28, 0.0  ;;  %v844_v39 = vrot.slane %v843_v33, 4  ;;  %v647_v40 = vpop.f32.mrb[11].mxu0  ;;  %v1019_v44 = vadd.f32 %v1018_v30, %v821_v13  ;;  %v688_v47 = vpop.f32.mrb[11].mxu1 }
 0x142   :  { %v954_v42 = vadd.f32 %v953_v31, %v952_v22  ;;  %v831_v45 = vadd.f32 %v830_v32, %v829_v27  ;;  %v958_v46 = vrot.slane %v957_v38, 4  ;;  %v895_v50 = vmul.f32 %v1579_v23, %v1579_v23 }
 0x143   :  { %v1034_v48 = vadd.f32 %v1033_v18, %v942_v36  ;;  %v845_v49 = vadd.f32 %v844_v39, %v843_v33  ;;  %v836_v51 = vsel %vm772_vm1, %v1581_v29, 0.0  ;;  %v1020_v53 = vadd.f32 %v1019_v44, %v828_v37 }
 0x144   :  { %v955_v52 = vrot.slane %v954_v42, 1  ;;  %v832_v54 = vrot.slane %v831_v45, 2  ;;  %v959_v55 = vadd.f32 %v958_v46, %v957_v38  ;;  %v971_v58 = vsel %vm772_vm1, %v895_v50, 0.0 }
 0x145   :  { %v1035_v56 = vadd.f32 %v1034_v48, %v949_v19  ;;  %v846_v57 = vrot.slane %v845_v49, 2  ;;  %v837_v59 = vrot.slane %v836_v51, 4  ;;  %v972_v63 = vrot.slane %v971_v58, 4 }
 0x146   :  { %v956_v60 = vadd.f32 %v955_v52, %v954_v42  ;;  %v833_v61 = vadd.f32 %v832_v54, %v831_v45  ;;  %v960_v62 = vrot.slane %v959_v55, 2  ;;  %v894_v3 = vmul.f32 %v1581_v29, %v1581_v29 }
 0x147   :  { %v847_v1 = vadd.f32 %v846_v57, %v845_v49  ;;  %v838_v2 = vadd.f32 %v837_v59, %v836_v51  ;;  %v850_v4 = vsel %vm772_vm1, %v1585_v34, 0.0  ;;  %v973_v43 = vadd.f32 %v972_v63, %v971_v58 }
 0x148   :  { %v1036_v5 = vadd.f32 %v1035_v56, %v956_v60  ;;  %v834_v6 = vrot.slane %v833_v61, 1  ;;  %v961_v10 = vadd.f32 %v960_v62, %v959_v55  ;;  %v964_v16 = vsel %vm772_vm1, %v894_v3, 0.0 }
 0x149   :  { %v848_v11 = vrot.slane %v847_v1, 1  ;;  %v839_v13 = vrot.slane %v838_v2, 2  ;;  %v851_v17 = vrot.slane %v850_v4, 4  ;;  %v974_v21 = vrot.slane %v973_v43, 2 }
 0x14a   :  { %v835_v18 = vadd.f32 %v834_v6, %v833_v61  ;;  %v962_v19 = vrot.slane %v961_v10, 1  ;;  %v965_v22 = vrot.slane %v964_v16, 4  ;;  %v896_v27 = vmul.f32 %v1585_v34, %v1585_v34 }
 0x14b   :  { %v840_v25 = vadd.f32 %v839_v13, %v838_v2  ;;  %v852_v26 = vadd.f32 %v851_v17, %v850_v4  ;;  %v975_v31 = vadd.f32 %v974_v21, %v973_v43  ;;  %v849_v33 = vadd.f32 %v848_v11, %v847_v1 }
 0x14c   :  { %v963_v28 = vadd.f32 %v962_v19, %v961_v10  ;;  %v1021_v30 = vadd.f32 %v1020_v53, %v835_v18  ;;  %v966_v32 = vadd.f32 %v965_v22, %v964_v16  ;;  %v978_v37 = vsel %vm772_vm1, %v896_v27, 0.0 }
 0x14d   :  { %v841_v35 = vrot.slane %v840_v25, 1  ;;  %v853_v36 = vrot.slane %v852_v26, 2  ;;  %v976_v39 = vrot.slane %v975_v31, 1  ;;  %v979_v41 = vrot.slane %v978_v37, 4 }
 0x14e   :  { %v1037_v38 = vadd.f32 %v1036_v5, %v963_v28  ;;  %v967_v40 = vrot.slane %v966_v32, 2  ;;  %v1601_v42 = vpop.f32.mrb[12].mxu0  ;;  %v1607_v48 = vpop.f32.mrb[12].mxu1 }
 0x14f   :  { %v842_v44 = vadd.f32 %v841_v35, %v840_v25  ;;  %v854_v45 = vadd.f32 %v853_v36, %v852_v26  ;;  %v857_v46 = vsel %vm772_vm1, %v1601_v42, 0.0  ;;  %v897_v47 = vmul.f32 %v1601_v42, %v1601_v42  ;;  %v1609_v49 = vpop.f32.mrb[13].mxu0  ;;  %v1611_v54 = vpop.f32.mrb[13].mxu1 }
 0x150   :  { %v977_v50 = vadd.f32 %v976_v39, %v975_v31  ;;  %v968_v51 = vadd.f32 %v967_v40, %v966_v32  ;;  %v980_v52 = vadd.f32 %v979_v41, %v978_v37  ;;  %v858_v53 = vrot.slane %v857_v46, 4  ;;  %v728_v55 = vpop.f32.mrb[14].mxu0  ;;  %v769_v61 = vpop.f32.mrb[14].mxu1 }
 0x151   :  { %v1022_v56 = vadd.f32 %v1021_v30, %v842_v44  ;;  %v855_v57 = vrot.slane %v854_v45, 1  ;;  %v985_v58 = vsel %vm772_vm1, %v897_v47, 0.0  ;;  %v871_v59 = vsel %vm772_vm1, %v1607_v48, 0.0  ;;  %v729_v60 = vpop.f32.mrb[15].mxu0  ;;  %v770_v3 = vpop.f32.mrb[15].mxu1 }
 0x152   :  { %v969_v62 = vrot.slane %v968_v51, 1  ;;  %v981_v63 = vrot.slane %v980_v52, 2  ;;  %v859_v1 = vadd.f32 %v858_v53, %v857_v46  ;;  %v986_v2 = vrot.slane %v985_v58, 4 }
 0x153   :  { %v856_v4 = vadd.f32 %v855_v57, %v854_v45  ;;  %v1023_v5 = vadd.f32 %v1022_v56, %v849_v33  ;;  %v872_v6 = vrot.slane %v871_v59, 4  ;;  %v899_v10 = vmul.f32 %v1607_v48, %v1607_v48 }
 0x154   :  { %v970_v43 = vadd.f32 %v969_v62, %v968_v51  ;;  %v982_v11 = vadd.f32 %v981_v63, %v980_v52  ;;  %v860_v13 = vrot.slane %v859_v1, 2  ;;  %v987_v16 = vadd.f32 %v986_v2, %v985_v58 }
 0x155   :  { %v1024_v17 = vadd.f32 %v1023_v5, %v856_v4  ;;  %v873_v18 = vadd.f32 %v872_v6, %v871_v59  ;;  %v999_v19 = vsel %vm772_vm1, %v899_v10, 0.0  ;;  %v864_v21 = vsel %vm772_vm1, %v1609_v49, 0.0 }
 0x156   :  { %v1038_v22 = vadd.f32 %v1037_v38, %v970_v43  ;;  %v983_v25 = vrot.slane %v982_v11, 1  ;;  %v861_v26 = vadd.f32 %v860_v13, %v859_v1  ;;  %v988_v27 = vrot.slane %v987_v16, 2 }
 0x157   :  { %v874_v28 = vrot.slane %v873_v18, 2  ;;  %v1000_v30 = vrot.slane %v999_v19, 4  ;;  %v865_v31 = vrot.slane %v864_v21, 4  ;;  %v898_v32 = vmul.f32 %v1609_v49, %v1609_v49 }
 0x158   :  { %v984_v33 = vadd.f32 %v983_v25, %v982_v11  ;;  %v1039_v35 = vadd.f32 %v1038_v22, %v977_v50  ;;  %v862_v36 = vrot.slane %v861_v26, 1  ;;  %v989_v37 = vadd.f32 %v988_v27, %v987_v16 }
 0x159   :  { %v1001_v39 = vadd.f32 %v1000_v30, %v999_v19  ;;  %v866_v40 = vadd.f32 %v865_v31, %v864_v21  ;;  %v992_v41 = vsel %vm772_vm1, %v898_v32, 0.0  ;;  %v875_v47 = vadd.f32 %v874_v28, %v873_v18 }
 0x15a   :  { %v1040_v44 = vadd.f32 %v1039_v35, %v984_v33  ;;  %v863_v45 = vadd.f32 %v862_v36, %v861_v26  ;;  %v990_v38 = vrot.slane %v989_v37, 1  ;;  %v993_v46 = vrot.slane %v992_v41, 4 }
 0x15b   :  { %v1002_v51 = vrot.slane %v1001_v39, 2  ;;  %v867_v52 = vrot.slane %v866_v40, 2  ;;  %v878_v53 = vsel %vm772_vm1, %v1611_v54, 0.0  ;;  %v900_v59 = vmul.f32 %v1611_v54, %v1611_v54 }
 0x15c   :  { %v991_v55 = vadd.f32 %v990_v38, %v989_v37  ;;  %v1025_v56 = vadd.f32 %v1024_v17, %v863_v45  ;;  %v994_v57 = vadd.f32 %v993_v46, %v992_v41  ;;  %v879_v50 = vrot.slane %v878_v53, 4 }
 0x15d   :  { %v868_v58 = vadd.f32 %v867_v52, %v866_v40  ;;  %v1003_v61 = vadd.f32 %v1002_v51, %v1001_v39  ;;  %v876_v1 = vrot.slane %v875_v47, 1  ;;  %v1006_v3 = vsel %vm772_vm1, %v900_v59, 0.0 }
 0x15e   :  { %v1041_v60 = vadd.f32 %v1040_v44, %v991_v55  ;;  %v995_v62 = vrot.slane %v994_v57, 2  ;;  %v880_v63 = vadd.f32 %v879_v50, %v878_v53  ;;  %v1007_v6 = vrot.slane %v1006_v3, 4 }
 0x15f   :  { %v869_v2 = vrot.slane %v868_v58, 1  ;;  %v1004_v43 = vrot.slane %v1003_v61, 1  ;;  %v877_v17 = vadd.f32 %v876_v1, %v875_v47  ;;  %v1058_v38 = vlaneseq  ;;  %v1051_v47 = vld [vmem:[#allocation4] sm:$0x1] }
 0x160   :  { %v996_v4 = vadd.f32 %v995_v62, %v994_v57  ;;  %v881_v5 = vrot.slane %v880_v63, 2  ;;  %v1008_v16 = vadd.f32 %v1007_v6, %v1006_v3  ;;  %v1419_v53 = vmov 1966171168   ;;  %v1055_v57 = vld [vmem:[#allocation6] sm:$0x1] }
 0x161   :  { %v870_v10 = vadd.f32 %v869_v2, %v868_v58  ;;  %v1005_v26 = vadd.f32 %v1004_v43, %v1003_v61  ;;  %v1059_v46 = vshrl.u32 %v1058_v38, 7  ;;  %v1151_v55 = vunpack.c.l.s4 %v1419_v53 }
 0x162   :  { %v997_v11 = vrot.slane %v996_v4, 1  ;;  %v882_v13 = vadd.f32 %v881_v5, %v880_v63  ;;  %v1009_v22 = vrot.slane %v1008_v16, 2 }
 0x163   :  { %v1026_v18 = vadd.f32 %v1025_v56, %v870_v10  ;;  %v1060_v51 = vsub.s32 0, %v1059_v46  ;;  %v1152_v59 = vunpack.c.0.s8 %v1151_v55 }
 0x164   :  { %v998_v19 = vadd.f32 %v997_v11, %v996_v4  ;;  %v883_v21 = vrot.slane %v882_v13, 1  ;;  %v1010_v30 = vadd.f32 %v1009_v22, %v1008_v16 }
 0x165   :  { %v1027_v25 = vadd.f32 %v1026_v18, %v877_v17 }
 0x166   :  { %v1042_v27 = vadd.f32 %v1041_v60, %v998_v19  ;;  %v884_v28 = vadd.f32 %v883_v21, %v882_v13  ;;  %v1011_v31 = vrot.slane %v1010_v30, 1 }
 0x168   :  { %v1028_v32 = vadd.f32 %v1027_v25, %v884_v28  ;;  %v1043_v33 = vadd.f32 %v1042_v27, %v1005_v26  ;;  %v1012_v35 = vadd.f32 %v1011_v31, %v1010_v30 }
 0x16a   :  { %v1046_v36 = vmul.f32 0.03125, %v1028_v32  ;;  %v1044_v37 = vadd.f32 %v1043_v33, %v1012_v35 }
 0x16c   :  { %v1048_v39 = vmul.f32 %v1046_v36, %v1046_v36  ;;  %v1047_v40 = vmul.f32 0.03125, %v1044_v37 }
 0x16e   :  { %v1049_v41 = vsub.f32 %v1047_v40, %v1048_v39 }
 0x170   :  { %v1050_v44 = vmax.f32 %v1049_v41, 0.0 }
 0x172   :  { %v1052_v45 = vadd.f32 1e-05, %v1050_v44 }
 0x174   :  { %1341 = vrsqrt.f32 %v1052_v45 }
 0x17e   :  { %v1342_v52 = vpop.eup %1341 }
 0x17f   :  { %v1054_v56 = vmul.f32 %v1342_v52, %v1051_v47 }
 0x181   :  { %v1056_v50 = vmul.f32 %v1054_v56, %v1046_v36  ;;  %v1061_v58 = vrot.slane %v1054_v56, %v1060_v51 }
 0x183   :  { %v1057_v60 = vsub.f32 %v1055_v57, %v1056_v50  ;;  %v1062_v61 = vmul.f32 %v1061_v58, %v1517_v0  ;;  %v1063_v62 = vmul.f32 %v1061_v58, %v1525_v8  ;;  %v1064_v63 = vmul.f32 %v1061_v58, %v1523_v7 }
 0x184   :  { %v1065_v1 = vmul.f32 %v1061_v58, %v1533_v12  ;;  %v1066_v2 = vmul.f32 %v1061_v58, %v1545_v9  ;;  %v1067_v3 = vmul.f32 %v1061_v58, %v1553_v15  ;;  %v1068_v4 = vmul.f32 %v1061_v58, %v1551_v14 }
 0x185   :  { %v1069_v5 = vmul.f32 %v1061_v58, %v1559_v20  ;;  %v1070_v6 = vmul.f32 %v1061_v58, %v1573_v24  ;;  %v1071_v10 = vmul.f32 %v1061_v58, %v1581_v29  ;;  %v1072_v0 = vmul.f32 %v1061_v58, %v1579_v23 }
 0x186   :  { %v1073_v8 = vmul.f32 %v1061_v58, %v1585_v34  ;;  %v1074_v7 = vmul.f32 %v1061_v58, %v1601_v42  ;;  %v1075_v12 = vmul.f32 %v1061_v58, %v1609_v49  ;;  %v1076_v9 = vmul.f32 %v1061_v58, %v1607_v48 }
 0x187   :  { %v1077_v15 = vmul.f32 %v1061_v58, %v1611_v54  ;;  %v1081_v43 = vrot.slane %v1057_v60, %v1060_v51  ;;  %v1155_v14 = vsub.s32 %v1152_v59, %v1059_v46 }
 0x189   :  { %v1082_v11 = vadd.f32 %v1081_v43, %v1062_v61  ;;  %v1083_v20 = vadd.f32 %v1081_v43, %v1063_v62  ;;  %v1084_v13 = vadd.f32 %v1081_v43, %v1064_v63  ;;  %v1085_v24 = vadd.f32 %v1081_v43, %v1065_v1 }
 0x18a   :  { %v1086_v16 = vadd.f32 %v1081_v43, %v1066_v2  ;;  %v1087_v29 = vadd.f32 %v1081_v43, %v1067_v3  ;;  %v1088_v17 = vadd.f32 %v1081_v43, %v1068_v4  ;;  %v1089_v23 = vadd.f32 %v1081_v43, %v1069_v5 }
 0x18b   :  { %v1090_v18 = vadd.f32 %v1081_v43, %v1070_v6  ;;  %v1091_v34 = vadd.f32 %v1081_v43, %v1071_v10  ;;  %v1092_v19 = vadd.f32 %v1081_v43, %v1072_v0  ;;  %v1093_v42 = vadd.f32 %v1081_v43, %v1073_v8 }
 0x18c   :  { %v1094_v21 = vadd.f32 %v1081_v43, %v1074_v7  ;;  %v1095_v49 = vadd.f32 %v1081_v43, %v1075_v12  ;;  %v1096_v22 = vadd.f32 %v1081_v43, %v1076_v9  ;;  %v1097_v48 = vadd.f32 %v1081_v43, %v1077_v15 }
 0x18d   :  { %v1098_v25 = vmax.f32 %v1082_v11, 0.0  ;;  %v1099_v54 = vmax.f32 %v1083_v20, 0.0  ;;  %v1100_v26 = vmax.f32 %v1084_v13, 0.0  ;;  %v1101_v27 = vmax.f32 %v1085_v24, 0.0 }
 0x18e   :  { %v1102_v28 = vmax.f32 %v1086_v16, 0.0  ;;  %v1103_v30 = vmax.f32 %v1087_v29, 0.0  ;;  %v1104_v31 = vmax.f32 %v1088_v17, 0.0  ;;  %v1105_v32 = vmax.f32 %v1089_v23, 0.0 }
 0x18f   :  { %v1106_v33 = vmax.f32 %v1090_v18, 0.0  ;;  %v1107_v35 = vmax.f32 %v1091_v34, 0.0  ;;  %v1108_v36 = vmax.f32 %v1092_v19, 0.0  ;;  %v1109_v37 = vmax.f32 %v1093_v42, 0.0 }
 0x190   :  { %v1110_v39 = vmax.f32 %v1094_v21, 0.0  ;;  %v1111_v40 = vmax.f32 %v1095_v49, 0.0  ;;  %v1112_v41 = vmax.f32 %v1096_v22, 0.0  ;;  %v1113_v44 = vmax.f32 %v1097_v48, 0.0 }
 0x191   :  { %v1326_v45 = vpack.c.bf16 %v1099_v54, %v1098_v25  ;;  %v1327_v38 = vpack.c.bf16 %v1101_v27, %v1100_v26  ;;  %v1328_v46 = vpack.c.bf16 %v1103_v30, %v1102_v28  ;;  %v1329_v47 = vpack.c.bf16 %v1105_v32, %v1104_v31 }
 0x192   :  { %v1330_v51 = vpack.c.bf16 %v1107_v35, %v1106_v33  ;;  %v1331_v52 = vpack.c.bf16 %v1109_v37, %v1108_v36  ;;  %v1332_v53 = vpack.c.bf16 %v1111_v40, %v1110_v39  ;;  %v1333_v55 = vpack.c.bf16 %v1113_v44, %v1112_v41 }
 0x193   :  { %v1156_v56 = vrot.slane %v1326_v45, %v1155_v14  ;;  %v1163_v57 = vrot.slane %v1327_v38, %v1155_v14  ;;  %v1170_v50 = vrot.slane %v1328_v46, %v1155_v14  ;;  %v1177_v58 = vrot.slane %v1329_v47, %v1155_v14 }
 0x194   :  { %v1205_v59 = vrot.slane %v1330_v51, %v1155_v14  ;;  %v1212_v60 = vrot.slane %v1331_v52, %v1155_v14  ;;  %v1219_v61 = vrot.slane %v1332_v53, %v1155_v14  ;;  %v1226_v62 = vrot.slane %v1333_v55, %v1155_v14 }
 0x195   :  { %v1178_v63 = vcombine.low %v1156_v56, %v1163_v57  ;;  %v1179_v1 = vcombine.low %v1170_v50, %v1177_v58 }
 0x196   :  { %v1227_v2 = vcombine.low %v1205_v59, %v1212_v60  ;;  %v1228_v3 = vcombine.low %v1219_v61, %v1226_v62 }
 0x197   :  { %v1186_v4 = vrot.slane %v1178_v63, %v1155_v14  ;;  %v1193_v5 = vrot.slane %v1179_v1, %v1155_v14 }
 0x198   :  { %v1235_v6 = vrot.slane %v1227_v2, %v1155_v14  ;;  %v1242_v10 = vrot.slane %v1228_v3, %v1155_v14 }
 0x199   :  { %v1194_v0 = vcombine.low %v1186_v4, %v1193_v5 }
 0x19a   :  { %v1243_v8 = vcombine.low %v1235_v6, %v1242_v10 }
 0x19b   :  { %1246 = vst [vmem:[%s1655_s4] sm:$0xff] %v1194_v0 }
 0x19c   :  { %1247 = vst [vmem:[%s1655_s4 + $0x8] sm:$0xff] %v1243_v8 }
 0x19d   :  { %1252 = vsyncpa [#allocation3], 1 }
 0x19e   :  { %1253 = vsyncpa [#allocation5], 1 }

// kernel: generator_forward.6
= control target key start
LH: loop header
LB: loop body
LE: loop exit
PB: predicated region body
PF: predicated region fallthrough
CT: control target
= control target key end

     0   :  { %10 = vsyncpa [#allocation3], 0  ;;  %s2711_s0 = inlined_call_operand.vmem [shape: bf16[32,1152], index: 0, kind: input, shape index: {}]   ;;  %s2712_s1 = inlined_call_operand.hbm [shape: bf16[1152,256], index: 1, kind: input, shape index: {}]   ;;  %s2713_s2 = inlined_call_operand.hbm [shape: f32[256,256], index: 2, kind: input, shape index: {}]   ;;  %s2714_s3 = inlined_call_operand.hbm [shape: f32[1,256], index: 3, kind: input, shape index: {}]   ;;  %s2715_s4 = inlined_call_operand.hbm [shape: f32[1,256], index: 4, kind: input, shape index: {}]   ;;  %s2716_s5 = inlined_call_operand.vmem [shape: bf16[32,256], index: 5, kind: output, shape index: {}]  }
   0x1   :  { %11 = vsyncpa [#allocation5], 0 }
   0x2   :  { %12 = vsyncpa [#allocation8], 0  ;;  %s2381_s18 = smov [#allocation4]   ;;  %s2287_s22 = scalar_lea.hbm %s2713_s2, 8192 }
   0x3   :  { %s32_s19 = sshll.u32 %s2381_s18, 4  ;;  %p2288_p0 = scmp.ne.s32.totalorder %s2713_s2, %s2287_s22  ;;  %s33_s19 = int_to_ptr.vmem [resolvable:$true] %s32_s19 }
   0x4   :  { %p2291_p1 = scmp.lt.u32.totalorder %s2287_s22, %s2713_s2 }
   0x6   :  { %p2293_p2 = pnand %p2291_p1, %p2288_p0 }
   0x8   :  { %2296 = shalt.err (!%p2293_p2)
}
   0x9   :  { %s2297_s27 = scalar_lea.vmem %s33_s19, 8192  ;;  %p2302_p4 = scmp.lt.s32.totalorder %s33_s19, %s33_s19 }
   0xa   :  { %p2298_p3 = scmp.ne.s32.totalorder %s33_s19, %s2297_s27  ;;  %p2303_p5 = scmp.lt.s32.totalorder %s2297_s27, %s2297_s27 }
   0xc   :  { %p2304_p6 = por %p2303_p5, %p2302_p4 }
   0xe   :  { %p2305_p7 = pnand %p2304_p6, %p2298_p3 }
  0x10   :  { %2308 = shalt.err (!%p2305_p7)
}
  0x11   :  { %s2382_s28 = smov 256   ;;  %s2383_s29 = smov 16  }
  0x12   :  { %38 = dma.hbm_to_vmem [thread:$0]  %s2713_s2, 8192, %s33_s19, [#allocation5], %s2382_s28, %s2382_s28, %s2383_s29  }
  0x13   :  { %s2384_s7 = smov [#allocation2]   ;;  %s2309_s11 = scalar_lea.hbm %s2712_s1, 18432 }
  0x14   :  { %s20_s8 = sshll.u32 %s2384_s7, 4  ;;  %p2310_p8 = scmp.ne.s32.totalorder %s2712_s1, %s2309_s11  ;;  %s21_s8 = int_to_ptr.vmem [resolvable:$true] %s20_s8 }
  0x15   :  { %p2313_p9 = scmp.lt.u32.totalorder %s2309_s11, %s2712_s1 }
  0x17   :  { %p2315_p10 = pnand %p2313_p9, %p2310_p8 }
  0x19   :  { %2318 = shalt.err (!%p2315_p10)
}
  0x1a   :  { %s2319_s16 = scalar_lea.vmem %s21_s8, 18432  ;;  %p2324_p12 = scmp.lt.s32.totalorder %s21_s8, %s21_s8 }
  0x1b   :  { %p2320_p11 = scmp.ne.s32.totalorder %s21_s8, %s2319_s16  ;;  %p2325_p13 = scmp.lt.s32.totalorder %s2319_s16, %s2319_s16 }
  0x1d   :  { %p2326_p0 = por %p2325_p13, %p2324_p12 }
  0x1f   :  { %p2327_p1 = pnand %p2326_p0, %p2320_p11 }
  0x21   :  { %2330 = shalt.err (!%p2327_p1)
}
  0x22   :  { %s2385_s2 = smov 128   ;;  %s2386_s17 = smov 8  }
  0x23   :  { %26 = dma.hbm_to_vmem [thread:$0]  %s2712_s1, 18432, %s21_s8, [#allocation3], %s2385_s2, %s2385_s2, %s2386_s17  }
  0x24   :  { %s2387_s20 = smov [#allocation6]   ;;  %s2388_s22 = smov [#allocation7]  }
  0x25   :  { %s45_s21 = sshll.u32 %s2387_s20, 4  ;;  %s55_s23 = sshll.u32 %s2388_s22, 4  ;;  %s46_s21 = int_to_ptr.vmem [resolvable:$true] %s45_s21  ;;  %s56_s23 = int_to_ptr.vmem [resolvable:$true] %s55_s23 }
  0x26   :  { %s2331_s26 = scalar_lea.hbm %s2714_s3, 32 }
  0x27   :  { %p2332_p2 = scmp.ne.s32.totalorder %s2714_s3, %s2331_s26  ;;  %p2335_p3 = scmp.lt.u32.totalorder %s2331_s26, %s2714_s3 }
  0x29   :  { %p2337_p4 = pnand %p2335_p3, %p2332_p2 }
  0x2b   :  { %2340 = shalt.err (!%p2337_p4)
}
  0x2c   :  { %s2341_s1 = scalar_lea.vmem %s46_s21, 32  ;;  %p2346_p6 = scmp.lt.s32.totalorder %s46_s21, %s46_s21 }
  0x2d   :  { %p2342_p5 = scmp.ne.s32.totalorder %s46_s21, %s2341_s1  ;;  %p2347_p7 = scmp.lt.s32.totalorder %s2341_s1, %s2341_s1 }
  0x2f   :  { %p2348_p8 = por %p2347_p7, %p2346_p6 }
  0x31   :  { %p2349_p9 = pnand %p2348_p8, %p2342_p5 }
  0x33   :  { %2352 = shalt.err (!%p2349_p9)
}
  0x34   :  { %48 = dma.hbm_to_vmem [thread:$0]  %s2714_s3, 32, %s46_s21, [#allocation5]  }
  0x35   :  { %s2353_s10 = scalar_lea.hbm %s2715_s4, 32 }
  0x36   :  { %p2354_p10 = scmp.ne.s32.totalorder %s2715_s4, %s2353_s10  ;;  %p2357_p11 = scmp.lt.u32.totalorder %s2353_s10, %s2715_s4 }
  0x38   :  { %p2359_p12 = pnand %p2357_p11, %p2354_p10 }
  0x3a   :  { %2362 = shalt.err (!%p2359_p12)
}
  0x3b   :  { %s2363_s15 = scalar_lea.vmem %s56_s23, 32  ;;  %p2368_p0 = scmp.lt.s32.totalorder %s56_s23, %s56_s23 }
  0x3c   :  { %p2364_p13 = scmp.ne.s32.totalorder %s56_s23, %s2363_s15  ;;  %p2369_p1 = scmp.lt.s32.totalorder %s2363_s15, %s2363_s15 }
  0x3e   :  { %p2370_p2 = por %p2369_p1, %p2368_p0 }
  0x40   :  { %p2371_p3 = pnand %p2370_p2, %p2364_p13 }
  0x42   :  { %2374 = shalt.err (!%p2371_p3)
}
  0x43   :  { %58 = dma.hbm_to_vmem [thread:$0]  %s2715_s4, 32, %s56_s23, [#allocation8]  }
  0x44   :  { %2375 = dma.done.wait [#allocation3], 18432  }
  0x45   :  { %2376 = vsyncadd [#allocation3], 4294948864 }
  0x46   :  { %2377 = dma.done.wait [#allocation5], 8224  }
  0x47   :  { %2378 = vsyncadd [#allocation5], 4294959072 }
  0x48   :  { %2379 = dma.done.wait [#allocation8], 32  }
  0x49   :  { %2380 = vsyncadd [#allocation8], 4294967264  ;;  %v2041_v0 = vld [vmem:[#allocation2 + $0x104] ss:$8 sps:$4 sm:$0xff]   ;;  %v2043_v1 = vld [vmem:[#allocation2 + $0x100] ss:$8 sps:$4 sm:$0xff]  }
  0x4a   :  { %1101 = vmatprep.subr.bf16.mxu0 %v2041_v0  ;;  %v2044_v2 = vld [vmem:[#allocation2 + $0x114] ss:$8 sps:$4 sm:$0xff]   ;;  %v2046_v3 = vld [vmem:[#allocation2 + $0x110] ss:$8 sps:$4 sm:$0xff]   ;;  %v2047_v4 = vld [vmem:[#allocation2 + $0x124] ss:$8 sps:$4 sm:$0xff]  }
  0x4b   :  { %1102 = vmatpush1.bf16.msra.mxu0 %v2043_v1  ;;  %v2049_v5 = vld [vmem:[#allocation2 + $0x120] ss:$8 sps:$4 sm:$0xff]   ;;  %v2050_v6 = vld [vmem:[#allocation2 + $0x134] ss:$8 sps:$4 sm:$0xff]   ;;  %v2052_v7 = vld [vmem:[#allocation2 + $0x130] ss:$8 sps:$4 sm:$0xff]  }
  0x4c   :  { %1103 = vmatprep.subr.bf16.mxu0 %v2044_v2  ;;  %v2053_v8 = vld [vmem:[#allocation2 + $0x144] ss:$8 sps:$4 sm:$0xff]   ;;  %v2055_v9 = vld [vmem:[#allocation2 + $0x140] ss:$8 sps:$4 sm:$0xff]   ;;  %v2056_v10 = vld [vmem:[#allocation2 + $0x154] ss:$8 sps:$4 sm:$0xff]  }
  0x4d   :  { %v2058_v11 = vld [vmem:[#allocation2 + $0x150] ss:$8 sps:$4 sm:$0xff]   ;;  %v2059_v12 = vld [vmem:[#allocation2 + $0x164] ss:$8 sps:$4 sm:$0xff]   ;;  %v2061_v14 = vld [vmem:[#allocation2 + $0x160] ss:$8 sps:$4 sm:$0xff]  }
  0x4e   :  { %v2091_v13 = vld [vmem:[%s2711_s0 + $0xc] ss:$36 sps:$4 sm:$0xff]   ;;  %v2062_v15 = vld [vmem:[#allocation2 + $0x174] ss:$8 sps:$4 sm:$0xff]   ;;  %v2067_v18 = vld [vmem:[#allocation2 + $0x180] ss:$8 sps:$4 sm:$0xff]  }
  0x4f   :  { %1104 = vmatpush1.bf16.msra.mxu0 %v2046_v3  ;;  %1133 = vmatprep.mubr.bf16.mxu0 %v2091_v13  ;;  %v2064_v16 = vld [vmem:[#allocation2 + $0x170] ss:$8 sps:$4 sm:$0xff]   ;;  %v2065_v17 = vld [vmem:[#allocation2 + $0x184] ss:$8 sps:$4 sm:$0xff]   ;;  %v2068_v19 = vld [vmem:[#allocation2 + $0x194] ss:$8 sps:$4 sm:$0xff]  }
  0x50   :  { %1105 = vmatprep.subr.bf16.mxu0 %v2047_v4  ;;  %v2116_v20 = vld [vmem:[#allocation2 + $0x4] ss:$8 sps:$4 sm:$0xff]   ;;  %v2118_v21 = vld [vmem:[#allocation2] ss:$8 sps:$4 sm:$0xff]   ;;  %v2070_v22 = vld [vmem:[#allocation2 + $0x190] ss:$8 sps:$4 sm:$0xff]  }
  0x51   :  { %v2071_v23 = vld [vmem:[#allocation2 + $0x1a4] ss:$8 sps:$4 sm:$0xff]   ;;  %1048 = vmatprep.subr.bf16.mxu1 %v2116_v20  ;;  %v2122_v24 = vld [vmem:[#allocation2 + $0x14] ss:$8 sps:$4 sm:$0xff]   ;;  %v2124_v25 = vld [vmem:[#allocation2 + $0x10] ss:$8 sps:$4 sm:$0xff]  }
  0x52   :  { %1049 = vmatpush1.bf16.msra.mxu1 %v2118_v21  ;;  %v2073_v26 = vld [vmem:[#allocation2 + $0x1a0] ss:$8 sps:$4 sm:$0xff]   ;;  %v2128_v27 = vld [vmem:[#allocation2 + $0x24] ss:$8 sps:$4 sm:$0xff]   ;;  %v2074_v28 = vld [vmem:[#allocation2 + $0x1b4] ss:$8 sps:$4 sm:$0xff]  }
  0x53   :  { %1106 = vmatpush1.bf16.msra.mxu0 %v2049_v5  ;;  %1050 = vmatprep.subr.bf16.mxu1 %v2122_v24  ;;  %v2130_v29 = vld [vmem:[#allocation2 + $0x20] ss:$8 sps:$4 sm:$0xff]   ;;  %v2134_v30 = vld [vmem:[#allocation2 + $0x34] ss:$8 sps:$4 sm:$0xff]   ;;  %v2076_v31 = vld [vmem:[#allocation2 + $0x1b0] ss:$8 sps:$4 sm:$0xff]  }
  0x54   :  { %1107 = vmatprep.subr.bf16.mxu0 %v2050_v6  ;;  %v2077_v32 = vld [vmem:[#allocation2 + $0x1c4] ss:$8 sps:$4 sm:$0xff]   ;;  %v2136_v33 = vld [vmem:[#allocation2 + $0x30] ss:$8 sps:$4 sm:$0xff]   ;;  %v2079_v35 = vld [vmem:[#allocation2 + $0x1c0] ss:$8 sps:$4 sm:$0xff]  }
  0x55   :  { %v2140_v34 = vld [vmem:[#allocation2 + $0x44] ss:$8 sps:$4 sm:$0xff]   ;;  %v2080_v36 = vld [vmem:[#allocation2 + $0x1d4] ss:$8 sps:$4 sm:$0xff]   ;;  %v2142_v37 = vld [vmem:[#allocation2 + $0x40] ss:$8 sps:$4 sm:$0xff]  }
  0x56   :  { %1051 = vmatpush1.bf16.msra.mxu1 %v2124_v25  ;;  %v2146_v38 = vld [vmem:[#allocation2 + $0x54] ss:$8 sps:$4 sm:$0xff]   ;;  %v2082_v39 = vld [vmem:[#allocation2 + $0x1d0] ss:$8 sps:$4 sm:$0xff]   ;;  %v2083_v40 = vld [vmem:[#allocation2 + $0x1e4] ss:$8 sps:$4 sm:$0xff]  }
  0x57   :  { %1108 = vmatpush1.bf16.msra.mxu0 %v2052_v7  ;;  %1052 = vmatprep.subr.bf16.mxu1 %v2128_v27  ;;  %v2148_v41 = vld [vmem:[#allocation2 + $0x50] ss:$8 sps:$4 sm:$0xff]   ;;  %v2152_v42 = vld [vmem:[#allocation2 + $0x64] ss:$8 sps:$4 sm:$0xff]   ;;  %v2085_v43 = vld [vmem:[#allocation2 + $0x1e0] ss:$8 sps:$4 sm:$0xff]  }
  0x58   :  { %1109 = vmatprep.subr.bf16.mxu0 %v2053_v8  ;;  %v2086_v44 = vld [vmem:[#allocation2 + $0x1f4] ss:$8 sps:$4 sm:$0xff]   ;;  %v2154_v45 = vld [vmem:[#allocation2 + $0x60] ss:$8 sps:$4 sm:$0xff]   ;;  %v2088_v47 = vld [vmem:[#allocation2 + $0x1f0] ss:$8 sps:$4 sm:$0xff]  }
  0x59   :  { %v2161_v46 = vld [vmem:[#allocation2 + $0x74] ss:$8 sps:$4 sm:$0xff]   ;;  %v2094_v48 = vld [vmem:[#allocation2 + $0x204] ss:$8 sps:$4 sm:$0xff]   ;;  %v2163_v49 = vld [vmem:[#allocation2 + $0x70] ss:$8 sps:$4 sm:$0xff]  }
  0x5a   :  { %1053 = vmatpush1.bf16.msra.mxu1 %v2130_v29  ;;  %v2089_v50 = vld [vmem:[%s2711_s0 + $0x8] ss:$36 sps:$4 sm:$0xff]   ;;  %v2155_v53 = vld [vmem:[%s2711_s0 + $0x54] ss:$36 sps:$4 sm:$0xff]  }
  0x5b   :  { %1110 = vmatpush1.bf16.msra.mxu0 %v2055_v9  ;;  %1054 = vmatprep.subr.bf16.mxu1 %v2134_v30  ;;  %v2167_v51 = vld [vmem:[#allocation2 + $0x84] ss:$8 sps:$4 sm:$0xff]   ;;  %v2092_v52 = vld [vmem:[#allocation2 + $0x200] ss:$8 sps:$4 sm:$0xff]   ;;  %v2097_v54 = vld [vmem:[#allocation2 + $0x214] ss:$8 sps:$4 sm:$0xff]  }
  0x5c   :  { %1111 = vmatprep.subr.bf16.mxu0 %v2056_v10  ;;  %v2169_v55 = vld [vmem:[#allocation2 + $0x80] ss:$8 sps:$4 sm:$0xff]   ;;  %v2176_v56 = vld [vmem:[#allocation2 + $0x94] ss:$8 sps:$4 sm:$0xff]   ;;  %v2095_v57 = vld [vmem:[#allocation2 + $0x210] ss:$8 sps:$4 sm:$0xff]  }
  0x5d   :  { %v2100_v58 = vld [vmem:[#allocation2 + $0x224] ss:$8 sps:$4 sm:$0xff]   ;;  %v2178_v59 = vld [vmem:[#allocation2 + $0x90] ss:$8 sps:$4 sm:$0xff]   ;;  %v2098_v62 = vld [vmem:[#allocation2 + $0x220] ss:$8 sps:$4 sm:$0xff]  }
  0x5e   :  { %1055 = vmatpush1.bf16.msra.mxu1 %v2136_v33  ;;  %v2160_v60 = vld [vmem:[%s2711_s0 + $0x50] ss:$36 sps:$4 sm:$0xff]   ;;  %v2182_v61 = vld [vmem:[#allocation2 + $0xa4] ss:$8 sps:$4 sm:$0xff]   ;;  %v2184_v1 = vld [vmem:[#allocation2 + $0xa0] ss:$8 sps:$4 sm:$0xff]  }
  0x5f   :  { %1112 = vmatpush1.bf16.msra.mxu0 %v2058_v11  ;;  %1056 = vmatprep.subr.bf16.mxu1 %v2140_v34  ;;  %v2172_v63 = vld [vmem:[%s2711_s0 + $0x14] ss:$36 sps:$4 sm:$0xff]   ;;  %v2106_v4 = vld [vmem:[#allocation2 + $0x244] ss:$8 sps:$4 sm:$0xff]   ;;  %v2104_v7 = vld [vmem:[#allocation2 + $0x240] ss:$8 sps:$4 sm:$0xff]  }
  0x60   :  { %1113 = vmatprep.subr.bf16.mxu0 %v2059_v12  ;;  %v2103_v0 = vld [vmem:[#allocation2 + $0x234] ss:$8 sps:$4 sm:$0xff]   ;;  %v2101_v3 = vld [vmem:[#allocation2 + $0x230] ss:$8 sps:$4 sm:$0xff]   ;;  %v2194_v6 = vld [vmem:[#allocation2 + $0xc4] ss:$8 sps:$4 sm:$0xff]  }
  0x61   :  { %v2188_v2 = vld [vmem:[#allocation2 + $0xb4] ss:$8 sps:$4 sm:$0xff]   ;;  %v2190_v5 = vld [vmem:[#allocation2 + $0xb0] ss:$8 sps:$4 sm:$0xff]   ;;  %v2220_v8 = vld [vmem:[%s2711_s0 + $0x4] ss:$36 sps:$4 sm:$0xff]  }
  0x62   :  { %1057 = vmatpush1.bf16.msra.mxu1 %v2142_v37  ;;  %v2109_v9 = vld [vmem:[#allocation2 + $0x254] ss:$8 sps:$4 sm:$0xff]   ;;  %v2196_v10 = vld [vmem:[#allocation2 + $0xc0] ss:$8 sps:$4 sm:$0xff]   ;;  %1080 = vmatprep.mubr.bf16.mxu1 %v2220_v8  ;;  %v2107_v12 = vld [vmem:[#allocation2 + $0x250] ss:$8 sps:$4 sm:$0xff]  }
  0x63   :  { %1114 = vmatpush1.bf16.msra.mxu0 %v2061_v14  ;;  %1058 = vmatprep.subr.bf16.mxu1 %v2146_v38  ;;  %v2200_v11 = vld [vmem:[#allocation2 + $0xd4] ss:$8 sps:$4 sm:$0xff]   ;;  %v2112_v13 = vld [vmem:[#allocation2 + $0x264] ss:$8 sps:$4 sm:$0xff]   ;;  %v2202_v14 = vld [vmem:[#allocation2 + $0xd0] ss:$8 sps:$4 sm:$0xff]  }
  0x64   :  { %1115 = vmatprep.subr.bf16.mxu0 %v2062_v15  ;;  %v2206_v15 = vld [vmem:[#allocation2 + $0xe4] ss:$8 sps:$4 sm:$0xff]   ;;  %v2113_v20 = vld [vmem:[#allocation2 + $0x270] ss:$8 sps:$4 sm:$0xff]   ;;  %v2127_v25 = vld [vmem:[#allocation2 + $0x294] ss:$8 sps:$4 sm:$0xff]  }
  0x65   :  { %v2121_v21 = vld [vmem:[#allocation2 + $0x284] ss:$8 sps:$4 sm:$0xff]   ;;  %v2221_v27 = vld [vmem:[#allocation2 + $0x400] ss:$8 sps:$4 sm:$0xff]   ;;  %v2229_v29 = vld [vmem:[#allocation2 + $0x414] ss:$8 sps:$4 sm:$0xff]  }
  0x66   :  { %1059 = vmatpush1.bf16.msra.mxu1 %v2148_v41  ;;  %v2223_v24 = vld [vmem:[#allocation2 + $0x404] ss:$8 sps:$4 sm:$0xff]   ;;  %v2125_v30 = vld [vmem:[#allocation2 + $0x290] ss:$8 sps:$4 sm:$0xff]   ;;  %v2131_v34 = vld [vmem:[#allocation2 + $0x2a0] ss:$8 sps:$4 sm:$0xff]  }
  0x67   :  { %1116 = vmatpush1.bf16.msra.mxu0 %v2064_v16  ;;  %1060 = vmatprep.subr.bf16.mxu1 %v2152_v42  ;;  %v2110_v16 = vld [vmem:[#allocation2 + $0x260] ss:$8 sps:$4 sm:$0xff]   ;;  %v2235_v33 = vld [vmem:[#allocation2 + $0x424] ss:$8 sps:$4 sm:$0xff]   ;;  %v2241_v38 = vld [vmem:[#allocation2 + $0x434] ss:$8 sps:$4 sm:$0xff]  }
  0x68   :  { %1117 = vmatprep.subr.bf16.mxu0 %v2065_v17  ;;  %v2115_v17 = vld [vmem:[#allocation2 + $0x274] ss:$8 sps:$4 sm:$0xff]   ;;  %v2233_v37 = vld [vmem:[#allocation2 + $0x420] ss:$8 sps:$4 sm:$0xff]   ;;  %v2239_v41 = vld [vmem:[#allocation2 + $0x430] ss:$8 sps:$4 sm:$0xff]  }
  0x69   :  { %v2389_v42 = vmov 0   ;;  %v2265_v8 = vld [vmem:[%s2711_s0 + $0x58] ss:$36 sps:$4 sm:$0xff]  }
  0x6a   :  { %1061 = vmatpush1.bf16.msra.mxu1 %v2154_v45  ;;  %v2151_v45 = vld [vmem:[#allocation2 + $0x2d4] ss:$8 sps:$4 sm:$0xff]  }
  0x6b   :  { %1118 = vmatpush1.bf16.msra.mxu0 %v2067_v18  ;;  %1062 = vmatprep.subr.bf16.mxu1 %v2161_v46  ;;  %v2208_v18 = vld [vmem:[#allocation2 + $0xe0] ss:$8 sps:$4 sm:$0xff]  }
  0x6c   :  { %1119 = vmatprep.subr.bf16.mxu0 %v2068_v19  ;;  %v2212_v19 = vld [vmem:[#allocation2 + $0xf4] ss:$8 sps:$4 sm:$0xff]   ;;  %v2245_v46 = vld [vmem:[#allocation2 + $0x440] ss:$8 sps:$4 sm:$0xff]  }
  0x6e   :  { %1063 = vmatpush1.bf16.msra.mxu1 %v2163_v49  ;;  %v2159_v49 = vld [vmem:[#allocation2 + $0x2e4] ss:$8 sps:$4 sm:$0xff]  }
  0x6f   :  { %1120 = vmatpush1.bf16.msra.mxu0 %v2070_v22  ;;  %1064 = vmatprep.subr.bf16.mxu1 %v2167_v51  ;;  %v2214_v22 = vld [vmem:[#allocation2 + $0xf0] ss:$8 sps:$4 sm:$0xff]   ;;  %v2264_v51 = vld [vmem:[#allocation2 + $0x464] ss:$8 sps:$4 sm:$0xff]  }
  0x70   :  { %1121 = vmatprep.subr.bf16.mxu0 %v2071_v23  ;;  %v2119_v23 = vld [vmem:[#allocation2 + $0x280] ss:$8 sps:$4 sm:$0xff]  }
  0x72   :  { %1065 = vmatpush1.bf16.msra.mxu1 %v2169_v55  ;;  %v2271_v55 = vld [vmem:[#allocation2 + $0x474] ss:$8 sps:$4 sm:$0xff]  }
  0x73   :  { %1122 = vmatpush1.bf16.msra.mxu0 %v2073_v26  ;;  %1066 = vmatprep.subr.bf16.mxu1 %v2176_v56  ;;  %v2218_v26 = vld [vmem:[%s2711_s0] ss:$36 sps:$4 sm:$0xff]   ;;  %v2164_v56 = vld [vmem:[#allocation2 + $0x2f0] ss:$8 sps:$4 sm:$0xff]  }
  0x74   :  { %1123 = vmatprep.subr.bf16.mxu0 %v2074_v28  ;;  %v2257_v28 = vld [vmem:[%s2711_s0 + $0x4c] ss:$36 sps:$4 sm:$0xff]  }
  0x76   :  { %1067 = vmatpush1.bf16.msra.mxu1 %v2178_v59  ;;  %v2175_v59 = vld [vmem:[#allocation2 + $0x304] ss:$8 sps:$4 sm:$0xff]  }
  0x77   :  { %1124 = vmatpush1.bf16.msra.mxu0 %v2076_v31  ;;  %1068 = vmatprep.subr.bf16.mxu1 %v2182_v61  ;;  %v2133_v31 = vld [vmem:[#allocation2 + $0x2a4] ss:$8 sps:$4 sm:$0xff]   ;;  %v2170_v61 = vld [vmem:[%s2711_s0 + $0x10] ss:$36 sps:$4 sm:$0xff]  }
  0x78   :  { %1125 = vmatprep.subr.bf16.mxu0 %v2077_v32  ;;  %v2227_v32 = vld [vmem:[#allocation2 + $0x410] ss:$8 sps:$4 sm:$0xff]  }
  0x7a   :  { %1069 = vmatpush1.bf16.msra.mxu1 %v2184_v1  ;;  %v2173_v1 = vld [vmem:[#allocation2 + $0x300] ss:$8 sps:$4 sm:$0xff]  }
  0x7b   :  { %1126 = vmatpush1.bf16.msra.mxu0 %v2079_v35  ;;  %1070 = vmatprep.subr.bf16.mxu1 %v2188_v2  ;;  %v2139_v35 = vld [vmem:[#allocation2 + $0x2b4] ss:$8 sps:$4 sm:$0xff]  }
  0x7c   :  { %1127 = vmatprep.subr.bf16.mxu0 %v2080_v36  ;;  %v2259_v36 = vld [vmem:[%s2711_s0 + $0x48] ss:$36 sps:$4 sm:$0xff]   ;;  %v2260_v2 = vld [vmem:[%s2711_s0 + $0x5c] ss:$36 sps:$4 sm:$0xff]  }
  0x7e   :  { %1071 = vmatpush1.bf16.msra.mxu1 %v2190_v5 }
  0x7f   :  { %1128 = vmatpush1.bf16.msra.mxu0 %v2082_v39  ;;  %1072 = vmatprep.subr.bf16.mxu1 %v2194_v6  ;;  %v2137_v39 = vld [vmem:[#allocation2 + $0x2b0] ss:$8 sps:$4 sm:$0xff]  }
  0x80   :  { %1129 = vmatprep.subr.bf16.mxu0 %v2083_v40  ;;  %v2145_v40 = vld [vmem:[#allocation2 + $0x2c4] ss:$8 sps:$4 sm:$0xff]   ;;  %v2179_v6 = vld [vmem:[#allocation2 + $0x310] ss:$8 sps:$4 sm:$0xff]  }
  0x82   :  { %1073 = vmatpush1.bf16.msra.mxu1 %v2196_v10  ;;  %v2277_v10 = vld [vmem:[%s2711_s0 + $0x1c] ss:$36 sps:$4 sm:$0xff]  }
  0x83   :  { %1130 = vmatpush1.bf16.msra.mxu0 %v2085_v43  ;;  %1074 = vmatprep.subr.bf16.mxu1 %v2200_v11  ;;  %v2247_v43 = vld [vmem:[#allocation2 + $0x444] ss:$8 sps:$4 sm:$0xff]   ;;  %v2193_v11 = vld [vmem:[#allocation2 + $0x334] ss:$8 sps:$4 sm:$0xff]  }
  0x84   :  { %1131 = vmatprep.subr.bf16.mxu0 %v2086_v44  ;;  %v2143_v44 = vld [vmem:[#allocation2 + $0x2c0] ss:$8 sps:$4 sm:$0xff]  }
  0x86   :  { %1075 = vmatpush1.bf16.msra.mxu1 %v2202_v14  ;;  %v2199_v14 = vld [vmem:[#allocation2 + $0x344] ss:$8 sps:$4 sm:$0xff]  }
  0x87   :  { %1132 = vmatpush1.bf16.msra.mxu0 %v2088_v47  ;;  %1076 = vmatprep.subr.bf16.mxu1 %v2206_v15  ;;  %v2253_v47 = vld [vmem:[#allocation2 + $0x454] ss:$8 sps:$4 sm:$0xff]   ;;  %v2197_v15 = vld [vmem:[#allocation2 + $0x340] ss:$8 sps:$4 sm:$0xff]  }
  0x88   :  { %1154 = vmatprep.subr.bf16.mxu0 %v2094_v48  ;;  %v2149_v48 = vld [vmem:[#allocation2 + $0x2d0] ss:$8 sps:$4 sm:$0xff]  }
  0x8a   :  { %1134 = vmatmul.mubr.bf16.vlgmr.msra.gmra.mrb[0].mxu0 %v2089_v50  ;;  %1077 = vmatpush1.bf16.msra.mxu1 %v2208_v18  ;;  %v2251_v50 = vld [vmem:[#allocation2 + $0x450] ss:$8 sps:$4 sm:$0xff]   ;;  %v2211_v18 = vld [vmem:[#allocation2 + $0x364] ss:$8 sps:$4 sm:$0xff]  }
  0x8b   :  { %1155 = vmatpush1.bf16.msra.mxu0 %v2092_v52  ;;  %1143 = vmatprep.mubr.bf16.mxu0 %v2155_v53  ;;  %v2157_v52 = vld [vmem:[#allocation2 + $0x2e0] ss:$8 sps:$4 sm:$0xff]   ;;  %v2166_v53 = vld [vmem:[#allocation2 + $0x2f4] ss:$8 sps:$4 sm:$0xff]  }
  0x8c   :  { %1156 = vmatprep.subr.bf16.mxu0 %v2097_v54  ;;  %1078 = vmatprep.subr.bf16.mxu1 %v2212_v19  ;;  %v2262_v54 = vld [vmem:[#allocation2 + $0x460] ss:$8 sps:$4 sm:$0xff]  }
  0x8d   :  { %v2209_v19 = vld [vmem:[#allocation2 + $0x360] ss:$8 sps:$4 sm:$0xff]  }
  0x8e   :  { %1079 = vmatpush1.bf16.msra.mxu1 %v2214_v22  ;;  %v2226_v22 = vld [vmem:[#allocation2 + $0x384] ss:$8 sps:$4 sm:$0xff]  }
  0x8f   :  { %1157 = vmatpush1.bf16.msra.mxu0 %v2095_v57  ;;  %1260 = vmatprep.subr.bf16.mxu1 %v2223_v24  ;;  %v1358_v57 = vld [vmem:[#allocation4 + $0x8] sm:$0xff]  ;;  %v2232_v24 = vld [vmem:[#allocation2 + $0x394] ss:$8 sps:$4 sm:$0xff]  }
  0x90   :  { %1158 = vmatprep.subr.bf16.mxu0 %v2100_v58  ;;  %v1360_v58 = vld [vmem:[#allocation4 + $0x18] sm:$0xff] }
  0x91   :  { %1081 = vmatmul.mubr.bf16.vlgmr.msra.gmra.mrb[0].mxu1 %v2218_v26  ;;  %v2238_v26 = vld [vmem:[#allocation2 + $0x3a4] ss:$8 sps:$4 sm:$0xff]  }
  0x92   :  { %1144 = vmatmul.mubr.bf16.gmra.mrb[4].mxu0 %v2160_v60  ;;  %1261 = vmatpush1.bf16.msra.mxu1 %v2221_v27  ;;  %v2269_v60 = vld [vmem:[#allocation2 + $0x470] ss:$8 sps:$4 sm:$0xff]   ;;  %v2236_v27 = vld [vmem:[#allocation2 + $0x3a0] ss:$8 sps:$4 sm:$0xff]  }
  0x93   :  { %1159 = vmatpush1.bf16.msra.mxu0 %v2098_v62  ;;  %1186 = vmatprep.mubr.bf16.mxu0 %v2172_v63  ;;  %v2499_v62 = vpack.c.bf16 %v1360_v58, %v1358_v57  ;;  %v1357_v63 = vld [vmem:[#allocation4] sm:$0xff]  ;;  %v1374_v57 = vld [vmem:[#allocation4 + $0x88] sm:$0xff]  ;;  %v1376_v58 = vld [vmem:[#allocation4 + $0x98] sm:$0xff] }
  0x94   :  { %1160 = vmatprep.subr.bf16.mxu0 %v2103_v0  ;;  %1090 = vmatprep.mubr.bf16.mxu1 %v2257_v28  ;;  %v1359_v0 = vld [vmem:[#allocation4 + $0x10] sm:$0xff] }
  0x95   :  { %1262 = vmatprep.subr.bf16.mxu1 %v2229_v29  ;;  %v2507_v5 = vpack.c.bf16 %v1359_v0, %v1357_v63  ;;  %v2244_v28 = vld [vmem:[#allocation2 + $0x3b4] ss:$8 sps:$4 sm:$0xff]   ;;  %v2242_v29 = vld [vmem:[#allocation2 + $0x3b0] ss:$8 sps:$4 sm:$0xff]   ;;  %v1378_v0 = vld [vmem:[#allocation4 + $0xa8] sm:$0xff] }
  0x96   :  { %1263 = vmatpush1.bf16.msra.mxu1 %v2227_v32  ;;  %v2256_v32 = vld [vmem:[#allocation2 + $0x3d4] ss:$8 sps:$4 sm:$0xff]  }
  0x97   :  { %1161 = vmatpush1.bf16.msra.mxu0 %v2101_v3  ;;  %1264 = vmatprep.subr.bf16.mxu1 %v2235_v33  ;;  %v2181_v3 = vld [vmem:[#allocation2 + $0x314] ss:$8 sps:$4 sm:$0xff]   ;;  %v2254_v33 = vld [vmem:[#allocation2 + $0x3d0] ss:$8 sps:$4 sm:$0xff]  }
  0x98   :  { %1162 = vmatprep.subr.bf16.mxu0 %v2106_v4  ;;  %v2278_v4 = vld [vmem:[%s2711_s0 + $0x20] ss:$36 sps:$4 sm:$0xff]   ;;  %v1375_v63 = vld [vmem:[#allocation4 + $0x90] sm:$0xff] }
  0x99   :  { %1091 = vmatmul.mubr.bf16.gmra.mrb[4].mxu1 %v2259_v36  ;;  %v2274_v36 = vld [vmem:[#allocation2 + $0x3f4] ss:$8 sps:$4 sm:$0xff]  }
  0x9a   :  { %1265 = vmatpush1.bf16.msra.mxu1 %v2233_v37  ;;  %1292 = vmatprep.mubr.bf16.mxu1 %v2389_v42  ;;  %v2272_v37 = vld [vmem:[#allocation2 + $0x3f0] ss:$8 sps:$4 sm:$0xff]  }
  0x9b   :  { %1163 = vmatpush1.bf16.msra.mxu0 %v2104_v7  ;;  %1266 = vmatprep.subr.bf16.mxu1 %v2241_v38  ;;  %v2187_v7 = vld [vmem:[#allocation2 + $0x324] ss:$8 sps:$4 sm:$0xff]  }
  0x9c   :  { %1164 = vmatprep.subr.bf16.mxu0 %v2109_v9  ;;  %v2185_v9 = vld [vmem:[#allocation2 + $0x320] ss:$8 sps:$4 sm:$0xff]  }
  0x9d   :  { %v1362_v38 = vld [vmem:[#allocation4 + $0x28] sm:$0xff] }
  0x9e   :  { %1267 = vmatpush1.bf16.msra.mxu1 %v2239_v41  ;;  %v1361_v41 = vld [vmem:[#allocation4 + $0x20] sm:$0xff] }
  0x9f   :  { %1165 = vmatpush1.bf16.msra.mxu0 %v2107_v12  ;;  %1268 = vmatprep.subr.bf16.mxu1 %v2247_v43  ;;  %v2281_v12 = vld [vmem:[%s2711_s0 + $0x68] ss:$36 sps:$4 sm:$0xff]  }
  0xa0   :  { %1166 = vmatprep.subr.bf16.mxu0 %v2112_v13  ;;  %v2191_v13 = vld [vmem:[#allocation2 + $0x330] ss:$8 sps:$4 sm:$0xff]   ;;  %v1366_v43 = vld [vmem:[#allocation4 + $0x48] sm:$0xff] }
  0xa2   :  { %1269 = vmatpush1.bf16.msra.mxu1 %v2245_v46  ;;  %v1365_v46 = vld [vmem:[#allocation4 + $0x40] sm:$0xff] }
  0xa3   :  { %1167 = vmatpush1.bf16.msra.mxu0 %v2110_v16  ;;  %1270 = vmatprep.subr.bf16.mxu1 %v2253_v47  ;;  %v2205_v16 = vld [vmem:[#allocation2 + $0x354] ss:$8 sps:$4 sm:$0xff]  }
  0xa4   :  { %1168 = vmatprep.subr.bf16.mxu0 %v2115_v17  ;;  %v2203_v17 = vld [vmem:[#allocation2 + $0x350] ss:$8 sps:$4 sm:$0xff]  }
  0xa5   :  { %v1367_v47 = vld [vmem:[#allocation4 + $0x50] sm:$0xff] }
  0xa6   :  { %1271 = vmatpush1.bf16.msra.mxu1 %v2251_v50  ;;  %v1372_v50 = vld [vmem:[#allocation4 + $0x78] sm:$0xff] }
  0xa7   :  { %1169 = vmatpush1.bf16.msra.mxu0 %v2113_v20  ;;  %1272 = vmatprep.subr.bf16.mxu1 %v2264_v51  ;;  %v2217_v20 = vld [vmem:[#allocation2 + $0x374] ss:$8 sps:$4 sm:$0xff]   ;;  %v2528_v51 = vpack.c.bf16 %v1367_v47, %v1365_v46  ;;  %v1406_v47 = vld [vmem:[#allocation4 + $0x188] sm:$0xff] }
  0xa8   :  { %1170 = vmatprep.subr.bf16.mxu0 %v2121_v21  ;;  %v2215_v21 = vld [vmem:[#allocation2 + $0x370] ss:$8 sps:$4 sm:$0xff]  }
  0xaa   :  { %1273 = vmatpush1.bf16.msra.mxu1 %v2262_v54  ;;  %v1369_v54 = vld [vmem:[#allocation4 + $0x60] sm:$0xff] }
  0xab   :  { %1171 = vmatpush1.bf16.msra.mxu0 %v2119_v23  ;;  %1274 = vmatprep.subr.bf16.mxu1 %v2271_v55  ;;  %v2224_v23 = vld [vmem:[#allocation2 + $0x380] ss:$8 sps:$4 sm:$0xff]   ;;  %v1371_v55 = vld [vmem:[#allocation4 + $0x70] sm:$0xff] }
  0xac   :  { %1172 = vmatprep.subr.bf16.mxu0 %v2127_v25  ;;  %v2230_v25 = vld [vmem:[#allocation2 + $0x390] ss:$8 sps:$4 sm:$0xff]  }
  0xae   :  { %1275 = vmatpush1.bf16.msra.mxu1 %v2269_v60  ;;  %v2543_v60 = vpack.c.bf16 %v1376_v58, %v1374_v57  ;;  %v1412_v57 = vld [vmem:[#allocation4 + $0x1b8] sm:$0xff] }
  0xaf   :  { %1173 = vmatpush1.bf16.msra.mxu0 %v2125_v30  ;;  %1872 = vmatprep.subr.bf16.mxu1 %v2499_v62  ;;  %v2250_v30 = vld [vmem:[#allocation2 + $0x3c4] ss:$8 sps:$4 sm:$0xff]  }
  0xb0   :  { %1174 = vmatprep.subr.bf16.mxu0 %v2133_v31  ;;  %v2248_v31 = vld [vmem:[#allocation2 + $0x3c0] ss:$8 sps:$4 sm:$0xff]  }
  0xb1   :  { %1293 = vmatmul.mubr.bf16.vlgmr.msra.gmra.mrb[8].mxu1 %v2278_v4 }
  0xb2   :  { %1302 = vmatprep.mubr.bf16.mxu1 %v2389_v42  ;;  %1874 = vmatpush1.bf16.msra.mxu1 %v2507_v5  ;;  %v1363_v42 = vld [vmem:[#allocation4 + $0x30] sm:$0xff] }
  0xb3   :  { %1175 = vmatpush1.bf16.msra.mxu0 %v2131_v34  ;;  %v2268_v34 = vld [vmem:[#allocation2 + $0x3e4] ss:$8 sps:$4 sm:$0xff]  }
  0xb4   :  { %1176 = vmatprep.subr.bf16.mxu0 %v2139_v35  ;;  %v2266_v35 = vld [vmem:[#allocation2 + $0x3e0] ss:$8 sps:$4 sm:$0xff]  }
  0xb7   :  { %1177 = vmatpush1.bf16.msra.mxu0 %v2137_v39  ;;  %v1364_v39 = vld [vmem:[#allocation4 + $0x38] sm:$0xff] }
  0xb8   :  { %1178 = vmatprep.subr.bf16.mxu0 %v2145_v40  ;;  %v2520_v40 = vpack.c.bf16 %v1364_v39, %v1362_v38  ;;  %v1402_v39 = vld [vmem:[#allocation4 + $0x168] sm:$0xff] }
  0xb9   :  { %1303 = vmatmul.mubr.bf16.gmra.mrb[12].mxu1 %v2281_v12  ;;  %v1381_v12 = vld [vmem:[#allocation4 + $0xc0] sm:$0xff] }
  0xba   :  { %1876 = vmatprep.subr.bf16.mxu1 %v2520_v40 }
  0xbb   :  { %1179 = vmatpush1.bf16.msra.mxu0 %v2143_v44  ;;  %v2522_v44 = vpack.c.bf16 %v1363_v42, %v1361_v41  ;;  %v1404_v41 = vld [vmem:[#allocation4 + $0x178] sm:$0xff] }
  0xbc   :  { %1180 = vmatprep.subr.bf16.mxu0 %v2151_v45  ;;  %v1368_v45 = vld [vmem:[#allocation4 + $0x58] sm:$0xff]  ;;  %v2589_v42 = vpack.c.bf16 %v1404_v41, %v1402_v39 }
  0xbd   :  { %1878 = vmatpush1.bf16.msra.mxu1 %v2522_v44 }
  0xbf   :  { %1181 = vmatpush1.bf16.msra.mxu0 %v2149_v48  ;;  %v2525_v48 = vpack.c.bf16 %v1368_v45, %v1366_v43  ;;  %v1401_v43 = vld [vmem:[#allocation4 + $0x160] sm:$0xff]  ;;  %v1403_v45 = vld [vmem:[#allocation4 + $0x170] sm:$0xff] }
  0xc0   :  { %1182 = vmatprep.subr.bf16.mxu0 %v2159_v49  ;;  %v1370_v49 = vld [vmem:[#allocation4 + $0x68] sm:$0xff]  ;;  %v2591_v46 = vpack.c.bf16 %v1403_v45, %v1401_v43 }
  0xc1   :  { %1880 = vmatprep.subr.bf16.mxu1 %v2525_v48 }
  0xc2   :  { %1882 = vmatpush1.bf16.msra.mxu1 %v2528_v51 }
  0xc3   :  { %1183 = vmatpush1.bf16.msra.mxu0 %v2157_v52  ;;  %v2275_v52 = vld [vmem:[%s2711_s0 + $0x18] ss:$36 sps:$4 sm:$0xff]  }
  0xc4   :  { %1184 = vmatprep.subr.bf16.mxu0 %v2166_v53  ;;  %v2534_v53 = vpack.c.bf16 %v1372_v50, %v1370_v49  ;;  %v1408_v49 = vld [vmem:[#allocation4 + $0x198] sm:$0xff] }
  0xc5   :  { %v2595_v50 = vpack.c.bf16 %v1408_v49, %v1406_v47 }
  0xc6   :  { %1884 = vmatprep.subr.bf16.mxu1 %v2534_v53 }
  0xc7   :  { %1185 = vmatpush1.bf16.msra.mxu0 %v2164_v56  ;;  %v2279_v56 = vld [vmem:[%s2711_s0 + $0x64] ss:$36 sps:$4 sm:$0xff]  }
  0xc8   :  { %1207 = vmatprep.subr.bf16.mxu0 %v2175_v59  ;;  %v2540_v59 = vpack.c.bf16 %v1371_v55, %v1369_v54  ;;  %v1407_v54 = vld [vmem:[#allocation4 + $0x190] sm:$0xff] }
  0xca   :  { %1187 = vmatmul.mubr.bf16.vlgmr.msra.gmra.mrb[0].mxu0 %v2170_v61  ;;  %v1373_v61 = vld [vmem:[#allocation4 + $0x80] sm:$0xff]  ;;  %1886 = vmatpush1.bf16.msra.mxu1 %v2540_v59 }
  0xcb   :  { %1208 = vmatpush1.bf16.msra.mxu0 %v2173_v1  ;;  %1196 = vmatprep.mubr.bf16.mxu0 %v2260_v2  ;;  %v1380_v1 = vld [vmem:[#allocation4 + $0xb8] sm:$0xff]  ;;  %v2546_v2 = vpack.c.bf16 %v1375_v63, %v1373_v61  ;;  %v1409_v61 = vld [vmem:[#allocation4 + $0x1a0] sm:$0xff]  ;;  %v1411_v63 = vld [vmem:[#allocation4 + $0x1b0] sm:$0xff] }
  0xcc   :  { %1209 = vmatprep.subr.bf16.mxu0 %v2181_v3  ;;  %v2282_v3 = vld [vmem:[%s2711_s0 + $0x60] ss:$36 sps:$4 sm:$0xff]   ;;  %1888 = vmatprep.subr.bf16.mxu1 %v2543_v60  ;;  %v2552_v4 = vpack.c.bf16 %v1380_v1, %v1378_v0  ;;  %v2603_v0 = vpack.c.bf16 %v1411_v63, %v1409_v61  ;;  %v1414_v1 = vld [vmem:[#allocation4 + $0x1c8] sm:$0xff] }
  0xce   :  { %1890 = vmatpush1.bf16.msra.mxu1 %v2546_v2 }
  0xcf   :  { %1210 = vmatpush1.bf16.msra.mxu0 %v2179_v6  ;;  %v1377_v6 = vld [vmem:[#allocation4 + $0xa0] sm:$0xff]  ;;  %1892 = vmatprep.subr.bf16.mxu1 %v2552_v4 }
  0xd0   :  { %1211 = vmatprep.subr.bf16.mxu0 %v2187_v7  ;;  %v1379_v7 = vld [vmem:[#allocation4 + $0xb0] sm:$0xff] }
  0xd2   :  { %1197 = vmatmul.mubr.bf16.gmra.mrb[4].mxu0 %v2265_v8  ;;  %v1382_v8 = vld [vmem:[#allocation4 + $0xc8] sm:$0xff] }
  0xd3   :  { %1212 = vmatpush1.bf16.msra.mxu0 %v2185_v9  ;;  %1239 = vmatprep.mubr.bf16.mxu0 %v2277_v10  ;;  %v1384_v9 = vld [vmem:[#allocation4 + $0xd8] sm:$0xff]  ;;  %v2555_v10 = vpack.c.bf16 %v1379_v7, %v1377_v6  ;;  %v1413_v7 = vld [vmem:[#allocation4 + $0x1c0] sm:$0xff] }
  0xd4   :  { %1213 = vmatprep.subr.bf16.mxu0 %v2193_v11  ;;  %v2558_v11 = vpack.c.bf16 %v1384_v9, %v1382_v8  ;;  %v1415_v8 = vld [vmem:[#allocation4 + $0x1d0] sm:$0xff] }
  0xd5   :  { %1894 = vmatpush1.bf16.msra.mxu1 %v2555_v10  ;;  %v2609_v9 = vpack.c.bf16 %v1415_v8, %v1413_v7 }
  0xd6   :  { %1896 = vmatprep.subr.bf16.mxu1 %v2558_v11 }
  0xd7   :  { %1214 = vmatpush1.bf16.msra.mxu0 %v2191_v13  ;;  %v1383_v13 = vld [vmem:[#allocation4 + $0xd0] sm:$0xff] }
  0xd8   :  { %1215 = vmatprep.subr.bf16.mxu0 %v2199_v14  ;;  %v1386_v14 = vld [vmem:[#allocation4 + $0xe8] sm:$0xff] }
  0xdb   :  { %1216 = vmatpush1.bf16.msra.mxu0 %v2197_v15  ;;  %v1388_v15 = vld [vmem:[#allocation4 + $0xf8] sm:$0xff] }
  0xdc   :  { %1217 = vmatprep.subr.bf16.mxu0 %v2205_v16  ;;  %v2561_v16 = vpack.c.bf16 %v1383_v13, %v1381_v12  ;;  %v1418_v12 = vld [vmem:[#allocation4 + $0x1e8] sm:$0xff]  ;;  %v1420_v13 = vld [vmem:[#allocation4 + $0x1f8] sm:$0xff] }
  0xde   :  { %1898 = vmatpush1.bf16.msra.mxu1 %v2561_v16 }
  0xdf   :  { %1218 = vmatpush1.bf16.msra.mxu0 %v2203_v17  ;;  %v2564_v17 = vpack.c.bf16 %v1388_v15, %v1386_v14  ;;  %v2613_v14 = vpack.c.bf16 %v1420_v13, %v1418_v12  ;;  %v1417_v15 = vld [vmem:[#allocation4 + $0x1e0] sm:$0xff] }
  0xe0   :  { %1219 = vmatprep.subr.bf16.mxu0 %v2211_v18  ;;  %v1385_v18 = vld [vmem:[#allocation4 + $0xe0] sm:$0xff] }
  0xe1   :  { %1900 = vmatprep.subr.bf16.mxu1 %v2564_v17 }
  0xe3   :  { %1220 = vmatpush1.bf16.msra.mxu0 %v2209_v19  ;;  %v1387_v19 = vld [vmem:[#allocation4 + $0xf0] sm:$0xff] }
  0xe4   :  { %1221 = vmatprep.subr.bf16.mxu0 %v2217_v20  ;;  %v1390_v20 = vld [vmem:[#allocation4 + $0x108] sm:$0xff] }
  0xe7   :  { %1222 = vmatpush1.bf16.msra.mxu0 %v2215_v21  ;;  %v1392_v21 = vld [vmem:[#allocation4 + $0x118] sm:$0xff] }
  0xe8   :  { %1223 = vmatprep.subr.bf16.mxu0 %v2226_v22  ;;  %v2567_v22 = vpack.c.bf16 %v1387_v19, %v1385_v18  ;;  %v1419_v18 = vld [vmem:[#allocation4 + $0x1f0] sm:$0xff] }
  0xe9   :  { %v2615_v19 = vpack.c.bf16 %v1419_v18, %v1417_v15 }
  0xea   :  { %1902 = vmatpush1.bf16.msra.mxu1 %v2567_v22 }
  0xeb   :  { %1224 = vmatpush1.bf16.msra.mxu0 %v2224_v23  ;;  %v2570_v23 = vpack.c.bf16 %v1392_v21, %v1390_v20 }
  0xec   :  { %1225 = vmatprep.subr.bf16.mxu0 %v2232_v24  ;;  %v1389_v24 = vld [vmem:[#allocation4 + $0x100] sm:$0xff] }
  0xed   :  { %1904 = vmatprep.subr.bf16.mxu1 %v2570_v23 }
  0xef   :  { %1226 = vmatpush1.bf16.msra.mxu0 %v2230_v25  ;;  %v1391_v25 = vld [vmem:[#allocation4 + $0x110] sm:$0xff] }
  0xf0   :  { %1227 = vmatprep.subr.bf16.mxu0 %v2238_v26  ;;  %v2574_v26 = vpack.c.bf16 %v1391_v25, %v1389_v24 }
  0xf2   :  { %1906 = vmatpush1.bf16.msra.mxu1 %v2574_v26 }
  0xf3   :  { %1228 = vmatpush1.bf16.msra.mxu0 %v2236_v27  ;;  %v1394_v27 = vld [vmem:[#allocation4 + $0x128] sm:$0xff] }
  0xf4   :  { %1229 = vmatprep.subr.bf16.mxu0 %v2244_v28  ;;  %v1396_v28 = vld [vmem:[#allocation4 + $0x138] sm:$0xff] }
  0xf7   :  { %1230 = vmatpush1.bf16.msra.mxu0 %v2242_v29  ;;  %v2577_v29 = vpack.c.bf16 %v1396_v28, %v1394_v27 }
  0xf8   :  { %1231 = vmatprep.subr.bf16.mxu0 %v2250_v30  ;;  %v1393_v30 = vld [vmem:[#allocation4 + $0x120] sm:$0xff] }
  0xf9   :  { %1908 = vmatprep.subr.bf16.mxu1 %v2577_v29 }
  0xfb   :  { %1232 = vmatpush1.bf16.msra.mxu0 %v2248_v31  ;;  %v1395_v31 = vld [vmem:[#allocation4 + $0x130] sm:$0xff] }
  0xfc   :  { %1233 = vmatprep.subr.bf16.mxu0 %v2256_v32  ;;  %v2579_v32 = vpack.c.bf16 %v1395_v31, %v1393_v30 }
  0xfe   :  { %1910 = vmatpush1.bf16.msra.mxu1 %v2579_v32 }
  0xff   :  { %1234 = vmatpush1.bf16.msra.mxu0 %v2254_v33  ;;  %v1398_v33 = vld [vmem:[#allocation4 + $0x148] sm:$0xff] }
 0x100   :  { %1235 = vmatprep.subr.bf16.mxu0 %v2268_v34  ;;  %v1400_v34 = vld [vmem:[#allocation4 + $0x158] sm:$0xff] }
 0x103   :  { %1236 = vmatpush1.bf16.msra.mxu0 %v2266_v35  ;;  %v2583_v35 = vpack.c.bf16 %v1400_v34, %v1398_v33 }
 0x104   :  { %1237 = vmatprep.subr.bf16.mxu0 %v2274_v36  ;;  %v1397_v36 = vld [vmem:[#allocation4 + $0x140] sm:$0xff] }
 0x105   :  { %1912 = vmatprep.subr.bf16.mxu1 %v2583_v35 }
 0x107   :  { %1238 = vmatpush1.bf16.msra.mxu0 %v2272_v37  ;;  %v1399_v37 = vld [vmem:[#allocation4 + $0x150] sm:$0xff] }
 0x108   :  { %v2585_v38 = vpack.c.bf16 %v1399_v37, %v1397_v36 }
 0x10a   :  { %1240 = vmatmul.mubr.bf16.vlgmr.msra.gmra.mrb[0].mxu0 %v2275_v52  ;;  %1914 = vmatpush1.bf16.msra.mxu1 %v2585_v38  ;;  %v1405_v52 = vld [vmem:[#allocation4 + $0x180] sm:$0xff] }
 0x10b   :  { %1249 = vmatprep.mubr.bf16.mxu0 %v2279_v56  ;;  %1916 = vmatprep.subr.bf16.mxu1 %v2589_v42  ;;  %v2597_v55 = vpack.c.bf16 %v1407_v54, %v1405_v52  ;;  %v1410_v56 = vld [vmem:[#allocation4 + $0x1a8] sm:$0xff] }
 0x10c   :  { %v2601_v58 = vpack.c.bf16 %v1412_v57, %v1410_v56 }
 0x10e   :  { %1918 = vmatpush1.bf16.msra.mxu1 %v2591_v46 }
 0x10f   :  { %1920 = vmatprep.subr.bf16.mxu1 %v2595_v50 }
 0x112   :  { %1250 = vmatmul.mubr.bf16.gmra.mrb[4].mxu0 %v2282_v3  ;;  %1922 = vmatpush1.bf16.msra.mxu1 %v2597_v55  ;;  %v1416_v3 = vld [vmem:[#allocation4 + $0x1d8] sm:$0xff] }
 0x113   :  { %1924 = vmatprep.subr.bf16.mxu1 %v2601_v58  ;;  %v2607_v6 = vpack.c.bf16 %v1416_v3, %v1414_v1 }
 0x116   :  { %1926 = vmatpush1.bf16.msra.mxu1 %v2603_v0 }
 0x117   :  { %1928 = vmatprep.subr.bf16.mxu1 %v2607_v6 }
 0x11a   :  { %1930 = vmatpush1.bf16.msra.mxu1 %v2609_v9 }
 0x11b   :  { %1932 = vmatprep.subr.bf16.mxu1 %v2613_v14 }
 0x11e   :  { %1934 = vmatpush1.bf16.msra.mxu1 %v2615_v19 }
 0x11f   :  { %1936 = vmatprep.subr.bf16.mxu1 %v2499_v62 }
 0x164   :  { %v1082_v20 = vpop.f32.mrb[0].mxu1 }
 0x165   :  { %v1084_v21 = vpop.f32.mrb[1].mxu1 }
 0x166   :  { %v1086_v24 = vpop.f32.mrb[2].mxu1 }
 0x167   :  { %v1088_v25 = vpop.f32.mrb[3].mxu1 }
 0x16c   :  { %v1092_v27 = vpop.f32.mrb[4].mxu1 }
 0x16d   :  { %v1094_v28 = vpop.f32.mrb[5].mxu1 }
 0x16e   :  { %v1096_v30 = vpop.f32.mrb[6].mxu1 }
 0x16f   :  { %v1098_v31 = vpop.f32.mrb[7].mxu1 }
 0x184   :  { %v1294_v33 = vpop.f32.mrb[8].mxu1 }
 0x185   :  { %v1296_v34 = vpop.f32.mrb[9].mxu1 }
 0x186   :  { %v1298_v36 = vpop.f32.mrb[10].mxu1 }
 0x187   :  { %v1300_v37 = vpop.f32.mrb[11].mxu1 }
 0x18c   :  { %v1304_v39 = vpop.f32.mrb[12].mxu1 }
 0x18d   :  { %v1306_v41 = vpop.f32.mrb[13].mxu1 }
 0x18e   :  { %v1308_v43 = vpop.f32.mrb[14].mxu1 }
 0x18f   :  { %v1310_v45 = vpop.f32.mrb[15].mxu1 }
 0x1dd   :  { %v1241_v47 = vpop.f32.mrb[0].mxu0 }
 0x1de   :  { %v1999_v49 = vadd.f32 %v1241_v47, %v1082_v20  ;;  %v1243_v52 = vpop.f32.mrb[1].mxu0 }
 0x1df   :  { %v2001_v62 = vadd.f32 %v1243_v52, %v1084_v21  ;;  %v1245_v54 = vpop.f32.mrb[2].mxu0 }
 0x1e0   :  { %v2620_v56 = vadd.f32 %v1999_v49, %v1294_v33  ;;  %v2003_v57 = vadd.f32 %v1245_v54, %v1086_v24  ;;  %v1247_v61 = vpop.f32.mrb[3].mxu0 }
 0x1e1   :  { %v2622_v63 = vadd.f32 %v2001_v62, %v1296_v34  ;;  %v2005_v1 = vadd.f32 %v1247_v61, %v1088_v25 }
 0x1e2   :  { %v2624_v3 = vadd.f32 %v2003_v57, %v1298_v36 }
 0x1e3   :  { %v2626_v7 = vadd.f32 %v2005_v1, %v1300_v37  ;;  %v1332_v25 = vmul.f32 %v2622_v63, %v2622_v63 }
 0x1e4   :  { %v1313_v21 = vadd.f32 %v2624_v3, %v2620_v56 }
 0x1e5   :  { %v1251_v8 = vpop.f32.mrb[4].mxu0  ;;  %v1334_v15 = vmul.f32 %v2626_v7, %v2626_v7  ;;  %v1322_v36 = vadd.f32 %v2626_v7, %v2622_v63 }
 0x1e6   :  { %v2007_v12 = vadd.f32 %v1251_v8, %v1092_v27  ;;  %v1253_v13 = vpop.f32.mrb[5].mxu0 }
 0x1e7   :  { %v2009_v18 = vadd.f32 %v1253_v13, %v1094_v28  ;;  %v1255_v20 = vpop.f32.mrb[6].mxu0  ;;  %v1348_v49 = vadd.f32 %v1334_v15, %v1332_v25 }
 0x1e8   :  { %v2632_v24 = vadd.f32 %v2007_v12, %v1304_v39  ;;  %v2011_v33 = vadd.f32 %v1255_v20, %v1096_v30  ;;  %v1257_v34 = vpop.f32.mrb[7].mxu0 }
 0x1e9   :  { %v2638_v27 = vadd.f32 %v2009_v18, %v1306_v41  ;;  %v2013_v37 = vadd.f32 %v1257_v34, %v1098_v31 }
 0x1ea   :  { %v1314_v47 = vadd.f32 %v2632_v24, %v1313_v21  ;;  %v2641_v28 = vadd.f32 %v2011_v33, %v1308_v43 }
 0x1eb   :  { %v1323_v52 = vadd.f32 %v2638_v27, %v1322_v36  ;;  %v1336_v30 = vmul.f32 %v2638_v27, %v2638_v27  ;;  %v2646_v39 = vadd.f32 %v2013_v37, %v1310_v45 }
 0x1ec   :  { %v1315_v62 = vadd.f32 %v2641_v28, %v1314_v47 }
 0x1ed   :  { %v1349_v54 = vadd.f32 %v1348_v49, %v1336_v30  ;;  %v1324_v57 = vadd.f32 %v2646_v39, %v1323_v52  ;;  %v1338_v31 = vmul.f32 %v2646_v39, %v2646_v39  ;;  %v1585_v52 = vlaneseq }
 0x1ee   :  { %v1316_v41 = vrot.slane %v1315_v62, 4 }
 0x1ef   :  { %v1325_v61 = vrot.slane %v1324_v57, 4  ;;  %v1350_v43 = vadd.f32 %v1349_v54, %v1338_v31 }
 0x1f0   :  { %v1317_v1 = vadd.f32 %v1316_v41, %v1315_v62  ;;  %v1586_v62 = vshrl.u32 %v1585_v52, 7 }
 0x1f1   :  { %v1326_v8 = vadd.f32 %v1325_v61, %v1324_v57  ;;  %v1351_v12 = vrot.slane %v1350_v43, 4 }
 0x1f2   :  { %v1318_v13 = vrot.slane %v1317_v1, 2 }
 0x1f3   :  { %v1327_v15 = vrot.slane %v1326_v8, 2  ;;  %v1352_v18 = vadd.f32 %v1351_v12, %v1350_v43  ;;  %v1574_v43 = vld [vmem:[#allocation6] sm:$0x3]  ;;  %v1606_v12 = vsub.s32 1, %v1586_v62 }
 0x1f4   :  { %v1319_v20 = vadd.f32 %v1318_v13, %v1317_v1 }
 0x1f5   :  { %v1328_v45 = vadd.f32 %v1327_v15, %v1326_v8  ;;  %v1353_v21 = vrot.slane %v1352_v18, 2  ;;  %v1602_v8 = vsub.s32 0, %v1586_v62 }
 0x1f6   :  { %v1320_v33 = vrot.slane %v1319_v20, 1 }
 0x1f7   :  { %v1329_v34 = vrot.slane %v1328_v45, 1  ;;  %v1354_v25 = vadd.f32 %v1353_v21, %v1352_v18 }
 0x1f8   :  { %v1321_v47 = vadd.f32 %v1320_v33, %v1319_v20 }
 0x1f9   :  { %v1330_v36 = vadd.f32 %v1329_v34, %v1328_v45  ;;  %v1355_v37 = vrot.slane %v1354_v25, 1  ;;  %v1598_v34 = vld [vmem:[#allocation7] sm:$0x3] }
 0x1fb   :  { %1485 = vmatprep.mubr.f32.mxu1 %v1330_v36  ;;  %v1356_v49 = vadd.f32 %v1355_v37, %v1354_v25 }
 0x1fc   :  { %1486 = vmatmul.mubr.f32.vlgmr.msra.gmra.mrb[16].mxu1 %v1321_v47 }
 0x1fd   :  { %1938 = vmatpush1.bf16.msra.mxu1 %v2507_v5  ;;  %1556 = vmatprep.mubr.f32.mxu1 %v1356_v49  ;;  %v1333_v5 = vmul.f32 %v2624_v3, %v2624_v3 }
 0x1fe   :  { %1940 = vmatprep.subr.bf16.mxu1 %v2520_v40  ;;  %v1331_v40 = vmul.f32 %v2620_v56, %v2620_v56 }
 0x201   :  { %1942 = vmatpush1.bf16.msra.mxu1 %v2522_v44  ;;  %v1335_v44 = vmul.f32 %v2632_v24, %v2632_v24 }
 0x202   :  { %1944 = vmatprep.subr.bf16.mxu1 %v2525_v48  ;;  %v1339_v48 = vadd.f32 %v1333_v5, %v1331_v40 }
 0x205   :  { %1946 = vmatpush1.bf16.msra.mxu1 %v2528_v51  ;;  %v1340_v51 = vadd.f32 %v1339_v48, %v1335_v44 }
 0x206   :  { %1948 = vmatprep.subr.bf16.mxu1 %v2534_v53  ;;  %v1337_v53 = vmul.f32 %v2641_v28, %v2641_v28 }
 0x209   :  { %1950 = vmatpush1.bf16.msra.mxu1 %v2540_v59  ;;  %v1341_v59 = vadd.f32 %v1340_v51, %v1337_v53 }
 0x20a   :  { %1952 = vmatprep.subr.bf16.mxu1 %v2543_v60 }
 0x20b   :  { %v1342_v60 = vrot.slane %v1341_v59, 4 }
 0x20d   :  { %1954 = vmatpush1.bf16.msra.mxu1 %v2546_v2  ;;  %v1343_v2 = vadd.f32 %v1342_v60, %v1341_v59 }
 0x20e   :  { %1956 = vmatprep.subr.bf16.mxu1 %v2552_v4 }
 0x20f   :  { %v1344_v4 = vrot.slane %v1343_v2, 2 }
 0x211   :  { %1958 = vmatpush1.bf16.msra.mxu1 %v2555_v10  ;;  %v1345_v10 = vadd.f32 %v1344_v4, %v1343_v2 }
 0x212   :  { %1960 = vmatprep.subr.bf16.mxu1 %v2558_v11 }
 0x213   :  { %v1346_v11 = vrot.slane %v1345_v10, 1 }
 0x215   :  { %1962 = vmatpush1.bf16.msra.mxu1 %v2561_v16  ;;  %v1347_v16 = vadd.f32 %v1346_v11, %v1345_v10 }
 0x216   :  { %1964 = vmatprep.subr.bf16.mxu1 %v2564_v17 }
 0x219   :  { %1966 = vmatpush1.bf16.msra.mxu1 %v2567_v22 }
 0x21a   :  { %1968 = vmatprep.subr.bf16.mxu1 %v2570_v23 }
 0x21d   :  { %1970 = vmatpush1.bf16.msra.mxu1 %v2574_v26 }
 0x21e   :  { %1972 = vmatprep.subr.bf16.mxu1 %v2577_v29 }
 0x221   :  { %1974 = vmatpush1.bf16.msra.mxu1 %v2579_v32 }
 0x222   :  { %1976 = vmatprep.subr.bf16.mxu1 %v2583_v35 }
 0x225   :  { %1978 = vmatpush1.bf16.msra.mxu1 %v2585_v38 }
 0x226   :  { %1980 = vmatprep.subr.bf16.mxu1 %v2589_v42 }
 0x229   :  { %1982 = vmatpush1.bf16.msra.mxu1 %v2591_v46 }
 0x22a   :  { %1984 = vmatprep.subr.bf16.mxu1 %v2595_v50 }
 0x22d   :  { %1986 = vmatpush1.bf16.msra.mxu1 %v2597_v55 }
 0x22e   :  { %1988 = vmatprep.subr.bf16.mxu1 %v2601_v58 }
 0x231   :  { %1990 = vmatpush1.bf16.msra.mxu1 %v2603_v0 }
 0x232   :  { %1992 = vmatprep.subr.bf16.mxu1 %v2607_v6 }
 0x235   :  { %1994 = vmatpush1.bf16.msra.mxu1 %v2609_v9 }
 0x236   :  { %1996 = vmatprep.subr.bf16.mxu1 %v2613_v14  ;;  %v2390_v14 = vmov 1966171168  }
 0x239   :  { %1998 = vmatpush1.bf16.msra.mxu1 %v2615_v19  ;;  %v1583_v19 = vunpack.c.l.s4 %v2390_v14 }
 0x23b   :  { %v1584_v30 = vunpack.c.0.s8 %v1583_v19 }
 0x23c   :  { %1557 = vmatmul.mubr.f32.vlgmr.msra.gmra.mrb[18].mxu1 %v1347_v16 }
 0x23d   :  { %v1587_v57 = vsub.s32 %v1584_v30, %v1586_v62 }
 0x2cf   :  { %v1487_v17 = vpop.f32.mrb[16].mxu1 }
 0x2d0   :  { %v1489_v22 = vpop.f32.mrb[17].mxu1  ;;  %v1564_v23 = vmul.f32 0.0078125, %v1487_v17 }
 0x2d1   :  { %v1565_v26 = vmul.f32 0.0078125, %v1489_v22 }
 0x2d2   :  { %v1568_v32 = vmul.f32 %v1564_v23, %v1564_v23 }
 0x2d3   :  { %v1569_v42 = vmul.f32 %v1565_v26, %v1565_v26 }
 0x30f   :  { %v1558_v29 = vpop.f32.mrb[18].mxu1 }
 0x310   :  { %v1566_v35 = vmul.f32 0.0078125, %v1558_v29  ;;  %v1560_v38 = vpop.f32.mrb[19].mxu1 }
 0x311   :  { %v1567_v46 = vmul.f32 0.0078125, %v1560_v38 }
 0x312   :  { %v1570_v50 = vsub.f32 %v1566_v35, %v1568_v32 }
 0x313   :  { %v1571_v55 = vsub.f32 %v1567_v46, %v1569_v42 }
 0x314   :  { %v1572_v58 = vmax.f32 %v1570_v50, 0.0 }
 0x315   :  { %v1573_v0 = vmax.f32 %v1571_v55, 0.0 }
 0x316   :  { %v1575_v6 = vadd.f32 1e-05, %v1572_v58 }
 0x317   :  { %v1576_v9 = vadd.f32 1e-05, %v1573_v0 }
 0x318   :  { %2283 = vrsqrt.f32 %v1575_v6 }
 0x319   :  { %2285 = vrsqrt.f32 %v1576_v9 }
 0x322   :  { %v2284_v54 = vpop.eup %2283 }
 0x323   :  { %v2286_v31 = vpop.eup %2285 }
 0x324   :  { %v1581_v41 = vcombine.low %v2284_v54, %v2286_v31 }
 0x326   :  { %v1588_v61 = vrot.slane %v1581_v41, %v1587_v57 }
 0x328   :  { %v1595_v1 = vrot.slane %v1588_v61, %v1587_v57 }
 0x32a   :  { %v1597_v13 = vmul.f32 %v1595_v1, %v1574_v43 }
 0x32c   :  { %v1603_v15 = vrot.slane %v1597_v13, %v1602_v8  ;;  %v1607_v18 = vrot.slane %v1597_v13, %v1606_v12 }
 0x32e   :  { %v1610_v20 = vmul.f32 %v1603_v15, %v1564_v23  ;;  %v1611_v45 = vmul.f32 %v1607_v18, %v1565_v26  ;;  %v1631_v37 = vmul.f32 %v2620_v56, %v1603_v15  ;;  %v1632_v47 = vmul.f32 %v2622_v63, %v1607_v18 }
 0x32f   :  { %v1633_v49 = vmul.f32 %v2624_v3, %v1603_v15  ;;  %v1634_v5 = vmul.f32 %v2626_v7, %v1607_v18  ;;  %v1635_v48 = vmul.f32 %v2632_v24, %v1603_v15  ;;  %v1636_v51 = vmul.f32 %v2638_v27, %v1607_v18 }
 0x330   :  { %v1614_v21 = vcombine.low %v1610_v20, %v1611_v45  ;;  %v1637_v53 = vmul.f32 %v2641_v28, %v1603_v15  ;;  %v1638_v59 = vmul.f32 %v2646_v39, %v1607_v18 }
 0x332   :  { %v1621_v33 = vrot.slane %v1614_v21, %v1587_v57 }
 0x334   :  { %v1628_v25 = vrot.slane %v1621_v33, %v1587_v57 }
 0x336   :  { %v1630_v36 = vsub.f32 %v1598_v34, %v1628_v25 }
 0x338   :  { %v1643_v40 = vrot.slane %v1630_v36, %v1602_v8  ;;  %v1647_v44 = vrot.slane %v1630_v36, %v1606_v12 }
 0x33a   :  { %v1650_v60 = vadd.f32 %v1643_v40, %v1631_v37  ;;  %v1651_v2 = vadd.f32 %v1647_v44, %v1632_v47  ;;  %v1652_v4 = vadd.f32 %v1643_v40, %v1633_v49  ;;  %v1653_v56 = vadd.f32 %v1647_v44, %v1634_v5 }
 0x33b   :  { %v1654_v10 = vadd.f32 %v1643_v40, %v1635_v48  ;;  %v1655_v63 = vadd.f32 %v1647_v44, %v1636_v51  ;;  %v1656_v11 = vadd.f32 %v1643_v40, %v1637_v53  ;;  %v1657_v3 = vadd.f32 %v1647_v44, %v1638_v59 }
 0x33c   :  { %v1658_v16 = vmax.f32 %v1650_v60, 0.0  ;;  %v1659_v7 = vmax.f32 %v1651_v2, 0.0  ;;  %v1660_v17 = vmax.f32 %v1652_v4, 0.0  ;;  %v1661_v22 = vmax.f32 %v1653_v56, 0.0 }
 0x33d   :  { %v1662_v23 = vmax.f32 %v1654_v10, 0.0  ;;  %v1663_v24 = vmax.f32 %v1655_v63, 0.0  ;;  %v1664_v26 = vmax.f32 %v1656_v11, 0.0  ;;  %v1665_v27 = vmax.f32 %v1657_v3, 0.0 }
 0x33e   :  { %v1867_v29 = vpack.c.bf16 %v1659_v7, %v1658_v16  ;;  %v1868_v28 = vpack.c.bf16 %v1661_v22, %v1660_v17 }
 0x33f   :  { %v1869_v32 = vpack.c.bf16 %v1663_v24, %v1662_v23  ;;  %v1870_v39 = vpack.c.bf16 %v1665_v27, %v1664_v26 }
 0x340   :  { %1690 = vst [vmem:[%s2716_s5] sm:$0xff] %v1867_v29  ;;  %1691 = vst [vmem:[%s2716_s5 + $0x8] sm:$0xff] %v1868_v28 }
 0x341   :  { %1692 = vst [vmem:[%s2716_s5 + $0x10] sm:$0xff] %v1869_v32  ;;  %1693 = vst [vmem:[%s2716_s5 + $0x18] sm:$0xff] %v1870_v39 }
 0x342   :  { %1698 = vsyncpa [#allocation3], 1 }
 0x343   :  { %1699 = vsyncpa [#allocation5], 1 }
 0x344   :  { %1700 = vsyncpa [#allocation8], 1 }

// kernel: generator_forward.7
= control target key start
LH: loop header
LB: loop body
LE: loop exit
PB: predicated region body
PF: predicated region fallthrough
CT: control target
= control target key end

     0   :  { %10 = vsyncpa [#allocation3], 0  ;;  %s2352_s0 = inlined_call_operand.vmem [shape: bf16[128,576], index: 0, kind: input, shape index: {}]   ;;  %s2353_s1 = inlined_call_operand.hbm [shape: bf16[576,128], index: 1, kind: input, shape index: {}]   ;;  %s2354_s2 = inlined_call_operand.hbm [shape: f32[128,128], index: 2, kind: input, shape index: {}]   ;;  %s2355_s3 = inlined_call_operand.hbm [shape: f32[1,128], index: 3, kind: input, shape index: {}]   ;;  %s2356_s4 = inlined_call_operand.hbm [shape: f32[1,128], index: 4, kind: input, shape index: {}]   ;;  %s2357_s5 = inlined_call_operand.vmem [shape: bf16[128,128], index: 5, kind: output, shape index: {}]  }
   0x1   :  { %11 = vsyncpa [#allocation5], 0 }
   0x2   :  { %12 = vsyncpa [#allocation8], 0  ;;  %s1976_s18 = smov [#allocation4]   ;;  %s1882_s22 = scalar_lea.hbm %s2354_s2, 2048 }
   0x3   :  { %s32_s19 = sshll.u32 %s1976_s18, 4  ;;  %p1883_p0 = scmp.ne.s32.totalorder %s2354_s2, %s1882_s22  ;;  %s33_s19 = int_to_ptr.vmem [resolvable:$true] %s32_s19 }
   0x4   :  { %p1886_p1 = scmp.lt.u32.totalorder %s1882_s22, %s2354_s2 }
   0x6   :  { %p1888_p2 = pnand %p1886_p1, %p1883_p0 }
   0x8   :  { %1891 = shalt.err (!%p1888_p2)
}
   0x9   :  { %s1892_s27 = scalar_lea.vmem %s33_s19, 2048  ;;  %p1897_p4 = scmp.lt.s32.totalorder %s33_s19, %s33_s19 }
   0xa   :  { %p1893_p3 = scmp.ne.s32.totalorder %s33_s19, %s1892_s27  ;;  %p1898_p5 = scmp.lt.s32.totalorder %s1892_s27, %s1892_s27 }
   0xc   :  { %p1899_p6 = por %p1898_p5, %p1897_p4 }
   0xe   :  { %p1900_p7 = pnand %p1899_p6, %p1893_p3 }
  0x10   :  { %1903 = shalt.err (!%p1900_p7)
}
  0x11   :  { %s1977_s28 = smov 128   ;;  %s1978_s29 = smov 8  }
  0x12   :  { %38 = dma.hbm_to_vmem [thread:$0]  %s2354_s2, 2048, %s33_s19, [#allocation5], %s1977_s28, %s1977_s28, %s1978_s29  }
  0x13   :  { %s1979_s7 = smov [#allocation2]   ;;  %s1904_s11 = scalar_lea.hbm %s2353_s1, 4608 }
  0x14   :  { %s20_s8 = sshll.u32 %s1979_s7, 4  ;;  %p1905_p8 = scmp.ne.s32.totalorder %s2353_s1, %s1904_s11  ;;  %s21_s8 = int_to_ptr.vmem [resolvable:$true] %s20_s8 }
  0x15   :  { %p1908_p9 = scmp.lt.u32.totalorder %s1904_s11, %s2353_s1 }
  0x17   :  { %p1910_p10 = pnand %p1908_p9, %p1905_p8 }
  0x19   :  { %1913 = shalt.err (!%p1910_p10)
}
  0x1a   :  { %s1914_s16 = scalar_lea.vmem %s21_s8, 4608  ;;  %p1919_p12 = scmp.lt.s32.totalorder %s21_s8, %s21_s8 }
  0x1b   :  { %p1915_p11 = scmp.ne.s32.totalorder %s21_s8, %s1914_s16  ;;  %p1920_p13 = scmp.lt.s32.totalorder %s1914_s16, %s1914_s16 }
  0x1d   :  { %p1921_p0 = por %p1920_p13, %p1919_p12 }
  0x1f   :  { %p1922_p1 = pnand %p1921_p0, %p1915_p11 }
  0x21   :  { %1925 = shalt.err (!%p1922_p1)
}
  0x22   :  { %s1980_s2 = smov 64   ;;  %s1981_s17 = smov 4  }
  0x23   :  { %26 = dma.hbm_to_vmem [thread:$0]  %s2353_s1, 4608, %s21_s8, [#allocation3], %s1980_s2, %s1980_s2, %s1981_s17  }
  0x24   :  { %s1982_s20 = smov [#allocation6]   ;;  %s1983_s22 = smov [#allocation7]  }
  0x25   :  { %s45_s21 = sshll.u32 %s1982_s20, 4  ;;  %s55_s23 = sshll.u32 %s1983_s22, 4  ;;  %s46_s21 = int_to_ptr.vmem [resolvable:$true] %s45_s21  ;;  %s56_s23 = int_to_ptr.vmem [resolvable:$true] %s55_s23 }
  0x26   :  { %s1926_s26 = scalar_lea.hbm %s2355_s3, 16 }
  0x27   :  { %p1927_p2 = scmp.ne.s32.totalorder %s2355_s3, %s1926_s26  ;;  %p1930_p3 = scmp.lt.u32.totalorder %s1926_s26, %s2355_s3 }
  0x29   :  { %p1932_p4 = pnand %p1930_p3, %p1927_p2 }
  0x2b   :  { %1935 = shalt.err (!%p1932_p4)
}
  0x2c   :  { %s1936_s1 = scalar_lea.vmem %s46_s21, 16  ;;  %s1940_s6 = scalar_lea.vmem %s46_s21, 32 }
  0x2d   :  { %p1937_p5 = scmp.ne.s32.totalorder %s46_s21, %s1936_s1  ;;  %p1941_p6 = scmp.lt.s32.totalorder %s46_s21, %s46_s21 }
  0x2e   :  { %p1942_p7 = scmp.lt.s32.totalorder %s1940_s6, %s1936_s1 }
  0x30   :  { %p1943_p8 = por %p1942_p7, %p1941_p6 }
  0x32   :  { %p1944_p9 = pnand %p1943_p8, %p1937_p5 }
  0x34   :  { %1947 = shalt.err (!%p1944_p9)
}
  0x35   :  { %48 = dma.hbm_to_vmem [thread:$0]  %s2355_s3, 16, %s46_s21, [#allocation5]  }
  0x36   :  { %s1948_s11 = scalar_lea.hbm %s2356_s4, 16 }
  0x37   :  { %p1949_p10 = scmp.ne.s32.totalorder %s2356_s4, %s1948_s11  ;;  %p1952_p11 = scmp.lt.u32.totalorder %s1948_s11, %s2356_s4 }
  0x39   :  { %p1954_p12 = pnand %p1952_p11, %p1949_p10 }
  0x3b   :  { %1957 = shalt.err (!%p1954_p12)
}
  0x3c   :  { %s1958_s16 = scalar_lea.vmem %s56_s23, 16  ;;  %s1962_s2 = scalar_lea.vmem %s56_s23, 32 }
  0x3d   :  { %p1959_p13 = scmp.ne.s32.totalorder %s56_s23, %s1958_s16  ;;  %p1963_p0 = scmp.lt.s32.totalorder %s56_s23, %s56_s23 }
  0x3e   :  { %p1964_p1 = scmp.lt.s32.totalorder %s1962_s2, %s1958_s16 }
  0x40   :  { %p1965_p2 = por %p1964_p1, %p1963_p0 }
  0x42   :  { %p1966_p3 = pnand %p1965_p2, %p1959_p13 }
  0x44   :  { %1969 = shalt.err (!%p1966_p3)
}
  0x45   :  { %58 = dma.hbm_to_vmem [thread:$0]  %s2356_s4, 16, %s56_s23, [#allocation8]  }
  0x46   :  { %1970 = dma.done.wait [#allocation3], 4608  }
  0x47   :  { %1971 = vsyncadd [#allocation3], 4294962688 }
  0x48   :  { %1972 = dma.done.wait [#allocation5], 2064  }
  0x49   :  { %1973 = vsyncadd [#allocation5], 4294965232 }
  0x4a   :  { %1974 = dma.done.wait [#allocation8], 16  }
  0x4b   :  { %1975 = vsyncadd [#allocation8], 4294967280  ;;  %v1788_v0 = vld [vmem:[#allocation2 + $0x40] sm:$0xff]   ;;  %v1792_v4 = vld [vmem:[#allocation2 + $0x48] sm:$0xff]   ;;  %vm608_vm0 = vcmask 523264   ;;  %vm1985_vm1 = vmmov 0  }
  0x4c   :  { %v1789_v1 = vld [vmem:[#allocation2 + $0xc0] sm:$0xff]   ;;  %1461 = vmatprep.subr.bf16.mxu0 %v1788_v0  ;;  %v1793_v5 = vld [vmem:[#allocation2 + $0xc8] sm:$0xff]   ;;  %v1796_v8 = vld [vmem:[#allocation2 + $0x50] sm:$0xff]  }
  0x4d   :  { %v1790_v2 = vld [vmem:[#allocation2] sm:$0xff]   ;;  %1525 = vmatprep.subr.bf16.mxu1 %v1789_v1  ;;  %v1794_v6 = vld [vmem:[#allocation2 + $0x8] sm:$0xff]   ;;  %v1797_v9 = vld [vmem:[#allocation2 + $0xd0] sm:$0xff]  }
  0x4e   :  { %v1791_v3 = vld [vmem:[#allocation2 + $0x80] sm:$0xff]   ;;  %1462 = vmatpush3.bf16.msra.mxu0 %v1790_v2  ;;  %v1795_v7 = vld [vmem:[#allocation2 + $0x88] sm:$0xff]   ;;  %v1798_v10 = vld [vmem:[#allocation2 + $0x10] sm:$0xff]  }
  0x4f   :  { %1526 = vmatpush3.bf16.msra.mxu1 %v1791_v3  ;;  %1463 = vmatprep.subr.bf16.mxu0 %v1792_v4  ;;  %v1799_v11 = vld [vmem:[#allocation2 + $0x90] sm:$0xff]   ;;  %v1800_v12 = vld [vmem:[#allocation2 + $0x58] sm:$0xff]   ;;  %v1804_v16 = vld [vmem:[#allocation2 + $0x60] sm:$0xff]  }
  0x50   :  { %1527 = vmatprep.subr.bf16.mxu1 %v1793_v5  ;;  %v1801_v13 = vld [vmem:[#allocation2 + $0xd8] sm:$0xff]   ;;  %v1805_v17 = vld [vmem:[#allocation2 + $0xe0] sm:$0xff]   ;;  %v1808_v20 = vld [vmem:[#allocation2 + $0x68] sm:$0xff]  }
  0x51   :  { %v1802_v14 = vld [vmem:[#allocation2 + $0x18] sm:$0xff]   ;;  %v1806_v18 = vld [vmem:[#allocation2 + $0x20] sm:$0xff]   ;;  %v1809_v21 = vld [vmem:[#allocation2 + $0xe8] sm:$0xff]  }
  0x52   :  { %1464 = vmatpush3.bf16.msra.mxu0 %v1794_v6  ;;  %v1803_v15 = vld [vmem:[#allocation2 + $0x98] sm:$0xff]   ;;  %v1807_v19 = vld [vmem:[#allocation2 + $0xa0] sm:$0xff]   ;;  %v1810_v22 = vld [vmem:[#allocation2 + $0x28] sm:$0xff]  }
  0x53   :  { %1528 = vmatpush3.bf16.msra.mxu1 %v1795_v7  ;;  %1465 = vmatprep.subr.bf16.mxu0 %v1796_v8  ;;  %v1811_v23 = vld [vmem:[#allocation2 + $0xa8] sm:$0xff]   ;;  %v1812_v24 = vld [vmem:[#allocation2 + $0x70] sm:$0xff]   ;;  %v1816_v28 = vld [vmem:[#allocation2 + $0x78] sm:$0xff]  }
  0x54   :  { %1529 = vmatprep.subr.bf16.mxu1 %v1797_v9  ;;  %v1813_v25 = vld [vmem:[#allocation2 + $0xf0] sm:$0xff]   ;;  %v1817_v29 = vld [vmem:[#allocation2 + $0xf8] sm:$0xff]   ;;  %v1825_v35 = vld [vmem:[%s2352_s0 + $0xc] ss:$20 sps:$4 sm:$0xff]  }
  0x55   :  { %v1814_v26 = vld [vmem:[#allocation2 + $0x30] sm:$0xff]   ;;  %v1818_v30 = vld [vmem:[#allocation2 + $0x38] sm:$0xff]   ;;  %v1826_v36 = vld [vmem:[#allocation2 + $0x100] sm:$0xff]   ;;  %762 = vmatprep.mubr.bf16.mxu1 %v1825_v35 }
  0x56   :  { %1466 = vmatpush3.bf16.msra.mxu0 %v1798_v10  ;;  %v1815_v27 = vld [vmem:[#allocation2 + $0xb0] sm:$0xff]   ;;  %v1819_v31 = vld [vmem:[#allocation2 + $0xb8] sm:$0xff]   ;;  %v1827_v37 = vld [vmem:[%s2352_s0 + $0x2c] ss:$20 sps:$4 sm:$0xff]  }
  0x57   :  { %1530 = vmatpush3.bf16.msra.mxu1 %v1799_v11  ;;  %1467 = vmatprep.subr.bf16.mxu0 %v1800_v12  ;;  %v1820_v32 = vld [vmem:[%s2352_s0] ss:$20 sps:$4 sm:$0xff]   ;;  %v1822_v33 = vld [vmem:[%s2352_s0 + $0x4] ss:$20 sps:$4 sm:$0xff]   ;;  %v1823_v34 = vld [vmem:[%s2352_s0 + $0x8] ss:$20 sps:$4 sm:$0xff]  }
  0x58   :  { %1531 = vmatprep.subr.bf16.mxu1 %v1801_v13  ;;  %665 = vmatprep.mubr.bf16.mxu0 %v1822_v33  ;;  %v1829_v38 = vld [vmem:[%s2352_s0 + $0x34] ss:$20 sps:$4 sm:$0xff]   ;;  %v1832_v40 = vld [vmem:[%s2352_s0 + $0x30] ss:$20 sps:$4 sm:$0xff]   ;;  %v1838_v45 = vld [vmem:[%s2352_s0 + $0x58] ss:$20 sps:$4 sm:$0xff]  }
  0x59   :  { %v1831_v39 = vld [vmem:[%s2352_s0 + $0x28] ss:$20 sps:$4 sm:$0xff]   ;;  %v1837_v44 = vld [vmem:[%s2352_s0 + $0x50] ss:$20 sps:$4 sm:$0xff]   ;;  %v1844_v50 = vld [vmem:[%s2352_s0 + $0x78] ss:$20 sps:$4 sm:$0xff]  }
  0x5a   :  { %1468 = vmatpush3.bf16.msra.mxu0 %v1802_v14  ;;  %v1833_v41 = vld [vmem:[%s2352_s0 + $0x54] ss:$20 sps:$4 sm:$0xff]   ;;  %v1835_v43 = vld [vmem:[%s2352_s0 + $0x5c] ss:$20 sps:$4 sm:$0xff]   ;;  %v1842_v48 = vld [vmem:[%s2352_s0 + $0x84] ss:$20 sps:$4 sm:$0xff]  }
  0x5b   :  { %1532 = vmatpush3.bf16.msra.mxu1 %v1803_v15  ;;  %1469 = vmatprep.subr.bf16.mxu0 %v1804_v16  ;;  %v1839_v42 = vld [vmem:[#allocation2 + $0x108] sm:$0xff]   ;;  %v1852_v46 = vld [vmem:[#allocation2 + $0x110] sm:$0xff]   ;;  %v1865_v49 = vld [vmem:[#allocation2 + $0x118] sm:$0xff]   ;;  %v1984_v12 = vmov 0.0|0.0  }
  0x5c   :  { %1533 = vmatprep.subr.bf16.mxu1 %v1805_v17  ;;  %v1840_v47 = vld [vmem:[%s2352_s0 + $0x7c] ss:$20 sps:$4 sm:$0xff]   ;;  %v1845_v51 = vld [vmem:[%s2352_s0 + $0x80] ss:$20 sps:$4 sm:$0xff]   ;;  %v1846_v52 = vld [vmem:[%s2352_s0 + $0xa4] ss:$20 sps:$4 sm:$0xff]  }
  0x5d   :  { %v1848_v53 = vld [vmem:[%s2352_s0 + $0xac] ss:$20 sps:$4 sm:$0xff]   ;;  %v1851_v55 = vld [vmem:[%s2352_s0 + $0xa8] ss:$20 sps:$4 sm:$0xff]   ;;  %v1858_v59 = vld [vmem:[%s2352_s0 + $0xd0] ss:$20 sps:$4 sm:$0xff]  }
  0x5e   :  { %1470 = vmatpush3.bf16.msra.mxu0 %v1806_v18  ;;  %v1850_v54 = vld [vmem:[%s2352_s0 + $0xa0] ss:$20 sps:$4 sm:$0xff]   ;;  %v1857_v58 = vld [vmem:[%s2352_s0 + $0xc8] ss:$20 sps:$4 sm:$0xff]   ;;  %v1863_v62 = vld [vmem:[%s2352_s0 + $0xf0] ss:$20 sps:$4 sm:$0xff]  }
  0x5f   :  { %1534 = vmatpush3.bf16.msra.mxu1 %v1807_v19  ;;  %1471 = vmatprep.subr.bf16.mxu0 %v1808_v20  ;;  %v1853_v56 = vld [vmem:[%s2352_s0 + $0xcc] ss:$20 sps:$4 sm:$0xff]   ;;  %v1855_v57 = vld [vmem:[%s2352_s0 + $0xd4] ss:$20 sps:$4 sm:$0xff]   ;;  %v1861_v61 = vld [vmem:[%s2352_s0 + $0xfc] ss:$20 sps:$4 sm:$0xff]  }
  0x60   :  { %1535 = vmatprep.subr.bf16.mxu1 %v1809_v21  ;;  %v1859_v60 = vld [vmem:[%s2352_s0 + $0xf4] ss:$20 sps:$4 sm:$0xff]   ;;  %v1864_v63 = vld [vmem:[%s2352_s0 + $0xf8] ss:$20 sps:$4 sm:$0xff]   ;;  %v1866_v0 = vld [vmem:[%s2352_s0 + $0x11c] ss:$20 sps:$4 sm:$0xff]  }
  0x61   :  { %v1868_v1 = vld [vmem:[%s2352_s0 + $0x124] ss:$20 sps:$4 sm:$0xff]   ;;  %v1871_v3 = vld [vmem:[%s2352_s0 + $0x120] ss:$20 sps:$4 sm:$0xff]   ;;  %v1875_v7 = vld [vmem:[%s2352_s0 + $0x88] ss:$20 sps:$4 sm:$0xff]  }
  0x62   :  { %1472 = vmatpush3.bf16.msra.mxu0 %v1810_v22  ;;  %v1870_v2 = vld [vmem:[%s2352_s0 + $0x118] ss:$20 sps:$4 sm:$0xff]   ;;  %v1872_v4 = vld [vmem:[%s2352_s0 + $0x10] ss:$20 sps:$4 sm:$0xff]   ;;  %v1874_v6 = vld [vmem:[%s2352_s0 + $0x60] ss:$20 sps:$4 sm:$0xff]  }
  0x63   :  { %1536 = vmatpush3.bf16.msra.mxu1 %v1811_v23  ;;  %1473 = vmatprep.subr.bf16.mxu0 %v1812_v24  ;;  %v1873_v5 = vld [vmem:[%s2352_s0 + $0x38] ss:$20 sps:$4 sm:$0xff]   ;;  %v1876_v8 = vld [vmem:[%s2352_s0 + $0xb0] ss:$20 sps:$4 sm:$0xff]   ;;  %v1878_v10 = vld [vmem:[%s2352_s0 + $0x100] ss:$20 sps:$4 sm:$0xff]  }
  0x64   :  { %1537 = vmatprep.subr.bf16.mxu1 %v1813_v25  ;;  %v1877_v9 = vld [vmem:[%s2352_s0 + $0xd8] ss:$20 sps:$4 sm:$0xff]   ;;  %v1879_v11 = vld [vmem:[%s2352_s0 + $0x128] ss:$20 sps:$4 sm:$0xff]   ;;  %v982_v13 = vld [vmem:[#allocation4] sm:$0xff] }
  0x65   :  { %v983_v14 = vld [vmem:[#allocation4 + $0x8] sm:$0xff]  ;;  %v984_v16 = vld [vmem:[#allocation4 + $0x10] sm:$0xff]  ;;  %v985_v17 = vld [vmem:[#allocation4 + $0x18] sm:$0xff] }
  0x66   :  { %1474 = vmatpush3.bf16.msra.mxu0 %v1814_v26  ;;  %v1730_v15 = vpack.c.bf16 %v983_v14, %v982_v13  ;;  %v1733_v18 = vpack.c.bf16 %v985_v17, %v984_v16  ;;  %v986_v19 = vld [vmem:[#allocation4 + $0x20] sm:$0xff]  ;;  %v987_v20 = vld [vmem:[#allocation4 + $0x28] sm:$0xff]  ;;  %v988_v22 = vld [vmem:[#allocation4 + $0x30] sm:$0xff] }
  0x67   :  { %1538 = vmatpush3.bf16.msra.mxu1 %v1815_v27  ;;  %1475 = vmatprep.subr.bf16.mxu0 %v1816_v28  ;;  %v1736_v21 = vpack.c.bf16 %v987_v20, %v986_v19  ;;  %v989_v23 = vld [vmem:[#allocation4 + $0x38] sm:$0xff]  ;;  %v990_v25 = vld [vmem:[#allocation4 + $0x40] sm:$0xff]  ;;  %v991_v26 = vld [vmem:[#allocation4 + $0x48] sm:$0xff] }
  0x68   :  { %1539 = vmatprep.subr.bf16.mxu1 %v1817_v29  ;;  %v1739_v24 = vpack.c.bf16 %v989_v23, %v988_v22  ;;  %v1742_v27 = vpack.c.bf16 %v991_v26, %v990_v25  ;;  %v992_v28 = vld [vmem:[#allocation4 + $0x50] sm:$0xff]  ;;  %v993_v29 = vld [vmem:[#allocation4 + $0x58] sm:$0xff] }
  0x69   :  { %v997_v35 = vld [vmem:[#allocation4 + $0x78] sm:$0xff] }
  0x6a   :  { %1476 = vmatpush3.bf16.msra.mxu0 %v1818_v30  ;;  %v1745_v30 = vpack.c.bf16 %v993_v29, %v992_v28 }
  0x6b   :  { %1540 = vmatpush3.bf16.msra.mxu1 %v1819_v31  ;;  %1635 = vmatprep.subr.bf16.mxu0 %v1826_v36  ;;  %v994_v31 = vld [vmem:[#allocation4 + $0x60] sm:$0xff] }
  0x6c   :  { %1729 = vmatprep.subr.bf16.mxu1 %v1984_v12 }
  0x6d   :  { %666 = vmatmul.mubr.bf16.vlgmr.msra.gmra.mrb[0].mxu0 %v1820_v32  ;;  %v995_v32 = vld [vmem:[#allocation4 + $0x68] sm:$0xff] }
  0x6e   :  { %763 = vmatmul.mubr.bf16.vlgmr.msra.gmra.mrb[0].mxu1 %v1823_v34  ;;  %1636 = vmatpush3.bf16.msra.mxu0 %v1826_v36  ;;  %v1748_v33 = vpack.c.bf16 %v995_v32, %v994_v31  ;;  %v996_v34 = vld [vmem:[#allocation4 + $0x70] sm:$0xff] }
  0x6f   :  { %673 = vmatprep.mubr.bf16.mxu0 %v1827_v37  ;;  %770 = vmatprep.mubr.bf16.mxu1 %v1829_v38  ;;  %v1751_v36 = vpack.c.bf16 %v997_v35, %v996_v34  ;;  %v1986_v37 = vmov 0.0  }
  0x70   :  { %1637 = vmatprep.subr.bf16.mxu0 %v1839_v42  ;;  %1731 = vmatpush3.bf16.msra.mxu1 %v1730_v15 }
  0x71   :  { %1732 = vmatprep.subr.bf16.mxu1 %v1984_v12 }
  0x72   :  { %1638 = vmatpush3.bf16.msra.mxu0 %v1839_v42 }
  0x73   :  { %1639 = vmatprep.subr.bf16.mxu0 %v1852_v46 }
  0x74   :  { %1734 = vmatpush3.bf16.msra.mxu1 %v1733_v18 }
  0x75   :  { %674 = vmatmul.mubr.bf16.gmra.mrb[4].mxu0 %v1831_v39  ;;  %1735 = vmatprep.subr.bf16.mxu1 %v1984_v12 }
  0x76   :  { %771 = vmatmul.mubr.bf16.gmra.mrb[4].mxu1 %v1832_v40  ;;  %681 = vmatprep.mubr.bf16.mxu0 %v1833_v41 }
  0x77   :  { %778 = vmatprep.mubr.bf16.mxu1 %v1835_v43  ;;  %1640 = vmatpush3.bf16.msra.mxu0 %v1852_v46 }
  0x78   :  { %1641 = vmatprep.subr.bf16.mxu0 %v1865_v49  ;;  %1737 = vmatpush3.bf16.msra.mxu1 %v1736_v21 }
  0x79   :  { %1738 = vmatprep.subr.bf16.mxu1 %v1984_v12 }
  0x7b   :  { %1642 = vmatpush3.bf16.msra.mxu0 %v1865_v49 }
  0x7c   :  { %1753 = vmatprep.subr.bf16.mxu0 %v1984_v12  ;;  %1740 = vmatpush3.bf16.msra.mxu1 %v1739_v24 }
  0x7d   :  { %682 = vmatmul.mubr.bf16.gmra.mrb[8].mxu0 %v1837_v44  ;;  %1741 = vmatprep.subr.bf16.mxu1 %v1984_v12 }
  0x7e   :  { %779 = vmatmul.mubr.bf16.gmra.mrb[8].mxu1 %v1838_v45  ;;  %689 = vmatprep.mubr.bf16.mxu0 %v1840_v47 }
  0x7f   :  { %786 = vmatprep.mubr.bf16.mxu1 %v1842_v48 }
  0x80   :  { %1743 = vmatpush3.bf16.msra.mxu1 %v1742_v27 }
  0x81   :  { %1744 = vmatprep.subr.bf16.mxu1 %v1984_v12 }
  0x84   :  { %1746 = vmatpush3.bf16.msra.mxu1 %v1745_v30 }
  0x85   :  { %690 = vmatmul.mubr.bf16.gmra.mrb[12].mxu0 %v1844_v50  ;;  %1747 = vmatprep.subr.bf16.mxu1 %v1984_v12 }
  0x86   :  { %787 = vmatmul.mubr.bf16.gmra.mrb[12].mxu1 %v1845_v51  ;;  %697 = vmatprep.mubr.bf16.mxu0 %v1846_v52 }
  0x87   :  { %794 = vmatprep.mubr.bf16.mxu1 %v1848_v53 }
  0x88   :  { %1749 = vmatpush3.bf16.msra.mxu1 %v1748_v33 }
  0x89   :  { %1750 = vmatprep.subr.bf16.mxu1 %v1984_v12 }
  0x8c   :  { %1752 = vmatpush3.bf16.msra.mxu1 %v1751_v36 }
  0x8d   :  { %698 = vmatmul.mubr.bf16.gmra.mrb[16].mxu0 %v1850_v54 }
  0x8e   :  { %795 = vmatmul.mubr.bf16.gmra.mrb[16].mxu1 %v1851_v55  ;;  %705 = vmatprep.mubr.bf16.mxu0 %v1853_v56 }
  0x8f   :  { %802 = vmatprep.mubr.bf16.mxu1 %v1855_v57 }
  0x95   :  { %706 = vmatmul.mubr.bf16.gmra.mrb[20].mxu0 %v1857_v58 }
  0x96   :  { %803 = vmatmul.mubr.bf16.gmra.mrb[20].mxu1 %v1858_v59  ;;  %713 = vmatprep.mubr.bf16.mxu0 %v1859_v60 }
  0x97   :  { %810 = vmatprep.mubr.bf16.mxu1 %v1861_v61 }
  0x9d   :  { %714 = vmatmul.mubr.bf16.gmra.mrb[24].mxu0 %v1863_v62 }
  0x9e   :  { %811 = vmatmul.mubr.bf16.gmra.mrb[24].mxu1 %v1864_v63  ;;  %721 = vmatprep.mubr.bf16.mxu0 %v1866_v0 }
  0x9f   :  { %818 = vmatprep.mubr.bf16.mxu1 %v1868_v1 }
  0xa5   :  { %722 = vmatmul.mubr.bf16.gmra.mrb[28].mxu0 %v1870_v2 }
  0xa6   :  { %819 = vmatmul.mubr.bf16.gmra.mrb[28].mxu1 %v1871_v3  ;;  %1643 = vmatprep.mubr.msk.bf16.mxu0 %vm608_vm0, %v1872_v4 }
  0xa7   :  { %1691 = vmatprep.mubr.msk.f32.mxu1 %vm1985_vm1, %v1986_v37 }
  0xad   :  { %1644 = vmatmul.mubr.msk.bf16.vlgmr.msra.gmra.mrb[32].mxu0 %vm608_vm0, %v1873_v5 }
  0xae   :  { %1647 = vmatprep.mubr.msk.bf16.mxu0 %vm608_vm0, %v1874_v6  ;;  %1755 = vmatpush3.bf16.msra.mxu0 %v1730_v15 }
  0xaf   :  { %1756 = vmatprep.subr.bf16.mxu0 %v1984_v12 }
  0xb2   :  { %1758 = vmatpush3.bf16.msra.mxu0 %v1733_v18 }
  0xb3   :  { %1759 = vmatprep.subr.bf16.mxu0 %v1984_v12 }
  0xb5   :  { %1648 = vmatmul.mubr.msk.bf16.gmra.mrb[36].mxu0 %vm608_vm0, %v1875_v7 }
  0xb6   :  { %1651 = vmatprep.mubr.msk.bf16.mxu0 %vm608_vm0, %v1876_v8  ;;  %1761 = vmatpush3.bf16.msra.mxu0 %v1736_v21 }
  0xb7   :  { %1762 = vmatprep.subr.bf16.mxu0 %v1984_v12 }
  0xba   :  { %1764 = vmatpush3.bf16.msra.mxu0 %v1739_v24 }
  0xbb   :  { %1765 = vmatprep.subr.bf16.mxu0 %v1984_v12 }
  0xbd   :  { %1652 = vmatmul.mubr.msk.bf16.gmra.mrb[40].mxu0 %vm608_vm0, %v1877_v9 }
  0xbe   :  { %1655 = vmatprep.mubr.msk.bf16.mxu0 %vm608_vm0, %v1878_v10  ;;  %1767 = vmatpush3.bf16.msra.mxu0 %v1742_v27 }
  0xbf   :  { %1768 = vmatprep.subr.bf16.mxu0 %v1984_v12 }
  0xc2   :  { %1770 = vmatpush3.bf16.msra.mxu0 %v1745_v30 }
  0xc3   :  { %1771 = vmatprep.subr.bf16.mxu0 %v1984_v12 }
  0xc5   :  { %1656 = vmatmul.mubr.msk.bf16.gmra.mrb[44].mxu0 %vm608_vm0, %v1879_v11 }
  0xc6   :  { %1773 = vmatpush3.bf16.msra.mxu0 %v1748_v33  ;;  %1726 = vmatprep.mubr.msk.f32.mxu0 %vm1985_vm1, %v1986_v37 }
  0xc7   :  { %1774 = vmatprep.subr.bf16.mxu0 %v1984_v12 }
  0xca   :  { %1776 = vmatpush3.bf16.msra.mxu0 %v1751_v36 }
 0x140   :  { %v1477_v38 = vpop.f32.mrb[0].mxu0 }
 0x141   :  { %v1541_v39 = vpop.f32.mrb[0].mxu1  ;;  %v1478_v40 = vpop.f32.mrb[1].mxu0 }
 0x142   :  { %v1479_v41 = vadd.f32 %v1478_v40, %v1477_v38  ;;  %v1542_v42 = vpop.f32.mrb[1].mxu1  ;;  %v1480_v43 = vpop.f32.mrb[2].mxu0 }
 0x143   :  { %v1543_v44 = vadd.f32 %v1542_v42, %v1541_v39  ;;  %v1544_v45 = vpop.f32.mrb[2].mxu1  ;;  %v1481_v46 = vpop.f32.mrb[3].mxu0 }
 0x144   :  { %v1482_v47 = vadd.f32 %v1481_v46, %v1480_v43  ;;  %v1545_v48 = vpop.f32.mrb[3].mxu1 }
 0x145   :  { %v1546_v49 = vadd.f32 %v1545_v48, %v1544_v45  ;;  %v2193_v50 = vadd.f32 %v1543_v44, %v1479_v41 }
 0x147   :  { %v2195_v51 = vadd.f32 %v1546_v49, %v1482_v47 }
 0x148   :  { %v1483_v52 = vpop.f32.mrb[4].mxu0 }
 0x149   :  { %v1547_v53 = vpop.f32.mrb[4].mxu1  ;;  %v1484_v54 = vpop.f32.mrb[5].mxu0 }
 0x14a   :  { %v1485_v55 = vadd.f32 %v1484_v54, %v1483_v52  ;;  %v1548_v56 = vpop.f32.mrb[5].mxu1  ;;  %v1486_v57 = vpop.f32.mrb[6].mxu0 }
 0x14b   :  { %v1549_v58 = vadd.f32 %v1548_v56, %v1547_v53  ;;  %v1550_v59 = vpop.f32.mrb[6].mxu1  ;;  %v1487_v60 = vpop.f32.mrb[7].mxu0 }
 0x14c   :  { %v1488_v61 = vadd.f32 %v1487_v60, %v1486_v57  ;;  %v1551_v62 = vpop.f32.mrb[7].mxu1 }
 0x14d   :  { %v1552_v63 = vadd.f32 %v1551_v62, %v1550_v59  ;;  %v2197_v0 = vadd.f32 %v1549_v58, %v1485_v55 }
 0x14f   :  { %v2199_v1 = vadd.f32 %v1552_v63, %v1488_v61 }
 0x150   :  { %v1489_v2 = vpop.f32.mrb[8].mxu0 }
 0x151   :  { %v1553_v3 = vpop.f32.mrb[8].mxu1  ;;  %v1490_v4 = vpop.f32.mrb[9].mxu0 }
 0x152   :  { %v1491_v5 = vadd.f32 %v1490_v4, %v1489_v2  ;;  %v1554_v6 = vpop.f32.mrb[9].mxu1  ;;  %v1492_v7 = vpop.f32.mrb[10].mxu0 }
 0x153   :  { %v1555_v8 = vadd.f32 %v1554_v6, %v1553_v3  ;;  %v1556_v9 = vpop.f32.mrb[10].mxu1  ;;  %v1493_v10 = vpop.f32.mrb[11].mxu0 }
 0x154   :  { %v1494_v11 = vadd.f32 %v1493_v10, %v1492_v7  ;;  %v1557_v12 = vpop.f32.mrb[11].mxu1 }
 0x155   :  { %v1558_v13 = vadd.f32 %v1557_v12, %v1556_v9  ;;  %v2201_v14 = vadd.f32 %v1555_v8, %v1491_v5 }
 0x157   :  { %v2203_v15 = vadd.f32 %v1558_v13, %v1494_v11 }
 0x158   :  { %v1495_v16 = vpop.f32.mrb[12].mxu0 }
 0x159   :  { %v1559_v17 = vpop.f32.mrb[12].mxu1  ;;  %v1496_v18 = vpop.f32.mrb[13].mxu0 }
 0x15a   :  { %v1497_v19 = vadd.f32 %v1496_v18, %v1495_v16  ;;  %v1560_v20 = vpop.f32.mrb[13].mxu1  ;;  %v1498_v21 = vpop.f32.mrb[14].mxu0 }
 0x15b   :  { %v1561_v22 = vadd.f32 %v1560_v20, %v1559_v17  ;;  %v1562_v23 = vpop.f32.mrb[14].mxu1  ;;  %v1499_v24 = vpop.f32.mrb[15].mxu0 }
 0x15c   :  { %v1500_v25 = vadd.f32 %v1499_v24, %v1498_v21  ;;  %v1563_v26 = vpop.f32.mrb[15].mxu1 }
 0x15d   :  { %v1564_v27 = vadd.f32 %v1563_v26, %v1562_v23  ;;  %v2205_v28 = vadd.f32 %v1561_v22, %v1497_v19 }
 0x15f   :  { %v2207_v29 = vadd.f32 %v1564_v27, %v1500_v25 }
 0x160   :  { %v1501_v30 = vpop.f32.mrb[16].mxu0 }
 0x161   :  { %v1565_v31 = vpop.f32.mrb[16].mxu1  ;;  %v1502_v32 = vpop.f32.mrb[17].mxu0 }
 0x162   :  { %v1503_v33 = vadd.f32 %v1502_v32, %v1501_v30  ;;  %v1566_v34 = vpop.f32.mrb[17].mxu1  ;;  %v1504_v35 = vpop.f32.mrb[18].mxu0 }
 0x163   :  { %v1567_v36 = vadd.f32 %v1566_v34, %v1565_v31  ;;  %v1568_v37 = vpop.f32.mrb[18].mxu1  ;;  %v1505_v38 = vpop.f32.mrb[19].mxu0 }
 0x164   :  { %v1506_v39 = vadd.f32 %v1505_v38, %v1504_v35  ;;  %v1569_v40 = vpop.f32.mrb[19].mxu1 }
 0x165   :  { %v1570_v41 = vadd.f32 %v1569_v40, %v1568_v37  ;;  %v2209_v42 = vadd.f32 %v1567_v36, %v1503_v33 }
 0x167   :  { %v2211_v43 = vadd.f32 %v1570_v41, %v1506_v39 }
 0x168   :  { %v1507_v44 = vpop.f32.mrb[20].mxu0 }
 0x169   :  { %v1571_v45 = vpop.f32.mrb[20].mxu1  ;;  %v1508_v46 = vpop.f32.mrb[21].mxu0 }
 0x16a   :  { %v1509_v47 = vadd.f32 %v1508_v46, %v1507_v44  ;;  %v1572_v48 = vpop.f32.mrb[21].mxu1  ;;  %v1510_v49 = vpop.f32.mrb[22].mxu0 }
 0x16b   :  { %v1573_v52 = vadd.f32 %v1572_v48, %v1571_v45  ;;  %v1574_v53 = vpop.f32.mrb[22].mxu1  ;;  %v1511_v54 = vpop.f32.mrb[23].mxu0 }
 0x16c   :  { %v1512_v55 = vadd.f32 %v1511_v54, %v1510_v49  ;;  %v1575_v56 = vpop.f32.mrb[23].mxu1 }
 0x16d   :  { %v1576_v57 = vadd.f32 %v1575_v56, %v1574_v53  ;;  %v2213_v58 = vadd.f32 %v1573_v52, %v1509_v47 }
 0x16f   :  { %v2215_v59 = vadd.f32 %v1576_v57, %v1512_v55 }
 0x170   :  { %v1513_v60 = vpop.f32.mrb[24].mxu0 }
 0x171   :  { %v1577_v61 = vpop.f32.mrb[24].mxu1  ;;  %v1514_v62 = vpop.f32.mrb[25].mxu0 }
 0x172   :  { %v1515_v63 = vadd.f32 %v1514_v62, %v1513_v60  ;;  %v1578_v2 = vpop.f32.mrb[25].mxu1  ;;  %v1516_v3 = vpop.f32.mrb[26].mxu0 }
 0x173   :  { %v1579_v4 = vadd.f32 %v1578_v2, %v1577_v61  ;;  %v1580_v5 = vpop.f32.mrb[26].mxu1  ;;  %v1517_v6 = vpop.f32.mrb[27].mxu0 }
 0x174   :  { %v1518_v7 = vadd.f32 %v1517_v6, %v1516_v3  ;;  %v1581_v8 = vpop.f32.mrb[27].mxu1 }
 0x175   :  { %v1582_v9 = vadd.f32 %v1581_v8, %v1580_v5  ;;  %v2217_v10 = vadd.f32 %v1579_v4, %v1515_v63 }
 0x177   :  { %v2219_v11 = vadd.f32 %v1582_v9, %v1518_v7 }
 0x178   :  { %v1519_v12 = vpop.f32.mrb[28].mxu0 }
 0x179   :  { %v1583_v13 = vpop.f32.mrb[28].mxu1  ;;  %v1520_v16 = vpop.f32.mrb[29].mxu0 }
 0x17a   :  { %v1521_v17 = vadd.f32 %v1520_v16, %v1519_v12  ;;  %v1584_v18 = vpop.f32.mrb[29].mxu1  ;;  %v1522_v19 = vpop.f32.mrb[30].mxu0 }
 0x17b   :  { %v1585_v20 = vadd.f32 %v1584_v18, %v1583_v13  ;;  %v1586_v21 = vpop.f32.mrb[30].mxu1  ;;  %v1523_v22 = vpop.f32.mrb[31].mxu0 }
 0x17c   :  { %v1524_v23 = vadd.f32 %v1523_v22, %v1522_v19  ;;  %v1587_v24 = vpop.f32.mrb[31].mxu1 }
 0x17d   :  { %v1588_v25 = vadd.f32 %v1587_v24, %v1586_v21  ;;  %v821_v26 = vadd.f32 %v1585_v20, %v1521_v17 }
 0x17f   :  { %v2221_v27 = vadd.f32 %v1588_v25, %v1524_v23 }
 0x180   :  { %v1645_v30 = vpop.f32.mrb[32].mxu0 }
 0x181   :  { %v2224_v31 = vadd.f32 %v1645_v30, %v2197_v0  ;;  %v861_v32 = vpop.f32.mrb[33].mxu0 }
 0x182   :  { %v2227_v33 = vadd.f32 %v861_v32, %v2193_v50  ;;  %v1646_v34 = vpop.f32.mrb[34].mxu0 }
 0x183   :  { %v2230_v35 = vadd.f32 %v1646_v34, %v2199_v1  ;;  %v864_v36 = vpop.f32.mrb[35].mxu0  ;;  %v947_v50 = vmul.f32 %v2224_v31, %v2224_v31 }
 0x184   :  { %v2233_v37 = vadd.f32 %v864_v36, %v2195_v51  ;;  %v945_v38 = vmul.f32 %v2227_v33, %v2227_v33 }
 0x185   :  { %v948_v45 = vmul.f32 %v2230_v35, %v2230_v35 }
 0x186   :  { %v924_v39 = vadd.f32 %v2233_v37, %v2227_v33  ;;  %v946_v0 = vmul.f32 %v2233_v37, %v2233_v37 }
 0x188   :  { %v925_v40 = vadd.f32 %v924_v39, %v2224_v31  ;;  %v961_v1 = vadd.f32 %v946_v0, %v945_v38  ;;  %v1649_v41 = vpop.f32.mrb[36].mxu0 }
 0x189   :  { %v2245_v44 = vadd.f32 %v1649_v41, %v2205_v28  ;;  %v877_v51 = vpop.f32.mrb[37].mxu0 }
 0x18a   :  { %v962_v46 = vadd.f32 %v961_v1, %v947_v50  ;;  %v2250_v47 = vadd.f32 %v877_v51, %v2201_v14  ;;  %v926_v48 = vadd.f32 %v925_v40, %v2230_v35  ;;  %v1650_v49 = vpop.f32.mrb[38].mxu0 }
 0x18b   :  { %v2254_v52 = vadd.f32 %v1650_v49, %v2207_v29  ;;  %v880_v53 = vpop.f32.mrb[39].mxu0  ;;  %v951_v29 = vmul.f32 %v2245_v44, %v2245_v44 }
 0x18c   :  { %v927_v54 = vadd.f32 %v926_v48, %v2250_v47  ;;  %v949_v28 = vmul.f32 %v2250_v47, %v2250_v47  ;;  %v963_v55 = vadd.f32 %v962_v46, %v948_v45  ;;  %v2260_v56 = vadd.f32 %v880_v53, %v2203_v15 }
 0x18d   :  { %v952_v15 = vmul.f32 %v2254_v52, %v2254_v52 }
 0x18e   :  { %v964_v57 = vadd.f32 %v963_v55, %v949_v28  ;;  %v928_v14 = vadd.f32 %v927_v54, %v2260_v56  ;;  %v950_v60 = vmul.f32 %v2260_v56, %v2260_v56 }
 0x190   :  { %v929_v61 = vadd.f32 %v928_v14, %v2245_v44  ;;  %v965_v62 = vadd.f32 %v964_v57, %v950_v60  ;;  %v1653_v63 = vpop.f32.mrb[40].mxu0 }
 0x191   :  { %v2269_v2 = vadd.f32 %v1653_v63, %v2213_v58  ;;  %v893_v3 = vpop.f32.mrb[41].mxu0 }
 0x192   :  { %v966_v4 = vadd.f32 %v965_v62, %v951_v29  ;;  %v2274_v5 = vadd.f32 %v893_v3, %v2209_v42  ;;  %v930_v6 = vadd.f32 %v929_v61, %v2254_v52  ;;  %v1654_v7 = vpop.f32.mrb[42].mxu0 }
 0x193   :  { %v2278_v8 = vadd.f32 %v1654_v7, %v2215_v59  ;;  %v896_v9 = vpop.f32.mrb[43].mxu0  ;;  %v955_v59 = vmul.f32 %v2269_v2, %v2269_v2 }
 0x194   :  { %v931_v12 = vadd.f32 %v930_v6, %v2274_v5  ;;  %v953_v58 = vmul.f32 %v2274_v5, %v2274_v5  ;;  %v967_v13 = vadd.f32 %v966_v4, %v952_v15  ;;  %v2284_v16 = vadd.f32 %v896_v9, %v2211_v43 }
 0x195   :  { %v956_v43 = vmul.f32 %v2278_v8, %v2278_v8 }
 0x196   :  { %v968_v17 = vadd.f32 %v967_v13, %v953_v58  ;;  %v932_v42 = vadd.f32 %v931_v12, %v2284_v16  ;;  %v954_v18 = vmul.f32 %v2284_v16, %v2284_v16 }
 0x198   :  { %v933_v19 = vadd.f32 %v932_v42, %v2269_v2  ;;  %v969_v20 = vadd.f32 %v968_v17, %v954_v18  ;;  %v1657_v21 = vpop.f32.mrb[44].mxu0  ;;  %v1152_v17 = vlaneseq  ;;  %v1144_v18 = vld [vmem:[#allocation6] sm:$0x1] }
 0x199   :  { %v2292_v22 = vadd.f32 %v1657_v21, %v821_v26  ;;  %v909_v23 = vpop.f32.mrb[45].mxu0  ;;  %v1148_v21 = vld [vmem:[#allocation7] sm:$0x1] }
 0x19a   :  { %v970_v24 = vadd.f32 %v969_v20, %v955_v59  ;;  %v2297_v25 = vadd.f32 %v909_v23, %v2217_v10  ;;  %v934_v30 = vadd.f32 %v933_v19, %v2278_v8  ;;  %v1658_v32 = vpop.f32.mrb[46].mxu0  ;;  %v1153_v42 = vshrl.u32 %v1152_v17, 7 }
 0x19b   :  { %v2301_v34 = vadd.f32 %v1658_v32, %v2221_v27  ;;  %v912_v36 = vpop.f32.mrb[47].mxu0  ;;  %v959_v10 = vmul.f32 %v2292_v22, %v2292_v22 }
 0x19c   :  { %v935_v38 = vadd.f32 %v934_v30, %v2297_v25  ;;  %v957_v26 = vmul.f32 %v2297_v25, %v2297_v25  ;;  %v971_v39 = vadd.f32 %v970_v24, %v956_v43  ;;  %v913_v0 = vadd.f32 %v912_v36, %v2219_v11 }
 0x19d   :  { %v960_v27 = vmul.f32 %v2301_v34, %v2301_v34  ;;  %v1154_v59 = vsub.s32 0, %v1153_v42 }
 0x19e   :  { %v972_v50 = vadd.f32 %v971_v39, %v957_v26  ;;  %v936_v40 = vadd.f32 %v935_v38, %v913_v0  ;;  %v958_v1 = vmul.f32 %v913_v0, %v913_v0 }
 0x1a0   :  { %v937_v41 = vadd.f32 %v936_v40, %v2292_v22  ;;  %v973_v51 = vadd.f32 %v972_v50, %v958_v1 }
 0x1a2   :  { %v938_v45 = vadd.f32 %v937_v41, %v2301_v34  ;;  %v974_v46 = vadd.f32 %v973_v51, %v959_v10 }
 0x1a4   :  { %v939_v48 = vrot.slane %v938_v45, 4  ;;  %v975_v49 = vadd.f32 %v974_v46, %v960_v27 }
 0x1a6   :  { %v940_v53 = vadd.f32 %v939_v48, %v938_v45  ;;  %v976_v54 = vrot.slane %v975_v49, 4 }
 0x1a8   :  { %v941_v11 = vrot.slane %v940_v53, 2  ;;  %v977_v28 = vadd.f32 %v976_v54, %v975_v49 }
 0x1aa   :  { %v942_v55 = vadd.f32 %v941_v11, %v940_v53  ;;  %v978_v57 = vrot.slane %v977_v28, 2 }
 0x1ac   :  { %v943_v14 = vrot.slane %v942_v55, 1  ;;  %v979_v60 = vadd.f32 %v978_v57, %v977_v28 }
 0x1ae   :  { %v944_v29 = vadd.f32 %v943_v14, %v942_v55  ;;  %v980_v61 = vrot.slane %v979_v60, 1 }
 0x1b0   :  { %1692 = vmatmul.mubr.f32.vlgmr.msra.gmra.mrb[32].mxu1 %v944_v29  ;;  %v981_v62 = vadd.f32 %v980_v61, %v979_v60 }
 0x1b2   :  { %1727 = vmatmul.mubr.f32.vlgmr.msra.gmra.mrb[48].mxu0 %v981_v62 }
 0x283   :  { %v1064_v63 = vpop.f32.mrb[32].mxu1 }
 0x284   :  { %v1139_v3 = vmul.f32 0.001953125, %v1064_v63  ;;  %v1693_v15 = vpop.f32.mrb[33].mxu1 }
 0x285   :  { %v1134_v4 = vpop.f32.mrb[48].mxu0 }
 0x286   :  { %v1141_v6 = vmul.f32 %v1139_v3, %v1139_v3  ;;  %v1140_v7 = vmul.f32 0.001953125, %v1134_v4  ;;  %v1728_v9 = vpop.f32.mrb[49].mxu0 }
 0x288   :  { %v1142_v12 = vsub.f32 %v1140_v7, %v1141_v6 }
 0x28a   :  { %v1143_v58 = vmax.f32 %v1142_v12, 0.0 }
 0x28c   :  { %v1145_v13 = vadd.f32 1e-05, %v1143_v58 }
 0x28e   :  { %1880 = vrsqrt.f32 %v1145_v13 }
 0x298   :  { %v1881_v19 = vpop.eup %1880 }
 0x299   :  { %v1147_v20 = vmul.f32 %v1881_v19, %v1144_v18 }
 0x29b   :  { %v1149_v23 = vmul.f32 %v1147_v20, %v1139_v3  ;;  %v1155_v43 = vrot.slane %v1147_v20, %v1154_v59 }
 0x29d   :  { %v1150_v24 = vsub.f32 %v1148_v21, %v1149_v23  ;;  %v1157_v30 = vmul.f32 %v1155_v43, %v2227_v33  ;;  %v1158_v32 = vmul.f32 %v1155_v43, %v2233_v37  ;;  %v1159_v36 = vmul.f32 %v1155_v43, %v2224_v31 }
 0x29e   :  { %v1160_v38 = vmul.f32 %v1155_v43, %v2230_v35  ;;  %v1161_v26 = vmul.f32 %v1155_v43, %v2250_v47  ;;  %v1162_v39 = vmul.f32 %v1155_v43, %v2260_v56  ;;  %v1163_v50 = vmul.f32 %v1155_v43, %v2245_v44 }
 0x29f   :  { %v1164_v40 = vmul.f32 %v1155_v43, %v2254_v52  ;;  %v1165_v1 = vmul.f32 %v1155_v43, %v2274_v5  ;;  %v1166_v10 = vmul.f32 %v1155_v43, %v2284_v16  ;;  %v1167_v33 = vmul.f32 %v1155_v43, %v2269_v2 }
 0x2a0   :  { %v1168_v37 = vmul.f32 %v1155_v43, %v2278_v8  ;;  %v1177_v41 = vrot.slane %v1150_v24, %v1154_v59  ;;  %v1169_v31 = vmul.f32 %v1155_v43, %v2297_v25  ;;  %v1170_v35 = vmul.f32 %v1155_v43, %v913_v0 }
 0x2a1   :  { %v1171_v47 = vmul.f32 %v1155_v43, %v2292_v22  ;;  %v1172_v56 = vmul.f32 %v1155_v43, %v2301_v34 }
 0x2a2   :  { %v1179_v51 = vadd.f32 %v1177_v41, %v1157_v30  ;;  %v1180_v44 = vadd.f32 %v1177_v41, %v1158_v32  ;;  %v1181_v27 = vadd.f32 %v1177_v41, %v1159_v36  ;;  %v1182_v52 = vadd.f32 %v1177_v41, %v1160_v38 }
 0x2a3   :  { %v1183_v45 = vadd.f32 %v1177_v41, %v1161_v26  ;;  %v1184_v5 = vadd.f32 %v1177_v41, %v1162_v39  ;;  %v1185_v46 = vadd.f32 %v1177_v41, %v1163_v50  ;;  %v1186_v16 = vadd.f32 %v1177_v41, %v1164_v40 }
 0x2a4   :  { %v1187_v48 = vadd.f32 %v1177_v41, %v1165_v1  ;;  %v1188_v2 = vadd.f32 %v1177_v41, %v1166_v10  ;;  %v1189_v49 = vadd.f32 %v1177_v41, %v1167_v33  ;;  %v1190_v8 = vadd.f32 %v1177_v41, %v1168_v37 }
 0x2a5   :  { %v1191_v53 = vadd.f32 %v1177_v41, %v1169_v31  ;;  %v1192_v54 = vadd.f32 %v1177_v41, %v1170_v35  ;;  %v1193_v25 = vadd.f32 %v1177_v41, %v1171_v47  ;;  %v1194_v0 = vadd.f32 %v1177_v41, %v1172_v56 }
 0x2a6   :  { %v1195_v11 = vmax.f32 %v1179_v51, 0.0  ;;  %v1196_v22 = vmax.f32 %v1180_v44, 0.0  ;;  %v1197_v28 = vmax.f32 %v1181_v27, 0.0  ;;  %v1198_v34 = vmax.f32 %v1182_v52, 0.0 }
 0x2a7   :  { %v1199_v55 = vmax.f32 %v1183_v45, 0.0  ;;  %v1200_v57 = vmax.f32 %v1184_v5, 0.0  ;;  %v1201_v14 = vmax.f32 %v1185_v46, 0.0  ;;  %v1202_v60 = vmax.f32 %v1186_v16, 0.0 }
 0x2a8   :  { %v1203_v29 = vmax.f32 %v1187_v48, 0.0  ;;  %v1204_v61 = vmax.f32 %v1188_v2, 0.0  ;;  %v1205_v62 = vmax.f32 %v1189_v49, 0.0  ;;  %v1206_v63 = vmax.f32 %v1190_v8, 0.0 }
 0x2a9   :  { %v1207_v3 = vmax.f32 %v1191_v53, 0.0  ;;  %v1208_v15 = vmax.f32 %v1192_v54, 0.0  ;;  %v1209_v4 = vmax.f32 %v1193_v25, 0.0  ;;  %v1210_v6 = vmax.f32 %v1194_v0, 0.0 }
 0x2aa   :  { %v1417_v7 = vpack.c.bf16 %v1196_v22, %v1195_v11  ;;  %v1422_v9 = vpack.c.bf16 %v1198_v34, %v1197_v28  ;;  %v1427_v12 = vpack.c.bf16 %v1200_v57, %v1199_v55  ;;  %v1432_v58 = vpack.c.bf16 %v1202_v60, %v1201_v14 }
 0x2ab   :  { %v1437_v13 = vpack.c.bf16 %v1204_v61, %v1203_v29  ;;  %v1442_v17 = vpack.c.bf16 %v1206_v63, %v1205_v62  ;;  %v1447_v42 = vpack.c.bf16 %v1208_v15, %v1207_v3  ;;  %v1452_v18 = vpack.c.bf16 %v1210_v6, %v1209_v4 }
 0x2ac   :  { %1418 = vst [vmem:[%s2357_s5] sm:$0xff] %v1417_v7   ;;  %1454 = vst [vmem:[%s2357_s5 + $0x8] sm:$0xff] %v1422_v9  }
 0x2ad   :  { %1455 = vst [vmem:[%s2357_s5 + $0x10] sm:$0xff] %v1427_v12   ;;  %1456 = vst [vmem:[%s2357_s5 + $0x18] sm:$0xff] %v1432_v58  }
 0x2ae   :  { %1457 = vst [vmem:[%s2357_s5 + $0x20] sm:$0xff] %v1437_v13   ;;  %1458 = vst [vmem:[%s2357_s5 + $0x28] sm:$0xff] %v1442_v17  }
 0x2af   :  { %1459 = vst [vmem:[%s2357_s5 + $0x30] sm:$0xff] %v1447_v42   ;;  %1460 = vst [vmem:[%s2357_s5 + $0x38] sm:$0xff] %v1452_v18  }
 0x2b0   :  { %1295 = vsyncpa [#allocation3], 1 }
 0x2b1   :  { %1296 = vsyncpa [#allocation5], 1 }
 0x2b2   :  { %1297 = vsyncpa [#allocation8], 1 }

// kernel: generator_forward.8
= control target key start
LH: loop header
LB: loop body
LE: loop exit
PB: predicated region body
PF: predicated region fallthrough
CT: control target
= control target key end

     0   :  { %10 = vsyncpa [#allocation3], 0  ;;  %s5367_s0 = inlined_call_operand.vmem [shape: bf16[512,288], index: 0, kind: input, shape index: {}]   ;;  %s5368_s1 = inlined_call_operand.vmem [shape: bf16[288,64], index: 1, kind: input, shape index: {}]   ;;  %s5369_s2 = inlined_call_operand.hbm [shape: f32[64,64], index: 2, kind: input, shape index: {}]   ;;  %s5370_s3 = inlined_call_operand.hbm [shape: f32[1,64], index: 3, kind: input, shape index: {}]   ;;  %s5371_s4 = inlined_call_operand.hbm [shape: f32[1,64], index: 4, kind: input, shape index: {}]   ;;  %s5372_s5 = inlined_call_operand.vmem [shape: bf16[512,64], index: 5, kind: output, shape index: {}]  }
   0x1   :  { %11 = vsyncpa [#allocation5], 0  ;;  %s3231_s18 = smov [#allocation4]   ;;  %s3232_s20 = smov [#allocation2]  }
   0x2   :  { %s34_s19 = sshll.u32 %s3231_s18, 4  ;;  %s21_s21 = sshll.u32 %s3232_s20, 4  ;;  %s35_s19 = int_to_ptr.vmem [resolvable:$true] %s34_s19  ;;  %s3270_s21 = int_to_ptr.vmem [resolvable:$true] %s21_s21 }
   0x3   :  { %s3161_s24 = scalar_lea.hbm %s5370_s3, 16 }
   0x4   :  { %p3162_p0 = scmp.ne.s32.totalorder %s5370_s3, %s3161_s24  ;;  %p3165_p1 = scmp.lt.u32.totalorder %s3161_s24, %s5370_s3 }
   0x6   :  { %p3167_p2 = pnand %p3165_p1, %p3162_p0 }
   0x8   :  { %3170 = shalt.err (!%p3167_p2)
}
   0x9   :  { %s3171_s29 = scalar_lea.vmem %s35_s19, 16  ;;  %s3175_s30 = scalar_lea.vmem %s35_s19, 32 }
   0xa   :  { %p3172_p3 = scmp.ne.s32.totalorder %s35_s19, %s3171_s29  ;;  %p3176_p4 = scmp.lt.s32.totalorder %s35_s19, %s35_s19 }
   0xb   :  { %p3177_p5 = scmp.lt.s32.totalorder %s3175_s30, %s3171_s29 }
   0xd   :  { %p3178_p6 = por %p3177_p5, %p3176_p4 }
   0xf   :  { %p3179_p7 = pnand %p3178_p6, %p3172_p3 }
  0x11   :  { %3182 = shalt.err (!%p3179_p7)
}
  0x12   :  { %37 = dma.hbm_to_vmem [thread:$0]  %s5370_s3, 16, %s35_s19, [#allocation5]  }
  0x13   :  { %s3183_s10 = scalar_lea.hbm %s5369_s2, 1024 }
  0x14   :  { %p3184_p8 = scmp.ne.s32.totalorder %s5369_s2, %s3183_s10  ;;  %p3187_p9 = scmp.lt.u32.totalorder %s3183_s10, %s5369_s2 }
  0x16   :  { %p3189_p10 = pnand %p3187_p9, %p3184_p8 }
  0x18   :  { %3192 = shalt.err (!%p3189_p10)
}
  0x19   :  { %s3193_s15 = scalar_lea.vmem %s3270_s21, 1024  ;;  %p3198_p12 = scmp.lt.s32.totalorder %s3270_s21, %s3270_s21 }
  0x1a   :  { %p3194_p11 = scmp.ne.s32.totalorder %s3270_s21, %s3193_s15  ;;  %p3199_p13 = scmp.lt.s32.totalorder %s3193_s15, %s3193_s15 }
  0x1c   :  { %p3200_p0 = por %p3199_p13, %p3198_p12 }
  0x1e   :  { %p3201_p1 = pnand %p3200_p0, %p3194_p11 }
  0x20   :  { %3204 = shalt.err (!%p3201_p1)
}
  0x21   :  { %s3233_s3 = smov 128   ;;  %s3234_s16 = smov 8  }
  0x22   :  { %27 = dma.hbm_to_vmem [thread:$0]  %s5369_s2, 1024, %s3270_s21, [#allocation3], %s3233_s3, %s3233_s3, %s3234_s16  }
  0x23   :  { %s3235_s19 = smov [#allocation6]   ;;  %s3205_s24 = scalar_lea.hbm %s5371_s4, 16 }
  0x24   :  { %s44_s20 = sshll.u32 %s3235_s19, 4  ;;  %p3206_p2 = scmp.ne.s32.totalorder %s5371_s4, %s3205_s24  ;;  %s45_s20 = int_to_ptr.vmem [resolvable:$true] %s44_s20 }
  0x25   :  { %p3209_p3 = scmp.lt.u32.totalorder %s3205_s24, %s5371_s4 }
  0x27   :  { %p3211_p4 = pnand %p3209_p3, %p3206_p2 }
  0x29   :  { %3214 = shalt.err (!%p3211_p4)
}
  0x2a   :  { %s3215_s29 = scalar_lea.vmem %s45_s20, 16  ;;  %s3219_s2 = scalar_lea.vmem %s45_s20, 32 }
  0x2b   :  { %p3216_p5 = scmp.ne.s32.totalorder %s45_s20, %s3215_s29  ;;  %p3220_p6 = scmp.lt.s32.totalorder %s45_s20, %s45_s20 }
  0x2c   :  { %p3221_p7 = scmp.lt.s32.totalorder %s3219_s2, %s3215_s29 }
  0x2e   :  { %p3222_p8 = por %p3221_p7, %p3220_p6 }
  0x30   :  { %p3223_p9 = pnand %p3222_p8, %p3216_p5 }
  0x32   :  { %3226 = shalt.err (!%p3223_p9)
}
  0x33   :  { %47 = dma.hbm_to_vmem [thread:$0]  %s5371_s4, 16, %s45_s20, [#allocation5]  }
  0x34   :  { %3227 = dma.done.wait [#allocation3], 1024  }
  0x35   :  { %3228 = vsyncadd [#allocation3], 4294966272 }
  0x36   :  { %3229 = dma.done.wait [#allocation5], 32  }
  0x37   :  { %3230 = vsyncadd [#allocation5], 4294967264  ;;  %v3236_v0 = vmov 0   ;;  %v3013_v1 = vld [vmem:[%s5368_s1] sm:$0xff]   ;;  %v3014_v2 = vld [vmem:[%s5368_s1 + $0x8] sm:$0xff]   ;;  %vm810_vm0 = vcmask 261120  }
  0x38   :  { %907 = vmatprep.subr.bf16.mxu0 %v3236_v0  ;;  %2972 = vmatprep.subr.bf16.mxu1 %v3236_v0  ;;  %v3015_v3 = vld [vmem:[%s5368_s1 + $0x10] sm:$0xff]   ;;  %v3016_v4 = vld [vmem:[%s5368_s1 + $0x18] sm:$0xff]   ;;  %v3017_v5 = vld [vmem:[%s5368_s1 + $0x20] sm:$0xff]   ;;  %vm1485_vm1 = vcmask 523264   ;;  %vm3238_vm2 = vmmov 0   ;;  %vm2443_vm3 = vcmask 519168  }
  0x39   :  { %908 = vmatpush1.bf16.msra.mxu0 %v3013_v1  ;;  %2988 = vmatpush1.bf16.msra.mxu1 %v3013_v1  ;;  %v3031_v6 = vld [vmem:[%s5367_s0 + $0x4] ss:$12 sps:$4 sm:$0xff]   ;;  %v3018_v7 = vld [vmem:[%s5368_s1 + $0x28] sm:$0xff]   ;;  %v3034_v8 = vld [vmem:[%s5367_s0 + $0x274] ss:$12 sps:$4 sm:$0xff]  }
  0x3a   :  { %909 = vmatprep.subr.bf16.mxu0 %v3236_v0  ;;  %2973 = vmatprep.subr.bf16.mxu1 %v3236_v0  ;;  %v3019_v9 = vld [vmem:[%s5368_s1 + $0x30] sm:$0xff]   ;;  %v3020_v10 = vld [vmem:[%s5368_s1 + $0x38] sm:$0xff]   ;;  %v3021_v11 = vld [vmem:[%s5368_s1 + $0x40] sm:$0xff]  }
  0x3b   :  { %939 = vmatprep.mubr.bf16.mxu0 %v3031_v6  ;;  %1147 = vmatprep.mubr.bf16.mxu1 %v3034_v8  ;;  %v3022_v12 = vld [vmem:[%s5368_s1 + $0x48] sm:$0xff]   ;;  %v3023_v13 = vld [vmem:[%s5368_s1 + $0x50] sm:$0xff]   ;;  %v3024_v14 = vld [vmem:[%s5368_s1 + $0x58] sm:$0xff]  }
  0x3c   :  { %v3025_v15 = vld [vmem:[%s5368_s1 + $0x60] sm:$0xff]   ;;  %v3026_v16 = vld [vmem:[%s5368_s1 + $0x68] sm:$0xff]   ;;  %v3027_v17 = vld [vmem:[%s5368_s1 + $0x70] sm:$0xff]  }
  0x3d   :  { %910 = vmatpush1.bf16.msra.mxu0 %v3014_v2  ;;  %2989 = vmatpush1.bf16.msra.mxu1 %v3014_v2  ;;  %v3028_v18 = vld [vmem:[%s5368_s1 + $0x78] sm:$0xff]   ;;  %v3065_v19 = vld [vmem:[%s5368_s1 + $0x80] sm:$0xff]   ;;  %v3066_v24 = vld [vmem:[%s5368_s1 + $0x88] sm:$0xff]  }
  0x3e   :  { %911 = vmatprep.subr.bf16.mxu0 %v3236_v0  ;;  %2974 = vmatprep.subr.bf16.mxu1 %v3236_v0  ;;  %v3029_v20 = vld [vmem:[%s5367_s0] ss:$12 sps:$4 sm:$0xff]   ;;  %v3032_v21 = vld [vmem:[%s5367_s0 + $0x270] ss:$12 sps:$4 sm:$0xff]   ;;  %v3039_v25 = vld [vmem:[%s5367_s0 + $0x18] ss:$12 sps:$4 sm:$0xff]  }
  0x3f   :  { %v3035_v22 = vld [vmem:[%s5367_s0 + $0x1c] ss:$12 sps:$4 sm:$0xff]   ;;  %v3037_v23 = vld [vmem:[%s5367_s0 + $0x28c] ss:$12 sps:$4 sm:$0xff]   ;;  %v3041_v27 = vld [vmem:[%s5367_s0 + $0x34] ss:$12 sps:$4 sm:$0xff]  }
  0x40   :  { %v3040_v26 = vld [vmem:[%s5367_s0 + $0x288] ss:$12 sps:$4 sm:$0xff]   ;;  %v3043_v28 = vld [vmem:[%s5367_s0 + $0x2a4] ss:$12 sps:$4 sm:$0xff]   ;;  %v3046_v30 = vld [vmem:[%s5367_s0 + $0x2a0] ss:$12 sps:$4 sm:$0xff]  }
  0x41   :  { %912 = vmatpush1.bf16.msra.mxu0 %v3015_v3  ;;  %2990 = vmatpush1.bf16.msra.mxu1 %v3015_v3  ;;  %v3045_v29 = vld [vmem:[%s5367_s0 + $0x30] ss:$12 sps:$4 sm:$0xff]   ;;  %v3047_v31 = vld [vmem:[%s5367_s0 + $0x4c] ss:$12 sps:$4 sm:$0xff]   ;;  %v3051_v33 = vld [vmem:[%s5367_s0 + $0x48] ss:$12 sps:$4 sm:$0xff]  }
  0x42   :  { %913 = vmatprep.subr.bf16.mxu0 %v3236_v0  ;;  %2975 = vmatprep.subr.bf16.mxu1 %v3236_v0  ;;  %v3049_v32 = vld [vmem:[%s5367_s0 + $0x2bc] ss:$12 sps:$4 sm:$0xff]   ;;  %v3052_v34 = vld [vmem:[%s5367_s0 + $0x2b8] ss:$12 sps:$4 sm:$0xff]   ;;  %v3055_v36 = vld [vmem:[%s5367_s0 + $0x2d4] ss:$12 sps:$4 sm:$0xff]  }
  0x43   :  { %v3053_v35 = vld [vmem:[%s5367_s0 + $0x64] ss:$12 sps:$4 sm:$0xff]   ;;  %v3057_v37 = vld [vmem:[%s5367_s0 + $0x60] ss:$12 sps:$4 sm:$0xff]   ;;  %v3059_v39 = vld [vmem:[%s5367_s0 + $0x7c] ss:$12 sps:$4 sm:$0xff]  }
  0x44   :  { %v3058_v38 = vld [vmem:[%s5367_s0 + $0x2d0] ss:$12 sps:$4 sm:$0xff]   ;;  %v3061_v40 = vld [vmem:[%s5367_s0 + $0x2ec] ss:$12 sps:$4 sm:$0xff]   ;;  %v3064_v42 = vld [vmem:[%s5367_s0 + $0x2e8] ss:$12 sps:$4 sm:$0xff]  }
  0x45   :  { %914 = vmatpush1.bf16.msra.mxu0 %v3016_v4  ;;  %2991 = vmatpush1.bf16.msra.mxu1 %v3016_v4  ;;  %v3063_v41 = vld [vmem:[%s5367_s0 + $0x78] ss:$12 sps:$4 sm:$0xff]   ;;  %v3067_v43 = vld [vmem:[%s5367_s0 + $0x94] ss:$12 sps:$4 sm:$0xff]   ;;  %v3070_v45 = vld [vmem:[%s5367_s0 + $0x90] ss:$12 sps:$4 sm:$0xff]  }
  0x46   :  { %915 = vmatprep.subr.bf16.mxu0 %v3236_v0  ;;  %2976 = vmatprep.subr.bf16.mxu1 %v3236_v0  ;;  %v3069_v44 = vld [vmem:[%s5367_s0 + $0x8] ss:$12 sps:$4 sm:$0xff]   ;;  %v3071_v46 = vld [vmem:[%s5367_s0 + $0x20] ss:$12 sps:$4 sm:$0xff]   ;;  %v3074_v48 = vld [vmem:[%s5367_s0 + $0x38] ss:$12 sps:$4 sm:$0xff]  }
  0x47   :  { %v3072_v47 = vld [vmem:[%s5367_s0 + $0xac] ss:$12 sps:$4 sm:$0xff]   ;;  %v3075_v49 = vld [vmem:[%s5367_s0 + $0xa8] ss:$12 sps:$4 sm:$0xff]   ;;  %v3076_v50 = vld [vmem:[%s5367_s0 + $0x50] ss:$12 sps:$4 sm:$0xff]  }
  0x48   :  { %v3077_v51 = vld [vmem:[%s5367_s0 + $0xc4] ss:$12 sps:$4 sm:$0xff]   ;;  %v3079_v52 = vld [vmem:[%s5367_s0 + $0x68] ss:$12 sps:$4 sm:$0xff]   ;;  %v3080_v53 = vld [vmem:[%s5367_s0 + $0xc0] ss:$12 sps:$4 sm:$0xff]  }
  0x49   :  { %916 = vmatpush1.bf16.msra.mxu0 %v3017_v5  ;;  %2992 = vmatpush1.bf16.msra.mxu1 %v3017_v5  ;;  %v3081_v54 = vld [vmem:[%s5367_s0 + $0x80] ss:$12 sps:$4 sm:$0xff]   ;;  %v3082_v55 = vld [vmem:[%s5367_s0 + $0xdc] ss:$12 sps:$4 sm:$0xff]   ;;  %v3084_v56 = vld [vmem:[%s5367_s0 + $0x98] ss:$12 sps:$4 sm:$0xff]  }
  0x4a   :  { %917 = vmatprep.subr.bf16.mxu0 %v3236_v0  ;;  %2977 = vmatprep.subr.bf16.mxu1 %v3236_v0  ;;  %v3085_v57 = vld [vmem:[%s5367_s0 + $0xd8] ss:$12 sps:$4 sm:$0xff]   ;;  %v3086_v58 = vld [vmem:[%s5367_s0 + $0xb0] ss:$12 sps:$4 sm:$0xff]   ;;  %v3087_v59 = vld [vmem:[%s5367_s0 + $0xf4] ss:$12 sps:$4 sm:$0xff]  }
  0x4b   :  { %v3089_v60 = vld [vmem:[%s5367_s0 + $0xc8] ss:$12 sps:$4 sm:$0xff]   ;;  %v3090_v61 = vld [vmem:[%s5367_s0 + $0xf0] ss:$12 sps:$4 sm:$0xff]   ;;  %v3091_v62 = vld [vmem:[%s5367_s0 + $0xe0] ss:$12 sps:$4 sm:$0xff]  }
  0x4c   :  { %v3092_v63 = vld [vmem:[%s5367_s0 + $0x10c] ss:$12 sps:$4 sm:$0xff]   ;;  %v3095_v1 = vld [vmem:[%s5367_s0 + $0x108] ss:$12 sps:$4 sm:$0xff]   ;;  %v3096_v2 = vld [vmem:[%s5367_s0 + $0x110] ss:$12 sps:$4 sm:$0xff]  }
  0x4d   :  { %918 = vmatpush1.bf16.msra.mxu0 %v3018_v7  ;;  %2993 = vmatpush1.bf16.msra.mxu1 %v3018_v7  ;;  %v3097_v3 = vld [vmem:[%s5367_s0 + $0x124] ss:$12 sps:$4 sm:$0xff]   ;;  %v3099_v4 = vld [vmem:[%s5367_s0 + $0x128] ss:$12 sps:$4 sm:$0xff]   ;;  %v3100_v5 = vld [vmem:[%s5367_s0 + $0x120] ss:$12 sps:$4 sm:$0xff]  }
  0x4e   :  { %919 = vmatprep.subr.bf16.mxu0 %v3236_v0  ;;  %2978 = vmatprep.subr.bf16.mxu1 %v3236_v0  ;;  %v3101_v6 = vld [vmem:[%s5367_s0 + $0x140] ss:$12 sps:$4 sm:$0xff]   ;;  %v3102_v7 = vld [vmem:[%s5367_s0 + $0x13c] ss:$12 sps:$4 sm:$0xff]   ;;  %v3104_v8 = vld [vmem:[%s5367_s0 + $0x158] ss:$12 sps:$4 sm:$0xff]  }
  0x51   :  { %920 = vmatpush1.bf16.msra.mxu0 %v3019_v9  ;;  %2994 = vmatpush1.bf16.msra.mxu1 %v3019_v9  ;;  %v3105_v9 = vld [vmem:[%s5367_s0 + $0x138] ss:$12 sps:$4 sm:$0xff]  }
  0x52   :  { %921 = vmatprep.subr.bf16.mxu0 %v3236_v0  ;;  %2979 = vmatprep.subr.bf16.mxu1 %v3236_v0 }
  0x55   :  { %922 = vmatpush1.bf16.msra.mxu0 %v3020_v10  ;;  %2995 = vmatpush1.bf16.msra.mxu1 %v3020_v10  ;;  %v3106_v10 = vld [vmem:[%s5367_s0 + $0x170] ss:$12 sps:$4 sm:$0xff]  }
  0x56   :  { %923 = vmatprep.subr.bf16.mxu0 %v3236_v0  ;;  %2980 = vmatprep.subr.bf16.mxu1 %v3236_v0 }
  0x59   :  { %924 = vmatpush1.bf16.msra.mxu0 %v3021_v11  ;;  %2996 = vmatpush1.bf16.msra.mxu1 %v3021_v11  ;;  %v3107_v11 = vld [vmem:[%s5367_s0 + $0x154] ss:$12 sps:$4 sm:$0xff]  }
  0x5a   :  { %925 = vmatprep.subr.bf16.mxu0 %v3236_v0  ;;  %2981 = vmatprep.subr.bf16.mxu1 %v3236_v0 }
  0x5d   :  { %926 = vmatpush1.bf16.msra.mxu0 %v3022_v12  ;;  %2997 = vmatpush1.bf16.msra.mxu1 %v3022_v12  ;;  %v3109_v12 = vld [vmem:[%s5367_s0 + $0x188] ss:$12 sps:$4 sm:$0xff]  }
  0x5e   :  { %927 = vmatprep.subr.bf16.mxu0 %v3236_v0  ;;  %2982 = vmatprep.subr.bf16.mxu1 %v3236_v0 }
  0x61   :  { %928 = vmatpush1.bf16.msra.mxu0 %v3023_v13  ;;  %2998 = vmatpush1.bf16.msra.mxu1 %v3023_v13  ;;  %v3110_v13 = vld [vmem:[%s5367_s0 + $0x150] ss:$12 sps:$4 sm:$0xff]  }
  0x62   :  { %929 = vmatprep.subr.bf16.mxu0 %v3236_v0  ;;  %2983 = vmatprep.subr.bf16.mxu1 %v3236_v0 }
  0x65   :  { %930 = vmatpush1.bf16.msra.mxu0 %v3024_v14  ;;  %2999 = vmatpush1.bf16.msra.mxu1 %v3024_v14  ;;  %v3111_v14 = vld [vmem:[%s5367_s0 + $0x1a0] ss:$12 sps:$4 sm:$0xff]  }
  0x66   :  { %931 = vmatprep.subr.bf16.mxu0 %v3236_v0  ;;  %2984 = vmatprep.subr.bf16.mxu1 %v3236_v0 }
  0x69   :  { %932 = vmatpush1.bf16.msra.mxu0 %v3025_v15  ;;  %3000 = vmatpush1.bf16.msra.mxu1 %v3025_v15  ;;  %v3112_v15 = vld [vmem:[%s5367_s0 + $0x16c] ss:$12 sps:$4 sm:$0xff]  }
  0x6a   :  { %933 = vmatprep.subr.bf16.mxu0 %v3236_v0  ;;  %2985 = vmatprep.subr.bf16.mxu1 %v3236_v0 }
  0x6d   :  { %934 = vmatpush1.bf16.msra.mxu0 %v3026_v16  ;;  %3001 = vmatpush1.bf16.msra.mxu1 %v3026_v16  ;;  %v3114_v16 = vld [vmem:[%s5367_s0 + $0x1b8] ss:$12 sps:$4 sm:$0xff]  }
  0x6e   :  { %935 = vmatprep.subr.bf16.mxu0 %v3236_v0  ;;  %2986 = vmatprep.subr.bf16.mxu1 %v3236_v0 }
  0x71   :  { %936 = vmatpush1.bf16.msra.mxu0 %v3027_v17  ;;  %3002 = vmatpush1.bf16.msra.mxu1 %v3027_v17  ;;  %v3115_v17 = vld [vmem:[%s5367_s0 + $0x168] ss:$12 sps:$4 sm:$0xff]  }
  0x72   :  { %937 = vmatprep.subr.bf16.mxu0 %v3236_v0  ;;  %2987 = vmatprep.subr.bf16.mxu1 %v3236_v0  ;;  %v3094_v0 = vld [vmem:[%s5367_s0 + $0xf8] ss:$12 sps:$4 sm:$0xff]  }
  0x75   :  { %938 = vmatpush1.bf16.msra.mxu0 %v3028_v18  ;;  %3003 = vmatpush1.bf16.msra.mxu1 %v3028_v18  ;;  %v3116_v18 = vld [vmem:[%s5367_s0 + $0x1d0] ss:$12 sps:$4 sm:$0xff]  }
  0x76   :  { %2842 = vmatprep.subr.bf16.mxu1 %v3065_v19 }
  0x78   :  { %940 = vmatmul.mubr.bf16.vlgmr.msra.gmra.mrb[0].mxu0 %v3029_v20  ;;  %1148 = vmatmul.mubr.bf16.vlgmr.msra.gmra.mrb[0].mxu1 %v3032_v21  ;;  %v3119_v20 = vld [vmem:[%s5367_s0 + $0x1e8] ss:$12 sps:$4 sm:$0xff]   ;;  %v3120_v21 = vld [vmem:[%s5367_s0 + $0x180] ss:$12 sps:$4 sm:$0xff]  }
  0x79   :  { %947 = vmatprep.mubr.bf16.mxu0 %v3035_v22  ;;  %1155 = vmatprep.mubr.bf16.mxu1 %v3037_v23  ;;  %v3121_v22 = vld [vmem:[%s5367_s0 + $0x200] ss:$12 sps:$4 sm:$0xff]   ;;  %v3122_v23 = vld [vmem:[%s5367_s0 + $0x19c] ss:$12 sps:$4 sm:$0xff]  }
  0x7a   :  { %2843 = vmatpush3.bf16.msra.mxu1 %v3065_v19  ;;  %v3117_v19 = vld [vmem:[%s5367_s0 + $0x184] ss:$12 sps:$4 sm:$0xff]  }
  0x7b   :  { %2844 = vmatprep.subr.bf16.mxu1 %v3066_v24 }
  0x7e   :  { %2845 = vmatpush3.bf16.msra.mxu1 %v3066_v24  ;;  %v3124_v24 = vld [vmem:[%s5367_s0 + $0x218] ss:$12 sps:$4 sm:$0xff]  }
  0x80   :  { %948 = vmatmul.mubr.bf16.gmra.mrb[4].mxu0 %v3039_v25  ;;  %1156 = vmatmul.mubr.bf16.gmra.mrb[4].mxu1 %v3040_v26  ;;  %v3125_v25 = vld [vmem:[%s5367_s0 + $0x198] ss:$12 sps:$4 sm:$0xff]   ;;  %v3126_v26 = vld [vmem:[%s5367_s0 + $0x230] ss:$12 sps:$4 sm:$0xff]  }
  0x81   :  { %955 = vmatprep.mubr.bf16.mxu0 %v3041_v27  ;;  %1163 = vmatprep.mubr.bf16.mxu1 %v3043_v28  ;;  %v3127_v27 = vld [vmem:[%s5367_s0 + $0x1b4] ss:$12 sps:$4 sm:$0xff]  }
  0x82   :  { %v3129_v28 = vld [vmem:[%s5367_s0 + $0x248] ss:$12 sps:$4 sm:$0xff]  }
  0x88   :  { %956 = vmatmul.mubr.bf16.gmra.mrb[8].mxu0 %v3045_v29  ;;  %1164 = vmatmul.mubr.bf16.gmra.mrb[8].mxu1 %v3046_v30  ;;  %v3130_v29 = vld [vmem:[%s5367_s0 + $0x1b0] ss:$12 sps:$4 sm:$0xff]   ;;  %v3131_v30 = vld [vmem:[%s5367_s0 + $0x260] ss:$12 sps:$4 sm:$0xff]  }
  0x89   :  { %963 = vmatprep.mubr.bf16.mxu0 %v3047_v31  ;;  %1171 = vmatprep.mubr.bf16.mxu1 %v3049_v32  ;;  %v3132_v31 = vld [vmem:[%s5367_s0 + $0x1cc] ss:$12 sps:$4 sm:$0xff]  }
  0x8a   :  { %v3134_v32 = vld [vmem:[%s5367_s0 + $0x278] ss:$12 sps:$4 sm:$0xff]  }
  0x90   :  { %964 = vmatmul.mubr.bf16.gmra.mrb[12].mxu0 %v3051_v33  ;;  %1172 = vmatmul.mubr.bf16.gmra.mrb[12].mxu1 %v3052_v34  ;;  %v3135_v33 = vld [vmem:[%s5367_s0 + $0x1c8] ss:$12 sps:$4 sm:$0xff]   ;;  %v3136_v34 = vld [vmem:[%s5367_s0 + $0x290] ss:$12 sps:$4 sm:$0xff]  }
  0x91   :  { %971 = vmatprep.mubr.bf16.mxu0 %v3053_v35  ;;  %1179 = vmatprep.mubr.bf16.mxu1 %v3055_v36  ;;  %v3137_v35 = vld [vmem:[%s5367_s0 + $0x1e4] ss:$12 sps:$4 sm:$0xff]   ;;  %v3139_v36 = vld [vmem:[%s5367_s0 + $0x2a8] ss:$12 sps:$4 sm:$0xff]  }
  0x98   :  { %972 = vmatmul.mubr.bf16.gmra.mrb[16].mxu0 %v3057_v37  ;;  %1180 = vmatmul.mubr.bf16.gmra.mrb[16].mxu1 %v3058_v38  ;;  %v3140_v37 = vld [vmem:[%s5367_s0 + $0x1e0] ss:$12 sps:$4 sm:$0xff]  }
  0x99   :  { %979 = vmatprep.mubr.bf16.mxu0 %v3059_v39  ;;  %1187 = vmatprep.mubr.bf16.mxu1 %v3061_v40  ;;  %v3141_v38 = vld [vmem:[%s5367_s0 + $0x2c0] ss:$12 sps:$4 sm:$0xff]   ;;  %v3142_v39 = vld [vmem:[%s5367_s0 + $0x1fc] ss:$12 sps:$4 sm:$0xff]   ;;  %v3144_v40 = vld [vmem:[%s5367_s0 + $0x2d8] ss:$12 sps:$4 sm:$0xff]  }
  0xa0   :  { %980 = vmatmul.mubr.bf16.gmra.mrb[20].mxu0 %v3063_v41  ;;  %1188 = vmatmul.mubr.bf16.gmra.mrb[20].mxu1 %v3064_v42  ;;  %v3145_v41 = vld [vmem:[%s5367_s0 + $0x1f8] ss:$12 sps:$4 sm:$0xff]   ;;  %v3146_v42 = vld [vmem:[%s5367_s0 + $0x2f0] ss:$12 sps:$4 sm:$0xff]  }
  0xa1   :  { %987 = vmatprep.mubr.bf16.mxu0 %v3067_v43  ;;  %2846 = vmatprep.mubr.msk.bf16.mxu1 %vm810_vm0, %v3069_v44  ;;  %v3147_v43 = vld [vmem:[%s5367_s0 + $0x214] ss:$12 sps:$4 sm:$0xff]   ;;  %v3149_v44 = vld [vmem:[%s5367_s0 + $0x210] ss:$12 sps:$4 sm:$0xff]  }
  0xa8   :  { %988 = vmatmul.mubr.bf16.gmra.mrb[24].mxu0 %v3070_v45  ;;  %2847 = vmatmul.mubr.msk.bf16.vlgmr.msra.gmra.mrb[24].mxu1 %vm810_vm0, %v3071_v46  ;;  %v3150_v45 = vld [vmem:[%s5367_s0 + $0x22c] ss:$12 sps:$4 sm:$0xff]   ;;  %v3152_v46 = vld [vmem:[%s5367_s0 + $0x228] ss:$12 sps:$4 sm:$0xff]  }
  0xa9   :  { %995 = vmatprep.mubr.bf16.mxu0 %v3072_v47  ;;  %2850 = vmatprep.mubr.msk.bf16.mxu1 %vm810_vm0, %v3074_v48  ;;  %v3153_v47 = vld [vmem:[%s5367_s0 + $0x244] ss:$12 sps:$4 sm:$0xff]   ;;  %v3155_v48 = vld [vmem:[%s5367_s0 + $0x240] ss:$12 sps:$4 sm:$0xff]  }
  0xb0   :  { %996 = vmatmul.mubr.bf16.gmra.mrb[28].mxu0 %v3075_v49  ;;  %2851 = vmatmul.mubr.msk.bf16.gmra.mrb[28].mxu1 %vm810_vm0, %v3076_v50  ;;  %v3156_v49 = vld [vmem:[%s5367_s0 + $0x25c] ss:$12 sps:$4 sm:$0xff]   ;;  %v3158_v50 = vld [vmem:[%s5367_s0 + $0x258] ss:$12 sps:$4 sm:$0xff]  }
  0xb1   :  { %1003 = vmatprep.mubr.bf16.mxu0 %v3077_v51  ;;  %2854 = vmatprep.mubr.msk.bf16.mxu1 %vm810_vm0, %v3079_v52  ;;  %v1816_v51 = vld [vmem:[#allocation2] sm:$0xff]  ;;  %v1817_v52 = vld [vmem:[#allocation2 + $0x8] sm:$0xff] }
  0xb8   :  { %1004 = vmatmul.mubr.bf16.gmra.mrb[32].mxu0 %v3080_v53  ;;  %2855 = vmatmul.mubr.msk.bf16.gmra.mrb[32].mxu1 %vm810_vm0, %v3081_v54  ;;  %v5373_v53 = vmov 0.0|0.0   ;;  %v3720_v54 = vpack.c.bf16 %v1817_v52, %v1816_v51 }
  0xb9   :  { %1011 = vmatprep.mubr.bf16.mxu0 %v3082_v55  ;;  %2858 = vmatprep.mubr.msk.bf16.mxu1 %vm810_vm0, %v3084_v56 }
  0xba   :  { %2948 = vmatprep.subr.bf16.mxu1 %v5373_v53 }
  0xbb   :  { %2950 = vmatpush3.bf16.msra.mxu1 %v3720_v54 }
  0xbc   :  { %2951 = vmatprep.subr.bf16.mxu1 %v5373_v53 }
  0xc0   :  { %1012 = vmatmul.mubr.bf16.gmra.mrb[36].mxu0 %v3085_v57  ;;  %2859 = vmatmul.mubr.msk.bf16.gmra.mrb[36].mxu1 %vm810_vm0, %v3086_v58 }
  0xc1   :  { %1019 = vmatprep.mubr.bf16.mxu0 %v3087_v59  ;;  %2862 = vmatprep.mubr.msk.bf16.mxu1 %vm810_vm0, %v3089_v60 }
  0xc8   :  { %1020 = vmatmul.mubr.bf16.gmra.mrb[40].mxu0 %v3090_v61  ;;  %2863 = vmatmul.mubr.msk.bf16.gmra.mrb[40].mxu1 %vm810_vm0, %v3091_v62 }
  0xc9   :  { %1027 = vmatprep.mubr.bf16.mxu0 %v3092_v63  ;;  %2866 = vmatprep.mubr.msk.bf16.mxu1 %vm810_vm0, %v3094_v0 }
  0xd0   :  { %1028 = vmatmul.mubr.bf16.gmra.mrb[44].mxu0 %v3095_v1  ;;  %2867 = vmatmul.mubr.msk.bf16.gmra.mrb[44].mxu1 %vm810_vm0, %v3096_v2 }
  0xd1   :  { %1035 = vmatprep.mubr.bf16.mxu0 %v3097_v3  ;;  %2870 = vmatprep.mubr.msk.bf16.mxu1 %vm810_vm0, %v3099_v4 }
  0xd8   :  { %1036 = vmatmul.mubr.bf16.gmra.mrb[48].mxu0 %v3100_v5  ;;  %2871 = vmatmul.mubr.msk.bf16.gmra.mrb[48].mxu1 %vm810_vm0, %v3101_v6 }
  0xd9   :  { %1043 = vmatprep.mubr.bf16.mxu0 %v3102_v7  ;;  %2874 = vmatprep.mubr.msk.bf16.mxu1 %vm810_vm0, %v3104_v8 }
  0xe0   :  { %1044 = vmatmul.mubr.bf16.gmra.mrb[52].mxu0 %v3105_v9  ;;  %2875 = vmatmul.mubr.msk.bf16.gmra.mrb[52].mxu1 %vm810_vm0, %v3106_v10 }
  0xe1   :  { %1051 = vmatprep.mubr.bf16.mxu0 %v3107_v11  ;;  %2878 = vmatprep.mubr.msk.bf16.mxu1 %vm810_vm0, %v3109_v12 }
  0xe8   :  { %1052 = vmatmul.mubr.bf16.gmra.mrb[56].mxu0 %v3110_v13  ;;  %2879 = vmatmul.mubr.msk.bf16.gmra.mrb[56].mxu1 %vm810_vm0, %v3111_v14 }
  0xe9   :  { %1059 = vmatprep.mubr.bf16.mxu0 %v3112_v15  ;;  %2882 = vmatprep.mubr.msk.bf16.mxu1 %vm810_vm0, %v3114_v16 }
  0xf0   :  { %1060 = vmatmul.mubr.bf16.gmra.mrb[60].mxu0 %v3115_v17  ;;  %2883 = vmatmul.mubr.msk.bf16.gmra.mrb[60].mxu1 %vm810_vm0, %v3116_v18  ;;  %v1818_v17 = vld [vmem:[#allocation2 + $0x10] sm:$0xff]  ;;  %v1819_v18 = vld [vmem:[#allocation2 + $0x18] sm:$0xff] }
  0xf1   :  { %1067 = vmatprep.mubr.bf16.mxu0 %v3117_v19  ;;  %2886 = vmatprep.mubr.msk.bf16.mxu1 %vm810_vm0, %v3119_v20 }
  0xf8   :  { %1068 = vmatmul.mubr.bf16.gmra.mrb[64].mxu0 %v3120_v21  ;;  %2887 = vmatmul.mubr.msk.bf16.gmra.mrb[64].mxu1 %vm810_vm0, %v3121_v22  ;;  %v3742_v21 = vpack.c.bf16 %v1819_v18, %v1818_v17 }
  0xf9   :  { %1075 = vmatprep.mubr.bf16.mxu0 %v3122_v23  ;;  %2890 = vmatprep.mubr.msk.bf16.mxu1 %vm810_vm0, %v3124_v24 }
  0xfa   :  { %2953 = vmatpush3.bf16.msra.mxu1 %v3742_v21 }
  0xfb   :  { %2954 = vmatprep.subr.bf16.mxu1 %v5373_v53 }
 0x100   :  { %1076 = vmatmul.mubr.bf16.gmra.mrb[68].mxu0 %v3125_v25  ;;  %2891 = vmatmul.mubr.msk.bf16.gmra.mrb[68].mxu1 %vm810_vm0, %v3126_v26 }
 0x101   :  { %1083 = vmatprep.mubr.bf16.mxu0 %v3127_v27  ;;  %2894 = vmatprep.mubr.msk.bf16.mxu1 %vm810_vm0, %v3129_v28 }
 0x108   :  { %1084 = vmatmul.mubr.bf16.gmra.mrb[72].mxu0 %v3130_v29  ;;  %2895 = vmatmul.mubr.msk.bf16.gmra.mrb[72].mxu1 %vm810_vm0, %v3131_v30 }
 0x109   :  { %1091 = vmatprep.mubr.bf16.mxu0 %v3132_v31  ;;  %2898 = vmatprep.mubr.msk.bf16.mxu1 %vm810_vm0, %v3134_v32 }
 0x110   :  { %1092 = vmatmul.mubr.bf16.gmra.mrb[76].mxu0 %v3135_v33  ;;  %2899 = vmatmul.mubr.msk.bf16.gmra.mrb[76].mxu1 %vm810_vm0, %v3136_v34 }
 0x111   :  { %1099 = vmatprep.mubr.bf16.mxu0 %v3137_v35  ;;  %2902 = vmatprep.mubr.msk.bf16.mxu1 %vm810_vm0, %v3139_v36 }
 0x118   :  { %1100 = vmatmul.mubr.bf16.gmra.mrb[80].mxu0 %v3140_v37  ;;  %2903 = vmatmul.mubr.msk.bf16.gmra.mrb[80].mxu1 %vm810_vm0, %v3141_v38 }
 0x119   :  { %1107 = vmatprep.mubr.bf16.mxu0 %v3142_v39  ;;  %2906 = vmatprep.mubr.msk.bf16.mxu1 %vm810_vm0, %v3144_v40 }
 0x120   :  { %1108 = vmatmul.mubr.bf16.gmra.mrb[84].mxu0 %v3145_v41  ;;  %2907 = vmatmul.mubr.msk.bf16.gmra.mrb[84].mxu1 %vm810_vm0, %v3146_v42 }
 0x121   :  { %1115 = vmatprep.mubr.bf16.mxu0 %v3147_v43 }
 0x128   :  { %1116 = vmatmul.mubr.bf16.gmra.mrb[88].mxu0 %v3149_v44 }
 0x129   :  { %1123 = vmatprep.mubr.bf16.mxu0 %v3150_v45 }
 0x130   :  { %1124 = vmatmul.mubr.bf16.gmra.mrb[92].mxu0 %v3152_v46 }
 0x131   :  { %1131 = vmatprep.mubr.bf16.mxu0 %v3153_v47 }
 0x138   :  { %1132 = vmatmul.mubr.bf16.gmra.mrb[96].mxu0 %v3155_v48 }
 0x139   :  { %1139 = vmatprep.mubr.bf16.mxu0 %v3156_v49 }
 0x140   :  { %1140 = vmatmul.mubr.bf16.gmra.mrb[100].mxu0 %v3158_v50 }
 0x14b   :  { %v941_v55 = vpop.f32.mrb[0].mxu0  ;;  %v3724_v56 = vpop.f32.mrb[0].mxu1 }
 0x14c   :  { %v943_v57 = vpop.f32.mrb[1].mxu0  ;;  %v1151_v58 = vpop.f32.mrb[1].mxu1 }
 0x14d   :  { %v944_v59 = vpop.f32.mrb[2].mxu0  ;;  %v3726_v60 = vpop.f32.mrb[2].mxu1 }
 0x14e   :  { %v946_v61 = vpop.f32.mrb[3].mxu0  ;;  %v1154_v62 = vpop.f32.mrb[3].mxu1 }
 0x153   :  { %v949_v63 = vpop.f32.mrb[4].mxu0  ;;  %v3728_v0 = vpop.f32.mrb[4].mxu1 }
 0x154   :  { %v951_v1 = vpop.f32.mrb[5].mxu0  ;;  %v1159_v2 = vpop.f32.mrb[5].mxu1 }
 0x155   :  { %v952_v3 = vpop.f32.mrb[6].mxu0  ;;  %v3730_v4 = vpop.f32.mrb[6].mxu1 }
 0x156   :  { %v954_v5 = vpop.f32.mrb[7].mxu0  ;;  %v1162_v6 = vpop.f32.mrb[7].mxu1 }
 0x15b   :  { %v3732_v7 = vpop.f32.mrb[8].mxu0  ;;  %v3734_v8 = vpop.f32.mrb[8].mxu1 }
 0x15c   :  { %v959_v9 = vpop.f32.mrb[9].mxu0  ;;  %v1167_v10 = vpop.f32.mrb[9].mxu1 }
 0x15d   :  { %v3736_v11 = vpop.f32.mrb[10].mxu0  ;;  %v3738_v12 = vpop.f32.mrb[10].mxu1  ;;  %v1820_v10 = vld [vmem:[#allocation2 + $0x20] sm:$0xff] }
 0x15e   :  { %v962_v13 = vpop.f32.mrb[11].mxu0  ;;  %v1170_v14 = vpop.f32.mrb[11].mxu1 }
 0x15f   :  { %v1821_v13 = vld [vmem:[#allocation2 + $0x28] sm:$0xff] }
 0x163   :  { %v965_v15 = vpop.f32.mrb[12].mxu0  ;;  %v3740_v16 = vpop.f32.mrb[12].mxu1 }
 0x164   :  { %v967_v19 = vpop.f32.mrb[13].mxu0  ;;  %v1175_v20 = vpop.f32.mrb[13].mxu1 }
 0x165   :  { %v3744_v22 = vpop.f32.mrb[14].mxu0  ;;  %v3746_v23 = vpop.f32.mrb[14].mxu1 }
 0x166   :  { %v970_v24 = vpop.f32.mrb[15].mxu0  ;;  %v1178_v25 = vpop.f32.mrb[15].mxu1 }
 0x167   :  { %v3798_v24 = vpack.c.bf16 %v1821_v13, %v1820_v10 }
 0x169   :  { %2956 = vmatpush3.bf16.msra.mxu1 %v3798_v24 }
 0x16a   :  { %2957 = vmatprep.subr.bf16.mxu1 %v5373_v53 }
 0x16b   :  { %v3750_v26 = vpop.f32.mrb[16].mxu0  ;;  %v3752_v27 = vpop.f32.mrb[16].mxu1 }
 0x16c   :  { %v975_v28 = vpop.f32.mrb[17].mxu0  ;;  %v1183_v29 = vpop.f32.mrb[17].mxu1 }
 0x16d   :  { %v3754_v30 = vpop.f32.mrb[18].mxu0  ;;  %v3756_v31 = vpop.f32.mrb[18].mxu1 }
 0x16e   :  { %v978_v32 = vpop.f32.mrb[19].mxu0  ;;  %v1186_v33 = vpop.f32.mrb[19].mxu1 }
 0x173   :  { %v3758_v34 = vpop.f32.mrb[20].mxu0  ;;  %v3760_v35 = vpop.f32.mrb[20].mxu1 }
 0x174   :  { %v983_v36 = vpop.f32.mrb[21].mxu0  ;;  %v1191_v37 = vpop.f32.mrb[21].mxu1 }
 0x175   :  { %v3762_v38 = vpop.f32.mrb[22].mxu0  ;;  %v3764_v39 = vpop.f32.mrb[22].mxu1 }
 0x176   :  { %v986_v40 = vpop.f32.mrb[23].mxu0  ;;  %v1194_v41 = vpop.f32.mrb[23].mxu1 }
 0x17b   :  { %v3766_v42 = vpop.f32.mrb[24].mxu0  ;;  %v2848_v43 = vpop.f32.mrb[24].mxu1 }
 0x17c   :  { %v3768_v44 = vadd.f32 %v2848_v43, %v949_v63  ;;  %v991_v45 = vpop.f32.mrb[25].mxu0  ;;  %v1230_v46 = vpop.f32.mrb[25].mxu1 }
 0x17d   :  { %v3770_v47 = vadd.f32 %v1230_v46, %v941_v55  ;;  %v3772_v48 = vpop.f32.mrb[26].mxu0  ;;  %v2849_v49 = vpop.f32.mrb[26].mxu1 }
 0x17e   :  { %v3774_v50 = vadd.f32 %v2849_v49, %v952_v3  ;;  %v994_v51 = vpop.f32.mrb[27].mxu0  ;;  %v1233_v52 = vpop.f32.mrb[27].mxu1  ;;  %v1621_v61 = vmul.f32 %v3768_v44, %v3768_v44  ;;  %v1489_v1 = vsel %vm1485_vm1, %v3768_v44, 0.0 }
 0x17f   :  { %v1619_v57 = vmul.f32 %v3770_v47, %v3770_v47  ;;  %v3778_v58 = vadd.f32 %v1233_v52, %v944_v59  ;;  %v1486_v55 = vsel %vm1485_vm1, %v3770_v47, 0.0 }
 0x180   :  { %v1622_v2 = vmul.f32 %v3774_v50, %v3774_v50  ;;  %v1686_v25 = vsel %vm1485_vm1, %v1621_v61, 0.0  ;;  %v1491_v28 = vsel %vm1485_vm1, %v3774_v50, 0.0 }
 0x181   :  { %v1487_v62 = vsel %vm1485_vm1, %v3778_v58, 0.0  ;;  %v1620_v63 = vmul.f32 %v3778_v58, %v3778_v58  ;;  %v1683_v3 = vsel %vm1485_vm1, %v1619_v57, 0.0 }
 0x182   :  { %v1488_v59 = vadd.f32 %v1487_v62, %v1486_v55  ;;  %v1688_v36 = vsel %vm1485_vm1, %v1622_v2, 0.0 }
 0x183   :  { %v1684_v5 = vsel %vm1485_vm1, %v1620_v63, 0.0  ;;  %v3794_v6 = vpop.f32.mrb[28].mxu0  ;;  %v2852_v9 = vpop.f32.mrb[28].mxu1 }
 0x184   :  { %v1490_v14 = vadd.f32 %v1489_v1, %v1488_v59  ;;  %v1685_v17 = vadd.f32 %v1684_v5, %v1683_v3  ;;  %v3796_v18 = vadd.f32 %v2852_v9, %v965_v15  ;;  %v999_v19 = vpop.f32.mrb[29].mxu0  ;;  %v1246_v20 = vpop.f32.mrb[29].mxu1 }
 0x185   :  { %v3804_v29 = vadd.f32 %v1246_v20, %v3732_v7  ;;  %v3806_v32 = vpop.f32.mrb[30].mxu0  ;;  %v2853_v33 = vpop.f32.mrb[30].mxu1 }
 0x186   :  { %v1492_v37 = vadd.f32 %v1491_v28, %v1490_v14  ;;  %v1687_v15 = vadd.f32 %v1686_v25, %v1685_v17  ;;  %v1002_v40 = vpop.f32.mrb[31].mxu0  ;;  %v1249_v41 = vpop.f32.mrb[31].mxu1  ;;  %v3815_v7 = vadd.f32 %v2853_v33, %v3744_v22  ;;  %v1625_v61 = vmul.f32 %v3796_v18, %v3796_v18 }
 0x187   :  { %v1493_v43 = vsel %vm1485_vm1, %v3804_v29, 0.0  ;;  %v1623_v45 = vmul.f32 %v3804_v29, %v3804_v29  ;;  %v3818_v46 = vadd.f32 %v1249_v41, %v3736_v11  ;;  %v1497_v11 = vsel %vm1485_vm1, %v3796_v18, 0.0 }
 0x188   :  { %v1689_v49 = vadd.f32 %v1688_v36, %v1687_v15  ;;  %v1494_v51 = vadd.f32 %v1493_v43, %v1492_v37  ;;  %v1626_v2 = vmul.f32 %v3815_v7, %v3815_v7  ;;  %v1499_v13 = vsel %vm1485_vm1, %v3815_v7, 0.0 }
 0x189   :  { %v1690_v52 = vsel %vm1485_vm1, %v1623_v45, 0.0  ;;  %v1495_v57 = vsel %vm1485_vm1, %v3818_v46, 0.0  ;;  %v1624_v22 = vmul.f32 %v3818_v46, %v3818_v46  ;;  %v1694_v25 = vsel %vm1485_vm1, %v1625_v61, 0.0 }
 0x18a   :  { %v1691_v55 = vadd.f32 %v1690_v52, %v1689_v49  ;;  %v1496_v62 = vadd.f32 %v1495_v57, %v1494_v51  ;;  %v1696_v41 = vsel %vm1485_vm1, %v1626_v2, 0.0 }
 0x18b   :  { %v3830_v63 = vpop.f32.mrb[32].mxu0  ;;  %v2856_v1 = vpop.f32.mrb[32].mxu1  ;;  %v1692_v3 = vsel %vm1485_vm1, %v1624_v22, 0.0 }
 0x18c   :  { %v1498_v59 = vadd.f32 %v1497_v11, %v1496_v62  ;;  %v3836_v5 = vadd.f32 %v2856_v1, %v3758_v34  ;;  %v1007_v9 = vpop.f32.mrb[33].mxu0  ;;  %v1262_v10 = vpop.f32.mrb[33].mxu1  ;;  %v1693_v14 = vadd.f32 %v1692_v3, %v1691_v55 }
 0x18d   :  { %v3841_v17 = vadd.f32 %v1262_v10, %v3750_v26  ;;  %v3843_v19 = vpop.f32.mrb[34].mxu0  ;;  %v2857_v20 = vpop.f32.mrb[34].mxu1 }
 0x18e   :  { %v1500_v28 = vadd.f32 %v1499_v13, %v1498_v59  ;;  %v3847_v33 = vadd.f32 %v2857_v20, %v3762_v38  ;;  %v1010_v34 = vpop.f32.mrb[35].mxu0  ;;  %v1265_v36 = vpop.f32.mrb[35].mxu1  ;;  %v1695_v37 = vadd.f32 %v1694_v25, %v1693_v14  ;;  %v1629_v52 = vmul.f32 %v3836_v5, %v3836_v5 }
 0x18f   :  { %v1501_v15 = vsel %vm1485_vm1, %v3841_v17, 0.0  ;;  %v1627_v40 = vmul.f32 %v3841_v17, %v3841_v17  ;;  %v3854_v26 = vadd.f32 %v1265_v36, %v3754_v30  ;;  %v1505_v30 = vsel %vm1485_vm1, %v3836_v5, 0.0 }
 0x190   :  { %5422 = vst [vmem:[#allocation9_spill] sm:$0xff] %v3847_v33  ;;  %v1502_v43 = vadd.f32 %v1501_v15, %v1500_v28  ;;  %v1697_v45 = vadd.f32 %v1696_v41, %v1695_v37  ;;  %v1630_v11 = vmul.f32 %v3847_v33, %v3847_v33  ;;  %v1507_v9 = vsel %vm1485_vm1, %v3847_v33, 0.0 }
 0x191   :  { %v1698_v49 = vsel %vm1485_vm1, %v1627_v40, 0.0  ;;  %v1503_v38 = vsel %vm1485_vm1, %v3854_v26, 0.0  ;;  %v1628_v51 = vmul.f32 %v3854_v26, %v3854_v26  ;;  %v1702_v25 = vsel %vm1485_vm1, %v1629_v52, 0.0 }
 0x192   :  { %v1504_v57 = vadd.f32 %v1503_v38, %v1502_v43  ;;  %v1699_v61 = vadd.f32 %v1698_v49, %v1697_v45  ;;  %v1704_v41 = vsel %vm1485_vm1, %v1630_v11, 0.0 }
 0x193   :  { %v1700_v55 = vsel %vm1485_vm1, %v1628_v51, 0.0  ;;  %v1013_v62 = vpop.f32.mrb[36].mxu0  ;;  %v2860_v22 = vpop.f32.mrb[36].mxu1 }
 0x194   :  { %v1506_v1 = vadd.f32 %v1505_v30, %v1504_v57  ;;  %v3870_v2 = vadd.f32 %v2860_v22, %v3794_v6  ;;  %v1015_v59 = vpop.f32.mrb[37].mxu0  ;;  %v1278_v3 = vpop.f32.mrb[37].mxu1  ;;  %v1701_v10 = vadd.f32 %v1700_v55, %v1699_v61 }
 0x195   :  { %v3875_v13 = vadd.f32 %v1278_v3, %v3766_v42  ;;  %v1016_v14 = vpop.f32.mrb[38].mxu0  ;;  %v2861_v20 = vpop.f32.mrb[38].mxu1 }
 0x196   :  { %5423 = vst [vmem:[#allocation10_spill] sm:$0xff] %v3870_v2  ;;  %v1508_v28 = vadd.f32 %v1507_v9, %v1506_v1  ;;  %v3879_v34 = vadd.f32 %v2861_v20, %v3806_v32  ;;  %v1018_v36 = vpop.f32.mrb[39].mxu0  ;;  %v1281_v6 = vpop.f32.mrb[39].mxu1  ;;  %v1703_v37 = vadd.f32 %v1702_v25, %v1701_v10  ;;  %v1633_v3 = vmul.f32 %v3870_v2, %v3870_v2 }
 0x197   :  { %5424 = vst [vmem:[#allocation11_spill] sm:$0xff] %v3875_v13  ;;  %v1509_v15 = vsel %vm1485_vm1, %v3875_v13, 0.0  ;;  %v1631_v40 = vmul.f32 %v3875_v13, %v3875_v13  ;;  %v3886_v42 = vadd.f32 %v1281_v6, %v3772_v48 }
 0x198   :  { %5425 = vst [vmem:[#allocation12_spill] sm:$0xff] %v3879_v34  ;;  %v1705_v43 = vadd.f32 %v1704_v41, %v1703_v37  ;;  %v1510_v45 = vadd.f32 %v1509_v15, %v1508_v28  ;;  %v1634_v6 = vmul.f32 %v3879_v34, %v3879_v34 }
 0x199   :  { %5426 = vst [vmem:[#allocation13_spill] sm:$0xff] %v3886_v42  ;;  %v1706_v49 = vsel %vm1485_vm1, %v1631_v40, 0.0  ;;  %v1632_v32 = vmul.f32 %v3886_v42, %v3886_v42  ;;  %v1511_v38 = vsel %vm1485_vm1, %v3886_v42, 0.0 }
 0x19a   :  { %v1707_v51 = vadd.f32 %v1706_v49, %v1705_v43  ;;  %v1512_v22 = vadd.f32 %v1511_v38, %v1510_v45 }
 0x19b   :  { %v1021_v52 = vpop.f32.mrb[40].mxu0  ;;  %v2864_v57 = vpop.f32.mrb[40].mxu1  ;;  %v1708_v30 = vsel %vm1485_vm1, %v1632_v32, 0.0 }
 0x19c   :  { %v3895_v61 = vadd.f32 %v2864_v57, %v1013_v62  ;;  %v1023_v48 = vpop.f32.mrb[41].mxu0  ;;  %v1294_v55 = vpop.f32.mrb[41].mxu1  ;;  %v1709_v25 = vadd.f32 %v1708_v30, %v1707_v51  ;;  %v1513_v62 = vsel %vm1485_vm1, %v3870_v2, 0.0  ;;  %v1712_v57 = vsel %vm1485_vm1, %v1634_v6, 0.0 }
 0x19d   :  { %v3898_v11 = vadd.f32 %v1294_v55, %v3830_v63  ;;  %v1024_v1 = vpop.f32.mrb[42].mxu0  ;;  %v2865_v59 = vpop.f32.mrb[42].mxu1  ;;  %v1514_v36 = vadd.f32 %v1513_v62, %v1512_v22  ;;  %v1710_v63 = vsel %vm1485_vm1, %v1633_v3, 0.0 }
 0x19e   :  { %5427 = vst [vmem:[#allocation14_spill] sm:$0xff] %v3895_v61  ;;  %v3902_v9 = vadd.f32 %v2865_v59, %v1016_v14  ;;  %v1026_v10 = vpop.f32.mrb[43].mxu0  ;;  %v1297_v20 = vpop.f32.mrb[43].mxu1  ;;  %v1711_v37 = vadd.f32 %v1710_v63, %v1709_v25  ;;  %v1515_v14 = vsel %vm1485_vm1, %v3879_v34, 0.0 }
 0x19f   :  { %5428 = vst [vmem:[#allocation15_spill] sm:$0xff] %v3898_v11  ;;  %v3905_v28 = vadd.f32 %v1297_v20, %v3843_v19  ;;  %v1635_v41 = vmul.f32 %v3898_v11, %v3898_v11  ;;  %v1516_v49 = vadd.f32 %v1515_v14, %v1514_v36  ;;  %v1517_v30 = vsel %vm1485_vm1, %v3898_v11, 0.0 }
 0x1a0   :  { %5429 = vst [vmem:[#allocation16_spill] sm:$0xff] %v3902_v9  ;;  %v1713_v59 = vadd.f32 %v1712_v57, %v1711_v37 }
 0x1a1   :  { %5430 = vst [vmem:[#allocation17_spill] sm:$0xff] %v3905_v28  ;;  %v1714_v10 = vsel %vm1485_vm1, %v1635_v41, 0.0  ;;  %v1518_v20 = vadd.f32 %v1517_v30, %v1516_v49  ;;  %v1519_v25 = vsel %vm1485_vm1, %v3905_v28, 0.0  ;;  %v1822_v41 = vld [vmem:[#allocation2 + $0x30] sm:$0xff]  ;;  %v1637_v49 = vmul.f32 %v3895_v61, %v3895_v61 }
 0x1a2   :  { %v1715_v62 = vadd.f32 %v1714_v10, %v1713_v59  ;;  %v5375_v30 = vmov 0.0   ;;  %v1521_v59 = vsel %vm1485_vm1, %v3895_v61, 0.0 }
 0x1a3   :  { %v1029_v15 = vpop.f32.mrb[44].mxu0  ;;  %v2868_v40 = vpop.f32.mrb[44].mxu1  ;;  %v1520_v14 = vadd.f32 %v1519_v25, %v1518_v20  ;;  %2926 = vmatprep.mubr.msk.f32.mxu1 %vm3238_vm2, %v5375_v30  ;;  %v1638_v20 = vmul.f32 %v3902_v9, %v3902_v9 }
 0x1a4   :  { %v3916_v19 = vadd.f32 %v2868_v40, %v1029_v15  ;;  %v1031_v43 = vpop.f32.mrb[45].mxu0  ;;  %v1310_v45 = vpop.f32.mrb[45].mxu1 }
 0x1a5   :  { %v3918_v32 = vadd.f32 %v1310_v45, %v1021_v52  ;;  %v1032_v38 = vpop.f32.mrb[46].mxu0  ;;  %v2869_v51 = vpop.f32.mrb[46].mxu1  ;;  %v1636_v52 = vmul.f32 %v3905_v28, %v3905_v28  ;;  %v1823_v45 = vld [vmem:[#allocation2 + $0x38] sm:$0xff]  ;;  %v1522_v10 = vadd.f32 %v1521_v59, %v1520_v14 }
 0x1a6   :  { %5431 = vst [vmem:[#allocation18_spill] sm:$0xff] %v3916_v19  ;;  %v3923_v48 = vadd.f32 %v2869_v51, %v1032_v38  ;;  %v1034_v55 = vpop.f32.mrb[47].mxu0  ;;  %v1313_v22 = vpop.f32.mrb[47].mxu1  ;;  %v3937_v57 = vpack.c.bf16 %v1823_v45, %v1822_v41 }
 0x1a7   :  { %5432 = vst [vmem:[#allocation19_spill] sm:$0xff] %v3918_v32  ;;  %v3925_v3 = vadd.f32 %v1313_v22, %v1024_v1  ;;  %v1716_v6 = vsel %vm1485_vm1, %v1636_v52, 0.0  ;;  %v1718_v52 = vsel %vm1485_vm1, %v1637_v49, 0.0  ;;  %v1720_v49 = vsel %vm1485_vm1, %v1638_v20, 0.0 }
 0x1a8   :  { %5433 = vst [vmem:[#allocation20_spill] sm:$0xff] %v3923_v48  ;;  %v1717_v55 = vadd.f32 %v1716_v6, %v1715_v62  ;;  %2959 = vmatpush3.bf16.msra.mxu1 %v3937_v57  ;;  %v1523_v62 = vsel %vm1485_vm1, %v3902_v9, 0.0  ;;  %v1639_v6 = vmul.f32 %v3918_v32, %v3918_v32  ;;  %v1529_v9 = vsel %vm1485_vm1, %v3916_v19, 0.0 }
 0x1a9   :  { %5434 = vst [vmem:[#allocation21_spill] sm:$0xff] %v3925_v3  ;;  %2960 = vmatprep.subr.bf16.mxu1 %v5373_v53  ;;  %v1524_v41 = vadd.f32 %v1523_v62, %v1522_v10  ;;  %v1527_v10 = vsel %vm1485_vm1, %v3925_v3, 0.0 }
 0x1aa   :  { %v1719_v25 = vadd.f32 %v1718_v52, %v1717_v55  ;;  %v1722_v30 = vsel %vm1485_vm1, %v1639_v6, 0.0 }
 0x1ab   :  { %v1037_v36 = vpop.f32.mrb[48].mxu0  ;;  %v2872_v63 = vpop.f32.mrb[48].mxu1 }
 0x1ac   :  { %v1039_v15 = vpop.f32.mrb[49].mxu0  ;;  %v1326_v40 = vpop.f32.mrb[49].mxu1  ;;  %v1721_v53 = vadd.f32 %v1720_v49, %v1719_v25 }
 0x1ad   :  { %v3933_v37 = vadd.f32 %v1326_v40, %v1037_v36  ;;  %v1040_v1 = vpop.f32.mrb[50].mxu0  ;;  %v2873_v43 = vpop.f32.mrb[50].mxu1 }
 0x1ae   :  { %v1042_v38 = vpop.f32.mrb[51].mxu0  ;;  %v1329_v51 = vpop.f32.mrb[51].mxu1  ;;  %v1723_v62 = vadd.f32 %v1722_v30, %v1721_v53 }
 0x1af   :  { %5435 = vst [vmem:[#allocation22_spill] sm:$0xff] %v3933_v37  ;;  %v3941_v22 = vadd.f32 %v1329_v51, %v1040_v1  ;;  %v1525_v51 = vsel %vm1485_vm1, %v3918_v32, 0.0 }
 0x1b1   :  { %5436 = vst [vmem:[#allocation23_spill] sm:$0xff] %v3941_v22 }
 0x1b3   :  { %v1045_v36 = vpop.f32.mrb[52].mxu0  ;;  %v2876_v15 = vpop.f32.mrb[52].mxu1 }
 0x1b4   :  { %v3954_v40 = vadd.f32 %v2872_v63, %v1045_v36  ;;  %v1047_v1 = vpop.f32.mrb[53].mxu0  ;;  %v1342_v14 = vpop.f32.mrb[53].mxu1  ;;  %v1640_v63 = vmul.f32 %v3925_v3, %v3925_v3  ;;  %v1526_v36 = vadd.f32 %v1525_v51, %v1524_v41  ;;  %v1641_v41 = vmul.f32 %v3916_v19, %v3916_v19 }
 0x1b5   :  { %v1048_v45 = vpop.f32.mrb[54].mxu0  ;;  %v2877_v38 = vpop.f32.mrb[54].mxu1 }
 0x1b6   :  { %5437 = vst [vmem:[#allocation24_spill] sm:$0xff] %v3954_v40  ;;  %v3959_v55 = vadd.f32 %v2873_v43, %v1048_v45  ;;  %v1050_v59 = vpop.f32.mrb[55].mxu0  ;;  %v1345_v52 = vpop.f32.mrb[55].mxu1  ;;  %v1724_v32 = vsel %vm1485_vm1, %v1640_v63, 0.0  ;;  %v1528_v25 = vadd.f32 %v1527_v10, %v1526_v36  ;;  %v1642_v36 = vmul.f32 %v3923_v48, %v3923_v48 }
 0x1b7   :  { %v1725_v30 = vadd.f32 %v1724_v32, %v1723_v62 }
 0x1b8   :  { %5438 = vst [vmem:[#allocation25_spill] sm:$0xff] %v3959_v55  ;;  %v1530_v63 = vadd.f32 %v1529_v9, %v1528_v25 }
 0x1bb   :  { %v1053_v1 = vpop.f32.mrb[56].mxu0  ;;  %v3966_v20 = vpop.f32.mrb[56].mxu1 }
 0x1bc   :  { %v3969_v43 = vadd.f32 %v1342_v14, %v1053_v1  ;;  %v1055_v45 = vpop.f32.mrb[57].mxu0  ;;  %v1358_v59 = vpop.f32.mrb[57].mxu1  ;;  %v1726_v14 = vsel %vm1485_vm1, %v1641_v41, 0.0 }
 0x1bd   :  { %v1056_v49 = vpop.f32.mrb[58].mxu0  ;;  %v3971_v6 = vpop.f32.mrb[58].mxu1  ;;  %v1727_v10 = vadd.f32 %v1726_v14, %v1725_v30  ;;  %v1728_v30 = vsel %vm1485_vm1, %v1642_v36, 0.0  ;;  %v1533_v14 = vsel %vm1485_vm1, %v3933_v37, 0.0  ;;  %v1645_v36 = vmul.f32 %v3954_v40, %v3954_v40 }
 0x1be   :  { %5439 = vst [vmem:[#allocation26_spill] sm:$0xff] %v3969_v43  ;;  %v3975_v51 = vadd.f32 %v1345_v52, %v1056_v49  ;;  %v1058_v3 = vpop.f32.mrb[59].mxu0  ;;  %v1361_v53 = vpop.f32.mrb[59].mxu1  ;;  %v1531_v52 = vsel %vm1485_vm1, %v3923_v48, 0.0 }
 0x1bf   :  { %v1643_v3 = vmul.f32 %v3933_v37, %v3933_v37  ;;  %v1532_v9 = vadd.f32 %v1531_v52, %v1530_v63  ;;  %v1729_v28 = vadd.f32 %v1728_v30, %v1727_v10  ;;  %v1535_v52 = vsel %vm1485_vm1, %v3941_v22, 0.0 }
 0x1c0   :  { %5440 = vst [vmem:[#allocation27_spill] sm:$0xff] %v3975_v51  ;;  %v1537_v10 = vsel %vm1485_vm1, %v3954_v40, 0.0  ;;  %v1734_v11 = vsel %vm1485_vm1, %v1645_v36, 0.0  ;;  %v1541_v36 = vsel %vm1485_vm1, %v3969_v43, 0.0 }
 0x1c1   :  { %v1534_v63 = vadd.f32 %v1533_v14, %v1532_v9 }
 0x1c3   :  { %v1061_v1 = vpop.f32.mrb[60].mxu0  ;;  %v3982_v45 = vpop.f32.mrb[60].mxu1  ;;  %v1536_v9 = vadd.f32 %v1535_v52, %v1534_v63  ;;  %v1647_v63 = vmul.f32 %v3969_v43, %v3969_v43 }
 0x1c4   :  { %v3988_v32 = vadd.f32 %v2876_v15, %v1061_v1  ;;  %v1063_v62 = vpop.f32.mrb[61].mxu0  ;;  %v3990_v49 = vpop.f32.mrb[61].mxu1  ;;  %v1730_v15 = vsel %vm1485_vm1, %v1643_v3, 0.0  ;;  %v1644_v1 = vmul.f32 %v3941_v22, %v3941_v22 }
 0x1c5   :  { %v1064_v25 = vpop.f32.mrb[62].mxu0  ;;  %v3992_v41 = vpop.f32.mrb[62].mxu1  ;;  %v1731_v62 = vadd.f32 %v1730_v15, %v1729_v28  ;;  %v1646_v28 = vmul.f32 %v3959_v55, %v3959_v55 }
 0x1c6   :  { %5441 = vst [vmem:[#allocation28_spill] sm:$0xff] %v3988_v32  ;;  %v3997_v19 = vadd.f32 %v2877_v38, %v1064_v25  ;;  %v1066_v48 = vpop.f32.mrb[63].mxu0  ;;  %v3999_v61 = vpop.f32.mrb[63].mxu1 }
 0x1c7   :  { %v1732_v48 = vsel %vm1485_vm1, %v1644_v1, 0.0 }
 0x1c8   :  { %5442 = vst [vmem:[#allocation29_spill] sm:$0xff] %v3997_v19  ;;  %v1733_v40 = vadd.f32 %v1732_v48, %v1731_v62  ;;  %v1648_v62 = vmul.f32 %v3975_v51, %v3975_v51 }
 0x1ca   :  { %v1735_v52 = vadd.f32 %v1734_v11, %v1733_v40 }
 0x1cb   :  { %v1069_v37 = vpop.f32.mrb[64].mxu0  ;;  %v4008_v38 = vpop.f32.mrb[64].mxu1 }
 0x1cc   :  { %v4013_v3 = vadd.f32 %v1358_v59, %v1069_v37  ;;  %v1071_v25 = vpop.f32.mrb[65].mxu0  ;;  %v4015_v30 = vpop.f32.mrb[65].mxu1  ;;  %v1538_v37 = vadd.f32 %v1537_v10, %v1536_v9  ;;  %v1539_v59 = vsel %vm1485_vm1, %v3959_v55, 0.0 }
 0x1cd   :  { %v1072_v14 = vpop.f32.mrb[66].mxu0  ;;  %v4017_v22 = vpop.f32.mrb[66].mxu1  ;;  %v1736_v25 = vsel %vm1485_vm1, %v1646_v28, 0.0 }
 0x1ce   :  { %5443 = vst [vmem:[#allocation30_spill] sm:$0xff] %v4013_v3  ;;  %v4022_v15 = vadd.f32 %v1361_v53, %v1072_v14  ;;  %v1074_v1 = vpop.f32.mrb[67].mxu0  ;;  %v4024_v34 = vpop.f32.mrb[67].mxu1  ;;  %v1540_v2 = vadd.f32 %v1539_v59, %v1538_v37  ;;  %v1737_v11 = vadd.f32 %v1736_v25, %v1735_v52  ;;  %v1543_v37 = vsel %vm1485_vm1, %v3975_v51, 0.0 }
 0x1cf   :  { %v1738_v1 = vsel %vm1485_vm1, %v1647_v63, 0.0  ;;  %v1649_v59 = vmul.f32 %v3988_v32, %v3988_v32 }
 0x1d0   :  { %5444 = vst [vmem:[#allocation31_spill] sm:$0xff] %v4022_v15  ;;  %v1542_v40 = vadd.f32 %v1541_v36, %v1540_v2  ;;  %v1545_v2 = vsel %vm1485_vm1, %v3988_v32, 0.0  ;;  %v1650_v36 = vmul.f32 %v3997_v19, %v3997_v19 }
 0x1d1   :  { %v1742_v25 = vsel %vm1485_vm1, %v1649_v59, 0.0 }
 0x1d2   :  { %v1544_v52 = vadd.f32 %v1543_v37, %v1542_v40 }
 0x1d3   :  { %v1077_v53 = vpop.f32.mrb[68].mxu0  ;;  %v4033_v14 = vpop.f32.mrb[68].mxu1 }
 0x1d4   :  { %v4039_v48 = vadd.f32 %v3966_v20, %v1077_v53  ;;  %v1079_v10 = vpop.f32.mrb[69].mxu0  ;;  %v4041_v9 = vpop.f32.mrb[69].mxu1  ;;  %v1739_v53 = vadd.f32 %v1738_v1, %v1737_v11  ;;  %v1546_v42 = vadd.f32 %v1545_v2, %v1544_v52  ;;  %v1651_v1 = vmul.f32 %v4013_v3, %v4013_v3 }
 0x1d5   :  { %v1080_v28 = vpop.f32.mrb[70].mxu0  ;;  %v4043_v55 = vpop.f32.mrb[70].mxu1  ;;  %v1740_v10 = vsel %vm1485_vm1, %v1648_v62, 0.0 }
 0x1d6   :  { %5445 = vst [vmem:[#allocation32_spill] sm:$0xff] %v4039_v48  ;;  %v4050_v63 = vadd.f32 %v3971_v6, %v1080_v28  ;;  %v1082_v43 = vpop.f32.mrb[71].mxu0  ;;  %v4052_v20 = vpop.f32.mrb[71].mxu1  ;;  %v1741_v51 = vadd.f32 %v1740_v10, %v1739_v53  ;;  %v1744_v53 = vsel %vm1485_vm1, %v1650_v36, 0.0  ;;  %v1549_v10 = vsel %vm1485_vm1, %v4013_v3, 0.0 }
 0x1d7   :  { %v1547_v43 = vsel %vm1485_vm1, %v3997_v19, 0.0  ;;  %v1551_v36 = vsel %vm1485_vm1, %v4022_v15, 0.0  ;;  %v1653_v3 = vmul.f32 %v4039_v48, %v4039_v48 }
 0x1d8   :  { %v1743_v28 = vadd.f32 %v1742_v25, %v1741_v51  ;;  %v1652_v51 = vmul.f32 %v4022_v15, %v4022_v15 }
 0x1d9   :  { %v1750_v15 = vsel %vm1485_vm1, %v1653_v3, 0.0 }
 0x1da   :  { %v1745_v25 = vadd.f32 %v1744_v53, %v1743_v28 }
 0x1db   :  { %v1085_v13 = vpop.f32.mrb[72].mxu0  ;;  %v4060_v6 = vpop.f32.mrb[72].mxu1 }
 0x1dc   :  { %v4067_v62 = vadd.f32 %v3990_v49, %v1085_v13  ;;  %v1087_v11 = vpop.f32.mrb[73].mxu0  ;;  %v4069_v40 = vpop.f32.mrb[73].mxu1  ;;  %v1548_v13 = vadd.f32 %v1547_v43, %v1546_v42  ;;  %v1746_v49 = vsel %vm1485_vm1, %v1651_v1, 0.0  ;;  %v1553_v42 = vsel %vm1485_vm1, %v4039_v48, 0.0 }
 0x1dd   :  { %v1088_v37 = vpop.f32.mrb[74].mxu0  ;;  %v4071_v59 = vpop.f32.mrb[74].mxu1  ;;  %v1747_v32 = vadd.f32 %v1746_v49, %v1745_v25 }
 0x1de   :  { %v4077_v2 = vadd.f32 %v3999_v61, %v1088_v37  ;;  %v1090_v52 = vpop.f32.mrb[75].mxu0  ;;  %v4079_v19 = vpop.f32.mrb[75].mxu1  ;;  %v1550_v11 = vadd.f32 %v1549_v10, %v1548_v13 }
 0x1df   :  { %v1748_v52 = vsel %vm1485_vm1, %v1652_v51, 0.0  ;;  %v1654_v51 = vmul.f32 %v4050_v63, %v4050_v63 }
 0x1e0   :  { %v1552_v10 = vadd.f32 %v1551_v36, %v1550_v11  ;;  %v1555_v11 = vsel %vm1485_vm1, %v4050_v63, 0.0 }
 0x1e3   :  { %v1093_v61 = vpop.f32.mrb[76].mxu0  ;;  %v2900_v37 = vpop.f32.mrb[76].mxu1 }
 0x1e4   :  { %v4092_v43 = vadd.f32 %v3982_v45, %v1093_v61  ;;  %v4095_v1 = vadd.f32 %v2900_v37, %v3728_v0  ;;  %v1095_v28 = vpop.f32.mrb[77].mxu0  ;;  %v1438_v53 = vpop.f32.mrb[77].mxu1  ;;  %v1749_v45 = vadd.f32 %v1748_v52, %v1747_v32  ;;  %v1554_v61 = vadd.f32 %v1553_v42, %v1552_v10 }
 0x1e5   :  { %v4098_v13 = vadd.f32 %v1438_v53, %v3724_v56  ;;  %v1096_v49 = vpop.f32.mrb[78].mxu0  ;;  %v2901_v25 = vpop.f32.mrb[78].mxu1  ;;  %v1655_v56 = vmul.f32 %v4067_v62, %v4067_v62  ;;  %v1557_v32 = vsel %vm1485_vm1, %v4067_v62, 0.0  ;;  %v1656_v53 = vmul.f32 %v4077_v2, %v4077_v2 }
 0x1e6   :  { %v1098_v48 = vpop.f32.mrb[79].mxu0  ;;  %v1441_v33 = vpop.f32.mrb[79].mxu1  ;;  %v4104_v0 = vadd.f32 %v3992_v41, %v1096_v49  ;;  %v4111_v36 = vadd.f32 %v2901_v25, %v3730_v4  ;;  %v1751_v37 = vadd.f32 %v1750_v15, %v1749_v45  ;;  %v1556_v41 = vadd.f32 %v1555_v11, %v1554_v61 }
 0x1e7   :  { %v4114_v3 = vadd.f32 %v1441_v33, %v3726_v60  ;;  %v1752_v48 = vsel %vm1485_vm1, %v1654_v51, 0.0  ;;  %v1754_v28 = vsel %vm1485_vm1, %v1655_v56, 0.0  ;;  %v1559_v61 = vsel %vm1485_vm1, %v4077_v2, 0.0 }
 0x1e8   :  { %v1753_v10 = vadd.f32 %v1752_v48, %v1751_v37  ;;  %v1558_v49 = vadd.f32 %v1557_v32, %v1556_v41  ;;  %v1657_v11 = vmul.f32 %v4092_v43, %v4092_v43  ;;  %v1756_v37 = vsel %vm1485_vm1, %v1656_v53, 0.0 }
 0x1e9   :  { %v1563_v53 = vsel %vm1485_vm1, %v4104_v0, 0.0 }
 0x1ea   :  { %v1560_v41 = vadd.f32 %v1559_v61, %v1558_v49 }
 0x1eb   :  { %v1101_v52 = vpop.f32.mrb[80].mxu0  ;;  %v2904_v42 = vpop.f32.mrb[80].mxu1 }
 0x1ec   :  { %v4123_v4 = vadd.f32 %v4015_v30, %v1101_v52  ;;  %v4126_v60 = vadd.f32 %v2904_v42, %v3740_v16  ;;  %v1103_v33 = vpop.f32.mrb[81].mxu0  ;;  %v1454_v15 = vpop.f32.mrb[81].mxu1  ;;  %v1755_v52 = vadd.f32 %v1754_v28, %v1753_v10  ;;  %v1758_v42 = vsel %vm1485_vm1, %v1657_v11, 0.0 }
 0x1ed   :  { %v4129_v25 = vadd.f32 %v1454_v15, %v3734_v8  ;;  %v1104_v51 = vpop.f32.mrb[82].mxu0  ;;  %v2905_v45 = vpop.f32.mrb[82].mxu1  ;;  %v1561_v8 = vsel %vm1485_vm1, %v4092_v43, 0.0  ;;  %v1658_v28 = vmul.f32 %v4104_v0, %v4104_v0 }
 0x1ee   :  { %v1106_v30 = vpop.f32.mrb[83].mxu0  ;;  %v1457_v56 = vpop.f32.mrb[83].mxu1  ;;  %v4136_v16 = vadd.f32 %v4024_v34, %v1104_v51  ;;  %v4142_v48 = vadd.f32 %v2905_v45, %v3746_v23  ;;  %v1757_v33 = vadd.f32 %v1756_v37, %v1755_v52  ;;  %v1562_v34 = vadd.f32 %v1561_v8, %v1560_v41 }
 0x1ef   :  { %v4145_v32 = vadd.f32 %v1457_v56, %v3738_v12  ;;  %v1659_v23 = vmul.f32 %v4123_v4, %v4123_v4  ;;  %v1760_v52 = vsel %vm1485_vm1, %v1658_v28, 0.0  ;;  %v1565_v37 = vsel %vm1485_vm1, %v4123_v4, 0.0 }
 0x1f0   :  { %v1759_v61 = vadd.f32 %v1758_v42, %v1757_v33  ;;  %v1660_v42 = vmul.f32 %v4136_v16, %v4136_v16 }
 0x1f2   :  { %v1761_v28 = vadd.f32 %v1760_v52, %v1759_v61 }
 0x1f3   :  { %v1109_v15 = vpop.f32.mrb[84].mxu0  ;;  %v2908_v10 = vpop.f32.mrb[84].mxu1 }
 0x1f4   :  { %v4155_v51 = vadd.f32 %v4008_v38, %v1109_v15  ;;  %v4158_v12 = vadd.f32 %v2908_v10, %v3760_v35  ;;  %v1111_v49 = vpop.f32.mrb[85].mxu0  ;;  %v1470_v45 = vpop.f32.mrb[85].mxu1  ;;  %v1564_v38 = vadd.f32 %v1563_v53, %v1562_v34  ;;  %v1762_v35 = vsel %vm1485_vm1, %v1659_v23, 0.0 }
 0x1f5   :  { %v4161_v11 = vadd.f32 %v1470_v45, %v3752_v27  ;;  %v1112_v30 = vpop.f32.mrb[86].mxu0  ;;  %v2909_v56 = vpop.f32.mrb[86].mxu1  ;;  %v1567_v49 = vsel %vm1485_vm1, %v4136_v16, 0.0  ;;  %v1763_v34 = vadd.f32 %v1762_v35, %v1761_v28  ;;  %v1764_v23 = vsel %vm1485_vm1, %v1660_v42, 0.0 }
 0x1f6   :  { %v1114_v8 = vpop.f32.mrb[87].mxu0  ;;  %v1473_v41 = vpop.f32.mrb[87].mxu1  ;;  %v4167_v15 = vadd.f32 %v4017_v22, %v1112_v30  ;;  %v4173_v27 = vadd.f32 %v2909_v56, %v3764_v39  ;;  %v1566_v10 = vadd.f32 %v1565_v37, %v1564_v38  ;;  %v1661_v22 = vmul.f32 %v4155_v51, %v4155_v51 }
 0x1f7   :  { %v4176_v33 = vadd.f32 %v1473_v41, %v3756_v31  ;;  %v1569_v45 = vsel %vm1485_vm1, %v4155_v51, 0.0  ;;  %v1765_v41 = vadd.f32 %v1764_v23, %v1763_v34 }
 0x1f8   :  { %v1568_v30 = vadd.f32 %v1567_v49, %v1566_v10  ;;  %v1766_v56 = vsel %vm1485_vm1, %v1661_v22, 0.0  ;;  %v1662_v52 = vmul.f32 %v4167_v15, %v4167_v15  ;;  %v1571_v35 = vsel %vm1485_vm1, %v4167_v15, 0.0 }
 0x1f9   :  { %v1767_v42 = vadd.f32 %v1766_v56, %v1765_v41 }
 0x1fa   :  { %v1570_v38 = vadd.f32 %v1569_v45, %v1568_v30  ;;  %v1768_v28 = vsel %vm1485_vm1, %v1662_v52, 0.0 }
 0x1fb   :  { %v1117_v53 = vpop.f32.mrb[88].mxu0  ;;  %v1769_v45 = vadd.f32 %v1768_v28, %v1767_v42 }
 0x1fc   :  { %v4186_v39 = vadd.f32 %v4041_v9, %v1117_v53  ;;  %v1119_v31 = vpop.f32.mrb[89].mxu0  ;;  %v1572_v49 = vadd.f32 %v1571_v35, %v1570_v38 }
 0x1fd   :  { %v1120_v61 = vpop.f32.mrb[90].mxu0 }
 0x1fe   :  { %v4192_v37 = vadd.f32 %v4052_v20, %v1120_v61  ;;  %v1122_v8 = vpop.f32.mrb[91].mxu0  ;;  %v1663_v9 = vmul.f32 %v4186_v39, %v4186_v39  ;;  %v1573_v10 = vsel %vm1485_vm1, %v4186_v39, 0.0 }
 0x1ff   :  { %v1574_v31 = vadd.f32 %v1573_v10, %v1572_v49 }
 0x200   :  { %v1770_v20 = vsel %vm1485_vm1, %v1663_v9, 0.0  ;;  %v1664_v34 = vmul.f32 %v4192_v37, %v4192_v37  ;;  %v1575_v61 = vsel %vm1485_vm1, %v4192_v37, 0.0 }
 0x201   :  { %v1771_v41 = vadd.f32 %v1770_v20, %v1769_v45  ;;  %v1576_v35 = vadd.f32 %v1575_v61, %v1574_v31 }
 0x202   :  { %v1772_v38 = vsel %vm1485_vm1, %v1664_v34, 0.0 }
 0x203   :  { %v1125_v22 = vpop.f32.mrb[92].mxu0  ;;  %v1773_v28 = vadd.f32 %v1772_v38, %v1771_v41 }
 0x204   :  { %v4205_v53 = vadd.f32 %v4033_v14, %v1125_v22  ;;  %v1127_v23 = vpop.f32.mrb[93].mxu0 }
 0x205   :  { %v1128_v30 = vpop.f32.mrb[94].mxu0 }
 0x206   :  { %v1665_v56 = vmul.f32 %v4205_v53, %v4205_v53  ;;  %v4212_v52 = vadd.f32 %v4043_v55, %v1128_v30  ;;  %v1130_v8 = vpop.f32.mrb[95].mxu0  ;;  %v1577_v14 = vsel %vm1485_vm1, %v4205_v53, 0.0 }
 0x207   :  { %v1578_v10 = vadd.f32 %v1577_v14, %v1576_v35 }
 0x208   :  { %v1774_v9 = vsel %vm1485_vm1, %v1665_v56, 0.0  ;;  %v1666_v42 = vmul.f32 %v4212_v52, %v4212_v52  ;;  %v1579_v55 = vsel %vm1485_vm1, %v4212_v52, 0.0 }
 0x209   :  { %v1775_v34 = vadd.f32 %v1774_v9, %v1773_v28  ;;  %v1580_v8 = vadd.f32 %v1579_v55, %v1578_v10 }
 0x20a   :  { %v1776_v45 = vsel %vm1485_vm1, %v1666_v42, 0.0 }
 0x20b   :  { %v1133_v49 = vpop.f32.mrb[96].mxu0  ;;  %v1777_v38 = vadd.f32 %v1776_v45, %v1775_v34 }
 0x20c   :  { %v4223_v22 = vadd.f32 %v4069_v40, %v1133_v49  ;;  %v1135_v20 = vpop.f32.mrb[97].mxu0 }
 0x20d   :  { %v1136_v23 = vpop.f32.mrb[98].mxu0 }
 0x20e   :  { %v1581_v31 = vsel %vm1485_vm1, %v4223_v22, 0.0  ;;  %v1667_v30 = vmul.f32 %v4223_v22, %v4223_v22  ;;  %v4231_v61 = vadd.f32 %v4079_v19, %v1136_v23  ;;  %v1138_v56 = vpop.f32.mrb[99].mxu0 }
 0x20f   :  { %v1582_v14 = vadd.f32 %v1581_v31, %v1580_v8  ;;  %v1671_v56 = vmul.f32 %v4098_v13, %v4098_v13 }
 0x210   :  { %v1778_v41 = vsel %vm1485_vm1, %v1667_v30, 0.0  ;;  %v1668_v40 = vmul.f32 %v4231_v61, %v4231_v61  ;;  %v1583_v35 = vsel %vm1485_vm1, %v4231_v61, 0.0 }
 0x211   :  { %v1779_v9 = vadd.f32 %v1778_v41, %v1777_v38  ;;  %v1584_v20 = vadd.f32 %v1583_v35, %v1582_v14  ;;  %v1672_v14 = vmul.f32 %v4114_v3, %v4114_v3 }
 0x212   :  { %v1780_v28 = vsel %vm1485_vm1, %v1668_v40, 0.0 }
 0x213   :  { %v1141_v42 = vpop.f32.mrb[100].mxu0  ;;  %v1781_v31 = vadd.f32 %v1780_v28, %v1779_v9  ;;  %v1673_v28 = vmul.f32 %v4095_v1, %v4095_v1 }
 0x214   :  { %v4240_v49 = vadd.f32 %v4060_v6, %v1141_v42  ;;  %v1143_v19 = vpop.f32.mrb[101].mxu0 }
 0x215   :  { %v1144_v10 = vpop.f32.mrb[102].mxu0  ;;  %v1786_v19 = vsel %vm1485_vm1, %v1671_v56, 0.0  ;;  %v1595_v56 = vsel %vm1485_vm1, %v4111_v36, 0.0 }
 0x216   :  { %v1585_v55 = vsel %vm1485_vm1, %v4240_v49, 0.0  ;;  %v1669_v34 = vmul.f32 %v4240_v49, %v4240_v49  ;;  %v4247_v23 = vadd.f32 %v4071_v59, %v1144_v10  ;;  %v1146_v45 = vpop.f32.mrb[103].mxu0  ;;  %v1589_v59 = vsel %vm1485_vm1, %v4098_v13, 0.0 }
 0x217   :  { %v1586_v30 = vadd.f32 %v1585_v55, %v1584_v20  ;;  %v1591_v20 = vsel %vm1485_vm1, %v4114_v3, 0.0  ;;  %v1674_v45 = vmul.f32 %v4111_v36, %v4111_v36 }
 0x218   :  { %v1782_v6 = vsel %vm1485_vm1, %v1669_v34, 0.0  ;;  %v1587_v8 = vsel %vm1485_vm1, %v4247_v23, 0.0  ;;  %v1670_v41 = vmul.f32 %v4247_v23, %v4247_v23  ;;  %v1593_v34 = vsel %vm1485_vm1, %v4095_v1, 0.0 }
 0x219   :  { %v1783_v40 = vadd.f32 %v1782_v6, %v1781_v31  ;;  %v1588_v38 = vadd.f32 %v1587_v8, %v1586_v30  ;;  %v1788_v31 = vsel %vm1485_vm1, %v1672_v14, 0.0  ;;  %v1790_v8 = vsel %vm1485_vm1, %v1673_v28, 0.0 }
 0x21a   :  { %v1784_v35 = vsel %vm1485_vm1, %v1670_v41, 0.0  ;;  %v1675_v41 = vmul.f32 %v4129_v25, %v4129_v25  ;;  %v1676_v14 = vmul.f32 %v4145_v32, %v4145_v32  ;;  %v1677_v28 = vmul.f32 %v4126_v60, %v4126_v60 }
 0x21b   :  { %v1590_v9 = vadd.f32 %v1589_v59, %v1588_v38  ;;  %v1785_v42 = vadd.f32 %v1784_v35, %v1783_v40  ;;  %v1792_v59 = vsel %vm1485_vm1, %v1674_v45, 0.0  ;;  %v1597_v35 = vsel %vm1485_vm1, %v4129_v25, 0.0 }
 0x21c   :  { %v1678_v45 = vmul.f32 %v4142_v48, %v4142_v48 }
 0x21d   :  { %v1592_v10 = vadd.f32 %v1591_v20, %v1590_v9  ;;  %v1787_v55 = vadd.f32 %v1786_v19, %v1785_v42  ;;  %v1794_v19 = vsel %vm1485_vm1, %v1675_v41, 0.0  ;;  %v1599_v20 = vsel %vm1485_vm1, %v4145_v32, 0.0 }
 0x21e   :  { %v1679_v41 = vmul.f32 %v4161_v11, %v4161_v11 }
 0x21f   :  { %v1594_v30 = vadd.f32 %v1593_v34, %v1592_v10  ;;  %v1789_v6 = vadd.f32 %v1788_v31, %v1787_v55  ;;  %v1601_v34 = vsel %vm1485_vm1, %v4126_v60, 0.0  ;;  %v1796_v31 = vsel %vm1485_vm1, %v1676_v14, 0.0 }
 0x220   :  { %v1680_v14 = vmul.f32 %v4176_v33, %v4176_v33 }
 0x221   :  { %v1596_v40 = vadd.f32 %v1595_v56, %v1594_v30  ;;  %v1791_v38 = vadd.f32 %v1790_v8, %v1789_v6  ;;  %v1798_v8 = vsel %vm1485_vm1, %v1677_v28, 0.0  ;;  %v1603_v56 = vsel %vm1485_vm1, %v4142_v48, 0.0 }
 0x222   :  { %v1681_v28 = vmul.f32 %v4158_v12, %v4158_v12 }
 0x223   :  { %v1598_v9 = vadd.f32 %v1597_v35, %v1596_v40  ;;  %v1793_v42 = vadd.f32 %v1792_v59, %v1791_v38  ;;  %v1800_v59 = vsel %vm1485_vm1, %v1678_v45, 0.0  ;;  %v1605_v35 = vsel %vm1485_vm1, %v4161_v11, 0.0 }
 0x224   :  { %v1804_v45 = vsel %vm1485_vm1, %v1680_v14, 0.0 }
 0x225   :  { %v1600_v10 = vadd.f32 %v1599_v20, %v1598_v9  ;;  %v1795_v55 = vadd.f32 %v1794_v19, %v1793_v42  ;;  %v1802_v19 = vsel %vm1485_vm1, %v1679_v41, 0.0  ;;  %v1607_v20 = vsel %vm1485_vm1, %v4176_v33, 0.0 }
 0x227   :  { %v1602_v30 = vadd.f32 %v1601_v34, %v1600_v10  ;;  %v1797_v6 = vadd.f32 %v1796_v31, %v1795_v55  ;;  %v1609_v34 = vsel %vm1485_vm1, %v4158_v12, 0.0 }
 0x229   :  { %v1604_v40 = vadd.f32 %v1603_v56, %v1602_v30  ;;  %v1799_v38 = vadd.f32 %v1798_v8, %v1797_v6  ;;  %v1806_v6 = vsel %vm1485_vm1, %v1681_v28, 0.0  ;;  %v1611_v8 = vsel %vm1485_vm1, %v4173_v27, 0.0 }
 0x22a   :  { %v1682_v56 = vmul.f32 %v4173_v27, %v4173_v27  ;;  %v5446_v28 = vmov 0.0  }
 0x22b   :  { %v1606_v9 = vadd.f32 %v1605_v35, %v1604_v40  ;;  %v1801_v42 = vadd.f32 %v1800_v59, %v1799_v38 }
 0x22c   :  { %v1808_v59 = vsel %vm1485_vm1, %v1682_v56, 0.0 }
 0x22d   :  { %v1608_v10 = vadd.f32 %v1607_v20, %v1606_v9  ;;  %v1803_v55 = vadd.f32 %v1802_v19, %v1801_v42 }
 0x22f   :  { %v1610_v31 = vadd.f32 %v1609_v34, %v1608_v10  ;;  %v1805_v30 = vadd.f32 %v1804_v45, %v1803_v55  ;;  %v5447_v34 = vmov 0.0|0.0  }
 0x231   :  { %v1612_v41 = vadd.f32 %v1611_v8, %v1610_v31  ;;  %v1807_v40 = vadd.f32 %v1806_v6, %v1805_v30 }
 0x233   :  { %v1613_v38 = vrot.slane %v1612_v41, 4  ;;  %v1809_v9 = vadd.f32 %v1808_v59, %v1807_v40 }
 0x235   :  { %v1614_v35 = vadd.f32 %v1613_v38, %v1612_v41  ;;  %v1810_v14 = vrot.slane %v1809_v9, 4 }
 0x237   :  { %v1615_v42 = vrot.slane %v1614_v35, 2  ;;  %v1811_v55 = vadd.f32 %v1810_v14, %v1809_v9 }
 0x239   :  { %v1616_v19 = vadd.f32 %v1615_v42, %v1614_v35  ;;  %v1812_v45 = vrot.slane %v1811_v55, 2 }
 0x23b   :  { %v1617_v20 = vrot.slane %v1616_v19, 1  ;;  %v1813_v31 = vadd.f32 %v1812_v45, %v1811_v55 }
 0x23d   :  { %v1618_v10 = vadd.f32 %v1617_v20, %v1616_v19  ;;  %v1814_v30 = vrot.slane %v1813_v31, 1  ;;  %v1976_v19 = vld [vmem:[#allocation4] sm:$0x1] }
 0x23f   :  { %2927 = vmatmul.mubr.msk.f32.vlgmr.msra.gmra.mrb[88].mxu1 %vm1485_vm1, %v1618_v10  ;;  %v1815_v6 = vadd.f32 %v1814_v30, %v1813_v31  ;;  %v4329_v10 = vld [vmem:[#allocation6] sm:$0x1] }
 0x240   :  { %2962 = vmatpush3.bf16.msra.mxu1 %v3720_v54  ;;  %2945 = vmatprep.mubr.msk.f32.mxu1 %vm3238_vm2, %v5446_v28 }
 0x241   :  { %2963 = vmatprep.subr.bf16.mxu1 %v5447_v34 }
 0x244   :  { %2965 = vmatpush3.bf16.msra.mxu1 %v3742_v21 }
 0x245   :  { %2966 = vmatprep.subr.bf16.mxu1 %v5447_v34 }
 0x248   :  { %2968 = vmatpush3.bf16.msra.mxu1 %v3798_v24  ;;  %v1984_v24 = vlaneseq }
 0x249   :  { %2969 = vmatprep.subr.bf16.mxu1 %v5447_v34 }
 0x24a   :  { %v4326_v42 = vshrl.u32 %v1984_v24, 7  ;;  %v5455_v24 = vld [vmem:[#allocation14_spill] sm:$0xff] }
 0x24c   :  { %2971 = vmatpush3.bf16.msra.mxu1 %v3937_v57  ;;  %v5400_v57 = vsub.s32 0, %v4326_v42 }
 0x24f   :  { %2946 = vmatmul.mubr.msk.f32.vlgmr.msra.gmra.mrb[90].mxu1 %vm1485_vm1, %v1815_v6 }
 0x312   :  { %v1893_v54 = vpop.f32.mrb[88].mxu1 }
 0x313   :  { %v2928_v8 = vpop.f32.mrb[89].mxu1  ;;  %v1971_v56 = vmul.f32 0.00048828125, %v1893_v54 }
 0x314   :  { %v5448_v8 = vld [vmem:[#allocation9_spill] sm:$0xff] }
 0x315   :  { %v1973_v40 = vmul.f32 %v1971_v56, %v1971_v56 }
 0x322   :  { %v1966_v41 = vpop.f32.mrb[90].mxu1 }
 0x323   :  { %v1972_v38 = vmul.f32 0.00048828125, %v1966_v41  ;;  %v2947_v21 = vpop.f32.mrb[91].mxu1  ;;  %v5450_v41 = vld [vmem:[#allocation13_spill] sm:$0xff] }
 0x324   :  { %v5453_v21 = vld [vmem:[#allocation15_spill] sm:$0xff] }
 0x325   :  { %v1974_v59 = vsub.f32 %v1972_v38, %v1973_v40  ;;  %v5451_v40 = vld [vmem:[#allocation10_spill] sm:$0xff]  ;;  %v5452_v38 = vld [vmem:[#allocation12_spill] sm:$0xff] }
 0x327   :  { %v1975_v35 = vmax.f32 %v1974_v59, 0.0 }
 0x329   :  { %v1977_v9 = vadd.f32 1e-05, %v1975_v35  ;;  %v5454_v35 = vld [vmem:[#allocation17_spill] sm:$0xff] }
 0x32b   :  { %3159 = vrsqrt.f32 %v1977_v9 }
 0x335   :  { %v3160_v14 = vpop.eup %3159 }
 0x336   :  { %v1979_v20 = vmul.f32 %v3160_v14, %v1976_v19  ;;  %v5456_v14 = vld [vmem:[#allocation16_spill] sm:$0xff] }
 0x338   :  { %v4331_v55 = vmul.f32 %v1979_v20, %v1971_v56  ;;  %v4335_v28 = vrot.slane %v1979_v20, %v5400_v57  ;;  %v5449_v56 = vld [vmem:[#allocation11_spill] sm:$0xff]  ;;  %v5468_v57 = vld [vmem:[#allocation24_spill] sm:$0xff] }
 0x33a   :  { %v1982_v34 = vsub.f32 %v4329_v10, %v4331_v55  ;;  %v4341_v45 = vmul.f32 %v4335_v28, %v3770_v47  ;;  %v4345_v31 = vmul.f32 %v4335_v28, %v3778_v58  ;;  %v4349_v30 = vmul.f32 %v4335_v28, %v3768_v44  ;;  %v5457_v10 = vld [vmem:[#allocation19_spill] sm:$0xff] }
 0x33b   :  { %v4353_v6 = vmul.f32 %v4335_v28, %v3774_v50  ;;  %v4357_v54 = vmul.f32 %v4335_v28, %v3804_v29  ;;  %v4361_v47 = vmul.f32 %v4335_v28, %v3818_v46  ;;  %v4365_v58 = vmul.f32 %v4335_v28, %v3796_v18 }
 0x33c   :  { %v4369_v44 = vmul.f32 %v4335_v28, %v3815_v7  ;;  %v4373_v50 = vmul.f32 %v4335_v28, %v3841_v17  ;;  %v4377_v29 = vmul.f32 %v4335_v28, %v3854_v26  ;;  %v4381_v46 = vmul.f32 %v4335_v28, %v3836_v5 }
 0x33d   :  { %v4385_v18 = vmul.f32 %v4335_v28, %v5448_v8  ;;  %v4389_v7 = vmul.f32 %v4335_v28, %v5449_v56  ;;  %v4393_v17 = vmul.f32 %v4335_v28, %v5450_v41  ;;  %v4397_v26 = vmul.f32 %v4335_v28, %v5451_v40  ;;  %v5458_v8 = vld [vmem:[#allocation21_spill] sm:$0xff]  ;;  %v5460_v41 = vld [vmem:[#allocation18_spill] sm:$0xff] }
 0x33e   :  { %v4401_v5 = vmul.f32 %v4335_v28, %v5452_v38  ;;  %v4405_v59 = vmul.f32 %v4335_v28, %v5453_v21  ;;  %v4409_v9 = vmul.f32 %v4335_v28, %v5454_v35  ;;  %v4413_v19 = vmul.f32 %v4335_v28, %v5455_v24  ;;  %v5462_v38 = vld [vmem:[#allocation20_spill] sm:$0xff]  ;;  %v5464_v35 = vld [vmem:[#allocation22_spill] sm:$0xff] }
 0x33f   :  { %v4417_v20 = vmul.f32 %v4335_v28, %v5456_v14  ;;  %v4421_v55 = vmul.f32 %v4335_v28, %v5457_v10  ;;  %v4425_v56 = vmul.f32 %v4335_v28, %v5458_v8  ;;  %v4429_v40 = vmul.f32 %v4335_v28, %v5460_v41  ;;  %v5466_v14 = vld [vmem:[#allocation23_spill] sm:$0xff] }
 0x340   :  { %v4433_v21 = vmul.f32 %v4335_v28, %v5462_v38  ;;  %v4437_v24 = vmul.f32 %v4335_v28, %v5464_v35  ;;  %v4441_v10 = vmul.f32 %v4335_v28, %v5466_v14  ;;  %v4445_v8 = vmul.f32 %v4335_v28, %v5468_v57 }
 0x341   :  { %5459 = vst [vmem:[#allocation9_spill] sm:$0xff] %v4425_v56  ;;  %5461 = vst [vmem:[#allocation11_spill] sm:$0xff] %v4429_v40  ;;  %v5470_v56 = vld [vmem:[#allocation25_spill] sm:$0xff]  ;;  %v5472_v40 = vld [vmem:[#allocation26_spill] sm:$0xff] }
 0x342   :  { %5463 = vst [vmem:[#allocation13_spill] sm:$0xff] %v4433_v21  ;;  %5465 = vst [vmem:[#allocation10_spill] sm:$0xff] %v4437_v24  ;;  %v4449_v41 = vmul.f32 %v4335_v28, %v5470_v56  ;;  %v4453_v38 = vmul.f32 %v4335_v28, %v5472_v40  ;;  %v5474_v21 = vld [vmem:[#allocation27_spill] sm:$0xff]  ;;  %v5475_v24 = vld [vmem:[#allocation28_spill] sm:$0xff] }
 0x343   :  { %5467 = vst [vmem:[#allocation12_spill] sm:$0xff] %v4441_v10  ;;  %5469 = vst [vmem:[#allocation15_spill] sm:$0xff] %v4445_v8  ;;  %v4457_v35 = vmul.f32 %v4335_v28, %v5474_v21  ;;  %v4461_v14 = vmul.f32 %v4335_v28, %v5475_v24  ;;  %v5476_v10 = vld [vmem:[#allocation29_spill] sm:$0xff]  ;;  %v5477_v8 = vld [vmem:[#allocation30_spill] sm:$0xff]  ;;  %v4481_v24 = vmul.f32 %v4335_v28, %v4050_v63 }
 0x344   :  { %5471 = vst [vmem:[#allocation17_spill] sm:$0xff] %v4449_v41  ;;  %5473 = vst [vmem:[#allocation14_spill] sm:$0xff] %v4453_v38  ;;  %v4465_v57 = vmul.f32 %v4335_v28, %v5476_v10  ;;  %v4469_v56 = vmul.f32 %v4335_v28, %v5477_v8  ;;  %v5478_v41 = vld [vmem:[#allocation31_spill] sm:$0xff]  ;;  %v5479_v38 = vld [vmem:[#allocation32_spill] sm:$0xff]  ;;  %v4485_v10 = vmul.f32 %v4335_v28, %v4067_v62 }
 0x345   :  { %v4473_v40 = vmul.f32 %v4335_v28, %v5478_v41  ;;  %v4477_v21 = vmul.f32 %v4335_v28, %v5479_v38  ;;  %v4489_v8 = vmul.f32 %v4335_v28, %v4077_v2  ;;  %v4493_v41 = vmul.f32 %v4335_v28, %v4092_v43 }
 0x346   :  { %v4497_v38 = vmul.f32 %v4335_v28, %v4104_v0  ;;  %v4501_v63 = vmul.f32 %v4335_v28, %v4123_v4  ;;  %v4505_v62 = vmul.f32 %v4335_v28, %v4136_v16  ;;  %v4509_v2 = vmul.f32 %v4335_v28, %v4155_v51 }
 0x347   :  { %v4513_v43 = vmul.f32 %v4335_v28, %v4167_v15  ;;  %v4517_v0 = vmul.f32 %v4335_v28, %v4186_v39  ;;  %v4521_v4 = vmul.f32 %v4335_v28, %v4192_v37  ;;  %v4525_v16 = vmul.f32 %v4335_v28, %v4205_v53 }
 0x348   :  { %v4529_v51 = vmul.f32 %v4335_v28, %v4212_v52  ;;  %v4533_v15 = vmul.f32 %v4335_v28, %v4223_v22  ;;  %v4537_v39 = vmul.f32 %v4335_v28, %v4231_v61  ;;  %v4541_v37 = vmul.f32 %v4335_v28, %v4240_v49 }
 0x349   :  { %v4545_v53 = vmul.f32 %v4335_v28, %v4247_v23  ;;  %v4549_v52 = vmul.f32 %v4335_v28, %v4098_v13  ;;  %v4553_v22 = vmul.f32 %v4335_v28, %v4114_v3  ;;  %v4557_v61 = vmul.f32 %v4335_v28, %v4095_v1 }
 0x34a   :  { %v4561_v49 = vmul.f32 %v4335_v28, %v4111_v36  ;;  %v4565_v23 = vmul.f32 %v4335_v28, %v4129_v25  ;;  %v4569_v13 = vmul.f32 %v4335_v28, %v4145_v32  ;;  %v4573_v3 = vmul.f32 %v4335_v28, %v4126_v60 }
 0x34b   :  { %5480 = vst [vmem:[#allocation16_spill] sm:$0xff] %v4557_v61  ;;  %v4577_v1 = vmul.f32 %v4335_v28, %v4142_v48  ;;  %v5481_v61 = vsub.s32 0, %v4326_v42  ;;  %v4585_v25 = vmul.f32 %v4335_v28, %v4161_v11  ;;  %v4589_v32 = vmul.f32 %v4335_v28, %v4176_v33 }
 0x34c   :  { %v4593_v60 = vmul.f32 %v4335_v28, %v4158_v12  ;;  %v4597_v48 = vmul.f32 %v4335_v28, %v4173_v27 }
 0x34d   :  { %v4581_v36 = vrot.slane %v1982_v34, %v5481_v61  ;;  %v5493_v61 = vld [vmem:[#allocation13_spill] sm:$0xff] }
 0x34f   :  { %v4601_v42 = vadd.f32 %v4581_v36, %v4341_v45  ;;  %v4605_v11 = vadd.f32 %v4581_v36, %v4345_v31  ;;  %v4609_v33 = vadd.f32 %v4581_v36, %v4349_v30  ;;  %v4613_v12 = vadd.f32 %v4581_v36, %v4353_v6 }
 0x350   :  { %v4617_v27 = vadd.f32 %v4581_v36, %v4357_v54  ;;  %v4621_v28 = vadd.f32 %v4581_v36, %v4361_v47  ;;  %v4625_v34 = vadd.f32 %v4581_v36, %v4365_v58  ;;  %v4629_v45 = vadd.f32 %v4581_v36, %v4369_v44 }
 0x351   :  { %v4633_v31 = vadd.f32 %v4581_v36, %v4373_v50  ;;  %v4637_v30 = vadd.f32 %v4581_v36, %v4377_v29  ;;  %v4641_v6 = vadd.f32 %v4581_v36, %v4381_v46  ;;  %v4645_v54 = vadd.f32 %v4581_v36, %v4385_v18 }
 0x352   :  { %v4649_v47 = vadd.f32 %v4581_v36, %v4389_v7  ;;  %v4653_v58 = vadd.f32 %v4581_v36, %v4393_v17  ;;  %v4657_v44 = vadd.f32 %v4581_v36, %v4397_v26  ;;  %v4661_v50 = vadd.f32 %v4581_v36, %v4401_v5  ;;  %v5489_v26 = vld [vmem:[#allocation9_spill] sm:$0xff] }
 0x353   :  { %5482 = vst [vmem:[#allocation19_spill] sm:$0xff] %v4633_v31  ;;  %5483 = vst [vmem:[#allocation21_spill] sm:$0xff] %v4637_v30  ;;  %v4665_v29 = vadd.f32 %v4581_v36, %v4405_v59  ;;  %v4669_v46 = vadd.f32 %v4581_v36, %v4409_v9  ;;  %v4673_v18 = vadd.f32 %v4581_v36, %v4413_v19  ;;  %v5491_v59 = vld [vmem:[#allocation11_spill] sm:$0xff] }
 0x354   :  { %5484 = vst [vmem:[#allocation18_spill] sm:$0xff] %v4641_v6  ;;  %5485 = vst [vmem:[#allocation20_spill] sm:$0xff] %v4645_v54  ;;  %v4677_v7 = vadd.f32 %v4581_v36, %v4417_v20  ;;  %v4681_v17 = vadd.f32 %v4581_v36, %v4421_v55  ;;  %v4685_v5 = vadd.f32 %v4581_v36, %v5489_v26 }
 0x355   :  { %5486 = vst [vmem:[#allocation22_spill] sm:$0xff] %v4673_v18  ;;  %v4689_v9 = vadd.f32 %v4581_v36, %v5491_v59  ;;  %v4693_v19 = vadd.f32 %v4581_v36, %v5493_v61  ;;  %v5494_v18 = vld [vmem:[#allocation10_spill] sm:$0xff] }
 0x356   :  { %5487 = vst [vmem:[#allocation23_spill] sm:$0xff] %v4677_v7  ;;  %5488 = vst [vmem:[#allocation24_spill] sm:$0xff] %v4681_v17  ;;  %v4697_v20 = vadd.f32 %v4581_v36, %v5494_v18  ;;  %v5495_v7 = vld [vmem:[#allocation12_spill] sm:$0xff]  ;;  %v5496_v17 = vld [vmem:[#allocation15_spill] sm:$0xff]  ;;  %v4717_v18 = vadd.f32 %v4581_v36, %v4457_v35  ;;  %v4737_v35 = vadd.f32 %v4581_v36, %v4477_v21 }
 0x357   :  { %5490 = vst [vmem:[#allocation25_spill] sm:$0xff] %v4685_v5  ;;  %5492 = vst [vmem:[#allocation26_spill] sm:$0xff] %v4689_v9  ;;  %v4701_v55 = vadd.f32 %v4581_v36, %v5495_v7  ;;  %v4705_v26 = vadd.f32 %v4581_v36, %v5496_v17  ;;  %v5497_v5 = vld [vmem:[#allocation17_spill] sm:$0xff]  ;;  %v5498_v9 = vld [vmem:[#allocation14_spill] sm:$0xff]  ;;  %v4721_v7 = vadd.f32 %v4581_v36, %v4461_v14 }
 0x358   :  { %v4709_v59 = vadd.f32 %v4581_v36, %v5497_v5  ;;  %v4713_v61 = vadd.f32 %v4581_v36, %v5498_v9  ;;  %v4725_v17 = vadd.f32 %v4581_v36, %v4465_v57  ;;  %v4729_v5 = vadd.f32 %v4581_v36, %v4469_v56 }
 0x359   :  { %v4733_v9 = vadd.f32 %v4581_v36, %v4473_v40  ;;  %v4741_v14 = vadd.f32 %v4581_v36, %v4481_v24  ;;  %v4745_v57 = vadd.f32 %v4581_v36, %v4485_v10  ;;  %v4749_v56 = vadd.f32 %v4581_v36, %v4489_v8 }
 0x35a   :  { %v4753_v40 = vadd.f32 %v4581_v36, %v4493_v41  ;;  %v4757_v21 = vadd.f32 %v4581_v36, %v4497_v38  ;;  %v4761_v24 = vadd.f32 %v4581_v36, %v4501_v63  ;;  %v4765_v10 = vadd.f32 %v4581_v36, %v4505_v62 }
 0x35b   :  { %5499 = vst [vmem:[#allocation27_spill] sm:$0xff] %v4749_v56  ;;  %v4769_v8 = vadd.f32 %v4581_v36, %v4509_v2  ;;  %v4773_v41 = vadd.f32 %v4581_v36, %v4513_v43  ;;  %v4777_v38 = vadd.f32 %v4581_v36, %v4517_v0  ;;  %v4781_v63 = vadd.f32 %v4581_v36, %v4521_v4 }
 0x35c   :  { %v4785_v62 = vadd.f32 %v4581_v36, %v4525_v16  ;;  %v4789_v2 = vadd.f32 %v4581_v36, %v4529_v51  ;;  %v4793_v43 = vadd.f32 %v4581_v36, %v4533_v15  ;;  %v4797_v0 = vadd.f32 %v4581_v36, %v4537_v39 }
 0x35d   :  { %v4801_v4 = vadd.f32 %v4581_v36, %v4541_v37  ;;  %v4805_v16 = vadd.f32 %v4581_v36, %v4545_v53  ;;  %v4809_v51 = vadd.f32 %v4581_v36, %v4549_v52  ;;  %v4813_v15 = vadd.f32 %v4581_v36, %v4553_v22  ;;  %v5513_v31 = vld [vmem:[#allocation23_spill] sm:$0xff]  ;;  %v5514_v30 = vld [vmem:[#allocation24_spill] sm:$0xff] }
 0x35e   :  { %5500 = vst [vmem:[#allocation28_spill] sm:$0xff] %v4789_v2  ;;  %5501 = vst [vmem:[#allocation29_spill] sm:$0xff] %v4793_v43  ;;  %v5505_v43 = vld [vmem:[#allocation16_spill] sm:$0xff]  ;;  %v4821_v37 = vadd.f32 %v4581_v36, %v4561_v49  ;;  %v4825_v53 = vadd.f32 %v4581_v36, %v4565_v23  ;;  %v4829_v52 = vadd.f32 %v4581_v36, %v4569_v13  ;;  %v5515_v6 = vld [vmem:[#allocation25_spill] sm:$0xff] }
 0x35f   :  { %5502 = vst [vmem:[#allocation30_spill] sm:$0xff] %v4797_v0  ;;  %5503 = vst [vmem:[#allocation31_spill] sm:$0xff] %v4801_v4  ;;  %v4817_v39 = vadd.f32 %v4581_v36, %v5505_v43  ;;  %v4833_v22 = vadd.f32 %v4581_v36, %v4573_v3  ;;  %v4837_v43 = vadd.f32 %v4581_v36, %v4577_v1  ;;  %v5516_v54 = vld [vmem:[#allocation26_spill] sm:$0xff]  ;;  %v5537_v0 = vld [vmem:[#allocation20_spill] sm:$0xff] }
 0x360   :  { %5504 = vst [vmem:[#allocation32_spill] sm:$0xff] %v4805_v16  ;;  %v4841_v49 = vadd.f32 %v4581_v36, %v4585_v25  ;;  %v4845_v23 = vadd.f32 %v4581_v36, %v4589_v32  ;;  %v4849_v13 = vadd.f32 %v4581_v36, %v4593_v60  ;;  %v4853_v3 = vadd.f32 %v4581_v36, %v4597_v48  ;;  %v5533_v16 = vld [vmem:[#allocation21_spill] sm:$0xff]  ;;  %v5535_v4 = vld [vmem:[#allocation18_spill] sm:$0xff] }
 0x361   :  { %5506 = vst [vmem:[#allocation9_spill] sm:$0xff] %v4833_v22  ;;  %5507 = vst [vmem:[#allocation11_spill] sm:$0xff] %v4837_v43  ;;  %v5512_v22 = vld [vmem:[#allocation22_spill] sm:$0xff]  ;;  %v5519_v56 = vmov %v4837_v43  ;;  %v5526_v48 = vmax.f32 %v4613_v12, 0.0  ;;  %v5527_v43 = vmax.f32 %v4617_v27, 0.0  ;;  %v5534_v27 = vmax.f32 %v5533_v16, 0.0 }
 0x362   :  { %5508 = vst [vmem:[#allocation13_spill] sm:$0xff] %v4841_v49  ;;  %5509 = vst [vmem:[#allocation10_spill] sm:$0xff] %v4845_v23  ;;  %v5523_v49 = vmax.f32 %v4601_v42, 0.0  ;;  %v5524_v23 = vmax.f32 %v4605_v11, 0.0  ;;  %v5528_v42 = vmax.f32 %v4621_v28, 0.0  ;;  %v5529_v11 = vmax.f32 %v4625_v34, 0.0 }
 0x363   :  { %5510 = vst [vmem:[#allocation12_spill] sm:$0xff] %v4849_v13  ;;  %5511 = vst [vmem:[#allocation15_spill] sm:$0xff] %v4853_v3  ;;  %v5525_v13 = vmax.f32 %v4609_v33, 0.0  ;;  %v2729_v1 = vpack.c.bf16 %v5526_v48, %v5526_v48  ;;  %v2730_v25 = vpack.c.bf16 %v5527_v43, %v5527_v43  ;;  %v5530_v33 = vmax.f32 %v4629_v45, 0.0  ;;  %v5531_v3 = vld [vmem:[#allocation19_spill] sm:$0xff] }
 0x364   :  { %v2726_v32 = vpack.c.bf16 %v5523_v49, %v5523_v49  ;;  %v2727_v60 = vpack.c.bf16 %v5524_v23, %v5524_v23  ;;  %v2731_v49 = vpack.c.bf16 %v5528_v42, %v5528_v42  ;;  %v2732_v23 = vpack.c.bf16 %v5529_v11, %v5529_v11 }
 0x365   :  { %v2728_v36 = vpack.c.bf16 %v5525_v13, %v5525_v13  ;;  %v2733_v13 = vpack.c.bf16 %v5530_v33, %v5530_v33  ;;  %v5532_v12 = vmax.f32 %v5531_v3, 0.0  ;;  %v2735_v43 = vpack.c.bf16 %v5534_v27, %v5534_v27  ;;  %2447 = vst.msk [vmem:[%s5372_s5 + $0xc] sm:$0xf] %vm2443_vm3, %v2729_v1  ;;  %2448 = vst.msk [vmem:[%s5372_s5 + $0x10] sm:$0xf] %vm2443_vm3, %v2730_v25 }
 0x366   :  { %v5536_v28 = vmax.f32 %v5535_v4, 0.0  ;;  %v5538_v34 = vmax.f32 %v5537_v0, 0.0  ;;  %2444 = vst.msk [vmem:[%s5372_s5] sm:$0xf] %vm2443_vm3, %v2726_v32  ;;  %2445 = vst.msk [vmem:[%s5372_s5 + $0x4] sm:$0xf] %vm2443_vm3, %v2727_v60 }
 0x367   :  { %v2734_v48 = vpack.c.bf16 %v5532_v12, %v5532_v12  ;;  %2446 = vst.msk [vmem:[%s5372_s5 + $0x8] sm:$0xf] %vm2443_vm3, %v2728_v36  ;;  %v5539_v45 = vmax.f32 %v4649_v47, 0.0  ;;  %v5540_v4 = vmax.f32 %v4653_v58, 0.0  ;;  %v5541_v3 = vmax.f32 %v4657_v44, 0.0 }
 0x368   :  { %v5518_v2 = vld [vmem:[#allocation9_spill] sm:$0xff]  ;;  %v2736_v42 = vpack.c.bf16 %v5536_v28, %v5536_v28  ;;  %v2737_v11 = vpack.c.bf16 %v5538_v34, %v5538_v34  ;;  %v5542_v60 = vmax.f32 %v4661_v50, 0.0  ;;  %2449 = vst.msk [vmem:[%s5372_s5 + $0x14] sm:$0xf] %vm2443_vm3, %v2731_v49  ;;  %2450 = vst.msk [vmem:[%s5372_s5 + $0x18] sm:$0xf] %vm2443_vm3, %v2732_v23 }
 0x369   :  { %v2738_v0 = vpack.c.bf16 %v5539_v45, %v5539_v45  ;;  %v2739_v16 = vpack.c.bf16 %v5540_v4, %v5540_v4  ;;  %v2740_v32 = vpack.c.bf16 %v5541_v3, %v5541_v3  ;;  %2451 = vst.msk [vmem:[%s5372_s5 + $0x1c] sm:$0xf] %vm2443_vm3, %v2733_v13  ;;  %v5543_v47 = vmax.f32 %v4665_v29, 0.0  ;;  %2452 = vst.msk [vmem:[%s5372_s5 + $0x20] sm:$0xf] %vm2443_vm3, %v2734_v48 }
 0x36a   :  { %v2741_v36 = vpack.c.bf16 %v5542_v60, %v5542_v60  ;;  %v5544_v44 = vmax.f32 %v4669_v46, 0.0  ;;  %v5545_v1 = vmax.f32 %v5512_v22, 0.0  ;;  %v5546_v49 = vmax.f32 %v5513_v31, 0.0  ;;  %2453 = vst.msk [vmem:[%s5372_s5 + $0x24] sm:$0xf] %vm2443_vm3, %v2735_v43 }
 0x36b   :  { %v2742_v58 = vpack.c.bf16 %v5543_v47, %v5543_v47  ;;  %2454 = vst.msk [vmem:[%s5372_s5 + $0x28] sm:$0xf] %vm2443_vm3, %v2736_v42  ;;  %2455 = vst.msk [vmem:[%s5372_s5 + $0x2c] sm:$0xf] %vm2443_vm3, %v2737_v11  ;;  %v5547_v31 = vmax.f32 %v5514_v30, 0.0  ;;  %v5548_v46 = vmax.f32 %v5515_v6, 0.0 }
 0x36c   :  { %v2743_v50 = vpack.c.bf16 %v5544_v44, %v5544_v44  ;;  %v2744_v25 = vpack.c.bf16 %v5545_v1, %v5545_v1  ;;  %v2745_v23 = vpack.c.bf16 %v5546_v49, %v5546_v49  ;;  %v5549_v33 = vmax.f32 %v5516_v54, 0.0  ;;  %2456 = vst.msk [vmem:[%s5372_s5 + $0x30] sm:$0xf] %vm2443_vm3, %v2738_v0  ;;  %2457 = vst.msk [vmem:[%s5372_s5 + $0x34] sm:$0xf] %vm2443_vm3, %v2739_v16 }
 0x36d   :  { %v2746_v29 = vpack.c.bf16 %v5547_v31, %v5547_v31  ;;  %v2747_v22 = vpack.c.bf16 %v5548_v46, %v5548_v46  ;;  %v5550_v12 = vmax.f32 %v4693_v19, 0.0  ;;  %2458 = vst.msk [vmem:[%s5372_s5 + $0x38] sm:$0xf] %vm2443_vm3, %v2740_v32  ;;  %2459 = vst.msk [vmem:[%s5372_s5 + $0x3c] sm:$0xf] %vm2443_vm3, %v2741_v36  ;;  %v5551_v30 = vmax.f32 %v4697_v20, 0.0 }
 0x36e   :  { %v2748_v13 = vpack.c.bf16 %v5549_v33, %v5549_v33  ;;  %v5552_v54 = vmax.f32 %v4701_v55, 0.0  ;;  %v5553_v27 = vmax.f32 %v4705_v26, 0.0  ;;  %v5554_v28 = vmax.f32 %v4709_v59, 0.0  ;;  %2460 = vst.msk [vmem:[%s5372_s5 + $0x40] sm:$0xf] %vm2443_vm3, %v2742_v58  ;;  %v5575_v46 = vld [vmem:[#allocation28_spill] sm:$0xff] }
 0x36f   :  { %v2749_v48 = vpack.c.bf16 %v5550_v12, %v5550_v12  ;;  %v2750_v6 = vpack.c.bf16 %v5551_v30, %v5551_v30  ;;  %2461 = vst.msk [vmem:[%s5372_s5 + $0x44] sm:$0xf] %vm2443_vm3, %v2743_v50  ;;  %2462 = vst.msk [vmem:[%s5372_s5 + $0x48] sm:$0xf] %vm2443_vm3, %v2744_v25  ;;  %v5555_v20 = vmax.f32 %v4713_v61, 0.0  ;;  %v5556_v26 = vmax.f32 %v4717_v18, 0.0 }
 0x370   :  { %v2751_v19 = vpack.c.bf16 %v5552_v54, %v5552_v54  ;;  %v2752_v43 = vpack.c.bf16 %v5553_v27, %v5553_v27  ;;  %v2753_v42 = vpack.c.bf16 %v5554_v28, %v5554_v28  ;;  %2463 = vst.msk [vmem:[%s5372_s5 + $0x4c] sm:$0xf] %vm2443_vm3, %v2745_v23  ;;  %v5557_v34 = vmax.f32 %v4721_v7, 0.0  ;;  %2464 = vst.msk [vmem:[%s5372_s5 + $0x50] sm:$0xf] %vm2443_vm3, %v2746_v29  ;;  %v5581_v30 = vld [vmem:[#allocation31_spill] sm:$0xff] }
 0x371   :  { %v2754_v55 = vpack.c.bf16 %v5555_v20, %v5555_v20  ;;  %v2755_v59 = vpack.c.bf16 %v5556_v26, %v5556_v26  ;;  %v5558_v45 = vmax.f32 %v4725_v17, 0.0  ;;  %2465 = vst.msk [vmem:[%s5372_s5 + $0x54] sm:$0xf] %vm2443_vm3, %v2747_v22  ;;  %2466 = vst.msk [vmem:[%s5372_s5 + $0x58] sm:$0xf] %vm2443_vm3, %v2748_v13  ;;  %v5559_v61 = vmax.f32 %v4729_v5, 0.0 }
 0x372   :  { %v2756_v11 = vpack.c.bf16 %v5557_v34, %v5557_v34  ;;  %2467 = vst.msk [vmem:[%s5372_s5 + $0x5c] sm:$0xf] %vm2443_vm3, %v2749_v48  ;;  %v5560_v7 = vmax.f32 %v4733_v9, 0.0  ;;  %v5561_v4 = vmax.f32 %v4737_v35, 0.0  ;;  %v5562_v3 = vmax.f32 %v4741_v14, 0.0  ;;  %v5564_v35 = vld [vmem:[#allocation27_spill] sm:$0xff] }
 0x373   :  { %v2757_v0 = vpack.c.bf16 %v5558_v45, %v5558_v45  ;;  %v2758_v18 = vpack.c.bf16 %v5559_v61, %v5559_v61  ;;  %2468 = vst.msk [vmem:[%s5372_s5 + $0x60] sm:$0xf] %vm2443_vm3, %v2750_v6  ;;  %2469 = vst.msk [vmem:[%s5372_s5 + $0x64] sm:$0xf] %vm2443_vm3, %v2751_v19  ;;  %v5563_v5 = vmax.f32 %v4745_v57, 0.0  ;;  %v5565_v14 = vmax.f32 %v5564_v35, 0.0 }
 0x374   :  { %v2759_v17 = vpack.c.bf16 %v5560_v7, %v5560_v7  ;;  %v2760_v16 = vpack.c.bf16 %v5561_v4, %v5561_v4  ;;  %v2761_v32 = vpack.c.bf16 %v5562_v3, %v5562_v3  ;;  %2470 = vst.msk [vmem:[%s5372_s5 + $0x68] sm:$0xf] %vm2443_vm3, %v2752_v43  ;;  %2471 = vst.msk [vmem:[%s5372_s5 + $0x6c] sm:$0xf] %vm2443_vm3, %v2753_v42  ;;  %v5566_v36 = vmax.f32 %v4753_v40, 0.0  ;;  %v5579_v13 = vld [vmem:[#allocation30_spill] sm:$0xff] }
 0x375   :  { %v2762_v9 = vpack.c.bf16 %v5563_v5, %v5563_v5  ;;  %v2763_v60 = vpack.c.bf16 %v5565_v14, %v5565_v14  ;;  %v5567_v58 = vmax.f32 %v4757_v21, 0.0  ;;  %2472 = vst.msk [vmem:[%s5372_s5 + $0x70] sm:$0xf] %vm2443_vm3, %v2754_v55  ;;  %2473 = vst.msk [vmem:[%s5372_s5 + $0x74] sm:$0xf] %vm2443_vm3, %v2755_v59  ;;  %v5568_v57 = vmax.f32 %v4761_v24, 0.0 }
 0x376   :  { %v2764_v47 = vpack.c.bf16 %v5566_v36, %v5566_v36  ;;  %2474 = vst.msk [vmem:[%s5372_s5 + $0x78] sm:$0xf] %vm2443_vm3, %v2756_v11  ;;  %2475 = vst.msk [vmem:[%s5372_s5 + $0x7c] sm:$0xf] %vm2443_vm3, %v2757_v0  ;;  %v5569_v21 = vmax.f32 %v4765_v10, 0.0  ;;  %v5570_v1 = vmax.f32 %v4769_v8, 0.0 }
 0x377   :  { %v2765_v44 = vpack.c.bf16 %v5567_v58, %v5567_v58  ;;  %v2766_v40 = vpack.c.bf16 %v5568_v57, %v5568_v57  ;;  %v5571_v49 = vmax.f32 %v4773_v41, 0.0  ;;  %2476 = vst.msk [vmem:[%s5372_s5 + $0x80] sm:$0xf] %vm2443_vm3, %v2758_v18  ;;  %2477 = vst.msk [vmem:[%s5372_s5 + $0x84] sm:$0xf] %vm2443_vm3, %v2759_v17  ;;  %v5572_v24 = vmax.f32 %v4777_v38, 0.0 }
 0x378   :  { %v2767_v50 = vpack.c.bf16 %v5569_v21, %v5569_v21  ;;  %v2768_v25 = vpack.c.bf16 %v5570_v1, %v5570_v1  ;;  %2478 = vst.msk [vmem:[%s5372_s5 + $0x88] sm:$0xf] %vm2443_vm3, %v2760_v16  ;;  %2479 = vst.msk [vmem:[%s5372_s5 + $0x8c] sm:$0xf] %vm2443_vm3, %v2761_v32  ;;  %v5573_v8 = vmax.f32 %v4781_v63, 0.0  ;;  %v5574_v31 = vmax.f32 %v4785_v62, 0.0 }
 0x379   :  { %v2769_v23 = vpack.c.bf16 %v5571_v49, %v5571_v49  ;;  %v2770_v10 = vpack.c.bf16 %v5572_v24, %v5572_v24  ;;  %v5576_v22 = vmax.f32 %v5575_v46, 0.0  ;;  %2480 = vst.msk [vmem:[%s5372_s5 + $0x90] sm:$0xf] %vm2443_vm3, %v2762_v9  ;;  %2481 = vst.msk [vmem:[%s5372_s5 + $0x94] sm:$0xf] %vm2443_vm3, %v2763_v60  ;;  %v5577_v38 = vld [vmem:[#allocation29_spill] sm:$0xff] }
 0x37a   :  { %v2771_v41 = vpack.c.bf16 %v5573_v8, %v5573_v8  ;;  %v2772_v29 = vpack.c.bf16 %v5574_v31, %v5574_v31  ;;  %2482 = vst.msk [vmem:[%s5372_s5 + $0x98] sm:$0xf] %vm2443_vm3, %v2764_v47  ;;  %2483 = vst.msk [vmem:[%s5372_s5 + $0x9c] sm:$0xf] %vm2443_vm3, %v2765_v44  ;;  %v5578_v63 = vmax.f32 %v5577_v38, 0.0  ;;  %v5580_v12 = vmax.f32 %v5579_v13, 0.0 }
 0x37b   :  { %v2773_v33 = vpack.c.bf16 %v5576_v22, %v5576_v22  ;;  %v5582_v6 = vmax.f32 %v5581_v30, 0.0  ;;  %v5583_v19 = vld [vmem:[#allocation32_spill] sm:$0xff]  ;;  %2484 = vst.msk [vmem:[%s5372_s5 + $0xa0] sm:$0xf] %vm2443_vm3, %v2766_v40  ;;  %2485 = vst.msk [vmem:[%s5372_s5 + $0xa4] sm:$0xf] %vm2443_vm3, %v2767_v50 }
 0x37c   :  { %v2774_v62 = vpack.c.bf16 %v5578_v63, %v5578_v63  ;;  %v2775_v48 = vpack.c.bf16 %v5580_v12, %v5580_v12  ;;  %v5584_v27 = vmax.f32 %v5583_v19, 0.0  ;;  %2486 = vst.msk [vmem:[%s5372_s5 + $0xa8] sm:$0xf] %vm2443_vm3, %v2768_v25  ;;  %2487 = vst.msk [vmem:[%s5372_s5 + $0xac] sm:$0xf] %vm2443_vm3, %v2769_v23  ;;  %v5585_v28 = vmax.f32 %v4809_v51, 0.0 }
 0x37d   :  { %v2776_v54 = vpack.c.bf16 %v5582_v6, %v5582_v6  ;;  %v5586_v20 = vmax.f32 %v4813_v15, 0.0  ;;  %v5587_v26 = vmax.f32 %v4817_v39, 0.0  ;;  %v5588_v34 = vmax.f32 %v4821_v37, 0.0  ;;  %2488 = vst.msk [vmem:[%s5372_s5 + $0xb0] sm:$0xf] %vm2443_vm3, %v2770_v10  ;;  %v5597_v4 = vld [vmem:[#allocation12_spill] sm:$0xff] }
 0x37e   :  { %v2777_v43 = vpack.c.bf16 %v5584_v27, %v5584_v27  ;;  %v2778_v42 = vpack.c.bf16 %v5585_v28, %v5585_v28  ;;  %2489 = vst.msk [vmem:[%s5372_s5 + $0xb4] sm:$0xf] %vm2443_vm3, %v2771_v41  ;;  %2490 = vst.msk [vmem:[%s5372_s5 + $0xb8] sm:$0xf] %vm2443_vm3, %v2772_v29  ;;  %v5589_v51 = vmax.f32 %v4825_v53, 0.0  ;;  %v5590_v39 = vmax.f32 %v4829_v52, 0.0 }
 0x37f   :  { %v2779_v55 = vpack.c.bf16 %v5586_v20, %v5586_v20  ;;  %v2780_v59 = vpack.c.bf16 %v5587_v26, %v5587_v26  ;;  %v2781_v11 = vpack.c.bf16 %v5588_v34, %v5588_v34  ;;  %2491 = vst.msk [vmem:[%s5372_s5 + $0xbc] sm:$0xf] %vm2443_vm3, %v2773_v33  ;;  %v5591_v45 = vmax.f32 %v5518_v2, 0.0  ;;  %2492 = vst.msk [vmem:[%s5372_s5 + $0xc0] sm:$0xf] %vm2443_vm3, %v2774_v62  ;;  %v5595_v52 = vld [vmem:[#allocation10_spill] sm:$0xff] }
 0x380   :  { %v2782_v15 = vpack.c.bf16 %v5589_v51, %v5589_v51  ;;  %v2783_v37 = vpack.c.bf16 %v5590_v39, %v5590_v39  ;;  %v5592_v61 = vmax.f32 %v5519_v56, 0.0  ;;  %2493 = vst.msk [vmem:[%s5372_s5 + $0xc4] sm:$0xf] %vm2443_vm3, %v2775_v48  ;;  %2494 = vst.msk [vmem:[%s5372_s5 + $0xc8] sm:$0xf] %vm2443_vm3, %v2776_v54  ;;  %v5593_v56 = vld [vmem:[#allocation13_spill] sm:$0xff] }
 0x381   :  { %v2784_v0 = vpack.c.bf16 %v5591_v45, %v5591_v45  ;;  %2495 = vst.msk [vmem:[%s5372_s5 + $0xcc] sm:$0xf] %vm2443_vm3, %v2777_v43  ;;  %v5594_v2 = vmax.f32 %v5593_v56, 0.0  ;;  %v5596_v7 = vmax.f32 %v5595_v52, 0.0  ;;  %v5598_v16 = vmax.f32 %v5597_v4, 0.0  ;;  %v5599_v32 = vld [vmem:[#allocation15_spill] sm:$0xff] }
 0x382   :  { %v2785_v18 = vpack.c.bf16 %v5592_v61, %v5592_v61  ;;  %v5600_v5 = vmax.f32 %v5599_v32, 0.0  ;;  %2496 = vst.msk [vmem:[%s5372_s5 + $0xd0] sm:$0xf] %vm2443_vm3, %v2778_v42  ;;  %2497 = vst.msk [vmem:[%s5372_s5 + $0xd4] sm:$0xf] %vm2443_vm3, %v2779_v55 }
 0x383   :  { %v2786_v53 = vpack.c.bf16 %v5594_v2, %v5594_v2  ;;  %v2787_v17 = vpack.c.bf16 %v5596_v7, %v5596_v7  ;;  %v2788_v3 = vpack.c.bf16 %v5598_v16, %v5598_v16  ;;  %2498 = vst.msk [vmem:[%s5372_s5 + $0xd8] sm:$0xf] %vm2443_vm3, %v2780_v59  ;;  %2499 = vst.msk [vmem:[%s5372_s5 + $0xdc] sm:$0xf] %vm2443_vm3, %v2781_v11 }
 0x384   :  { %v2789_v9 = vpack.c.bf16 %v5600_v5, %v5600_v5  ;;  %2500 = vst.msk [vmem:[%s5372_s5 + $0xe0] sm:$0xf] %vm2443_vm3, %v2782_v15  ;;  %2501 = vst.msk [vmem:[%s5372_s5 + $0xe4] sm:$0xf] %vm2443_vm3, %v2783_v37 }
 0x385   :  { %2502 = vst.msk [vmem:[%s5372_s5 + $0xe8] sm:$0xf] %vm2443_vm3, %v2784_v0  ;;  %2503 = vst.msk [vmem:[%s5372_s5 + $0xec] sm:$0xf] %vm2443_vm3, %v2785_v18 }
 0x386   :  { %2504 = vst.msk [vmem:[%s5372_s5 + $0xf0] sm:$0xf] %vm2443_vm3, %v2786_v53  ;;  %2505 = vst.msk [vmem:[%s5372_s5 + $0xf4] sm:$0xf] %vm2443_vm3, %v2787_v17 }
 0x387   :  { %2506 = vst.msk [vmem:[%s5372_s5 + $0xf8] sm:$0xf] %vm2443_vm3, %v2788_v3  ;;  %2507 = vst.msk [vmem:[%s5372_s5 + $0xfc] sm:$0xf] %vm2443_vm3, %v2789_v9 }
 0x388   :  { %2512 = vsyncpa [#allocation3], 1 }
 0x389   :  { %2513 = vsyncpa [#allocation5], 1 }

// kernel: generator_forward.9
= control target key start
LH: loop header
LB: loop body
LE: loop exit
PB: predicated region body
PF: predicated region fallthrough
CT: control target
= control target key end

     0   :  { %s1307_s12 = smov 0   ;;  %s1309_s13 = smov 0   ;;  %s1655_s0 = inlined_call_operand.vmem [shape: bf16[144,2048], index: 0, kind: input, shape index: {}]   ;;  %s1656_s1 = inlined_call_operand.vmem [shape: bf16[12,144], index: 1, kind: input, shape index: {}]   ;;  %s1657_s2 = inlined_call_operand.vmem [shape: f32[12,1], index: 2, kind: input, shape index: {}]   ;;  %s1658_s3 = inlined_call_operand.vmem [shape: f32[12,2048], index: 3, kind: output, shape index: {}]  }
   0x1   :  { %s1311_s14 = smov 0  }
   0x2 LB: > { %s1106_s15 = sadd.s32 4294967295, %s1284_s14   ;;  %s1324_s16 = sadd.s32 1, %s1284_s14   ;;  %s1284_s14 = sphi %s1311_s14, %s1662_s14   ;;  %s1280_s13 = sphi %s1309_s13, %s1661_s13   ;;  %s1276_s12 = sphi %s1307_s12, %s1660_s12  }
   0x3   : > { %s17_s17 = ssub.s32 %s1284_s14, %s1324_s16  ;;  %s20_s18 = sadd.s32 1, %s1280_s13 }
   0x4   : > { %p18_p0 = scmp.eq.s32.totalorder %s17_s17, 0  ;;  %p27_p1 = scmp.ne.s32.totalorder %s1280_s13, %s1276_s12 }
   0x5   : > { %p28_p2 = scmp.eq.s32.totalorder %s1284_s14, 0  ;;  %p99_p3 = scmp.eq.s32.totalorder %s1106_s15, 1 }
   0x6   : > { %s1335_s19 = scalar_select %p18_p0, %s1280_s13, %s20_s18  }
   0x7   : > { %p29_p4 = por %p28_p2, %p27_p1  ;;  %p1337_p5 = por %p99_p3, %p27_p1 }
   0x8   : > { %p1109_p6 = scmp.ge.s32.totalorder %s1284_s14, 2 }
   0xa   : > { %127 = sbr.rel (%p1109_p6) target bundleno = 58 (0x3a), region = 24 }
  0x11   : > { %130 = sbr.rel (!%p29_p4) target bundleno = 58 (0x3a), region = 28  ;;  %s132_s21 = sand.u32 (%p29_p4), 1, %s1280_s13  }
  0x12   : > { %s1197_s22 = sshll.u32 (%p29_p4), %s1284_s14, 5  ;;  %s1199_s23 = smul.u32 (%p29_p4), 576, %s132_s21 }
  0x13   : > { %s1347_s26 = scalar_lea.vmem (%p29_p4), %s1655_s0, %s1197_s22 }
  0x14   : > { %v150_v0 = vld [vmem:[%s1347_s26] sm:$0xff] (%p29_p4)  ;;  %v152_v1 = vld [vmem:[%s1347_s26 + $0x8] sm:$0xff] (%p29_p4)  ;;  %v154_v2 = vld [vmem:[%s1347_s26 + $0x10] sm:$0xff] (%p29_p4)  ;;  %s1355_s27 = scalar_lea.vmem (%p29_p4), [#allocation2], %s1199_s23 }
  0x15   : > { %v156_v3 = vld [vmem:[%s1347_s26 + $0x18] sm:$0xff] (%p29_p4)  ;;  %v158_v4 = vld [vmem:[%s1347_s26 + $0x40] sm:$0xff] (%p29_p4)  ;;  %v160_v5 = vld [vmem:[%s1347_s26 + $0x48] sm:$0xff] (%p29_p4)  ;;  %151 = vst [vmem:[%s1355_s27] sm:$0xff] (%p29_p4), %v150_v0 }
  0x16   : > { %153 = vst [vmem:[%s1355_s27 + $0x8] sm:$0xff] (%p29_p4), %v152_v1  ;;  %155 = vst [vmem:[%s1355_s27 + $0x10] sm:$0xff] (%p29_p4), %v154_v2  ;;  %v162_v6 = vld [vmem:[%s1347_s26 + $0x50] sm:$0xff] (%p29_p4)  ;;  %v164_v7 = vld [vmem:[%s1347_s26 + $0x58] sm:$0xff] (%p29_p4) }
  0x17   : > { %157 = vst [vmem:[%s1355_s27 + $0x18] sm:$0xff] (%p29_p4), %v156_v3  ;;  %159 = vst [vmem:[%s1355_s27 + $0x20] sm:$0xff] (%p29_p4), %v158_v4  ;;  %v166_v8 = vld [vmem:[%s1347_s26 + $0x80] sm:$0xff] (%p29_p4)  ;;  %v168_v9 = vld [vmem:[%s1347_s26 + $0x88] sm:$0xff] (%p29_p4) }
  0x18   : > { %161 = vst [vmem:[%s1355_s27 + $0x28] sm:$0xff] %v160_v5  ;;  %163 = vst [vmem:[%s1355_s27 + $0x30] sm:$0xff] %v162_v6  ;;  %v170_v10 = vld [vmem:[%s1347_s26 + $0x90] sm:$0xff]  ;;  %v172_v11 = vld [vmem:[%s1347_s26 + $0x98] sm:$0xff] }
  0x19   : > { %165 = vst [vmem:[%s1355_s27 + $0x38] sm:$0xff] %v164_v7  ;;  %167 = vst [vmem:[%s1355_s27 + $0x40] sm:$0xff] %v166_v8  ;;  %v174_v12 = vld [vmem:[%s1347_s26 + $0xc0] sm:$0xff]  ;;  %v176_v13 = vld [vmem:[%s1347_s26 + $0xc8] sm:$0xff] }
  0x1a   : > { %169 = vst [vmem:[%s1355_s27 + $0x48] sm:$0xff] %v168_v9  ;;  %171 = vst [vmem:[%s1355_s27 + $0x50] sm:$0xff] %v170_v10  ;;  %v178_v14 = vld [vmem:[%s1347_s26 + $0xd0] sm:$0xff]  ;;  %v180_v15 = vld [vmem:[%s1347_s26 + $0xd8] sm:$0xff] }
  0x1b   : > { %173 = vst [vmem:[%s1355_s27 + $0x58] sm:$0xff] %v172_v11  ;;  %175 = vst [vmem:[%s1355_s27 + $0x60] sm:$0xff] %v174_v12  ;;  %v182_v16 = vld [vmem:[%s1347_s26 + $0x100] sm:$0xff]  ;;  %v184_v17 = vld [vmem:[%s1347_s26 + $0x108] sm:$0xff] }
  0x1c   : > { %177 = vst [vmem:[%s1355_s27 + $0x68] sm:$0xff] %v176_v13  ;;  %179 = vst [vmem:[%s1355_s27 + $0x70] sm:$0xff] %v178_v14  ;;  %v186_v18 = vld [vmem:[%s1347_s26 + $0x110] sm:$0xff]  ;;  %v188_v19 = vld [vmem:[%s1347_s26 + $0x118] sm:$0xff] }
  0x1d   : > { %181 = vst [vmem:[%s1355_s27 + $0x78] sm:$0xff] %v180_v15  ;;  %183 = vst [vmem:[%s1355_s27 + $0x80] sm:$0xff] %v182_v16  ;;  %v190_v20 = vld [vmem:[%s1347_s26 + $0x140] sm:$0xff]  ;;  %v192_v21 = vld [vmem:[%s1347_s26 + $0x148] sm:$0xff] }
  0x1e   : > { %185 = vst [vmem:[%s1355_s27 + $0x88] sm:$0xff] %v184_v17  ;;  %187 = vst [vmem:[%s1355_s27 + $0x90] sm:$0xff] %v186_v18  ;;  %v194_v22 = vld [vmem:[%s1347_s26 + $0x150] sm:$0xff]  ;;  %v196_v23 = vld [vmem:[%s1347_s26 + $0x158] sm:$0xff] }
  0x1f   : > { %189 = vst [vmem:[%s1355_s27 + $0x98] sm:$0xff] %v188_v19  ;;  %191 = vst [vmem:[%s1355_s27 + $0xa0] sm:$0xff] %v190_v20  ;;  %v198_v24 = vld [vmem:[%s1347_s26 + $0x180] sm:$0xff]  ;;  %v200_v25 = vld [vmem:[%s1347_s26 + $0x188] sm:$0xff] }
  0x20   : > { %193 = vst [vmem:[%s1355_s27 + $0xa8] sm:$0xff] %v192_v21  ;;  %195 = vst [vmem:[%s1355_s27 + $0xb0] sm:$0xff] %v194_v22  ;;  %v202_v26 = vld [vmem:[%s1347_s26 + $0x190] sm:$0xff]  ;;  %v204_v27 = vld [vmem:[%s1347_s26 + $0x198] sm:$0xff] }
  0x21   : > { %197 = vst [vmem:[%s1355_s27 + $0xb8] sm:$0xff] %v196_v23  ;;  %199 = vst [vmem:[%s1355_s27 + $0xc0] sm:$0xff] %v198_v24  ;;  %v206_v28 = vld [vmem:[%s1347_s26 + $0x1c0] sm:$0xff]  ;;  %v208_v29 = vld [vmem:[%s1347_s26 + $0x1c8] sm:$0xff] }
  0x22   : > { %201 = vst [vmem:[%s1355_s27 + $0xc8] sm:$0xff] %v200_v25  ;;  %203 = vst [vmem:[%s1355_s27 + $0xd0] sm:$0xff] %v202_v26  ;;  %v210_v30 = vld [vmem:[%s1347_s26 + $0x1d0] sm:$0xff]  ;;  %v212_v31 = vld [vmem:[%s1347_s26 + $0x1d8] sm:$0xff] }
  0x23   : > { %205 = vst [vmem:[%s1355_s27 + $0xd8] sm:$0xff] %v204_v27  ;;  %207 = vst [vmem:[%s1355_s27 + $0xe0] sm:$0xff] %v206_v28  ;;  %v214_v32 = vld [vmem:[%s1347_s26 + $0x200] sm:$0xff]  ;;  %v216_v33 = vld [vmem:[%s1347_s26 + $0x208] sm:$0xff] }
  0x24   : > { %209 = vst [vmem:[%s1355_s27 + $0xe8] sm:$0xff] %v208_v29  ;;  %211 = vst [vmem:[%s1355_s27 + $0xf0] sm:$0xff] %v210_v30  ;;  %v218_v34 = vld [vmem:[%s1347_s26 + $0x210] sm:$0xff]  ;;  %v220_v35 = vld [vmem:[%s1347_s26 + $0x218] sm:$0xff] }
  0x25   : > { %213 = vst [vmem:[%s1355_s27 + $0xf8] sm:$0xff] %v212_v31  ;;  %215 = vst [vmem:[%s1355_s27 + $0x100] sm:$0xff] %v214_v32  ;;  %v222_v36 = vld [vmem:[%s1347_s26 + $0x240] sm:$0xff]  ;;  %v224_v37 = vld [vmem:[%s1347_s26 + $0x248] sm:$0xff] }
  0x26   : > { %217 = vst [vmem:[%s1355_s27 + $0x108] sm:$0xff] %v216_v33  ;;  %219 = vst [vmem:[%s1355_s27 + $0x110] sm:$0xff] %v218_v34  ;;  %v226_v38 = vld [vmem:[%s1347_s26 + $0x250] sm:$0xff]  ;;  %v228_v39 = vld [vmem:[%s1347_s26 + $0x258] sm:$0xff] }
  0x27   : > { %221 = vst [vmem:[%s1355_s27 + $0x118] sm:$0xff] %v220_v35  ;;  %223 = vst [vmem:[%s1355_s27 + $0x120] sm:$0xff] %v222_v36  ;;  %v230_v40 = vld [vmem:[%s1347_s26 + $0x280] sm:$0xff]  ;;  %v232_v41 = vld [vmem:[%s1347_s26 + $0x288] sm:$0xff] }
  0x28   : > { %225 = vst [vmem:[%s1355_s27 + $0x128] sm:$0xff] %v224_v37  ;;  %227 = vst [vmem:[%s1355_s27 + $0x130] sm:$0xff] %v226_v38  ;;  %v234_v42 = vld [vmem:[%s1347_s26 + $0x290] sm:$0xff]  ;;  %v236_v43 = vld [vmem:[%s1347_s26 + $0x298] sm:$0xff] }
  0x29   : > { %229 = vst [vmem:[%s1355_s27 + $0x138] sm:$0xff] %v228_v39  ;;  %231 = vst [vmem:[%s1355_s27 + $0x140] sm:$0xff] %v230_v40  ;;  %v238_v44 = vld [vmem:[%s1347_s26 + $0x2c0] sm:$0xff]  ;;  %v240_v45 = vld [vmem:[%s1347_s26 + $0x2c8] sm:$0xff] }
  0x2a   : > { %233 = vst [vmem:[%s1355_s27 + $0x148] sm:$0xff] %v232_v41  ;;  %235 = vst [vmem:[%s1355_s27 + $0x150] sm:$0xff] %v234_v42  ;;  %v242_v46 = vld [vmem:[%s1347_s26 + $0x2d0] sm:$0xff]  ;;  %v244_v47 = vld [vmem:[%s1347_s26 + $0x2d8] sm:$0xff] }
  0x2b   : > { %237 = vst [vmem:[%s1355_s27 + $0x158] sm:$0xff] %v236_v43  ;;  %239 = vst [vmem:[%s1355_s27 + $0x160] sm:$0xff] %v238_v44  ;;  %v246_v48 = vld [vmem:[%s1347_s26 + $0x300] sm:$0xff]  ;;  %v248_v49 = vld [vmem:[%s1347_s26 + $0x308] sm:$0xff] }
  0x2c   : > { %241 = vst [vmem:[%s1355_s27 + $0x168] sm:$0xff] %v240_v45  ;;  %243 = vst [vmem:[%s1355_s27 + $0x170] sm:$0xff] %v242_v46  ;;  %v250_v50 = vld [vmem:[%s1347_s26 + $0x310] sm:$0xff]  ;;  %v252_v51 = vld [vmem:[%s1347_s26 + $0x318] sm:$0xff] }
  0x2d   : > { %245 = vst [vmem:[%s1355_s27 + $0x178] sm:$0xff] %v244_v47  ;;  %247 = vst [vmem:[%s1355_s27 + $0x180] sm:$0xff] %v246_v48  ;;  %v254_v52 = vld [vmem:[%s1347_s26 + $0x340] sm:$0xff]  ;;  %v256_v53 = vld [vmem:[%s1347_s26 + $0x348] sm:$0xff] }
  0x2e   : > { %249 = vst [vmem:[%s1355_s27 + $0x188] sm:$0xff] %v248_v49  ;;  %251 = vst [vmem:[%s1355_s27 + $0x190] sm:$0xff] %v250_v50  ;;  %v258_v54 = vld [vmem:[%s1347_s26 + $0x350] sm:$0xff]  ;;  %v260_v55 = vld [vmem:[%s1347_s26 + $0x358] sm:$0xff] }
  0x2f   : > { %253 = vst [vmem:[%s1355_s27 + $0x198] sm:$0xff] %v252_v51  ;;  %255 = vst [vmem:[%s1355_s27 + $0x1a0] sm:$0xff] %v254_v52  ;;  %v262_v56 = vld [vmem:[%s1347_s26 + $0x380] sm:$0xff]  ;;  %v264_v57 = vld [vmem:[%s1347_s26 + $0x388] sm:$0xff] }
  0x30   : > { %257 = vst [vmem:[%s1355_s27 + $0x1a8] sm:$0xff] %v256_v53  ;;  %259 = vst [vmem:[%s1355_s27 + $0x1b0] sm:$0xff] %v258_v54  ;;  %v266_v58 = vld [vmem:[%s1347_s26 + $0x390] sm:$0xff]  ;;  %v268_v59 = vld [vmem:[%s1347_s26 + $0x398] sm:$0xff] }
  0x31   : > { %261 = vst [vmem:[%s1355_s27 + $0x1b8] sm:$0xff] %v260_v55  ;;  %263 = vst [vmem:[%s1355_s27 + $0x1c0] sm:$0xff] %v262_v56  ;;  %v270_v60 = vld [vmem:[%s1347_s26 + $0x3c0] sm:$0xff]  ;;  %v272_v61 = vld [vmem:[%s1347_s26 + $0x3c8] sm:$0xff] }
  0x32   : > { %265 = vst [vmem:[%s1355_s27 + $0x1c8] sm:$0xff] %v264_v57  ;;  %267 = vst [vmem:[%s1355_s27 + $0x1d0] sm:$0xff] %v266_v58  ;;  %v274_v62 = vld [vmem:[%s1347_s26 + $0x3d0] sm:$0xff]  ;;  %v276_v63 = vld [vmem:[%s1347_s26 + $0x3d8] sm:$0xff] }
  0x33   : > { %269 = vst [vmem:[%s1355_s27 + $0x1d8] sm:$0xff] %v268_v59  ;;  %271 = vst [vmem:[%s1355_s27 + $0x1e0] sm:$0xff] %v270_v60  ;;  %v278_v0 = vld [vmem:[%s1347_s26 + $0x400] sm:$0xff]  ;;  %v280_v1 = vld [vmem:[%s1347_s26 + $0x408] sm:$0xff] }
  0x34   : > { %273 = vst [vmem:[%s1355_s27 + $0x1e8] sm:$0xff] %v272_v61  ;;  %275 = vst [vmem:[%s1355_s27 + $0x1f0] sm:$0xff] %v274_v62  ;;  %v282_v2 = vld [vmem:[%s1347_s26 + $0x410] sm:$0xff]  ;;  %v284_v3 = vld [vmem:[%s1347_s26 + $0x418] sm:$0xff] }
  0x35   : > { %277 = vst [vmem:[%s1355_s27 + $0x1f8] sm:$0xff] %v276_v63  ;;  %279 = vst [vmem:[%s1355_s27 + $0x200] sm:$0xff] %v278_v0  ;;  %v286_v4 = vld [vmem:[%s1347_s26 + $0x440] sm:$0xff]  ;;  %v288_v5 = vld [vmem:[%s1347_s26 + $0x448] sm:$0xff] }
  0x36   : > { %281 = vst [vmem:[%s1355_s27 + $0x208] sm:$0xff] %v280_v1  ;;  %283 = vst [vmem:[%s1355_s27 + $0x210] sm:$0xff] %v282_v2  ;;  %v290_v6 = vld [vmem:[%s1347_s26 + $0x450] sm:$0xff]  ;;  %v292_v7 = vld [vmem:[%s1347_s26 + $0x458] sm:$0xff] }
  0x37   : > { %285 = vst [vmem:[%s1355_s27 + $0x218] sm:$0xff] %v284_v3  ;;  %287 = vst [vmem:[%s1355_s27 + $0x220] sm:$0xff] %v286_v4 }
  0x38   : > { %289 = vst [vmem:[%s1355_s27 + $0x228] sm:$0xff] %v288_v5  ;;  %291 = vst [vmem:[%s1355_s27 + $0x230] sm:$0xff] %v290_v6 }
  0x39   : > { %293 = vst [vmem:[%s1355_s27 + $0x238] sm:$0xff] %v292_v7 }
  0x3a PF: > { %p1112_p7 = scmp.ge.s32.totalorder %s1284_s14, 1  ;;  %p298_p8 = scmp.lt.s32.totalorder %s1284_s14, 3 }
  0x3c   : > { %p299_p9 = pnand %p1112_p7, %p298_p8 }
  0x3d   : > { %s305_s28 = sand.u32 (!%p299_p9), 1, %s1276_s12   ;;  %vm785_vm0 = vcmask (!%p299_p9), 130048   ;;  %v1503_v8 = vld [vmem:[%s1656_s1 + $0x4] ss:$8 sps:$4 sm:$0x3f] (!%p299_p9)   ;;  %v1286_v9 = vmov (!%p299_p9), 0  }
  0x3e   : > { %302 = sbr.rel (%p299_p9) target bundleno = 383 (0x17f), region = 51  ;;  %1226 = vset.pattern.permute.xlu0 (!%p299_p9), %v1286_v9  ;;  %v404_v10 = vld [vmem:[%s1657_s2] sm:$0xff] (!%p299_p9)  ;;  %1188 = vmatprep.mubr.msk.bf16.mxu0 (!%p299_p9), %vm785_vm0, %v1503_v8  ;;  %v405_v11 = vld [vmem:[%s1657_s2 + $0x8] sm:$0xf] (!%p299_p9)  ;;  %s1113_s17 = sshll.u32 (!%p299_p9), %s305_s28, 7 }
  0x3f   : > { %s1200_s29 = smul.u32 (!%p299_p9), 576, %s305_s28  ;;  %408 = vperm.xlu0 (!%p299_p9), %1226, %v404_v10   ;;  %1189 = vmatprep.mubr.msk.bf16.mxu1 (!%p299_p9), %vm785_vm0, %v1503_v8  ;;  %s1604_s18 = scalar_lea.vmem (!%p299_p9), [#allocation3], %s1113_s17 }
  0x41   : > { %s1515_s9 = scalar_lea.vmem (!%p299_p9), [#allocation2], %s1200_s29 }
  0x42   : > { %v332_v12 = vld [vmem:[%s1515_s9] sm:$0xff] (!%p299_p9)  ;;  %v333_v14 = vld [vmem:[%s1515_s9 + $0x8] sm:$0xff] (!%p299_p9) }
  0x43   : > { %v336_v13 = vld [vmem:[%s1515_s9 + $0x20] sm:$0xff] (!%p299_p9)  ;;  %v337_v16 = vld [vmem:[%s1515_s9 + $0x28] sm:$0xff] (!%p299_p9)  ;;  %413 = vperm.xlu0 (!%p299_p9), %1226, %v405_v11  }
  0x44   : > { %v1117_v15 = vcombine.high (!%p299_p9), %v332_v12, %v336_v13  ;;  %v1116_v17 = vcombine.low (!%p299_p9), %v332_v12, %v336_v13  ;;  %v340_v18 = vld [vmem:[%s1515_s9 + $0x40] sm:$0xff] (!%p299_p9)  ;;  %v1119_v20 = vcombine.high (!%p299_p9), %v333_v14, %v337_v16  ;;  %v1118_v21 = vcombine.low (!%p299_p9), %v333_v14, %v337_v16  ;;  %v341_v23 = vld [vmem:[%s1515_s9 + $0x48] sm:$0xff] (!%p299_p9) }
  0x45   : > { %v344_v19 = vld [vmem:[%s1515_s9 + $0x60] sm:$0xff]  ;;  %v345_v24 = vld [vmem:[%s1515_s9 + $0x68] sm:$0xff]  ;;  %s1198_s12 = sshll.u32 (%p1337_p5), %s1106_s15, 6 }
  0x46   : > { %v1125_v22 = vcombine.high %v340_v18, %v344_v19  ;;  %v348_v25 = vld [vmem:[%s1515_s9 + $0x80] sm:$0xff]  ;;  %789 = vmatprep.subr.bf16.mxu0 %v1117_v15  ;;  %v1127_v26 = vcombine.high %v341_v23, %v345_v24  ;;  %v349_v28 = vld [vmem:[%s1515_s9 + $0x88] sm:$0xff]  ;;  %832 = vmatprep.subr.bf16.mxu1 %v1119_v20  ;;  %v1124_v30 = vcombine.low %v340_v18, %v344_v19  ;;  %v334_v19 = vld [vmem:[%s1515_s9 + $0x10] sm:$0xff]  ;;  %s1002_s20 = scalar_lea.vmem (%p1337_p5), %s1658_s3, %s1198_s12 }
  0x47   : > { %v352_v27 = vld [vmem:[%s1515_s9 + $0xa0] sm:$0xff]  ;;  %v353_v29 = vld [vmem:[%s1515_s9 + $0xa8] sm:$0xff]  ;;  %790 = vmatpush1.bf16.msra.mxu0 %v1116_v17  ;;  %833 = vmatpush1.bf16.msra.mxu1 %v1118_v21  ;;  %v1126_v31 = vcombine.low %v341_v23, %v345_v24  ;;  %v338_v20 = vld [vmem:[%s1515_s9 + $0x30] sm:$0xff] }
  0x48   : > { %791 = vmatprep.subr.bf16.mxu0 %v1125_v22  ;;  %v1133_v32 = vcombine.high %v348_v25, %v352_v27  ;;  %834 = vmatprep.subr.bf16.mxu1 %v1127_v26  ;;  %v1135_v33 = vcombine.high %v349_v28, %v353_v29  ;;  %v356_v34 = vld [vmem:[%s1515_s9 + $0xc0] sm:$0xff]  ;;  %v357_v36 = vld [vmem:[%s1515_s9 + $0xc8] sm:$0xff]  ;;  %v1132_v38 = vcombine.low %v348_v25, %v352_v27  ;;  %v335_v21 = vld [vmem:[%s1515_s9 + $0x18] sm:$0xff] }
  0x49   : > { %v360_v35 = vld [vmem:[%s1515_s9 + $0xe0] sm:$0xff]  ;;  %v361_v37 = vld [vmem:[%s1515_s9 + $0xe8] sm:$0xff]  ;;  %v1134_v39 = vcombine.low %v349_v28, %v353_v29  ;;  %v339_v22 = vld [vmem:[%s1515_s9 + $0x38] sm:$0xff]  ;;  %v1121_v25 = vcombine.high %v334_v19, %v338_v20 }
  0x4a   : > { %v1141_v40 = vcombine.high %v356_v34, %v360_v35  ;;  %v1143_v41 = vcombine.high %v357_v36, %v361_v37  ;;  %v364_v42 = vld [vmem:[%s1515_s9 + $0x100] sm:$0xff]  ;;  %v365_v44 = vld [vmem:[%s1515_s9 + $0x108] sm:$0xff]  ;;  %v1140_v46 = vcombine.low %v356_v34, %v360_v35  ;;  %v1142_v47 = vcombine.low %v357_v36, %v361_v37  ;;  %v342_v27 = vld [vmem:[%s1515_s9 + $0x50] sm:$0xff] }
  0x4b   : > { %792 = vmatpush1.bf16.msra.mxu0 %v1124_v30  ;;  %835 = vmatpush1.bf16.msra.mxu1 %v1126_v31  ;;  %v368_v43 = vld [vmem:[%s1515_s9 + $0x120] sm:$0xff]  ;;  %v369_v45 = vld [vmem:[%s1515_s9 + $0x128] sm:$0xff]  ;;  %v1123_v26 = vcombine.high %v335_v21, %v339_v22  ;;  %v346_v28 = vld [vmem:[%s1515_s9 + $0x70] sm:$0xff] }
  0x4c   : > { %793 = vmatprep.subr.bf16.mxu0 %v1133_v32  ;;  %836 = vmatprep.subr.bf16.mxu1 %v1135_v33  ;;  %v1149_v48 = vcombine.high %v364_v42, %v368_v43  ;;  %v1151_v49 = vcombine.high %v365_v44, %v369_v45  ;;  %v372_v50 = vld [vmem:[%s1515_s9 + $0x140] sm:$0xff]  ;;  %v373_v52 = vld [vmem:[%s1515_s9 + $0x148] sm:$0xff]  ;;  %v1148_v54 = vcombine.low %v364_v42, %v368_v43  ;;  %v343_v30 = vld [vmem:[%s1515_s9 + $0x58] sm:$0xff] }
  0x4d   : > { %v376_v51 = vld [vmem:[%s1515_s9 + $0x160] sm:$0xff]  ;;  %v377_v53 = vld [vmem:[%s1515_s9 + $0x168] sm:$0xff]  ;;  %v1150_v55 = vcombine.low %v365_v44, %v369_v45  ;;  %v347_v31 = vld [vmem:[%s1515_s9 + $0x78] sm:$0xff]  ;;  %v1120_v32 = vcombine.low %v334_v19, %v338_v20  ;;  %v1122_v33 = vcombine.low %v335_v21, %v339_v22  ;;  %v1129_v34 = vcombine.high %v342_v27, %v346_v28 }
  0x4e   : > { %v1157_v56 = vcombine.high %v372_v50, %v376_v51  ;;  %v1159_v57 = vcombine.high %v373_v52, %v377_v53  ;;  %v380_v58 = vld [vmem:[%s1515_s9 + $0x180] sm:$0xff]  ;;  %v381_v60 = vld [vmem:[%s1515_s9 + $0x188] sm:$0xff]  ;;  %v1156_v62 = vcombine.low %v372_v50, %v376_v51  ;;  %v1158_v63 = vcombine.low %v373_v52, %v377_v53  ;;  %v350_v36 = vld [vmem:[%s1515_s9 + $0x90] sm:$0xff] }
  0x4f   : > { %794 = vmatpush1.bf16.msra.mxu0 %v1132_v38  ;;  %837 = vmatpush1.bf16.msra.mxu1 %v1134_v39  ;;  %v384_v59 = vld [vmem:[%s1515_s9 + $0x1a0] sm:$0xff]  ;;  %v385_v61 = vld [vmem:[%s1515_s9 + $0x1a8] sm:$0xff]  ;;  %v1131_v35 = vcombine.high %v343_v30, %v347_v31  ;;  %v354_v37 = vld [vmem:[%s1515_s9 + $0xb0] sm:$0xff] }
  0x50   : > { %795 = vmatprep.subr.bf16.mxu0 %v1141_v40  ;;  %838 = vmatprep.subr.bf16.mxu1 %v1143_v41  ;;  %v1165_v0 = vcombine.high %v380_v58, %v384_v59  ;;  %v1167_v1 = vcombine.high %v381_v60, %v385_v61  ;;  %v388_v2 = vld [vmem:[%s1515_s9 + $0x1c0] sm:$0xff]  ;;  %v389_v4 = vld [vmem:[%s1515_s9 + $0x1c8] sm:$0xff]  ;;  %v1164_v6 = vcombine.low %v380_v58, %v384_v59  ;;  %v351_v38 = vld [vmem:[%s1515_s9 + $0x98] sm:$0xff] }
  0x51   : > { %v392_v3 = vld [vmem:[%s1515_s9 + $0x1e0] sm:$0xff]  ;;  %v393_v5 = vld [vmem:[%s1515_s9 + $0x1e8] sm:$0xff]  ;;  %v1166_v7 = vcombine.low %v381_v60, %v385_v61  ;;  %v355_v39 = vld [vmem:[%s1515_s9 + $0xb8] sm:$0xff]  ;;  %v1128_v40 = vcombine.low %v342_v27, %v346_v28  ;;  %v1130_v41 = vcombine.low %v343_v30, %v347_v31  ;;  %v1137_v42 = vcombine.high %v350_v36, %v354_v37 }
  0x52   : > { %v1173_v9 = vcombine.high %v388_v2, %v392_v3  ;;  %v1175_v10 = vcombine.high %v389_v4, %v393_v5  ;;  %v396_v11 = vld [vmem:[%s1515_s9 + $0x200] sm:$0xff]  ;;  %v397_v13 = vld [vmem:[%s1515_s9 + $0x208] sm:$0xff]  ;;  %v1172_v15 = vcombine.low %v388_v2, %v392_v3  ;;  %v1174_v16 = vcombine.low %v389_v4, %v393_v5  ;;  %v358_v44 = vld [vmem:[%s1515_s9 + $0xd0] sm:$0xff] }
  0x53   : > { %796 = vmatpush1.bf16.msra.mxu0 %v1140_v46  ;;  %839 = vmatpush1.bf16.msra.mxu1 %v1142_v47  ;;  %v400_v12 = vld [vmem:[%s1515_s9 + $0x220] sm:$0xff]  ;;  %v401_v14 = vld [vmem:[%s1515_s9 + $0x228] sm:$0xff]  ;;  %v1139_v43 = vcombine.high %v351_v38, %v355_v39  ;;  %v362_v45 = vld [vmem:[%s1515_s9 + $0xf0] sm:$0xff] }
  0x54   : > { %797 = vmatprep.subr.bf16.mxu0 %v1149_v48  ;;  %840 = vmatprep.subr.bf16.mxu1 %v1151_v49  ;;  %v1181_v17 = vcombine.high %v396_v11, %v400_v12  ;;  %v1183_v18 = vcombine.high %v397_v13, %v401_v14  ;;  %v1180_v23 = vcombine.low %v396_v11, %v400_v12  ;;  %v1562_v29 = vld [vmem:[%s1656_s1] ss:$8 sps:$4 sm:$0x3f]   ;;  %v359_v46 = vld [vmem:[%s1515_s9 + $0xd8] sm:$0xff]  ;;  %v366_v52 = vld [vmem:[%s1515_s9 + $0x110] sm:$0xff] }
  0x55   : > { %v1182_v24 = vcombine.low %v397_v13, %v401_v14  ;;  %v363_v47 = vld [vmem:[%s1515_s9 + $0xf8] sm:$0xff]  ;;  %v1136_v48 = vcombine.low %v350_v36, %v354_v37  ;;  %v1138_v49 = vcombine.low %v351_v38, %v355_v39  ;;  %v1145_v50 = vcombine.high %v358_v44, %v362_v45  ;;  %v370_v53 = vld [vmem:[%s1515_s9 + $0x130] sm:$0xff] }
  0x56   : > { %v1147_v51 = vcombine.high %v359_v46, %v363_v47  ;;  %v374_v59 = vld [vmem:[%s1515_s9 + $0x150] sm:$0xff]  ;;  %v375_v61 = vld [vmem:[%s1515_s9 + $0x158] sm:$0xff] }
  0x57   : > { %798 = vmatpush1.bf16.msra.mxu0 %v1148_v54  ;;  %841 = vmatpush1.bf16.msra.mxu1 %v1150_v55  ;;  %v367_v54 = vld [vmem:[%s1515_s9 + $0x118] sm:$0xff]  ;;  %v378_v60 = vld [vmem:[%s1515_s9 + $0x170] sm:$0xff] }
  0x58   : > { %799 = vmatprep.subr.bf16.mxu0 %v1157_v56  ;;  %842 = vmatprep.subr.bf16.mxu1 %v1159_v57  ;;  %v371_v55 = vld [vmem:[%s1515_s9 + $0x138] sm:$0xff]  ;;  %v1144_v56 = vcombine.low %v358_v44, %v362_v45  ;;  %v1153_v57 = vcombine.high %v366_v52, %v370_v53  ;;  %v382_v3 = vld [vmem:[%s1515_s9 + $0x190] sm:$0xff] }
  0x59   : > { %v1155_v58 = vcombine.high %v367_v54, %v371_v55  ;;  %v386_v4 = vld [vmem:[%s1515_s9 + $0x1b0] sm:$0xff]  ;;  %v383_v5 = vld [vmem:[%s1515_s9 + $0x198] sm:$0xff] }
  0x5a   : > { %v390_v12 = vld [vmem:[%s1515_s9 + $0x1d0] sm:$0xff]  ;;  %v391_v14 = vld [vmem:[%s1515_s9 + $0x1d8] sm:$0xff] }
  0x5b   : > { %800 = vmatpush1.bf16.msra.mxu0 %v1156_v62  ;;  %843 = vmatpush1.bf16.msra.mxu1 %v1158_v63  ;;  %v379_v62 = vld [vmem:[%s1515_s9 + $0x178] sm:$0xff]  ;;  %v1152_v63 = vcombine.low %v366_v52, %v370_v53  ;;  %v394_v13 = vld [vmem:[%s1515_s9 + $0x1f0] sm:$0xff] }
  0x5c   : > { %801 = vmatprep.subr.bf16.mxu0 %v1165_v0  ;;  %844 = vmatprep.subr.bf16.mxu1 %v1167_v1  ;;  %v1154_v0 = vcombine.low %v367_v54, %v371_v55  ;;  %v1161_v1 = vcombine.high %v374_v59, %v378_v60  ;;  %v1163_v2 = vcombine.high %v375_v61, %v379_v62  ;;  %v398_v20 = vld [vmem:[%s1515_s9 + $0x210] sm:$0xff]  ;;  %v399_v22 = vld [vmem:[%s1515_s9 + $0x218] sm:$0xff] }
  0x5d   : > { %v402_v21 = vld [vmem:[%s1515_s9 + $0x230] sm:$0xff] }
  0x5e   : > { %v1184_v28 = vcombine.low %v398_v20, %v402_v21 }
  0x5f   : > { %802 = vmatpush1.bf16.msra.mxu0 %v1164_v6  ;;  %845 = vmatpush1.bf16.msra.mxu1 %v1166_v7  ;;  %v387_v6 = vld [vmem:[%s1515_s9 + $0x1b8] sm:$0xff]  ;;  %v1160_v7 = vcombine.low %v374_v59, %v378_v60 }
  0x60   : > { %803 = vmatprep.subr.bf16.mxu0 %v1173_v9  ;;  %846 = vmatprep.subr.bf16.mxu1 %v1175_v10  ;;  %v1162_v9 = vcombine.low %v375_v61, %v379_v62  ;;  %v1169_v10 = vcombine.high %v382_v3, %v386_v4  ;;  %v1171_v11 = vcombine.high %v383_v5, %v387_v6 }
  0x63   : > { %804 = vmatpush1.bf16.msra.mxu0 %v1172_v15  ;;  %847 = vmatpush1.bf16.msra.mxu1 %v1174_v16  ;;  %v395_v15 = vld [vmem:[%s1515_s9 + $0x1f8] sm:$0xff]  ;;  %v1168_v16 = vcombine.low %v382_v3, %v386_v4 }
  0x64   : > { %805 = vmatprep.subr.bf16.mxu0 %v1181_v17  ;;  %848 = vmatprep.subr.bf16.mxu1 %v1183_v18  ;;  %v1170_v17 = vcombine.low %v383_v5, %v387_v6  ;;  %v1177_v18 = vcombine.high %v390_v12, %v394_v13  ;;  %v1179_v19 = vcombine.high %v391_v14, %v395_v15 }
  0x67   : > { %806 = vmatpush1.bf16.msra.mxu0 %v1180_v23  ;;  %849 = vmatpush1.bf16.msra.mxu1 %v1182_v24  ;;  %v403_v23 = vld [vmem:[%s1515_s9 + $0x238] sm:$0xff]  ;;  %v1176_v24 = vcombine.low %v390_v12, %v394_v13 }
  0x68   : > { %875 = vmatprep.subr.bf16.mxu0 %v1121_v25  ;;  %918 = vmatprep.subr.bf16.mxu1 %v1123_v26  ;;  %v1178_v25 = vcombine.low %v391_v14, %v395_v15  ;;  %v1185_v26 = vcombine.high %v398_v20, %v402_v21  ;;  %v1187_v27 = vcombine.high %v399_v22, %v403_v23 }
  0x69   : > { %v1186_v30 = vcombine.low %v399_v22, %v403_v23 }
  0x6a   : > { %822 = vmatmul.mubr.bf16.vlgmr.msra.gmra.mrb[0].mxu0 %v1562_v29  ;;  %865 = vmatmul.mubr.bf16.vlgmr.msra.gmra.mrb[0].mxu1 %v1562_v29 }
  0x6b   : > { %876 = vmatpush1.bf16.msra.mxu0 %v1120_v32  ;;  %919 = vmatpush1.bf16.msra.mxu1 %v1122_v33 }
  0x6c   : > { %877 = vmatprep.subr.bf16.mxu0 %v1129_v34  ;;  %920 = vmatprep.subr.bf16.mxu1 %v1131_v35 }
  0x6d   : > { %1190 = vmatprep.mubr.msk.bf16.mxu0 %vm785_vm0, %v1503_v8  ;;  %1191 = vmatprep.mubr.msk.bf16.mxu1 %vm785_vm0, %v1503_v8  ;;  %v1146_v8 = vcombine.low %v359_v46, %v363_v47 }
  0x6f   : > { %878 = vmatpush1.bf16.msra.mxu0 %v1128_v40  ;;  %921 = vmatpush1.bf16.msra.mxu1 %v1130_v41 }
  0x70   : > { %879 = vmatprep.subr.bf16.mxu0 %v1137_v42  ;;  %922 = vmatprep.subr.bf16.mxu1 %v1139_v43 }
  0x73   : > { %880 = vmatpush1.bf16.msra.mxu0 %v1136_v48  ;;  %923 = vmatpush1.bf16.msra.mxu1 %v1138_v49 }
  0x74   : > { %881 = vmatprep.subr.bf16.mxu0 %v1145_v50  ;;  %924 = vmatprep.subr.bf16.mxu1 %v1147_v51 }
  0x77   : > { %882 = vmatpush1.bf16.msra.mxu0 %v1144_v56  ;;  %925 = vmatpush1.bf16.msra.mxu1 %v1146_v8 }
  0x78   : > { %883 = vmatprep.subr.bf16.mxu0 %v1153_v57  ;;  %926 = vmatprep.subr.bf16.mxu1 %v1155_v58 }
  0x7b   : > { %884 = vmatpush1.bf16.msra.mxu0 %v1152_v63  ;;  %927 = vmatpush1.bf16.msra.mxu1 %v1154_v0 }
  0x7c   : > { %885 = vmatprep.subr.bf16.mxu0 %v1161_v1  ;;  %928 = vmatprep.subr.bf16.mxu1 %v1163_v2 }
  0x7f   : > { %886 = vmatpush1.bf16.msra.mxu0 %v1160_v7  ;;  %929 = vmatpush1.bf16.msra.mxu1 %v1162_v9 }
  0x80   : > { %887 = vmatprep.subr.bf16.mxu0 %v1169_v10  ;;  %930 = vmatprep.subr.bf16.mxu1 %v1171_v11 }
  0x83   : > { %888 = vmatpush1.bf16.msra.mxu0 %v1168_v16  ;;  %931 = vmatpush1.bf16.msra.mxu1 %v1170_v17 }
  0x84   : > { %889 = vmatprep.subr.bf16.mxu0 %v1177_v18  ;;  %932 = vmatprep.subr.bf16.mxu1 %v1179_v19 }
  0x87   : > { %890 = vmatpush1.bf16.msra.mxu0 %v1176_v24  ;;  %933 = vmatpush1.bf16.msra.mxu1 %v1178_v25 }
  0x88   : > { %891 = vmatprep.subr.bf16.mxu0 %v1185_v26  ;;  %934 = vmatprep.subr.bf16.mxu1 %v1187_v27 }
  0x8b   : > { %892 = vmatpush1.bf16.msra.mxu0 %v1184_v28  ;;  %935 = vmatpush1.bf16.msra.mxu1 %v1186_v30 }
  0x8e   : > { %908 = vmatmul.mubr.bf16.vlgmr.msra.gmra.mrb[4].mxu0 %v1562_v29  ;;  %951 = vmatmul.mubr.bf16.vlgmr.msra.gmra.mrb[4].mxu1 %v1562_v29 }
  0xbe   : > { %v409_v31 = vpop.permute.xlu0 %408 }
  0xc2   : > { %v414_v33 = vpop.permute.xlu0 %413 }
 0x13d   : > { %v823_v32 = vpop.f32.mrb[0].mxu0  ;;  %v866_v35 = vpop.f32.mrb[0].mxu1 }
 0x13e   : > { %v824_v34 = vadd.f32 %v823_v32, %v409_v31  ;;  %v825_v36 = vpop.f32.mrb[1].mxu0  ;;  %v867_v37 = vadd.f32 %v866_v35, %v409_v31  ;;  %v868_v39 = vpop.f32.mrb[1].mxu1 }
 0x13f   : > { %v826_v38 = vadd.f32 %v825_v36, %v409_v31  ;;  %v827_v40 = vpop.f32.mrb[2].mxu0  ;;  %v869_v41 = vadd.f32 %v868_v39, %v409_v31  ;;  %v870_v43 = vpop.f32.mrb[2].mxu1 }
 0x140   : > { %1230 = vtanh.f32 %v824_v34  ;;  %v828_v42 = vadd.f32 %v827_v40, %v414_v33  ;;  %v829_v44 = vpop.f32.mrb[3].mxu0  ;;  %v871_v45 = vadd.f32 %v870_v43, %v414_v33  ;;  %v872_v46 = vpop.f32.mrb[3].mxu1 }
 0x141   : > { %1232 = vtanh.f32 %v867_v37  ;;  %v830_v29 = vadd.f32 %v829_v44, %v414_v33  ;;  %v873_v47 = vadd.f32 %v872_v46, %v414_v33 }
 0x142   : > { %1234 = vtanh.f32 %v826_v38 }
 0x143   : > { %1236 = vtanh.f32 %v869_v41 }
 0x144   : > { %1238 = vtanh.f32 %v828_v42 }
 0x145   : > { %1240 = vtanh.f32 %v871_v45 }
 0x146   : > { %1242 = vtanh.f32 %v830_v29 }
 0x147   : > { %1244 = vtanh.f32 %v873_v47 }
 0x14a   : > { %v1231_v48 = vpop.eup %1230 }
 0x14b   : > { %v1233_v49 = vpop.eup %1232  ;;  %977 = vst [vmem:[%s1604_s18] sm:$0xff] %v1231_v48 }
 0x14c   : > { %v1235_v50 = vpop.eup %1234  ;;  %979 = vst [vmem:[%s1604_s18 + $0x10] sm:$0xff] %v1233_v49 }
 0x14d   : > { %v1237_v51 = vpop.eup %1236  ;;  %978 = vst [vmem:[%s1604_s18 + $0x8] sm:$0xff] %v1235_v50 }
 0x14e   : > { %v1239_v52 = vpop.eup %1238  ;;  %980 = vst [vmem:[%s1604_s18 + $0x18] sm:$0xff] %v1237_v51 }
 0x14f   : > { %v1241_v53 = vpop.eup %1240  ;;  %985 = vst [vmem:[%s1604_s18 + $0x40] sm:$0xf] %v1239_v52 }
 0x150   : > { %v1243_v54 = vpop.eup %1242  ;;  %987 = vst [vmem:[%s1604_s18 + $0x50] sm:$0xf] %v1241_v53 }
 0x151   : > { %v1245_v55 = vpop.eup %1244  ;;  %986 = vst [vmem:[%s1604_s18 + $0x48] sm:$0xf] %v1243_v54 }
 0x152   : > { %988 = vst [vmem:[%s1604_s18 + $0x58] sm:$0xf] %v1245_v55  ;;  %v1015_v16 = vld [vmem:[%s1604_s18] sm:$0xff] (%p1337_p5) }
 0x153   : > { %v1019_v18 = vld [vmem:[%s1604_s18 + $0x10] sm:$0xff] (%p1337_p5)  ;;  %1016 = vst [vmem:[%s1002_s20] sm:$0xff] (%p1337_p5), %v1015_v16 }
 0x154   : > { %v1017_v17 = vld [vmem:[%s1604_s18 + $0x8] sm:$0xff] (%p1337_p5)  ;;  %1020 = vst [vmem:[%s1002_s20 + $0x10] sm:$0xff] (%p1337_p5), %v1019_v18 }
 0x155   : > { %v1021_v19 = vld [vmem:[%s1604_s18 + $0x18] sm:$0xff] (%p1337_p5)  ;;  %1018 = vst [vmem:[%s1002_s20 + $0x8] sm:$0xff] (%p1337_p5), %v1017_v17 }
 0x156   : > { %1022 = vst [vmem:[%s1002_s20 + $0x18] sm:$0xff] (%p1337_p5), %v1021_v19  ;;  %v1031_v24 = vld [vmem:[%s1604_s18 + $0x40] sm:$0xff] (%p1337_p5) }
 0x157   : > { %1032 = vst [vmem:[%s1002_s20 + $0x80] sm:$0xff] (%p1337_p5), %v1031_v24  ;;  %v1035_v26 = vld [vmem:[%s1604_s18 + $0x50] sm:$0xff] (%p1337_p5) }
 0x158   : > { %v1033_v25 = vld [vmem:[%s1604_s18 + $0x48] sm:$0xff] (%p1337_p5)  ;;  %1036 = vst [vmem:[%s1002_s20 + $0x90] sm:$0xff] (%p1337_p5), %v1035_v26 }
 0x159   : > { %v1037_v27 = vld [vmem:[%s1604_s18 + $0x58] sm:$0xff] (%p1337_p5)  ;;  %1034 = vst [vmem:[%s1002_s20 + $0x88] sm:$0xff] (%p1337_p5), %v1033_v25 }
 0x15a   : > { %1038 = vst [vmem:[%s1002_s20 + $0x98] sm:$0xff] (%p1337_p5), %v1037_v27 }
 0x161   : > { %v909_v56 = vpop.f32.mrb[4].mxu0  ;;  %v952_v57 = vpop.f32.mrb[4].mxu1 }
 0x162   : > { %v910_v8 = vadd.f32 %v909_v56, %v409_v31  ;;  %v911_v58 = vpop.f32.mrb[5].mxu0  ;;  %v953_v59 = vadd.f32 %v952_v57, %v409_v31  ;;  %v954_v61 = vpop.f32.mrb[5].mxu1 }
 0x163   : > { %v912_v60 = vadd.f32 %v911_v58, %v409_v31  ;;  %v913_v62 = vpop.f32.mrb[6].mxu0  ;;  %v955_v63 = vadd.f32 %v954_v61, %v409_v31  ;;  %v956_v1 = vpop.f32.mrb[6].mxu1 }
 0x164   : > { %1246 = vtanh.f32 %v910_v8  ;;  %v914_v0 = vadd.f32 %v913_v62, %v414_v33  ;;  %v915_v2 = vpop.f32.mrb[7].mxu0  ;;  %v957_v3 = vadd.f32 %v956_v1, %v414_v33  ;;  %v958_v4 = vpop.f32.mrb[7].mxu1 }
 0x165   : > { %1248 = vtanh.f32 %v953_v59  ;;  %v916_v5 = vadd.f32 %v915_v2, %v414_v33  ;;  %v959_v6 = vadd.f32 %v958_v4, %v414_v33 }
 0x166   : > { %1250 = vtanh.f32 %v912_v60 }
 0x167   : > { %1252 = vtanh.f32 %v955_v63 }
 0x168   : > { %1254 = vtanh.f32 %v914_v0 }
 0x169   : > { %1256 = vtanh.f32 %v957_v3 }
 0x16a   : > { %1258 = vtanh.f32 %v916_v5 }
 0x16b   : > { %1260 = vtanh.f32 %v959_v6 }
 0x16e   : > { %v1247_v7 = vpop.eup %1246 }
 0x16f   : > { %v1249_v9 = vpop.eup %1248  ;;  %981 = vst [vmem:[%s1604_s18 + $0x20] sm:$0xff] %v1247_v7 }
 0x170   : > { %v1251_v10 = vpop.eup %1250  ;;  %983 = vst [vmem:[%s1604_s18 + $0x30] sm:$0xff] %v1249_v9  ;;  %999 = sbr.rel (!%p1337_p5) target bundleno = 383 (0x17f), region = 59 }
 0x171   : > { %v1253_v11 = vpop.eup %1252  ;;  %982 = vst [vmem:[%s1604_s18 + $0x28] sm:$0xff] %v1251_v10 }
 0x172   : > { %v1255_v12 = vpop.eup %1254  ;;  %984 = vst [vmem:[%s1604_s18 + $0x38] sm:$0xff] %v1253_v11 }
 0x173   : > { %v1257_v13 = vpop.eup %1256  ;;  %989 = vst [vmem:[%s1604_s18 + $0x60] sm:$0xf] %v1255_v12 }
 0x174   : > { %v1259_v14 = vpop.eup %1258  ;;  %991 = vst [vmem:[%s1604_s18 + $0x70] sm:$0xf] %v1257_v13 }
 0x175   : > { %v1261_v15 = vpop.eup %1260  ;;  %990 = vst [vmem:[%s1604_s18 + $0x68] sm:$0xf] %v1259_v14 }
 0x176   : > { %992 = vst [vmem:[%s1604_s18 + $0x78] sm:$0xf] %v1261_v15  ;;  %v1023_v20 = vld [vmem:[%s1604_s18 + $0x20] sm:$0xff] (%p1337_p5) }
 0x177   : > { %1024 = vst [vmem:[%s1002_s20 + $0x20] sm:$0xff] %v1023_v20  ;;  %v1027_v22 = vld [vmem:[%s1604_s18 + $0x30] sm:$0xff] }
 0x178   : > { %v1025_v21 = vld [vmem:[%s1604_s18 + $0x28] sm:$0xff]  ;;  %1028 = vst [vmem:[%s1002_s20 + $0x30] sm:$0xff] %v1027_v22 }
 0x179   : > { %1026 = vst [vmem:[%s1002_s20 + $0x28] sm:$0xff] %v1025_v21  ;;  %v1029_v23 = vld [vmem:[%s1604_s18 + $0x38] sm:$0xff] }
 0x17a   : > { %1030 = vst [vmem:[%s1002_s20 + $0x38] sm:$0xff] %v1029_v23  ;;  %v1039_v28 = vld [vmem:[%s1604_s18 + $0x60] sm:$0xff] }
 0x17b   : > { %v1043_v31 = vld [vmem:[%s1604_s18 + $0x70] sm:$0xff]  ;;  %1040 = vst [vmem:[%s1002_s20 + $0xa0] sm:$0xff] %v1039_v28 }
 0x17c   : > { %v1041_v30 = vld [vmem:[%s1604_s18 + $0x68] sm:$0xff]  ;;  %1044 = vst [vmem:[%s1002_s20 + $0xb0] sm:$0xff] %v1043_v31 }
 0x17d   : > { %1042 = vst [vmem:[%s1002_s20 + $0xa8] sm:$0xff] %v1041_v30  ;;  %v1045_v32 = vld [vmem:[%s1604_s18 + $0x78] sm:$0xff] }
 0x17e   : > { %1046 = vst [vmem:[%s1002_s20 + $0xb8] sm:$0xff] %v1045_v32 }
 0x17f PF: > { %p10_p10 = scmp.ge.s32.totalorder %s1324_s16, 4   ;;  %s1660_s12 = smov %s1280_s13 }
 0x180   : > { %s1661_s13 = smov %s1335_s19  ;;  %s1662_s14 = smov %s1324_s16 }
 0x181   :  { %12 = sbr.rel (!%p10_p10) target bundleno = 2 (0x2), region = 113 }

</bundles_post_ra>
